<compile_context>
chip_gen: v6e
topology: v6e:2x2x1
jax: 0.10.0
libtpu: 0.0.40
codegen_flags: <defaults>
</compile_context>

<pallas_src>
import functools
import numpy as np
import jax
import jax.numpy as jnp
from jax import lax
from jax.experimental import pallas as pl
from jax.experimental.pallas import tpu as pltpu

BN_EPS = 1e-4              # matches the module's BN_EPS = 0.0001
MXU_DTYPE = jnp.bfloat16   # matmul operand dtype (accumulate / BN stay f32)
CIN0 = 8                   # first-layer input channels zero-padded 3 -> 8


# --------------------------------------------------------------------------
# In-kernel building blocks (traced inside the single fused kernel)
# --------------------------------------------------------------------------
def _conv_bn_relu(x, w_ref, g_ref, b_ref, masks, W):
    """Fused Conv3x3(pad=1, no bias) + BatchNorm(train, eps=BN_EPS) + ReLU.

    x:      (Cin, P) f32 activation, P = N*H*W, p = n*H*W + h*W + w
    w_ref:  (Cout, 9*Cin) bf16 fused weights, column = t*Cin + c, t = kh*3+kw
    g_ref:  (Cout, 1) f32 gamma,  b_ref: (Cout, 1) f32 beta
    masks:  (9, 1, P) f32 border-validity masks (already loaded / hoisted)
    """
    P = x.shape[1]
    parts = []
    for t in range(9):
        dy, dx = t // 3 - 1, t % 3 - 1
        off = dy * W + dx
        # shifted view: xs[p] = x[p + off]  (wrap-around masked out below)
        xs = x if off == 0 else pltpu.roll(x, (-off) % P, axis=1)
        if (dy, dx) != (0, 0):
            xs = xs * masks[t]                      # zero-padding mask
        parts.append(xs)
    # (9*Cin, P): Cin is always a multiple of 8 -> aligned sublane concat.
    stack = jnp.concatenate(parts, axis=0).astype(MXU_DTYPE)  # single cast
    acc = jnp.dot(w_ref[...], stack,
                  preferred_element_type=jnp.float32)          # (Cout, P) f32

    # BatchNorm (training mode): batch stats over N*H*W, biased variance,
    # var = E[x^2] - mean^2 so both reductions read acc in one pass.
    inv_p = np.float32(1.0 / P)
    mean = jnp.sum(acc, axis=1, keepdims=True) * inv_p
    var = jnp.sum(acc * acc, axis=1, keepdims=True) * inv_p - mean * mean
    scale = lax.rsqrt(var + BN_EPS) * g_ref[...]
    shift = b_ref[...] - mean * scale
    return jnp.maximum(acc * scale + shift, 0.0)


def _max_pool_2x2(x, gmat, W):
    """2x2/stride-2 max pool on the (C, P) layout.

    Two lane rolls + max give the max over each 2x2 window at even (h, w)
    positions; a bf16 0/1 gather matmul compacts those P/4 lanes.
    """
    P = x.shape[1]
    m1 = jnp.maximum(x, pltpu.roll(x, P - 1, axis=1))    # max(x[p], x[p+1])
    m2 = jnp.maximum(m1, pltpu.roll(m1, P - W, axis=1))  # + rows p+W, p+W+1
    return jnp.dot(m2.astype(MXU_DTYPE), gmat,
                   preferred_element_type=jnp.float32)


def _unet_kernel(x_ref,
                 wd0, gd0, bd0, wd1, gd1, bd1,
                 wc0, gc0, bc0,
                 wu0, gu0, bu0, wu1, gu1, bu1, wu2, gu2, bu2,
                 wcls, bcls, pool_g, up_m, m_full, m_half,
                 o_ref, *, H, W):
    del H
    mf = m_full[...]                         # hoisted mask loads
    mh = m_half[...]
    x = x_ref[...]                           # (8, N*H*W) f32, lane-dense

    # ---- down1: StackEncoder(3, 24) at HxW ----
    h = _conv_bn_relu(x, wd0, gd0, bd0, mf, W)
    h = _conv_bn_relu(h, wd1, gd1, bd1, mf, W)
    down1 = h                                # (24, N*H*W) skip tensor

    # ---- max-pool 2x2 -> H/2 x W/2 ----
    h = _max_pool_2x2(h, pool_g[...], W)     # (24, N*H*W/4)

    # ---- center conv at H/2 x W/2 ----
    h = _conv_bn_relu(h, wc0, gc0, bc0, mh, W // 2)

    # ---- bilinear upsample (align_corners=True): one bf16 MXU matmul ----
    h = jnp.dot(h.astype(MXU_DTYPE), up_m[...],
                preferred_element_type=jnp.float32)

    # ---- skip concat (channels: [upsampled, down1]) + decoder ----
    h = jnp.concatenate([h, down1], axis=0)  # (48, N*H*W), 8-aligned pieces
    h = _conv_bn_relu(h, wu0, gu0, bu0, mf, W)
    h = _conv_bn_relu(h, wu1, gu1, bu1, mf, W)
    h = _conv_bn_relu(h, wu2, gu2, bu2, mf, W)

    # ---- classify: 1x1 conv (24 -> 3) + bias; lane-dense (3, N*H*W) store --
    o_ref[...] = jnp.dot(wcls[...], h.astype(MXU_DTYPE),
                         preferred_element_type=jnp.float32) + bcls[...]


# --------------------------------------------------------------------------
# Host-side constant builders (trace-time numpy, tiny at this resolution)
# --------------------------------------------------------------------------
def _interp_matrix(out_size, in_size):
    # Bilinear interpolation weights along one axis, align_corners=True.
    R = np.zeros((out_size, in_size), np.float32)
    if out_size == 1 or in_size == 1:
        R[:, 0] = 1.0
        return R
    coords = np.arange(out_size, dtype=np.float64) * (in_size - 1) / (out_size - 1)
    lo = np.clip(np.floor(coords).astype(np.int64), 0, in_size - 1)
    hi = np.minimum(lo + 1, in_size - 1)
    frac = (coords - lo).astype(np.float32)
    R[np.arange(out_size), lo] += (1.0 - frac)
    R[np.arange(out_size), hi] += frac
    return R


def _pool_gather_matrix(N, H, W):
    # (P, P/4) 0/1 matrix selecting the even-(h,w) lanes for 2x2 pooling.
    Ho, Wo = H // 2, W // 2
    P, Q = N * H * W, N * Ho * Wo
    G = np.zeros((P, Q), np.float32)
    for n in range(N):
        for ho in range(Ho):
            for wo in range(Wo):
                q = n * Ho * Wo + ho * Wo + wo
                src = n * H * W + (2 * ho) * W + (2 * wo)
                G[src, q] = 1.0
    return jnp.asarray(G)


def _upsample_matrix(N, H, W):
    # (P/4, P) block-diagonal bilinear (align_corners=True) matrix so that
    # upsampled = center @ M   in the (C, P) layout.
    Hi, Wi = H // 2, W // 2
    Rh = _interp_matrix(H, Hi)
    Rw = _interp_matrix(W, Wi)
    K2 = np.kron(Rh, Rw)                         # (H*W, Hi*Wi)
    M = np.zeros((N * Hi * Wi, N * H * W), np.float32)
    for n in range(N):
        M[n * Hi * Wi:(n + 1) * Hi * Wi, n * H * W:(n + 1) * H * W] = K2.T
    return jnp.asarray(M)


def _conv_tap_masks(N, H, W):
    # (9, 1, P) f32 validity masks for the 9 conv taps (zero padding).
    P = N * H * W
    p = np.arange(P)
    hh = (p // W) % H
    ww = p % W
    m = np.zeros((9, 1, P), np.float32)
    for t in range(9):
        dy, dx = t // 3 - 1, t % 3 - 1
        valid = ((hh + dy >= 0) & (hh + dy < H) &
                 (ww + dx >= 0) & (ww + dx < W))
        m[t, 0] = valid.astype(np.float32)
    return jnp.asarray(m)


def _fullspec(shape):
    zeros = (0,) * len(shape)
    return pl.BlockSpec(shape, lambda i, _z=zeros: _z)


# --------------------------------------------------------------------------
# Parameters (deterministic synthetic init mirroring the module's shapes)
# --------------------------------------------------------------------------
def init_params(key):
    layer_defs = [('down1_0', 3, 24), ('down1_1', 24, 24), ('center_0', 24, 24),
                  ('up1_0', 48, 24), ('up1_1', 24, 24), ('up1_2', 24, 24)]
    ks = jax.random.split(key, 2 * len(layer_defs) + 2)
    params = {}
    for i, (name, cin, cout) in enumerate(layer_defs):
        w = jax.random.normal(ks[2 * i], (3, 3, cin, cout), jnp.float32)
        w = w * (1.0 / np.sqrt(9 * cin))
        k1, k2 = jax.random.split(ks[2 * i + 1])
        gamma = 1.0 + 0.1 * jax.random.normal(k1, (cout,), jnp.float32)
        beta = 0.1 * jax.random.normal(k2, (cout,), jnp.float32)
        params[name] = (w, gamma, beta)
    params['classify_w'] = jax.random.normal(ks[-2], (24, 3), jnp.float32) / np.sqrt(24.0)
    params['classify_b'] = 0.1 * jax.random.normal(ks[-1], (3,), jnp.float32)
    return params


# --------------------------------------------------------------------------
# Forward pass (matches UNet_small.forward) — one fused pallas_call
# --------------------------------------------------------------------------
def unet_small_forward(x_nchw, params):
    N, Cin, H, W = x_nchw.shape
    assert Cin == 3 and H % 2 == 0 and W % 2 == 0
    P = N * H * W

    def prep(name, pad_cin_to=None):
        w, g, b = params[name]                      # w: (3,3,cin,cout) HWIO
        cin, cout = w.shape[2], w.shape[3]
        if pad_cin_to is not None and pad_cin_to > cin:
            w = jnp.pad(w, ((0, 0), (0, 0), (0, pad_cin_to - cin), (0, 0)))
            cin = pad_cin_to
        # fused weight: (Cout, 9*Cin), column index = t*Cin + c, t = kh*3+kw
        wf = jnp.transpose(w.reshape(9, cin, cout), (2, 0, 1)).reshape(cout, 9 * cin)
        return wf.astype(MXU_DTYPE), g.reshape(cout, 1), b.reshape(cout, 1)

    layers = [prep('down1_0', pad_cin_to=CIN0),
              prep('down1_1'), prep('center_0'),
              prep('up1_0'), prep('up1_1'), prep('up1_2')]

    wcls = params['classify_w'].T.astype(MXU_DTYPE)          # (3, 24) bf16
    bcls = params['classify_b'].reshape(3, 1)                # (3, 1) f32

    pool_g = _pool_gather_matrix(N, H, W).astype(MXU_DTYPE)  # (P, P/4) 0/1
    up_m = _upsample_matrix(N, H, W).astype(MXU_DTYPE)       # (P/4, P)
    m_full = _conv_tap_masks(N, H, W)                        # (9, 1, P) f32
    m_half = _conv_tap_masks(N, H // 2, W // 2)              # (9, 1, P/4) f32

    # Lane-dense (C, N*H*W) input slab, channel-padded 3 -> 8 (zero rows) so
    # every in-kernel sublane concat is 8-aligned; shuffle done by XLA here.
    x_cp = jnp.transpose(x_nchw, (1, 0, 2, 3)).reshape(3, P)
    x_cp = jnp.pad(x_cp, ((0, CIN0 - 3), (0, 0)))

    inputs = [x_cp]
    for lyr in layers:
        inputs.extend(lyr)
    inputs += [wcls, bcls, pool_g, up_m, m_full, m_half]

    out = pl.pallas_call(
        functools.partial(_unet_kernel, H=H, W=W),
        out_shape=jax.ShapeDtypeStruct((3, P), jnp.float32),
        grid=(1,),
        in_specs=[_fullspec(a.shape) for a in inputs],
        out_specs=_fullspec((3, P)),
        compiler_params=pltpu.CompilerParams(
            dimension_semantics=("arbitrary",)),
    )(*inputs)

    out = out.reshape(3, N, H, W).transpose(1, 0, 2, 3)      # -> NCHW (cheap)
    # torch.squeeze(out, dim=1): only squeezes if that dim is 1 (it is 3 here).
    if out.shape[1] == 1:
        out = jnp.squeeze(out, axis=1)
    return out


# --------------------------------------------------------------------------
if __name__ == "__main__":
    key = jax.random.PRNGKey(0)
    kx, kp = jax.random.split(key)
    x = jax.random.normal(kx, (2, 3, 16, 16), jnp.float32)   # in_shape=(3,16,16)
    params = init_params(kp)

    fwd = jax.jit(functools.partial(unet_small_forward, params=params))
    out = fwd(x)
    jax.block_until_ready(out)

    assert out.shape == (2, 3, 16, 16), out.shape
    assert out.dtype == jnp.float32
    assert bool(jnp.all(jnp.isfinite(out)))
    print("KERNEL_OK")
</pallas_src>

<mosaic_0001>
module attributes {stable_mosaic.version = 11 : i64} {
  func.func @_unet_kernel(%arg0: i32, %arg1: memref<8x512xf32, #tpu.memory_space<vmem>>, %arg2: memref<24x72xbf16, #tpu.memory_space<vmem>>, %arg3: memref<24x1xf32, #tpu.memory_space<vmem>>, %arg4: memref<24x1xf32, #tpu.memory_space<vmem>>, %arg5: memref<24x216xbf16, #tpu.memory_space<vmem>>, %arg6: memref<24x1xf32, #tpu.memory_space<vmem>>, %arg7: memref<24x1xf32, #tpu.memory_space<vmem>>, %arg8: memref<24x216xbf16, #tpu.memory_space<vmem>>, %arg9: memref<24x1xf32, #tpu.memory_space<vmem>>, %arg10: memref<24x1xf32, #tpu.memory_space<vmem>>, %arg11: memref<24x432xbf16, #tpu.memory_space<vmem>>, %arg12: memref<24x1xf32, #tpu.memory_space<vmem>>, %arg13: memref<24x1xf32, #tpu.memory_space<vmem>>, %arg14: memref<24x216xbf16, #tpu.memory_space<vmem>>, %arg15: memref<24x1xf32, #tpu.memory_space<vmem>>, %arg16: memref<24x1xf32, #tpu.memory_space<vmem>>, %arg17: memref<24x216xbf16, #tpu.memory_space<vmem>>, %arg18: memref<24x1xf32, #tpu.memory_space<vmem>>, %arg19: memref<24x1xf32, #tpu.memory_space<vmem>>, %arg20: memref<3x24xbf16, #tpu.memory_space<vmem>>, %arg21: memref<3x1xf32, #tpu.memory_space<vmem>>, %arg22: memref<512x128xbf16, #tpu.memory_space<vmem>>, %arg23: memref<128x512xbf16, #tpu.memory_space<vmem>>, %arg24: memref<9x1x512xf32, #tpu.memory_space<vmem>>, %arg25: memref<9x1x128xf32, #tpu.memory_space<vmem>>, %arg26: memref<3x512xf32, #tpu.memory_space<vmem>>) attributes {dimension_semantics = [#tpu.dimension_semantics<arbitrary>], iteration_bounds = array<i64: 1>, scalar_prefetch = 0 : i64, scratch_operands = 0 : i64, tpu.core_type = #tpu.core_type<tc>, window_params = [{pipeline_mode = #tpu.pipeline_mode<synchronous>, transform_indices = @transform_0, window_bounds = array<i64: 8, 512>}, {pipeline_mode = #tpu.pipeline_mode<synchronous>, transform_indices = @transform_1, window_bounds = array<i64: 24, 72>}, {pipeline_mode = #tpu.pipeline_mode<synchronous>, transform_indices = @transform_2, window_bounds = array<i64: 24, 1>}, {pipeline_mode = #tpu.pipeline_mode<synchronous>, transform_indices = @transform_3, window_bounds = array<i64: 24, 1>}, {pipeline_mode = #tpu.pipeline_mode<synchronous>, transform_indices = @transform_4, window_bounds = array<i64: 24, 216>}, {pipeline_mode = #tpu.pipeline_mode<synchronous>, transform_indices = @transform_5, window_bounds = array<i64: 24, 1>}, {pipeline_mode = #tpu.pipeline_mode<synchronous>, transform_indices = @transform_6, window_bounds = array<i64: 24, 1>}, {pipeline_mode = #tpu.pipeline_mode<synchronous>, transform_indices = @transform_7, window_bounds = array<i64: 24, 216>}, {pipeline_mode = #tpu.pipeline_mode<synchronous>, transform_indices = @transform_8, window_bounds = array<i64: 24, 1>}, {pipeline_mode = #tpu.pipeline_mode<synchronous>, transform_indices = @transform_9, window_bounds = array<i64: 24, 1>}, {pipeline_mode = #tpu.pipeline_mode<synchronous>, transform_indices = @transform_10, window_bounds = array<i64: 24, 432>}, {pipeline_mode = #tpu.pipeline_mode<synchronous>, transform_indices = @transform_11, window_bounds = array<i64: 24, 1>}, {pipeline_mode = #tpu.pipeline_mode<synchronous>, transform_indices = @transform_12, window_bounds = array<i64: 24, 1>}, {pipeline_mode = #tpu.pipeline_mode<synchronous>, transform_indices = @transform_13, window_bounds = array<i64: 24, 216>}, {pipeline_mode = #tpu.pipeline_mode<synchronous>, transform_indices = @transform_14, window_bounds = array<i64: 24, 1>}, {pipeline_mode = #tpu.pipeline_mode<synchronous>, transform_indices = @transform_15, window_bounds = array<i64: 24, 1>}, {pipeline_mode = #tpu.pipeline_mode<synchronous>, transform_indices = @transform_16, window_bounds = array<i64: 24, 216>}, {pipeline_mode = #tpu.pipeline_mode<synchronous>, transform_indices = @transform_17, window_bounds = array<i64: 24, 1>}, {pipeline_mode = #tpu.pipeline_mode<synchronous>, transform_indices = @transform_18, window_bounds = array<i64: 24, 1>}, {pipeline_mode = #tpu.pipeline_mode<synchronous>, transform_indices = @transform_19, window_bounds = array<i64: 3, 24>}, {pipeline_mode = #tpu.pipeline_mode<synchronous>, transform_indices = @transform_20, window_bounds = array<i64: 3, 1>}, {pipeline_mode = #tpu.pipeline_mode<synchronous>, transform_indices = @transform_21, window_bounds = array<i64: 512, 128>}, {pipeline_mode = #tpu.pipeline_mode<synchronous>, transform_indices = @transform_22, window_bounds = array<i64: 128, 512>}, {pipeline_mode = #tpu.pipeline_mode<synchronous>, transform_indices = @transform_23, window_bounds = array<i64: 9, 1, 512>}, {pipeline_mode = #tpu.pipeline_mode<synchronous>, transform_indices = @transform_24, window_bounds = array<i64: 9, 1, 128>}, {pipeline_mode = #tpu.pipeline_mode<synchronous>, transform_indices = @transform_25, window_bounds = array<i64: 3, 512>}]} {
    %c0 = arith.constant 0 : index
    %c0_0 = arith.constant 0 : index
    %c0_1 = arith.constant 0 : index
    %0 = vector.load %arg24[%c0, %c0_0, %c0_1] : memref<9x1x512xf32, #tpu.memory_space<vmem>>, vector<9x1x512xf32>
    %c0_2 = arith.constant 0 : index
    %c0_3 = arith.constant 0 : index
    %c0_4 = arith.constant 0 : index
    %1 = vector.load %arg25[%c0_2, %c0_3, %c0_4] : memref<9x1x128xf32, #tpu.memory_space<vmem>>, vector<9x1x128xf32>
    %c0_5 = arith.constant 0 : index
    %c0_6 = arith.constant 0 : index
    %2 = vector.load %arg1[%c0_5, %c0_6] : memref<8x512xf32, #tpu.memory_space<vmem>>, vector<8x512xf32>
    %c17_i32 = arith.constant 17 : i32
    %3 = tpu.dynamic_rotate %2 by %c17_i32 dim 1 : vector<8x512xf32>, i32 -> vector<8x512xf32>
    %4 = vector.extract_strided_slice %0 {offsets = [0, 0, 0], sizes = [1, 1, 512], strides = [1, 1, 1]} : vector<9x1x512xf32> to vector<1x1x512xf32>
    %5 = vector.shape_cast %4 : vector<1x1x512xf32> to vector<1x512xf32>
    %6 = vector.broadcast %5 : vector<1x512xf32> to vector<8x512xf32>
    %7 = arith.mulf %3, %6 : vector<8x512xf32>
    %c16_i32 = arith.constant 16 : i32
    %8 = tpu.dynamic_rotate %2 by %c16_i32 dim 1 : vector<8x512xf32>, i32 -> vector<8x512xf32>
    %9 = vector.extract_strided_slice %0 {offsets = [1, 0, 0], sizes = [1, 1, 512], strides = [1, 1, 1]} : vector<9x1x512xf32> to vector<1x1x512xf32>
    %10 = vector.shape_cast %9 : vector<1x1x512xf32> to vector<1x512xf32>
    %11 = vector.broadcast %10 : vector<1x512xf32> to vector<8x512xf32>
    %12 = arith.mulf %8, %11 : vector<8x512xf32>
    %c15_i32 = arith.constant 15 : i32
    %13 = tpu.dynamic_rotate %2 by %c15_i32 dim 1 : vector<8x512xf32>, i32 -> vector<8x512xf32>
    %14 = vector.extract_strided_slice %0 {offsets = [2, 0, 0], sizes = [1, 1, 512], strides = [1, 1, 1]} : vector<9x1x512xf32> to vector<1x1x512xf32>
    %15 = vector.shape_cast %14 : vector<1x1x512xf32> to vector<1x512xf32>
    %16 = vector.broadcast %15 : vector<1x512xf32> to vector<8x512xf32>
    %17 = arith.mulf %13, %16 : vector<8x512xf32>
    %c1_i32 = arith.constant 1 : i32
    %18 = tpu.dynamic_rotate %2 by %c1_i32 dim 1 : vector<8x512xf32>, i32 -> vector<8x512xf32>
    %19 = vector.extract_strided_slice %0 {offsets = [3, 0, 0], sizes = [1, 1, 512], strides = [1, 1, 1]} : vector<9x1x512xf32> to vector<1x1x512xf32>
    %20 = vector.shape_cast %19 : vector<1x1x512xf32> to vector<1x512xf32>
    %21 = vector.broadcast %20 : vector<1x512xf32> to vector<8x512xf32>
    %22 = arith.mulf %18, %21 : vector<8x512xf32>
    %c511_i32 = arith.constant 511 : i32
    %23 = tpu.dynamic_rotate %2 by %c511_i32 dim 1 : vector<8x512xf32>, i32 -> vector<8x512xf32>
    %24 = vector.extract_strided_slice %0 {offsets = [5, 0, 0], sizes = [1, 1, 512], strides = [1, 1, 1]} : vector<9x1x512xf32> to vector<1x1x512xf32>
    %25 = vector.shape_cast %24 : vector<1x1x512xf32> to vector<1x512xf32>
    %26 = vector.broadcast %25 : vector<1x512xf32> to vector<8x512xf32>
    %27 = arith.mulf %23, %26 : vector<8x512xf32>
    %c497_i32 = arith.constant 497 : i32
    %28 = tpu.dynamic_rotate %2 by %c497_i32 dim 1 : vector<8x512xf32>, i32 -> vector<8x512xf32>
    %29 = vector.extract_strided_slice %0 {offsets = [6, 0, 0], sizes = [1, 1, 512], strides = [1, 1, 1]} : vector<9x1x512xf32> to vector<1x1x512xf32>
    %30 = vector.shape_cast %29 : vector<1x1x512xf32> to vector<1x512xf32>
    %31 = vector.broadcast %30 : vector<1x512xf32> to vector<8x512xf32>
    %32 = arith.mulf %28, %31 : vector<8x512xf32>
    %c496_i32 = arith.constant 496 : i32
    %33 = tpu.dynamic_rotate %2 by %c496_i32 dim 1 : vector<8x512xf32>, i32 -> vector<8x512xf32>
    %34 = vector.extract_strided_slice %0 {offsets = [7, 0, 0], sizes = [1, 1, 512], strides = [1, 1, 1]} : vector<9x1x512xf32> to vector<1x1x512xf32>
    %35 = vector.shape_cast %34 : vector<1x1x512xf32> to vector<1x512xf32>
    %36 = vector.broadcast %35 : vector<1x512xf32> to vector<8x512xf32>
    %37 = arith.mulf %33, %36 : vector<8x512xf32>
    %c495_i32 = arith.constant 495 : i32
    %38 = tpu.dynamic_rotate %2 by %c495_i32 dim 1 : vector<8x512xf32>, i32 -> vector<8x512xf32>
    %39 = vector.extract_strided_slice %0 {offsets = [8, 0, 0], sizes = [1, 1, 512], strides = [1, 1, 1]} : vector<9x1x512xf32> to vector<1x1x512xf32>
    %40 = vector.shape_cast %39 : vector<1x1x512xf32> to vector<1x512xf32>
    %41 = vector.broadcast %40 : vector<1x512xf32> to vector<8x512xf32>
    %42 = arith.mulf %38, %41 : vector<8x512xf32>
    %43 = tpu.concatenate %7, %12, %17, %22, %2, %27, %32, %37, %42 in 0 : vector<8x512xf32>, vector<8x512xf32>, vector<8x512xf32>, vector<8x512xf32>, vector<8x512xf32>, vector<8x512xf32>, vector<8x512xf32>, vector<8x512xf32>, vector<8x512xf32> -> vector<72x512xf32>
    %44 = arith.truncf %43 : vector<72x512xf32> to vector<72x512xbf16>
    %c0_7 = arith.constant 0 : index
    %c0_8 = arith.constant 0 : index
    %45 = vector.load %arg2[%c0_7, %c0_8] : memref<24x72xbf16, #tpu.memory_space<vmem>>, vector<24x72xbf16>
    %cst = arith.constant dense<0.000000e+00> : vector<24x512xf32>
    %46 = tpu.matmul %45, %44, %cst {dimension_numbers = #tpu.dot_dimension_numbers<[1], [0], [0], [1], [0, 0, 1, 1], [], []>} : vector<24x72xbf16>, vector<72x512xbf16>, vector<24x512xf32> -> vector<24x512xf32>
    %cst_9 = arith.constant dense<0.000000e+00> : vector<24xf32>
    %47 = vector.multi_reduction <add>, %46, %cst_9 [1] : vector<24x512xf32> to vector<24xf32>
    %48 = vector.shape_cast %47 : vector<24xf32> to vector<24x1xf32>
    %cst_10 = arith.constant 0.001953125 : f32
    %49 = vector.broadcast %cst_10 : f32 to vector<24x1xf32>
    %50 = arith.mulf %48, %49 : vector<24x1xf32>
    %51 = arith.mulf %46, %46 : vector<24x512xf32>
    %cst_11 = arith.constant dense<0.000000e+00> : vector<24xf32>
    %52 = vector.multi_reduction <add>, %51, %cst_11 [1] : vector<24x512xf32> to vector<24xf32>
    %53 = vector.shape_cast %52 : vector<24xf32> to vector<24x1xf32>
    %cst_12 = arith.constant 0.001953125 : f32
    %54 = vector.broadcast %cst_12 : f32 to vector<24x1xf32>
    %55 = arith.mulf %53, %54 : vector<24x1xf32>
    %56 = arith.mulf %50, %50 : vector<24x1xf32>
    %57 = arith.subf %55, %56 : vector<24x1xf32>
    %cst_13 = arith.constant 9.99999974E-5 : f32
    %58 = vector.broadcast %cst_13 : f32 to vector<24x1xf32>
    %59 = arith.addf %57, %58 : vector<24x1xf32>
    %60 = math.rsqrt %59 : vector<24x1xf32>
    %c0_14 = arith.constant 0 : index
    %c0_15 = arith.constant 0 : index
    %61 = vector.load %arg3[%c0_14, %c0_15] : memref<24x1xf32, #tpu.memory_space<vmem>>, vector<24x1xf32>
    %62 = arith.mulf %60, %61 : vector<24x1xf32>
    %c0_16 = arith.constant 0 : index
    %c0_17 = arith.constant 0 : index
    %63 = vector.load %arg4[%c0_16, %c0_17] : memref<24x1xf32, #tpu.memory_space<vmem>>, vector<24x1xf32>
    %64 = arith.mulf %50, %62 : vector<24x1xf32>
    %65 = arith.subf %63, %64 : vector<24x1xf32>
    %66 = vector.broadcast %62 : vector<24x1xf32> to vector<24x512xf32>
    %67 = arith.mulf %46, %66 : vector<24x512xf32>
    %68 = vector.broadcast %65 : vector<24x1xf32> to vector<24x512xf32>
    %69 = arith.addf %67, %68 : vector<24x512xf32>
    %cst_18 = arith.constant 0.000000e+00 : f32
    %70 = vector.broadcast %cst_18 : f32 to vector<24x512xf32>
    %71 = arith.maximumf %69, %70 : vector<24x512xf32>
    %c17_i32_19 = arith.constant 17 : i32
    %72 = tpu.dynamic_rotate %71 by %c17_i32_19 dim 1 : vector<24x512xf32>, i32 -> vector<24x512xf32>
    %73 = vector.extract_strided_slice %0 {offsets = [0, 0, 0], sizes = [1, 1, 512], strides = [1, 1, 1]} : vector<9x1x512xf32> to vector<1x1x512xf32>
    %74 = vector.shape_cast %73 : vector<1x1x512xf32> to vector<1x512xf32>
    %75 = vector.broadcast %74 : vector<1x512xf32> to vector<24x512xf32>
    %76 = arith.mulf %72, %75 : vector<24x512xf32>
    %c16_i32_20 = arith.constant 16 : i32
    %77 = tpu.dynamic_rotate %71 by %c16_i32_20 dim 1 : vector<24x512xf32>, i32 -> vector<24x512xf32>
    %78 = vector.extract_strided_slice %0 {offsets = [1, 0, 0], sizes = [1, 1, 512], strides = [1, 1, 1]} : vector<9x1x512xf32> to vector<1x1x512xf32>
    %79 = vector.shape_cast %78 : vector<1x1x512xf32> to vector<1x512xf32>
    %80 = vector.broadcast %79 : vector<1x512xf32> to vector<24x512xf32>
    %81 = arith.mulf %77, %80 : vector<24x512xf32>
    %c15_i32_21 = arith.constant 15 : i32
    %82 = tpu.dynamic_rotate %71 by %c15_i32_21 dim 1 : vector<24x512xf32>, i32 -> vector<24x512xf32>
    %83 = vector.extract_strided_slice %0 {offsets = [2, 0, 0], sizes = [1, 1, 512], strides = [1, 1, 1]} : vector<9x1x512xf32> to vector<1x1x512xf32>
    %84 = vector.shape_cast %83 : vector<1x1x512xf32> to vector<1x512xf32>
    %85 = vector.broadcast %84 : vector<1x512xf32> to vector<24x512xf32>
    %86 = arith.mulf %82, %85 : vector<24x512xf32>
    %c1_i32_22 = arith.constant 1 : i32
    %87 = tpu.dynamic_rotate %71 by %c1_i32_22 dim 1 : vector<24x512xf32>, i32 -> vector<24x512xf32>
    %88 = vector.extract_strided_slice %0 {offsets = [3, 0, 0], sizes = [1, 1, 512], strides = [1, 1, 1]} : vector<9x1x512xf32> to vector<1x1x512xf32>
    %89 = vector.shape_cast %88 : vector<1x1x512xf32> to vector<1x512xf32>
    %90 = vector.broadcast %89 : vector<1x512xf32> to vector<24x512xf32>
    %91 = arith.mulf %87, %90 : vector<24x512xf32>
    %c511_i32_23 = arith.constant 511 : i32
    %92 = tpu.dynamic_rotate %71 by %c511_i32_23 dim 1 : vector<24x512xf32>, i32 -> vector<24x512xf32>
    %93 = vector.extract_strided_slice %0 {offsets = [5, 0, 0], sizes = [1, 1, 512], strides = [1, 1, 1]} : vector<9x1x512xf32> to vector<1x1x512xf32>
    %94 = vector.shape_cast %93 : vector<1x1x512xf32> to vector<1x512xf32>
    %95 = vector.broadcast %94 : vector<1x512xf32> to vector<24x512xf32>
    %96 = arith.mulf %92, %95 : vector<24x512xf32>
    %c497_i32_24 = arith.constant 497 : i32
    %97 = tpu.dynamic_rotate %71 by %c497_i32_24 dim 1 : vector<24x512xf32>, i32 -> vector<24x512xf32>
    %98 = vector.extract_strided_slice %0 {offsets = [6, 0, 0], sizes = [1, 1, 512], strides = [1, 1, 1]} : vector<9x1x512xf32> to vector<1x1x512xf32>
    %99 = vector.shape_cast %98 : vector<1x1x512xf32> to vector<1x512xf32>
    %100 = vector.broadcast %99 : vector<1x512xf32> to vector<24x512xf32>
    %101 = arith.mulf %97, %100 : vector<24x512xf32>
    %c496_i32_25 = arith.constant 496 : i32
    %102 = tpu.dynamic_rotate %71 by %c496_i32_25 dim 1 : vector<24x512xf32>, i32 -> vector<24x512xf32>
    %103 = vector.extract_strided_slice %0 {offsets = [7, 0, 0], sizes = [1, 1, 512], strides = [1, 1, 1]} : vector<9x1x512xf32> to vector<1x1x512xf32>
    %104 = vector.shape_cast %103 : vector<1x1x512xf32> to vector<1x512xf32>
    %105 = vector.broadcast %104 : vector<1x512xf32> to vector<24x512xf32>
    %106 = arith.mulf %102, %105 : vector<24x512xf32>
    %c495_i32_26 = arith.constant 495 : i32
    %107 = tpu.dynamic_rotate %71 by %c495_i32_26 dim 1 : vector<24x512xf32>, i32 -> vector<24x512xf32>
    %108 = vector.extract_strided_slice %0 {offsets = [8, 0, 0], sizes = [1, 1, 512], strides = [1, 1, 1]} : vector<9x1x512xf32> to vector<1x1x512xf32>
    %109 = vector.shape_cast %108 : vector<1x1x512xf32> to vector<1x512xf32>
    %110 = vector.broadcast %109 : vector<1x512xf32> to vector<24x512xf32>
    %111 = arith.mulf %107, %110 : vector<24x512xf32>
    %112 = tpu.concatenate %76, %81, %86, %91, %71, %96, %101, %106, %111 in 0 : vector<24x512xf32>, vector<24x512xf32>, vector<24x512xf32>, vector<24x512xf32>, vector<24x512xf32>, vector<24x512xf32>, vector<24x512xf32>, vector<24x512xf32>, vector<24x512xf32> -> vector<216x512xf32>
    %113 = arith.truncf %112 : vector<216x512xf32> to vector<216x512xbf16>
    %c0_27 = arith.constant 0 : index
    %c0_28 = arith.constant 0 : index
    %114 = vector.load %arg5[%c0_27, %c0_28] : memref<24x216xbf16, #tpu.memory_space<vmem>>, vector<24x216xbf16>
    %cst_29 = arith.constant dense<0.000000e+00> : vector<24x512xf32>
    %115 = tpu.matmul %114, %113, %cst_29 {dimension_numbers = #tpu.dot_dimension_numbers<[1], [0], [0], [1], [0, 0, 1, 1], [], []>} : vector<24x216xbf16>, vector<216x512xbf16>, vector<24x512xf32> -> vector<24x512xf32>
    %cst_30 = arith.constant dense<0.000000e+00> : vector<24xf32>
    %116 = vector.multi_reduction <add>, %115, %cst_30 [1] : vector<24x512xf32> to vector<24xf32>
    %117 = vector.shape_cast %116 : vector<24xf32> to vector<24x1xf32>
    %cst_31 = arith.constant 0.001953125 : f32
    %118 = vector.broadcast %cst_31 : f32 to vector<24x1xf32>
    %119 = arith.mulf %117, %118 : vector<24x1xf32>
    %120 = arith.mulf %115, %115 : vector<24x512xf32>
    %cst_32 = arith.constant dense<0.000000e+00> : vector<24xf32>
    %121 = vector.multi_reduction <add>, %120, %cst_32 [1] : vector<24x512xf32> to vector<24xf32>
    %122 = vector.shape_cast %121 : vector<24xf32> to vector<24x1xf32>
    %cst_33 = arith.constant 0.001953125 : f32
    %123 = vector.broadcast %cst_33 : f32 to vector<24x1xf32>
    %124 = arith.mulf %122, %123 : vector<24x1xf32>
    %125 = arith.mulf %119, %119 : vector<24x1xf32>
    %126 = arith.subf %124, %125 : vector<24x1xf32>
    %cst_34 = arith.constant 9.99999974E-5 : f32
    %127 = vector.broadcast %cst_34 : f32 to vector<24x1xf32>
    %128 = arith.addf %126, %127 : vector<24x1xf32>
    %129 = math.rsqrt %128 : vector<24x1xf32>
    %c0_35 = arith.constant 0 : index
    %c0_36 = arith.constant 0 : index
    %130 = vector.load %arg6[%c0_35, %c0_36] : memref<24x1xf32, #tpu.memory_space<vmem>>, vector<24x1xf32>
    %131 = arith.mulf %129, %130 : vector<24x1xf32>
    %c0_37 = arith.constant 0 : index
    %c0_38 = arith.constant 0 : index
    %132 = vector.load %arg7[%c0_37, %c0_38] : memref<24x1xf32, #tpu.memory_space<vmem>>, vector<24x1xf32>
    %133 = arith.mulf %119, %131 : vector<24x1xf32>
    %134 = arith.subf %132, %133 : vector<24x1xf32>
    %135 = vector.broadcast %131 : vector<24x1xf32> to vector<24x512xf32>
    %136 = arith.mulf %115, %135 : vector<24x512xf32>
    %137 = vector.broadcast %134 : vector<24x1xf32> to vector<24x512xf32>
    %138 = arith.addf %136, %137 : vector<24x512xf32>
    %cst_39 = arith.constant 0.000000e+00 : f32
    %139 = vector.broadcast %cst_39 : f32 to vector<24x512xf32>
    %140 = arith.maximumf %138, %139 : vector<24x512xf32>
    %c0_40 = arith.constant 0 : index
    %c0_41 = arith.constant 0 : index
    %141 = vector.load %arg22[%c0_40, %c0_41] : memref<512x128xbf16, #tpu.memory_space<vmem>>, vector<512x128xbf16>
    %c511_i32_42 = arith.constant 511 : i32
    %142 = tpu.dynamic_rotate %140 by %c511_i32_42 dim 1 : vector<24x512xf32>, i32 -> vector<24x512xf32>
    %143 = arith.maximumf %140, %142 : vector<24x512xf32>
    %c496_i32_43 = arith.constant 496 : i32
    %144 = tpu.dynamic_rotate %143 by %c496_i32_43 dim 1 : vector<24x512xf32>, i32 -> vector<24x512xf32>
    %145 = arith.maximumf %143, %144 : vector<24x512xf32>
    %146 = arith.truncf %145 : vector<24x512xf32> to vector<24x512xbf16>
    %cst_44 = arith.constant dense<0.000000e+00> : vector<24x128xf32>
    %147 = tpu.matmul %146, %141, %cst_44 {dimension_numbers = #tpu.dot_dimension_numbers<[1], [0], [0], [1], [0, 0, 1, 1], [], []>} : vector<24x512xbf16>, vector<512x128xbf16>, vector<24x128xf32> -> vector<24x128xf32>
    %c9_i32 = arith.constant 9 : i32
    %148 = tpu.dynamic_rotate %147 by %c9_i32 dim 1 : vector<24x128xf32>, i32 -> vector<24x128xf32>
    %149 = vector.extract_strided_slice %1 {offsets = [0, 0, 0], sizes = [1, 1, 128], strides = [1, 1, 1]} : vector<9x1x128xf32> to vector<1x1x128xf32>
    %150 = vector.shape_cast %149 : vector<1x1x128xf32> to vector<1x128xf32>
    %151 = vector.broadcast %150 : vector<1x128xf32> to vector<24x128xf32>
    %152 = arith.mulf %148, %151 : vector<24x128xf32>
    %c8_i32 = arith.constant 8 : i32
    %153 = tpu.dynamic_rotate %147 by %c8_i32 dim 1 : vector<24x128xf32>, i32 -> vector<24x128xf32>
    %154 = vector.extract_strided_slice %1 {offsets = [1, 0, 0], sizes = [1, 1, 128], strides = [1, 1, 1]} : vector<9x1x128xf32> to vector<1x1x128xf32>
    %155 = vector.shape_cast %154 : vector<1x1x128xf32> to vector<1x128xf32>
    %156 = vector.broadcast %155 : vector<1x128xf32> to vector<24x128xf32>
    %157 = arith.mulf %153, %156 : vector<24x128xf32>
    %c7_i32 = arith.constant 7 : i32
    %158 = tpu.dynamic_rotate %147 by %c7_i32 dim 1 : vector<24x128xf32>, i32 -> vector<24x128xf32>
    %159 = vector.extract_strided_slice %1 {offsets = [2, 0, 0], sizes = [1, 1, 128], strides = [1, 1, 1]} : vector<9x1x128xf32> to vector<1x1x128xf32>
    %160 = vector.shape_cast %159 : vector<1x1x128xf32> to vector<1x128xf32>
    %161 = vector.broadcast %160 : vector<1x128xf32> to vector<24x128xf32>
    %162 = arith.mulf %158, %161 : vector<24x128xf32>
    %c1_i32_45 = arith.constant 1 : i32
    %163 = tpu.dynamic_rotate %147 by %c1_i32_45 dim 1 : vector<24x128xf32>, i32 -> vector<24x128xf32>
    %164 = vector.extract_strided_slice %1 {offsets = [3, 0, 0], sizes = [1, 1, 128], strides = [1, 1, 1]} : vector<9x1x128xf32> to vector<1x1x128xf32>
    %165 = vector.shape_cast %164 : vector<1x1x128xf32> to vector<1x128xf32>
    %166 = vector.broadcast %165 : vector<1x128xf32> to vector<24x128xf32>
    %167 = arith.mulf %163, %166 : vector<24x128xf32>
    %c127_i32 = arith.constant 127 : i32
    %168 = tpu.dynamic_rotate %147 by %c127_i32 dim 1 : vector<24x128xf32>, i32 -> vector<24x128xf32>
    %169 = vector.extract_strided_slice %1 {offsets = [5, 0, 0], sizes = [1, 1, 128], strides = [1, 1, 1]} : vector<9x1x128xf32> to vector<1x1x128xf32>
    %170 = vector.shape_cast %169 : vector<1x1x128xf32> to vector<1x128xf32>
    %171 = vector.broadcast %170 : vector<1x128xf32> to vector<24x128xf32>
    %172 = arith.mulf %168, %171 : vector<24x128xf32>
    %c121_i32 = arith.constant 121 : i32
    %173 = tpu.dynamic_rotate %147 by %c121_i32 dim 1 : vector<24x128xf32>, i32 -> vector<24x128xf32>
    %174 = vector.extract_strided_slice %1 {offsets = [6, 0, 0], sizes = [1, 1, 128], strides = [1, 1, 1]} : vector<9x1x128xf32> to vector<1x1x128xf32>
    %175 = vector.shape_cast %174 : vector<1x1x128xf32> to vector<1x128xf32>
    %176 = vector.broadcast %175 : vector<1x128xf32> to vector<24x128xf32>
    %177 = arith.mulf %173, %176 : vector<24x128xf32>
    %c120_i32 = arith.constant 120 : i32
    %178 = tpu.dynamic_rotate %147 by %c120_i32 dim 1 : vector<24x128xf32>, i32 -> vector<24x128xf32>
    %179 = vector.extract_strided_slice %1 {offsets = [7, 0, 0], sizes = [1, 1, 128], strides = [1, 1, 1]} : vector<9x1x128xf32> to vector<1x1x128xf32>
    %180 = vector.shape_cast %179 : vector<1x1x128xf32> to vector<1x128xf32>
    %181 = vector.broadcast %180 : vector<1x128xf32> to vector<24x128xf32>
    %182 = arith.mulf %178, %181 : vector<24x128xf32>
    %c119_i32 = arith.constant 119 : i32
    %183 = tpu.dynamic_rotate %147 by %c119_i32 dim 1 : vector<24x128xf32>, i32 -> vector<24x128xf32>
    %184 = vector.extract_strided_slice %1 {offsets = [8, 0, 0], sizes = [1, 1, 128], strides = [1, 1, 1]} : vector<9x1x128xf32> to vector<1x1x128xf32>
    %185 = vector.shape_cast %184 : vector<1x1x128xf32> to vector<1x128xf32>
    %186 = vector.broadcast %185 : vector<1x128xf32> to vector<24x128xf32>
    %187 = arith.mulf %183, %186 : vector<24x128xf32>
    %188 = tpu.concatenate %152, %157, %162, %167, %147, %172, %177, %182, %187 in 0 : vector<24x128xf32>, vector<24x128xf32>, vector<24x128xf32>, vector<24x128xf32>, vector<24x128xf32>, vector<24x128xf32>, vector<24x128xf32>, vector<24x128xf32>, vector<24x128xf32> -> vector<216x128xf32>
    %189 = arith.truncf %188 : vector<216x128xf32> to vector<216x128xbf16>
    %c0_46 = arith.constant 0 : index
    %c0_47 = arith.constant 0 : index
    %190 = vector.load %arg8[%c0_46, %c0_47] : memref<24x216xbf16, #tpu.memory_space<vmem>>, vector<24x216xbf16>
    %cst_48 = arith.constant dense<0.000000e+00> : vector<24x128xf32>
    %191 = tpu.matmul %190, %189, %cst_48 {dimension_numbers = #tpu.dot_dimension_numbers<[1], [0], [0], [1], [0, 0, 1, 1], [], []>} : vector<24x216xbf16>, vector<216x128xbf16>, vector<24x128xf32> -> vector<24x128xf32>
    %cst_49 = arith.constant dense<0.000000e+00> : vector<24xf32>
    %192 = vector.multi_reduction <add>, %191, %cst_49 [1] : vector<24x128xf32> to vector<24xf32>
    %193 = vector.shape_cast %192 : vector<24xf32> to vector<24x1xf32>
    %cst_50 = arith.constant 7.812500e-03 : f32
    %194 = vector.broadcast %cst_50 : f32 to vector<24x1xf32>
    %195 = arith.mulf %193, %194 : vector<24x1xf32>
    %196 = arith.mulf %191, %191 : vector<24x128xf32>
    %cst_51 = arith.constant dense<0.000000e+00> : vector<24xf32>
    %197 = vector.multi_reduction <add>, %196, %cst_51 [1] : vector<24x128xf32> to vector<24xf32>
    %198 = vector.shape_cast %197 : vector<24xf32> to vector<24x1xf32>
    %cst_52 = arith.constant 7.812500e-03 : f32
    %199 = vector.broadcast %cst_52 : f32 to vector<24x1xf32>
    %200 = arith.mulf %198, %199 : vector<24x1xf32>
    %201 = arith.mulf %195, %195 : vector<24x1xf32>
    %202 = arith.subf %200, %201 : vector<24x1xf32>
    %cst_53 = arith.constant 9.99999974E-5 : f32
    %203 = vector.broadcast %cst_53 : f32 to vector<24x1xf32>
    %204 = arith.addf %202, %203 : vector<24x1xf32>
    %205 = math.rsqrt %204 : vector<24x1xf32>
    %c0_54 = arith.constant 0 : index
    %c0_55 = arith.constant 0 : index
    %206 = vector.load %arg9[%c0_54, %c0_55] : memref<24x1xf32, #tpu.memory_space<vmem>>, vector<24x1xf32>
    %207 = arith.mulf %205, %206 : vector<24x1xf32>
    %c0_56 = arith.constant 0 : index
    %c0_57 = arith.constant 0 : index
    %208 = vector.load %arg10[%c0_56, %c0_57] : memref<24x1xf32, #tpu.memory_space<vmem>>, vector<24x1xf32>
    %209 = arith.mulf %195, %207 : vector<24x1xf32>
    %210 = arith.subf %208, %209 : vector<24x1xf32>
    %211 = vector.broadcast %207 : vector<24x1xf32> to vector<24x128xf32>
    %212 = arith.mulf %191, %211 : vector<24x128xf32>
    %213 = vector.broadcast %210 : vector<24x1xf32> to vector<24x128xf32>
    %214 = arith.addf %212, %213 : vector<24x128xf32>
    %cst_58 = arith.constant 0.000000e+00 : f32
    %215 = vector.broadcast %cst_58 : f32 to vector<24x128xf32>
    %216 = arith.maximumf %214, %215 : vector<24x128xf32>
    %217 = arith.truncf %216 : vector<24x128xf32> to vector<24x128xbf16>
    %c0_59 = arith.constant 0 : index
    %c0_60 = arith.constant 0 : index
    %218 = vector.load %arg23[%c0_59, %c0_60] : memref<128x512xbf16, #tpu.memory_space<vmem>>, vector<128x512xbf16>
    %cst_61 = arith.constant dense<0.000000e+00> : vector<24x512xf32>
    %219 = tpu.matmul %217, %218, %cst_61 {dimension_numbers = #tpu.dot_dimension_numbers<[1], [0], [0], [1], [0, 0, 1, 1], [], []>} : vector<24x128xbf16>, vector<128x512xbf16>, vector<24x512xf32> -> vector<24x512xf32>
    %220 = tpu.concatenate %219, %140 in 0 : vector<24x512xf32>, vector<24x512xf32> -> vector<48x512xf32>
    %c17_i32_62 = arith.constant 17 : i32
    %221 = tpu.dynamic_rotate %220 by %c17_i32_62 dim 1 : vector<48x512xf32>, i32 -> vector<48x512xf32>
    %222 = vector.extract_strided_slice %0 {offsets = [0, 0, 0], sizes = [1, 1, 512], strides = [1, 1, 1]} : vector<9x1x512xf32> to vector<1x1x512xf32>
    %223 = vector.shape_cast %222 : vector<1x1x512xf32> to vector<1x512xf32>
    %224 = vector.broadcast %223 : vector<1x512xf32> to vector<48x512xf32>
    %225 = arith.mulf %221, %224 : vector<48x512xf32>
    %c16_i32_63 = arith.constant 16 : i32
    %226 = tpu.dynamic_rotate %220 by %c16_i32_63 dim 1 : vector<48x512xf32>, i32 -> vector<48x512xf32>
    %227 = vector.extract_strided_slice %0 {offsets = [1, 0, 0], sizes = [1, 1, 512], strides = [1, 1, 1]} : vector<9x1x512xf32> to vector<1x1x512xf32>
    %228 = vector.shape_cast %227 : vector<1x1x512xf32> to vector<1x512xf32>
    %229 = vector.broadcast %228 : vector<1x512xf32> to vector<48x512xf32>
    %230 = arith.mulf %226, %229 : vector<48x512xf32>
    %c15_i32_64 = arith.constant 15 : i32
    %231 = tpu.dynamic_rotate %220 by %c15_i32_64 dim 1 : vector<48x512xf32>, i32 -> vector<48x512xf32>
    %232 = vector.extract_strided_slice %0 {offsets = [2, 0, 0], sizes = [1, 1, 512], strides = [1, 1, 1]} : vector<9x1x512xf32> to vector<1x1x512xf32>
    %233 = vector.shape_cast %232 : vector<1x1x512xf32> to vector<1x512xf32>
    %234 = vector.broadcast %233 : vector<1x512xf32> to vector<48x512xf32>
    %235 = arith.mulf %231, %234 : vector<48x512xf32>
    %c1_i32_65 = arith.constant 1 : i32
    %236 = tpu.dynamic_rotate %220 by %c1_i32_65 dim 1 : vector<48x512xf32>, i32 -> vector<48x512xf32>
    %237 = vector.extract_strided_slice %0 {offsets = [3, 0, 0], sizes = [1, 1, 512], strides = [1, 1, 1]} : vector<9x1x512xf32> to vector<1x1x512xf32>
    %238 = vector.shape_cast %237 : vector<1x1x512xf32> to vector<1x512xf32>
    %239 = vector.broadcast %238 : vector<1x512xf32> to vector<48x512xf32>
    %240 = arith.mulf %236, %239 : vector<48x512xf32>
    %c511_i32_66 = arith.constant 511 : i32
    %241 = tpu.dynamic_rotate %220 by %c511_i32_66 dim 1 : vector<48x512xf32>, i32 -> vector<48x512xf32>
    %242 = vector.extract_strided_slice %0 {offsets = [5, 0, 0], sizes = [1, 1, 512], strides = [1, 1, 1]} : vector<9x1x512xf32> to vector<1x1x512xf32>
    %243 = vector.shape_cast %242 : vector<1x1x512xf32> to vector<1x512xf32>
    %244 = vector.broadcast %243 : vector<1x512xf32> to vector<48x512xf32>
    %245 = arith.mulf %241, %244 : vector<48x512xf32>
    %c497_i32_67 = arith.constant 497 : i32
    %246 = tpu.dynamic_rotate %220 by %c497_i32_67 dim 1 : vector<48x512xf32>, i32 -> vector<48x512xf32>
    %247 = vector.extract_strided_slice %0 {offsets = [6, 0, 0], sizes = [1, 1, 512], strides = [1, 1, 1]} : vector<9x1x512xf32> to vector<1x1x512xf32>
    %248 = vector.shape_cast %247 : vector<1x1x512xf32> to vector<1x512xf32>
    %249 = vector.broadcast %248 : vector<1x512xf32> to vector<48x512xf32>
    %250 = arith.mulf %246, %249 : vector<48x512xf32>
    %c496_i32_68 = arith.constant 496 : i32
    %251 = tpu.dynamic_rotate %220 by %c496_i32_68 dim 1 : vector<48x512xf32>, i32 -> vector<48x512xf32>
    %252 = vector.extract_strided_slice %0 {offsets = [7, 0, 0], sizes = [1, 1, 512], strides = [1, 1, 1]} : vector<9x1x512xf32> to vector<1x1x512xf32>
    %253 = vector.shape_cast %252 : vector<1x1x512xf32> to vector<1x512xf32>
    %254 = vector.broadcast %253 : vector<1x512xf32> to vector<48x512xf32>
    %255 = arith.mulf %251, %254 : vector<48x512xf32>
    %c495_i32_69 = arith.constant 495 : i32
    %256 = tpu.dynamic_rotate %220 by %c495_i32_69 dim 1 : vector<48x512xf32>, i32 -> vector<48x512xf32>
    %257 = vector.extract_strided_slice %0 {offsets = [8, 0, 0], sizes = [1, 1, 512], strides = [1, 1, 1]} : vector<9x1x512xf32> to vector<1x1x512xf32>
    %258 = vector.shape_cast %257 : vector<1x1x512xf32> to vector<1x512xf32>
    %259 = vector.broadcast %258 : vector<1x512xf32> to vector<48x512xf32>
    %260 = arith.mulf %256, %259 : vector<48x512xf32>
    %261 = tpu.concatenate %225, %230, %235, %240, %220, %245, %250, %255, %260 in 0 : vector<48x512xf32>, vector<48x512xf32>, vector<48x512xf32>, vector<48x512xf32>, vector<48x512xf32>, vector<48x512xf32>, vector<48x512xf32>, vector<48x512xf32>, vector<48x512xf32> -> vector<432x512xf32>
    %262 = arith.truncf %261 : vector<432x512xf32> to vector<432x512xbf16>
    %c0_70 = arith.constant 0 : index
    %c0_71 = arith.constant 0 : index
    %263 = vector.load %arg11[%c0_70, %c0_71] : memref<24x432xbf16, #tpu.memory_space<vmem>>, vector<24x432xbf16>
    %cst_72 = arith.constant dense<0.000000e+00> : vector<24x512xf32>
    %264 = tpu.matmul %263, %262, %cst_72 {dimension_numbers = #tpu.dot_dimension_numbers<[1], [0], [0], [1], [0, 0, 1, 1], [], []>} : vector<24x432xbf16>, vector<432x512xbf16>, vector<24x512xf32> -> vector<24x512xf32>
    %cst_73 = arith.constant dense<0.000000e+00> : vector<24xf32>
    %265 = vector.multi_reduction <add>, %264, %cst_73 [1] : vector<24x512xf32> to vector<24xf32>
    %266 = vector.shape_cast %265 : vector<24xf32> to vector<24x1xf32>
    %cst_74 = arith.constant 0.001953125 : f32
    %267 = vector.broadcast %cst_74 : f32 to vector<24x1xf32>
    %268 = arith.mulf %266, %267 : vector<24x1xf32>
    %269 = arith.mulf %264, %264 : vector<24x512xf32>
    %cst_75 = arith.constant dense<0.000000e+00> : vector<24xf32>
    %270 = vector.multi_reduction <add>, %269, %cst_75 [1] : vector<24x512xf32> to vector<24xf32>
    %271 = vector.shape_cast %270 : vector<24xf32> to vector<24x1xf32>
    %cst_76 = arith.constant 0.001953125 : f32
    %272 = vector.broadcast %cst_76 : f32 to vector<24x1xf32>
    %273 = arith.mulf %271, %272 : vector<24x1xf32>
    %274 = arith.mulf %268, %268 : vector<24x1xf32>
    %275 = arith.subf %273, %274 : vector<24x1xf32>
    %cst_77 = arith.constant 9.99999974E-5 : f32
    %276 = vector.broadcast %cst_77 : f32 to vector<24x1xf32>
    %277 = arith.addf %275, %276 : vector<24x1xf32>
    %278 = math.rsqrt %277 : vector<24x1xf32>
    %c0_78 = arith.constant 0 : index
    %c0_79 = arith.constant 0 : index
    %279 = vector.load %arg12[%c0_78, %c0_79] : memref<24x1xf32, #tpu.memory_space<vmem>>, vector<24x1xf32>
    %280 = arith.mulf %278, %279 : vector<24x1xf32>
    %c0_80 = arith.constant 0 : index
    %c0_81 = arith.constant 0 : index
    %281 = vector.load %arg13[%c0_80, %c0_81] : memref<24x1xf32, #tpu.memory_space<vmem>>, vector<24x1xf32>
    %282 = arith.mulf %268, %280 : vector<24x1xf32>
    %283 = arith.subf %281, %282 : vector<24x1xf32>
    %284 = vector.broadcast %280 : vector<24x1xf32> to vector<24x512xf32>
    %285 = arith.mulf %264, %284 : vector<24x512xf32>
    %286 = vector.broadcast %283 : vector<24x1xf32> to vector<24x512xf32>
    %287 = arith.addf %285, %286 : vector<24x512xf32>
    %cst_82 = arith.constant 0.000000e+00 : f32
    %288 = vector.broadcast %cst_82 : f32 to vector<24x512xf32>
    %289 = arith.maximumf %287, %288 : vector<24x512xf32>
    %c17_i32_83 = arith.constant 17 : i32
    %290 = tpu.dynamic_rotate %289 by %c17_i32_83 dim 1 : vector<24x512xf32>, i32 -> vector<24x512xf32>
    %291 = vector.extract_strided_slice %0 {offsets = [0, 0, 0], sizes = [1, 1, 512], strides = [1, 1, 1]} : vector<9x1x512xf32> to vector<1x1x512xf32>
    %292 = vector.shape_cast %291 : vector<1x1x512xf32> to vector<1x512xf32>
    %293 = vector.broadcast %292 : vector<1x512xf32> to vector<24x512xf32>
    %294 = arith.mulf %290, %293 : vector<24x512xf32>
    %c16_i32_84 = arith.constant 16 : i32
    %295 = tpu.dynamic_rotate %289 by %c16_i32_84 dim 1 : vector<24x512xf32>, i32 -> vector<24x512xf32>
    %296 = vector.extract_strided_slice %0 {offsets = [1, 0, 0], sizes = [1, 1, 512], strides = [1, 1, 1]} : vector<9x1x512xf32> to vector<1x1x512xf32>
    %297 = vector.shape_cast %296 : vector<1x1x512xf32> to vector<1x512xf32>
    %298 = vector.broadcast %297 : vector<1x512xf32> to vector<24x512xf32>
    %299 = arith.mulf %295, %298 : vector<24x512xf32>
    %c15_i32_85 = arith.constant 15 : i32
    %300 = tpu.dynamic_rotate %289 by %c15_i32_85 dim 1 : vector<24x512xf32>, i32 -> vector<24x512xf32>
    %301 = vector.extract_strided_slice %0 {offsets = [2, 0, 0], sizes = [1, 1, 512], strides = [1, 1, 1]} : vector<9x1x512xf32> to vector<1x1x512xf32>
    %302 = vector.shape_cast %301 : vector<1x1x512xf32> to vector<1x512xf32>
    %303 = vector.broadcast %302 : vector<1x512xf32> to vector<24x512xf32>
    %304 = arith.mulf %300, %303 : vector<24x512xf32>
    %c1_i32_86 = arith.constant 1 : i32
    %305 = tpu.dynamic_rotate %289 by %c1_i32_86 dim 1 : vector<24x512xf32>, i32 -> vector<24x512xf32>
    %306 = vector.extract_strided_slice %0 {offsets = [3, 0, 0], sizes = [1, 1, 512], strides = [1, 1, 1]} : vector<9x1x512xf32> to vector<1x1x512xf32>
    %307 = vector.shape_cast %306 : vector<1x1x512xf32> to vector<1x512xf32>
    %308 = vector.broadcast %307 : vector<1x512xf32> to vector<24x512xf32>
    %309 = arith.mulf %305, %308 : vector<24x512xf32>
    %c511_i32_87 = arith.constant 511 : i32
    %310 = tpu.dynamic_rotate %289 by %c511_i32_87 dim 1 : vector<24x512xf32>, i32 -> vector<24x512xf32>
    %311 = vector.extract_strided_slice %0 {offsets = [5, 0, 0], sizes = [1, 1, 512], strides = [1, 1, 1]} : vector<9x1x512xf32> to vector<1x1x512xf32>
    %312 = vector.shape_cast %311 : vector<1x1x512xf32> to vector<1x512xf32>
    %313 = vector.broadcast %312 : vector<1x512xf32> to vector<24x512xf32>
    %314 = arith.mulf %310, %313 : vector<24x512xf32>
    %c497_i32_88 = arith.constant 497 : i32
    %315 = tpu.dynamic_rotate %289 by %c497_i32_88 dim 1 : vector<24x512xf32>, i32 -> vector<24x512xf32>
    %316 = vector.extract_strided_slice %0 {offsets = [6, 0, 0], sizes = [1, 1, 512], strides = [1, 1, 1]} : vector<9x1x512xf32> to vector<1x1x512xf32>
    %317 = vector.shape_cast %316 : vector<1x1x512xf32> to vector<1x512xf32>
    %318 = vector.broadcast %317 : vector<1x512xf32> to vector<24x512xf32>
    %319 = arith.mulf %315, %318 : vector<24x512xf32>
    %c496_i32_89 = arith.constant 496 : i32
    %320 = tpu.dynamic_rotate %289 by %c496_i32_89 dim 1 : vector<24x512xf32>, i32 -> vector<24x512xf32>
    %321 = vector.extract_strided_slice %0 {offsets = [7, 0, 0], sizes = [1, 1, 512], strides = [1, 1, 1]} : vector<9x1x512xf32> to vector<1x1x512xf32>
    %322 = vector.shape_cast %321 : vector<1x1x512xf32> to vector<1x512xf32>
    %323 = vector.broadcast %322 : vector<1x512xf32> to vector<24x512xf32>
    %324 = arith.mulf %320, %323 : vector<24x512xf32>
    %c495_i32_90 = arith.constant 495 : i32
    %325 = tpu.dynamic_rotate %289 by %c495_i32_90 dim 1 : vector<24x512xf32>, i32 -> vector<24x512xf32>
    %326 = vector.extract_strided_slice %0 {offsets = [8, 0, 0], sizes = [1, 1, 512], strides = [1, 1, 1]} : vector<9x1x512xf32> to vector<1x1x512xf32>
    %327 = vector.shape_cast %326 : vector<1x1x512xf32> to vector<1x512xf32>
    %328 = vector.broadcast %327 : vector<1x512xf32> to vector<24x512xf32>
    %329 = arith.mulf %325, %328 : vector<24x512xf32>
    %330 = tpu.concatenate %294, %299, %304, %309, %289, %314, %319, %324, %329 in 0 : vector<24x512xf32>, vector<24x512xf32>, vector<24x512xf32>, vector<24x512xf32>, vector<24x512xf32>, vector<24x512xf32>, vector<24x512xf32>, vector<24x512xf32>, vector<24x512xf32> -> vector<216x512xf32>
    %331 = arith.truncf %330 : vector<216x512xf32> to vector<216x512xbf16>
    %c0_91 = arith.constant 0 : index
    %c0_92 = arith.constant 0 : index
    %332 = vector.load %arg14[%c0_91, %c0_92] : memref<24x216xbf16, #tpu.memory_space<vmem>>, vector<24x216xbf16>
    %cst_93 = arith.constant dense<0.000000e+00> : vector<24x512xf32>
    %333 = tpu.matmul %332, %331, %cst_93 {dimension_numbers = #tpu.dot_dimension_numbers<[1], [0], [0], [1], [0, 0, 1, 1], [], []>} : vector<24x216xbf16>, vector<216x512xbf16>, vector<24x512xf32> -> vector<24x512xf32>
    %cst_94 = arith.constant dense<0.000000e+00> : vector<24xf32>
    %334 = vector.multi_reduction <add>, %333, %cst_94 [1] : vector<24x512xf32> to vector<24xf32>
    %335 = vector.shape_cast %334 : vector<24xf32> to vector<24x1xf32>
    %cst_95 = arith.constant 0.001953125 : f32
    %336 = vector.broadcast %cst_95 : f32 to vector<24x1xf32>
    %337 = arith.mulf %335, %336 : vector<24x1xf32>
    %338 = arith.mulf %333, %333 : vector<24x512xf32>
    %cst_96 = arith.constant dense<0.000000e+00> : vector<24xf32>
    %339 = vector.multi_reduction <add>, %338, %cst_96 [1] : vector<24x512xf32> to vector<24xf32>
    %340 = vector.shape_cast %339 : vector<24xf32> to vector<24x1xf32>
    %cst_97 = arith.constant 0.001953125 : f32
    %341 = vector.broadcast %cst_97 : f32 to vector<24x1xf32>
    %342 = arith.mulf %340, %341 : vector<24x1xf32>
    %343 = arith.mulf %337, %337 : vector<24x1xf32>
    %344 = arith.subf %342, %343 : vector<24x1xf32>
    %cst_98 = arith.constant 9.99999974E-5 : f32
    %345 = vector.broadcast %cst_98 : f32 to vector<24x1xf32>
    %346 = arith.addf %344, %345 : vector<24x1xf32>
    %347 = math.rsqrt %346 : vector<24x1xf32>
    %c0_99 = arith.constant 0 : index
    %c0_100 = arith.constant 0 : index
    %348 = vector.load %arg15[%c0_99, %c0_100] : memref<24x1xf32, #tpu.memory_space<vmem>>, vector<24x1xf32>
    %349 = arith.mulf %347, %348 : vector<24x1xf32>
    %c0_101 = arith.constant 0 : index
    %c0_102 = arith.constant 0 : index
    %350 = vector.load %arg16[%c0_101, %c0_102] : memref<24x1xf32, #tpu.memory_space<vmem>>, vector<24x1xf32>
    %351 = arith.mulf %337, %349 : vector<24x1xf32>
    %352 = arith.subf %350, %351 : vector<24x1xf32>
    %353 = vector.broadcast %349 : vector<24x1xf32> to vector<24x512xf32>
    %354 = arith.mulf %333, %353 : vector<24x512xf32>
    %355 = vector.broadcast %352 : vector<24x1xf32> to vector<24x512xf32>
    %356 = arith.addf %354, %355 : vector<24x512xf32>
    %cst_103 = arith.constant 0.000000e+00 : f32
    %357 = vector.broadcast %cst_103 : f32 to vector<24x512xf32>
    %358 = arith.maximumf %356, %357 : vector<24x512xf32>
    %c17_i32_104 = arith.constant 17 : i32
    %359 = tpu.dynamic_rotate %358 by %c17_i32_104 dim 1 : vector<24x512xf32>, i32 -> vector<24x512xf32>
    %360 = vector.extract_strided_slice %0 {offsets = [0, 0, 0], sizes = [1, 1, 512], strides = [1, 1, 1]} : vector<9x1x512xf32> to vector<1x1x512xf32>
    %361 = vector.shape_cast %360 : vector<1x1x512xf32> to vector<1x512xf32>
    %362 = vector.broadcast %361 : vector<1x512xf32> to vector<24x512xf32>
    %363 = arith.mulf %359, %362 : vector<24x512xf32>
    %c16_i32_105 = arith.constant 16 : i32
    %364 = tpu.dynamic_rotate %358 by %c16_i32_105 dim 1 : vector<24x512xf32>, i32 -> vector<24x512xf32>
    %365 = vector.extract_strided_slice %0 {offsets = [1, 0, 0], sizes = [1, 1, 512], strides = [1, 1, 1]} : vector<9x1x512xf32> to vector<1x1x512xf32>
    %366 = vector.shape_cast %365 : vector<1x1x512xf32> to vector<1x512xf32>
    %367 = vector.broadcast %366 : vector<1x512xf32> to vector<24x512xf32>
    %368 = arith.mulf %364, %367 : vector<24x512xf32>
    %c15_i32_106 = arith.constant 15 : i32
    %369 = tpu.dynamic_rotate %358 by %c15_i32_106 dim 1 : vector<24x512xf32>, i32 -> vector<24x512xf32>
    %370 = vector.extract_strided_slice %0 {offsets = [2, 0, 0], sizes = [1, 1, 512], strides = [1, 1, 1]} : vector<9x1x512xf32> to vector<1x1x512xf32>
    %371 = vector.shape_cast %370 : vector<1x1x512xf32> to vector<1x512xf32>
    %372 = vector.broadcast %371 : vector<1x512xf32> to vector<24x512xf32>
    %373 = arith.mulf %369, %372 : vector<24x512xf32>
    %c1_i32_107 = arith.constant 1 : i32
    %374 = tpu.dynamic_rotate %358 by %c1_i32_107 dim 1 : vector<24x512xf32>, i32 -> vector<24x512xf32>
    %375 = vector.extract_strided_slice %0 {offsets = [3, 0, 0], sizes = [1, 1, 512], strides = [1, 1, 1]} : vector<9x1x512xf32> to vector<1x1x512xf32>
    %376 = vector.shape_cast %375 : vector<1x1x512xf32> to vector<1x512xf32>
    %377 = vector.broadcast %376 : vector<1x512xf32> to vector<24x512xf32>
    %378 = arith.mulf %374, %377 : vector<24x512xf32>
    %c511_i32_108 = arith.constant 511 : i32
    %379 = tpu.dynamic_rotate %358 by %c511_i32_108 dim 1 : vector<24x512xf32>, i32 -> vector<24x512xf32>
    %380 = vector.extract_strided_slice %0 {offsets = [5, 0, 0], sizes = [1, 1, 512], strides = [1, 1, 1]} : vector<9x1x512xf32> to vector<1x1x512xf32>
    %381 = vector.shape_cast %380 : vector<1x1x512xf32> to vector<1x512xf32>
    %382 = vector.broadcast %381 : vector<1x512xf32> to vector<24x512xf32>
    %383 = arith.mulf %379, %382 : vector<24x512xf32>
    %c497_i32_109 = arith.constant 497 : i32
    %384 = tpu.dynamic_rotate %358 by %c497_i32_109 dim 1 : vector<24x512xf32>, i32 -> vector<24x512xf32>
    %385 = vector.extract_strided_slice %0 {offsets = [6, 0, 0], sizes = [1, 1, 512], strides = [1, 1, 1]} : vector<9x1x512xf32> to vector<1x1x512xf32>
    %386 = vector.shape_cast %385 : vector<1x1x512xf32> to vector<1x512xf32>
    %387 = vector.broadcast %386 : vector<1x512xf32> to vector<24x512xf32>
    %388 = arith.mulf %384, %387 : vector<24x512xf32>
    %c496_i32_110 = arith.constant 496 : i32
    %389 = tpu.dynamic_rotate %358 by %c496_i32_110 dim 1 : vector<24x512xf32>, i32 -> vector<24x512xf32>
    %390 = vector.extract_strided_slice %0 {offsets = [7, 0, 0], sizes = [1, 1, 512], strides = [1, 1, 1]} : vector<9x1x512xf32> to vector<1x1x512xf32>
    %391 = vector.shape_cast %390 : vector<1x1x512xf32> to vector<1x512xf32>
    %392 = vector.broadcast %391 : vector<1x512xf32> to vector<24x512xf32>
    %393 = arith.mulf %389, %392 : vector<24x512xf32>
    %c495_i32_111 = arith.constant 495 : i32
    %394 = tpu.dynamic_rotate %358 by %c495_i32_111 dim 1 : vector<24x512xf32>, i32 -> vector<24x512xf32>
    %395 = vector.extract_strided_slice %0 {offsets = [8, 0, 0], sizes = [1, 1, 512], strides = [1, 1, 1]} : vector<9x1x512xf32> to vector<1x1x512xf32>
    %396 = vector.shape_cast %395 : vector<1x1x512xf32> to vector<1x512xf32>
    %397 = vector.broadcast %396 : vector<1x512xf32> to vector<24x512xf32>
    %398 = arith.mulf %394, %397 : vector<24x512xf32>
    %399 = tpu.concatenate %363, %368, %373, %378, %358, %383, %388, %393, %398 in 0 : vector<24x512xf32>, vector<24x512xf32>, vector<24x512xf32>, vector<24x512xf32>, vector<24x512xf32>, vector<24x512xf32>, vector<24x512xf32>, vector<24x512xf32>, vector<24x512xf32> -> vector<216x512xf32>
    %400 = arith.truncf %399 : vector<216x512xf32> to vector<216x512xbf16>
    %c0_112 = arith.constant 0 : index
    %c0_113 = arith.constant 0 : index
    %401 = vector.load %arg17[%c0_112, %c0_113] : memref<24x216xbf16, #tpu.memory_space<vmem>>, vector<24x216xbf16>
    %cst_114 = arith.constant dense<0.000000e+00> : vector<24x512xf32>
    %402 = tpu.matmul %401, %400, %cst_114 {dimension_numbers = #tpu.dot_dimension_numbers<[1], [0], [0], [1], [0, 0, 1, 1], [], []>} : vector<24x216xbf16>, vector<216x512xbf16>, vector<24x512xf32> -> vector<24x512xf32>
    %cst_115 = arith.constant dense<0.000000e+00> : vector<24xf32>
    %403 = vector.multi_reduction <add>, %402, %cst_115 [1] : vector<24x512xf32> to vector<24xf32>
    %404 = vector.shape_cast %403 : vector<24xf32> to vector<24x1xf32>
    %cst_116 = arith.constant 0.001953125 : f32
    %405 = vector.broadcast %cst_116 : f32 to vector<24x1xf32>
    %406 = arith.mulf %404, %405 : vector<24x1xf32>
    %407 = arith.mulf %402, %402 : vector<24x512xf32>
    %cst_117 = arith.constant dense<0.000000e+00> : vector<24xf32>
    %408 = vector.multi_reduction <add>, %407, %cst_117 [1] : vector<24x512xf32> to vector<24xf32>
    %409 = vector.shape_cast %408 : vector<24xf32> to vector<24x1xf32>
    %cst_118 = arith.constant 0.001953125 : f32
    %410 = vector.broadcast %cst_118 : f32 to vector<24x1xf32>
    %411 = arith.mulf %409, %410 : vector<24x1xf32>
    %412 = arith.mulf %406, %406 : vector<24x1xf32>
    %413 = arith.subf %411, %412 : vector<24x1xf32>
    %cst_119 = arith.constant 9.99999974E-5 : f32
    %414 = vector.broadcast %cst_119 : f32 to vector<24x1xf32>
    %415 = arith.addf %413, %414 : vector<24x1xf32>
    %416 = math.rsqrt %415 : vector<24x1xf32>
    %c0_120 = arith.constant 0 : index
    %c0_121 = arith.constant 0 : index
    %417 = vector.load %arg18[%c0_120, %c0_121] : memref<24x1xf32, #tpu.memory_space<vmem>>, vector<24x1xf32>
    %418 = arith.mulf %416, %417 : vector<24x1xf32>
    %c0_122 = arith.constant 0 : index
    %c0_123 = arith.constant 0 : index
    %419 = vector.load %arg19[%c0_122, %c0_123] : memref<24x1xf32, #tpu.memory_space<vmem>>, vector<24x1xf32>
    %420 = arith.mulf %406, %418 : vector<24x1xf32>
    %421 = arith.subf %419, %420 : vector<24x1xf32>
    %422 = vector.broadcast %418 : vector<24x1xf32> to vector<24x512xf32>
    %423 = arith.mulf %402, %422 : vector<24x512xf32>
    %424 = vector.broadcast %421 : vector<24x1xf32> to vector<24x512xf32>
    %425 = arith.addf %423, %424 : vector<24x512xf32>
    %cst_124 = arith.constant 0.000000e+00 : f32
    %426 = vector.broadcast %cst_124 : f32 to vector<24x512xf32>
    %427 = arith.maximumf %425, %426 : vector<24x512xf32>
    %c0_125 = arith.constant 0 : index
    %c0_126 = arith.constant 0 : index
    %428 = vector.load %arg20[%c0_125, %c0_126] : memref<3x24xbf16, #tpu.memory_space<vmem>>, vector<3x24xbf16>
    %429 = arith.truncf %427 : vector<24x512xf32> to vector<24x512xbf16>
    %cst_127 = arith.constant dense<0.000000e+00> : vector<3x512xf32>
    %430 = tpu.matmul %428, %429, %cst_127 {dimension_numbers = #tpu.dot_dimension_numbers<[1], [0], [0], [1], [0, 0, 1, 1], [], []>} : vector<3x24xbf16>, vector<24x512xbf16>, vector<3x512xf32> -> vector<3x512xf32>
    %c0_128 = arith.constant 0 : index
    %c0_129 = arith.constant 0 : index
    %431 = vector.load %arg21[%c0_128, %c0_129] : memref<3x1xf32, #tpu.memory_space<vmem>>, vector<3x1xf32>
    %432 = vector.broadcast %431 : vector<3x1xf32> to vector<3x512xf32>
    %433 = arith.addf %430, %432 : vector<3x512xf32>
    %c0_130 = arith.constant 0 : index
    %c0_131 = arith.constant 0 : index
    %434 = vector.load %arg26[%c0_130, %c0_131] : memref<3x512xf32, #tpu.memory_space<vmem>>, vector<3x512xf32>
    tpu.vector_store %arg26[%c0_130, %c0_131], %433 {strides = array<i32>} : memref<3x512xf32, #tpu.memory_space<vmem>>, vector<3x512xf32>,
    return
  }
  func.func @transform_0(%arg0: i32) -> (i32, i32) {
    %c0_i32 = arith.constant 0 : i32
    %c0_i32_0 = arith.constant 0 : i32
    %c0_i32_1 = arith.constant 0 : i32
    return %c0_i32, %c0_i32_0 : i32, i32
  }
  func.func @transform_1(%arg0: i32) -> (i32, i32) {
    %c0_i32 = arith.constant 0 : i32
    %c0_i32_0 = arith.constant 0 : i32
    %c0_i32_1 = arith.constant 0 : i32
    return %c0_i32, %c0_i32_0 : i32, i32
  }
  func.func @transform_2(%arg0: i32) -> (i32, i32) {
    %c0_i32 = arith.constant 0 : i32
    %c0_i32_0 = arith.constant 0 : i32
    %c0_i32_1 = arith.constant 0 : i32
    return %c0_i32, %c0_i32_0 : i32, i32
  }
  func.func @transform_3(%arg0: i32) -> (i32, i32) {
    %c0_i32 = arith.constant 0 : i32
    %c0_i32_0 = arith.constant 0 : i32
    %c0_i32_1 = arith.constant 0 : i32
    return %c0_i32, %c0_i32_0 : i32, i32
  }
  func.func @transform_4(%arg0: i32) -> (i32, i32) {
    %c0_i32 = arith.constant 0 : i32
    %c0_i32_0 = arith.constant 0 : i32
    %c0_i32_1 = arith.constant 0 : i32
    return %c0_i32, %c0_i32_0 : i32, i32
  }
  func.func @transform_5(%arg0: i32) -> (i32, i32) {
    %c0_i32 = arith.constant 0 : i32
    %c0_i32_0 = arith.constant 0 : i32
    %c0_i32_1 = arith.constant 0 : i32
    return %c0_i32, %c0_i32_0 : i32, i32
  }
  func.func @transform_6(%arg0: i32) -> (i32, i32) {
    %c0_i32 = arith.constant 0 : i32
    %c0_i32_0 = arith.constant 0 : i32
    %c0_i32_1 = arith.constant 0 : i32
    return %c0_i32, %c0_i32_0 : i32, i32
  }
  func.func @transform_7(%arg0: i32) -> (i32, i32) {
    %c0_i32 = arith.constant 0 : i32
    %c0_i32_0 = arith.constant 0 : i32
    %c0_i32_1 = arith.constant 0 : i32
    return %c0_i32, %c0_i32_0 : i32, i32
  }
  func.func @transform_8(%arg0: i32) -> (i32, i32) {
    %c0_i32 = arith.constant 0 : i32
    %c0_i32_0 = arith.constant 0 : i32
    %c0_i32_1 = arith.constant 0 : i32
    return %c0_i32, %c0_i32_0 : i32, i32
  }
  func.func @transform_9(%arg0: i32) -> (i32, i32) {
    %c0_i32 = arith.constant 0 : i32
    %c0_i32_0 = arith.constant 0 : i32
    %c0_i32_1 = arith.constant 0 : i32
    return %c0_i32, %c0_i32_0 : i32, i32
  }
  func.func @transform_10(%arg0: i32) -> (i32, i32) {
    %c0_i32 = arith.constant 0 : i32
    %c0_i32_0 = arith.constant 0 : i32
    %c0_i32_1 = arith.constant 0 : i32
    return %c0_i32, %c0_i32_0 : i32, i32
  }
  func.func @transform_11(%arg0: i32) -> (i32, i32) {
    %c0_i32 = arith.constant 0 : i32
    %c0_i32_0 = arith.constant 0 : i32
    %c0_i32_1 = arith.constant 0 : i32
    return %c0_i32, %c0_i32_0 : i32, i32
  }
  func.func @transform_12(%arg0: i32) -> (i32, i32) {
    %c0_i32 = arith.constant 0 : i32
    %c0_i32_0 = arith.constant 0 : i32
    %c0_i32_1 = arith.constant 0 : i32
    return %c0_i32, %c0_i32_0 : i32, i32
  }
  func.func @transform_13(%arg0: i32) -> (i32, i32) {
    %c0_i32 = arith.constant 0 : i32
    %c0_i32_0 = arith.constant 0 : i32
    %c0_i32_1 = arith.constant 0 : i32
    return %c0_i32, %c0_i32_0 : i32, i32
  }
  func.func @transform_14(%arg0: i32) -> (i32, i32) {
    %c0_i32 = arith.constant 0 : i32
    %c0_i32_0 = arith.constant 0 : i32
    %c0_i32_1 = arith.constant 0 : i32
    return %c0_i32, %c0_i32_0 : i32, i32
  }
  func.func @transform_15(%arg0: i32) -> (i32, i32) {
    %c0_i32 = arith.constant 0 : i32
    %c0_i32_0 = arith.constant 0 : i32
    %c0_i32_1 = arith.constant 0 : i32
    return %c0_i32, %c0_i32_0 : i32, i32
  }
  func.func @transform_16(%arg0: i32) -> (i32, i32) {
    %c0_i32 = arith.constant 0 : i32
    %c0_i32_0 = arith.constant 0 : i32
    %c0_i32_1 = arith.constant 0 : i32
    return %c0_i32, %c0_i32_0 : i32, i32
  }
  func.func @transform_17(%arg0: i32) -> (i32, i32) {
    %c0_i32 = arith.constant 0 : i32
    %c0_i32_0 = arith.constant 0 : i32
    %c0_i32_1 = arith.constant 0 : i32
    return %c0_i32, %c0_i32_0 : i32, i32
  }
  func.func @transform_18(%arg0: i32) -> (i32, i32) {
    %c0_i32 = arith.constant 0 : i32
    %c0_i32_0 = arith.constant 0 : i32
    %c0_i32_1 = arith.constant 0 : i32
    return %c0_i32, %c0_i32_0 : i32, i32
  }
  func.func @transform_19(%arg0: i32) -> (i32, i32) {
    %c0_i32 = arith.constant 0 : i32
    %c0_i32_0 = arith.constant 0 : i32
    %c0_i32_1 = arith.constant 0 : i32
    return %c0_i32, %c0_i32_0 : i32, i32
  }
  func.func @transform_20(%arg0: i32) -> (i32, i32) {
    %c0_i32 = arith.constant 0 : i32
    %c0_i32_0 = arith.constant 0 : i32
    %c0_i32_1 = arith.constant 0 : i32
    return %c0_i32, %c0_i32_0 : i32, i32
  }
  func.func @transform_21(%arg0: i32) -> (i32, i32) {
    %c0_i32 = arith.constant 0 : i32
    %c0_i32_0 = arith.constant 0 : i32
    %c0_i32_1 = arith.constant 0 : i32
    return %c0_i32, %c0_i32_0 : i32, i32
  }
  func.func @transform_22(%arg0: i32) -> (i32, i32) {
    %c0_i32 = arith.constant 0 : i32
    %c0_i32_0 = arith.constant 0 : i32
    %c0_i32_1 = arith.constant 0 : i32
    return %c0_i32, %c0_i32_0 : i32, i32
  }
  func.func @transform_23(%arg0: i32) -> (i32, i32, i32) {
    %c0_i32 = arith.constant 0 : i32
    %c0_i32_0 = arith.constant 0 : i32
    %c0_i32_1 = arith.constant 0 : i32
    %c0_i32_2 = arith.constant 0 : i32
    return %c0_i32, %c0_i32_0, %c0_i32_1 : i32, i32, i32
  }
  func.func @transform_24(%arg0: i32) -> (i32, i32, i32) {
    %c0_i32 = arith.constant 0 : i32
    %c0_i32_0 = arith.constant 0 : i32
    %c0_i32_1 = arith.constant 0 : i32
    %c0_i32_2 = arith.constant 0 : i32
    return %c0_i32, %c0_i32_0, %c0_i32_1 : i32, i32, i32
  }
  func.func @transform_25(%arg0: i32) -> (i32, i32) {
    %c0_i32 = arith.constant 0 : i32
    %c0_i32_0 = arith.constant 0 : i32
    %c0_i32_1 = arith.constant 0 : i32
    return %c0_i32, %c0_i32_0 : i32, i32
  }
}

</mosaic_0001>

<bundles_post_ra>
// kernel: unet_small_forward.1
= control target key start
LH: loop header
LB: loop body
LE: loop exit
PB: predicated region body
PF: predicated region fallthrough
CT: control target
= control target key end

     0   :  { %s11816_s0 = inlined_call_operand.vmem [shape: f32[8,512], index: 0, kind: input, shape index: {}]   ;;  %s11817_s1 = inlined_call_operand.hbm [shape: bf16[24,72], index: 1, kind: input, shape index: {}]   ;;  %s11818_s2 = inlined_call_operand.vmem [shape: f32[24,1], index: 2, kind: input, shape index: {}]   ;;  %s11819_s3 = inlined_call_operand.vmem [shape: f32[24,1], index: 3, kind: input, shape index: {}]   ;;  %s11820_s4 = inlined_call_operand.hbm [shape: bf16[24,216], index: 4, kind: input, shape index: {}]   ;;  %s11821_s5 = inlined_call_operand.hbm [shape: f32[24,1], index: 5, kind: input, shape index: {}]   ;;  %s11822_s6 = inlined_call_operand.hbm [shape: f32[24,1], index: 6, kind: input, shape index: {}]   ;;  %s11823_s7 = inlined_call_operand.hbm [shape: bf16[24,216], index: 7, kind: input, shape index: {}]   ;;  %s11824_s8 = inlined_call_operand.hbm [shape: f32[24,1], index: 8, kind: input, shape index: {}]   ;;  %s11825_s9 = inlined_call_operand.hbm [shape: f32[24,1], index: 9, kind: input, shape index: {}]   ;;  %s11826_s10 = inlined_call_operand.vmem [shape: bf16[24,432], index: 10, kind: input, shape index: {}]   ;;  %s11827_s11 = inlined_call_operand.hbm [shape: f32[24,1], index: 11, kind: input, shape index: {}]   ;;  %s11828_s12 = inlined_call_operand.hbm [shape: f32[24,1], index: 12, kind: input, shape index: {}]   ;;  %s11829_s13 = inlined_call_operand.hbm [shape: bf16[24,216], index: 13, kind: input, shape index: {}]   ;;  %s11830_s14 = inlined_call_operand.hbm [shape: f32[24,1], index: 14, kind: input, shape index: {}]   ;;  %s11831_s15 = inlined_call_operand.hbm [shape: f32[24,1], index: 15, kind: input, shape index: {}]   ;;  %s11832_s16 = inlined_call_operand.hbm [shape: bf16[24,216], index: 16, kind: input, shape index: {}]   ;;  %s11833_s17 = inlined_call_operand.hbm [shape: f32[24,1], index: 17, kind: input, shape index: {}]   ;;  %s11834_s18 = inlined_call_operand.hbm [shape: f32[24,1], index: 18, kind: input, shape index: {}]   ;;  %s11835_s19 = inlined_call_operand.vmem [shape: bf16[3,24], index: 19, kind: input, shape index: {}]   ;;  %s11836_s20 = inlined_call_operand.hbm [shape: f32[3,1], index: 20, kind: input, shape index: {}]   ;;  %s11837_s21 = inlined_call_operand.vmem [shape: bf16[512,128], index: 21, kind: input, shape index: {}]   ;;  %s11838_s22 = inlined_call_operand.hbm [shape: bf16[128,512], index: 22, kind: input, shape index: {}]   ;;  %s11839_s23 = inlined_call_operand.vmem [shape: f32[9,1,512], index: 23, kind: input, shape index: {}]   ;;  %s11840_s24 = inlined_call_operand.hbm [shape: f32[9,1,128], index: 24, kind: input, shape index: {}]   ;;  %s11841_s25 = inlined_call_operand.vmem [shape: f32[3,512], index: 25, kind: output, shape index: {}]  }
   0x1   :  { %12188 = sst [smem:[#allocation216_spill]] %s11816_s0 }
   0x2   :  { %12189 = sst [smem:[#allocation217_spill]] %s11817_s1 }
   0x3   :  { %12190 = sst [smem:[#allocation218_spill]] %s11818_s2 }
   0x4   :  { %12191 = sst [smem:[#allocation219_spill]] %s11819_s3 }
   0x5   :  { %12192 = sst [smem:[#allocation220_spill]] %s11820_s4 }
   0x6   :  { %12193 = sst [smem:[#allocation221_spill]] %s11821_s5 }
   0x7   :  { %12194 = sst [smem:[#allocation222_spill]] %s11822_s6 }
   0x8   :  { %12195 = sst [smem:[#allocation223_spill]] %s11823_s7 }
   0x9   :  { %12196 = sst [smem:[#allocation224_spill]] %s11824_s8 }
   0xa   :  { %12197 = sst [smem:[#allocation225_spill]] %s11825_s9 }
   0xb   :  { %30 = vsyncpa [#allocation3], 0 }
   0xc   :  { %31 = vsyncpa [#allocation5], 0 }
   0xd   :  { %32 = vsyncpa [#allocation8], 0 }
   0xe   :  { %33 = vsyncpa [#allocation11], 0 }
   0xf   :  { %34 = vsyncpa [#allocation14], 0 }
  0x10   :  { %35 = vsyncpa [#allocation17], 0 }
  0x11   :  { %36 = vsyncpa [#allocation20], 0 }
  0x12   :  { %37 = vsyncpa [#allocation23], 0 }
  0x13   :  { %38 = vsyncpa [#allocation26], 0 }
  0x14   :  { %39 = vsyncpa [#allocation29], 0  ;;  %s6302_s29 = smov [#allocation4]  }
  0x15   :  { %s63_s2 = sshll.u32 %s6302_s29, 4  ;;  %s64_s2 = int_to_ptr.vmem [resolvable:$true] %s63_s2 }
  0x16   :  { %s5930_s6 = scalar_lea.vmem %s64_s2, 384  ;;  %p5935_p1 = scmp.lt.s32.totalorder %s64_s2, %s64_s2 }
  0x17   :  { %p5931_p0 = scmp.ne.s32.totalorder %s64_s2, %s5930_s6  ;;  %p5936_p2 = scmp.lt.s32.totalorder %s5930_s6, %s5930_s6 }
  0x19   :  { %p5937_p3 = por %p5936_p2, %p5935_p1 }
  0x1b   :  { %p5938_p4 = pnand %p5937_p3, %p5931_p0 }
  0x1d   :  { %5941 = shalt.err (!%p5938_p4)
}
  0x1e   :  { %s6303_s30 = smov 128   ;;  %s6304_s7 = smov 8  }
  0x1f   :  { %s12198_s1 = sld [smem:[#allocation220_spill]]  ;;  %s6305_s8 = smov [#allocation7]  }
  0x20   :  { %s87_s27 = sshll.u32 %s6305_s8, 4  ;;  %s6306_s4 = smov [#allocation10]   ;;  %s88_s27 = int_to_ptr.vmem [resolvable:$true] %s87_s27 }
  0x21   :  { %s111_s28 = sshll.u32 %s6306_s4, 4  ;;  %s5950_s9 = scalar_lea.vmem %s88_s27, 384  ;;  %s112_s28 = int_to_ptr.vmem [resolvable:$true] %s111_s28 }
  0x22   :  { %p5951_p5 = scmp.ne.s32.totalorder %s88_s27, %s5950_s9  ;;  %p5955_p6 = scmp.lt.s32.totalorder %s88_s27, %s88_s27 }
  0x23   :  { %p5956_p7 = scmp.lt.s32.totalorder %s5950_s9, %s5950_s9 }
  0x25   :  { %69 = dma.hbm_to_vmem [thread:$0]  %s12198_s1, 384, %s64_s2, [#allocation5], %s6303_s30, %s6303_s30, %s6304_s7  }
  0x26   :  { %p5957_p8 = por %p5956_p7, %p5955_p6 }
  0x28   :  { %p5958_p9 = pnand %p5957_p8, %p5951_p5 }
  0x2a   :  { %5961 = shalt.err (!%p5958_p9)
}
  0x2b   :  { %s12199_s29 = sld [smem:[#allocation222_spill]]  ;;  %s5970_s2 = scalar_lea.vmem %s112_s28, 384 }
  0x2c   :  { %p5971_p10 = scmp.ne.s32.totalorder %s112_s28, %s5970_s2  ;;  %p5975_p11 = scmp.lt.s32.totalorder %s112_s28, %s112_s28 }
  0x2d   :  { %p5976_p12 = scmp.lt.s32.totalorder %s5970_s2, %s5970_s2 }
  0x2f   :  { %p5977_p13 = por %p5976_p12, %p5975_p11 }
  0x31   :  { %93 = dma.hbm_to_vmem [thread:$0]  %s12199_s29, 384, %s88_s27, [#allocation8], %s6303_s30, %s6303_s30, %s6304_s7  }
  0x32   :  { %p5978_p0 = pnand %p5977_p13, %p5971_p10 }
  0x34   :  { %5981 = shalt.err (!%p5978_p0)
}
  0x35   :  { %s12200_s26 = sld [smem:[#allocation224_spill]]  ;;  %s6307_s1 = smov [#allocation13]  }
  0x36   :  { %s137_s8 = sshll.u32 %s6307_s1, 4  ;;  %s6308_s4 = smov [#allocation16]   ;;  %s138_s8 = int_to_ptr.vmem [resolvable:$true] %s137_s8 }
  0x37   :  { %s161_s27 = sshll.u32 %s6308_s4, 4  ;;  %s5990_s9 = scalar_lea.vmem %s138_s8, 384  ;;  %s162_s27 = int_to_ptr.vmem [resolvable:$true] %s161_s27 }
  0x38   :  { %p5991_p1 = scmp.ne.s32.totalorder %s138_s8, %s5990_s9  ;;  %p5995_p2 = scmp.lt.s32.totalorder %s138_s8, %s138_s8 }
  0x39   :  { %p5996_p3 = scmp.lt.s32.totalorder %s5990_s9, %s5990_s9 }
  0x3b   :  { %117 = dma.hbm_to_vmem [thread:$0]  %s12200_s26, 384, %s112_s28, [#allocation11], %s6303_s30, %s6303_s30, %s6304_s7  }
  0x3c   :  { %p5997_p4 = por %p5996_p3, %p5995_p2 }
  0x3e   :  { %p5998_p5 = pnand %p5997_p4, %p5991_p1 }
  0x40   :  { %6001 = shalt.err (!%p5998_p5)
}
  0x41   :  { %143 = dma.hbm_to_vmem [thread:$0]  %s11827_s11, 384, %s138_s8, [#allocation14], %s6303_s30, %s6303_s30, %s6304_s7  }
  0x42   :  { %s6010_s28 = scalar_lea.vmem %s162_s27, 384  ;;  %p6015_p7 = scmp.lt.s32.totalorder %s162_s27, %s162_s27 }
  0x43   :  { %p6011_p6 = scmp.ne.s32.totalorder %s162_s27, %s6010_s28  ;;  %p6016_p8 = scmp.lt.s32.totalorder %s6010_s28, %s6010_s28 }
  0x45   :  { %p6017_p9 = por %p6016_p8, %p6015_p7 }
  0x47   :  { %p6018_p10 = pnand %p6017_p9, %p6011_p6 }
  0x49   :  { %6021 = shalt.err (!%p6018_p10)
}
  0x4a   :  { %167 = dma.hbm_to_vmem [thread:$0]  %s11829_s13, 384, %s162_s27, [#allocation17], %s6303_s30, %s6303_s30, %s6304_s7  }
  0x4b   :  { %s6309_s6 = smov [#allocation19]   ;;  %s6310_s26 = smov [#allocation22]  }
  0x4c   :  { %s185_s3 = sshll.u32 %s6309_s6, 4  ;;  %s209_s11 = sshll.u32 %s6310_s26, 4  ;;  %s186_s3 = int_to_ptr.vmem [resolvable:$true] %s185_s3  ;;  %s210_s11 = int_to_ptr.vmem [resolvable:$true] %s209_s11 }
  0x4d   :  { %s6030_s1 = scalar_lea.vmem %s186_s3, 384  ;;  %p6035_p12 = scmp.lt.s32.totalorder %s186_s3, %s186_s3 }
  0x4e   :  { %p6031_p11 = scmp.ne.s32.totalorder %s186_s3, %s6030_s1  ;;  %p6036_p13 = scmp.lt.s32.totalorder %s6030_s1, %s6030_s1 }
  0x50   :  { %p6037_p0 = por %p6036_p13, %p6035_p12 }
  0x52   :  { %p6038_p1 = pnand %p6037_p0, %p6031_p11 }
  0x54   :  { %6041 = shalt.err (!%p6038_p1)
}
  0x55   :  { %191 = dma.hbm_to_vmem [thread:$0]  %s11831_s15, 384, %s186_s3, [#allocation20], %s6303_s30, %s6303_s30, %s6304_s7  }
  0x56   :  { %s6050_s13 = scalar_lea.vmem %s210_s11, 384  ;;  %p6055_p3 = scmp.lt.s32.totalorder %s210_s11, %s210_s11 }
  0x57   :  { %p6051_p2 = scmp.ne.s32.totalorder %s210_s11, %s6050_s13  ;;  %p6056_p4 = scmp.lt.s32.totalorder %s6050_s13, %s6050_s13 }
  0x59   :  { %p6057_p5 = por %p6056_p4, %p6055_p3 }
  0x5b   :  { %p6058_p6 = pnand %p6057_p5, %p6051_p2 }
  0x5d   :  { %6061 = shalt.err (!%p6058_p6)
}
  0x5e   :  { %215 = dma.hbm_to_vmem [thread:$0]  %s11833_s17, 384, %s210_s11, [#allocation23], %s6303_s30, %s6303_s30, %s6304_s7  }
  0x5f   :  { %s6311_s5 = smov [#allocation25]   ;;  %s6312_s28 = smov [#allocation2]  }
  0x60   :  { %s236_s0 = sshll.u32 %s6311_s5, 4  ;;  %s47_s15 = sshll.u32 %s6312_s28, 4  ;;  %s237_s0 = int_to_ptr.vmem [resolvable:$true] %s236_s0  ;;  %s48_s15 = int_to_ptr.vmem [resolvable:$true] %s47_s15 }
  0x61   :  { %s6070_s29 = scalar_lea.vmem %s237_s0, 64  ;;  %p6075_p8 = scmp.lt.s32.totalorder %s237_s0, %s237_s0 }
  0x62   :  { %p6071_p7 = scmp.ne.s32.totalorder %s237_s0, %s6070_s29  ;;  %p6076_p9 = scmp.lt.s32.totalorder %s6070_s29, %s6070_s29 }
  0x64   :  { %p6077_p10 = por %p6076_p9, %p6075_p8 }
  0x66   :  { %p6078_p11 = pnand %p6077_p10, %p6071_p7 }
  0x68   :  { %6081 = shalt.err (!%p6078_p11)
}
  0x69   :  { %239 = dma.hbm_to_vmem [thread:$0]  %s11836_s20, 64, %s237_s0, [#allocation26]  }
  0x6a   :  { %s6090_s3 = scalar_lea.vmem %s48_s15, 192  ;;  %p6095_p13 = scmp.lt.s32.totalorder %s48_s15, %s48_s15 }
  0x6b   :  { %p6091_p12 = scmp.ne.s32.totalorder %s48_s15, %s6090_s3  ;;  %p6096_p0 = scmp.lt.s32.totalorder %s6090_s3, %s6090_s3 }
  0x6d   :  { %p6097_p1 = por %p6096_p0, %p6095_p13 }
  0x6f   :  { %p6098_p2 = pnand %p6097_p1, %p6091_p12 }
  0x71   :  { %6101 = shalt.err (!%p6098_p2)
}
  0x72   :  { %s6313_s17 = smov 64   ;;  %s6314_s26 = smov 4  }
  0x73   :  { %s12201_s8 = sld [smem:[#allocation217_spill]]  ;;  %s6315_s4 = smov [#allocation6]  }
  0x74   :  { %s75_s13 = sshll.u32 %s6315_s4, 4  ;;  %s6316_s27 = smov [#allocation9]   ;;  %s76_s13 = int_to_ptr.vmem [resolvable:$true] %s75_s13 }
  0x75   :  { %s99_s9 = sshll.u32 %s6316_s27, 4  ;;  %s6110_s20 = scalar_lea.vmem %s76_s13, 384  ;;  %s100_s9 = int_to_ptr.vmem [resolvable:$true] %s99_s9 }
  0x76   :  { %p6111_p3 = scmp.ne.s32.totalorder %s76_s13, %s6110_s20  ;;  %p6115_p4 = scmp.lt.s32.totalorder %s76_s13, %s76_s13 }
  0x77   :  { %p6116_p5 = scmp.lt.s32.totalorder %s6110_s20, %s6110_s20 }
  0x79   :  { %53 = dma.hbm_to_vmem [thread:$0]  %s12201_s8, 192, %s48_s15, [#allocation3], %s6313_s17, %s6313_s17, %s6314_s26  }
  0x7a   :  { %p6117_p6 = por %p6116_p5, %p6115_p4 }
  0x7c   :  { %p6118_p7 = pnand %p6117_p6, %p6111_p3 }
  0x7e   :  { %6121 = shalt.err (!%p6118_p7)
}
  0x7f   :  { %s12202_s28 = sld [smem:[#allocation221_spill]]  ;;  %s6130_s15 = scalar_lea.vmem %s100_s9, 384 }
  0x80   :  { %p6131_p8 = scmp.ne.s32.totalorder %s100_s9, %s6130_s15  ;;  %p6135_p9 = scmp.lt.s32.totalorder %s100_s9, %s100_s9 }
  0x81   :  { %p6136_p10 = scmp.lt.s32.totalorder %s6130_s15, %s6130_s15 }
  0x83   :  { %p6137_p11 = por %p6136_p10, %p6135_p9 }
  0x85   :  { %81 = dma.hbm_to_vmem [thread:$0]  %s12202_s28, 384, %s76_s13, [#allocation5], %s6303_s30, %s6303_s30, %s6304_s7  }
  0x86   :  { %p6138_p12 = pnand %p6137_p11, %p6131_p8 }
  0x88   :  { %6141 = shalt.err (!%p6138_p12)
}
  0x89   :  { %s12203_s6 = sld [smem:[#allocation223_spill]]  ;;  %s6317_s3 = smov [#allocation12]  }
  0x8a   :  { %s123_s17 = sshll.u32 %s6317_s3, 4  ;;  %s6318_s26 = smov [#allocation15]   ;;  %s124_s17 = int_to_ptr.vmem [resolvable:$true] %s123_s17 }
  0x8b   :  { %s149_s11 = sshll.u32 %s6318_s26, 4  ;;  %s6150_s1 = scalar_lea.vmem %s124_s17, 384  ;;  %s150_s11 = int_to_ptr.vmem [resolvable:$true] %s149_s11 }
  0x8c   :  { %p6151_p13 = scmp.ne.s32.totalorder %s124_s17, %s6150_s1  ;;  %p6155_p0 = scmp.lt.s32.totalorder %s124_s17, %s124_s17 }
  0x8d   :  { %p6156_p1 = scmp.lt.s32.totalorder %s6150_s1, %s6150_s1 }
  0x8f   :  { %105 = dma.hbm_to_vmem [thread:$0]  %s12203_s6, 384, %s100_s9, [#allocation8], %s6303_s30, %s6303_s30, %s6304_s7  }
  0x90   :  { %p6157_p2 = por %p6156_p1, %p6155_p0 }
  0x92   :  { %p6158_p3 = pnand %p6157_p2, %p6151_p13 }
  0x94   :  { %6161 = shalt.err (!%p6158_p3)
}
  0x95   :  { %s12204_s13 = sld [smem:[#allocation225_spill]]  ;;  %s6170_s27 = scalar_lea.vmem %s150_s11, 384 }
  0x96   :  { %p6171_p4 = scmp.ne.s32.totalorder %s150_s11, %s6170_s27  ;;  %p6175_p5 = scmp.lt.s32.totalorder %s150_s11, %s150_s11 }
  0x97   :  { %p6176_p6 = scmp.lt.s32.totalorder %s6170_s27, %s6170_s27 }
  0x99   :  { %p6177_p7 = por %p6176_p6, %p6175_p5 }
  0x9b   :  { %129 = dma.hbm_to_vmem [thread:$0]  %s12204_s13, 384, %s124_s17, [#allocation11], %s6303_s30, %s6303_s30, %s6304_s7  }
  0x9c   :  { %p6178_p8 = pnand %p6177_p7, %p6171_p4 }
  0x9e   :  { %6181 = shalt.err (!%p6178_p8)
}
  0x9f   :  { %155 = dma.hbm_to_vmem [thread:$0]  %s11828_s12, 384, %s150_s11, [#allocation14], %s6303_s30, %s6303_s30, %s6304_s7  }
  0xa0   :  { %s6319_s5 = smov [#allocation18]   ;;  %s6320_s28 = smov [#allocation21]  }
  0xa1   :  { %s173_s0 = sshll.u32 %s6319_s5, 4  ;;  %s197_s15 = sshll.u32 %s6320_s28, 4  ;;  %s174_s0 = int_to_ptr.vmem [resolvable:$true] %s173_s0  ;;  %s198_s15 = int_to_ptr.vmem [resolvable:$true] %s197_s15 }
  0xa2   :  { %s6190_s29 = scalar_lea.vmem %s174_s0, 384  ;;  %p6195_p10 = scmp.lt.s32.totalorder %s174_s0, %s174_s0 }
  0xa3   :  { %p6191_p9 = scmp.ne.s32.totalorder %s174_s0, %s6190_s29  ;;  %p6196_p11 = scmp.lt.s32.totalorder %s6190_s29, %s6190_s29 }
  0xa5   :  { %p6197_p12 = por %p6196_p11, %p6195_p10 }
  0xa7   :  { %p6198_p13 = pnand %p6197_p12, %p6191_p9 }
  0xa9   :  { %6201 = shalt.err (!%p6198_p13)
}
  0xaa   :  { %179 = dma.hbm_to_vmem [thread:$0]  %s11830_s14, 384, %s174_s0, [#allocation17], %s6303_s30, %s6303_s30, %s6304_s7  }
  0xab   :  { %s6210_s12 = scalar_lea.vmem %s198_s15, 384  ;;  %p6215_p1 = scmp.lt.s32.totalorder %s198_s15, %s198_s15 }
  0xac   :  { %p6211_p0 = scmp.ne.s32.totalorder %s198_s15, %s6210_s12  ;;  %p6216_p2 = scmp.lt.s32.totalorder %s6210_s12, %s6210_s12 }
  0xae   :  { %p6217_p3 = por %p6216_p2, %p6215_p1 }
  0xb0   :  { %p6218_p4 = pnand %p6217_p3, %p6211_p0 }
  0xb2   :  { %6221 = shalt.err (!%p6218_p4)
}
  0xb3   :  { %203 = dma.hbm_to_vmem [thread:$0]  %s11832_s16, 384, %s198_s15, [#allocation20], %s6303_s30, %s6303_s30, %s6304_s7  }
  0xb4   :  { %s6321_s26 = smov [#allocation24]   ;;  %s6322_s1 = smov [#allocation27]  }
  0xb5   :  { %s221_s11 = sshll.u32 %s6321_s26, 4  ;;  %s247_s14 = sshll.u32 %s6322_s1, 4  ;;  %s222_s11 = int_to_ptr.vmem [resolvable:$true] %s221_s11  ;;  %s248_s14 = int_to_ptr.vmem [resolvable:$true] %s247_s14 }
  0xb6   :  { %s6230_s8 = scalar_lea.vmem %s222_s11, 384  ;;  %p6235_p6 = scmp.lt.s32.totalorder %s222_s11, %s222_s11 }
  0xb7   :  { %p6231_p5 = scmp.ne.s32.totalorder %s222_s11, %s6230_s8  ;;  %p6236_p7 = scmp.lt.s32.totalorder %s6230_s8, %s6230_s8 }
  0xb9   :  { %p6237_p8 = por %p6236_p7, %p6235_p6 }
  0xbb   :  { %p6238_p9 = pnand %p6237_p8, %p6231_p5 }
  0xbd   :  { %6241 = shalt.err (!%p6238_p9)
}
  0xbe   :  { %227 = dma.hbm_to_vmem [thread:$0]  %s11834_s18, 384, %s222_s11, [#allocation23], %s6303_s30, %s6303_s30, %s6304_s7  }
  0xbf   :  { %s6250_s16 = scalar_lea.vmem %s248_s14, 4096  ;;  %p6255_p11 = scmp.lt.s32.totalorder %s248_s14, %s248_s14 }
  0xc0   :  { %p6251_p10 = scmp.ne.s32.totalorder %s248_s14, %s6250_s16  ;;  %p6256_p12 = scmp.lt.s32.totalorder %s6250_s16, %s6250_s16 }
  0xc2   :  { %p6257_p13 = por %p6256_p12, %p6255_p11 }
  0xc4   :  { %p6258_p0 = pnand %p6257_p13, %p6251_p10 }
  0xc6   :  { %6261 = shalt.err (!%p6258_p0)
}
  0xc7   :  { %s6323_s27 = smov 256   ;;  %s6324_s9 = smov 16  }
  0xc8   :  { %253 = dma.hbm_to_vmem [thread:$0]  %s11838_s22, 4096, %s248_s14, [#allocation26], %s6323_s27, %s6323_s27, %s6324_s9  }
  0xc9   :  { %s6325_s0 = smov [#allocation28]  }
  0xca   :  { %s261_s28 = sshll.u32 %s6325_s0, 4  ;;  %s262_s28 = int_to_ptr.vmem [resolvable:$true] %s261_s28 }
  0xcb   :  { %s6270_s15 = scalar_lea.vmem %s262_s28, 144  ;;  %s6274_s18 = scalar_lea.vmem %s262_s28, 160 }
  0xcc   :  { %p6271_p1 = scmp.ne.s32.totalorder %s262_s28, %s6270_s15  ;;  %p6275_p2 = scmp.lt.s32.totalorder %s262_s28, %s262_s28 }
  0xcd   :  { %p6276_p3 = scmp.lt.s32.totalorder %s6274_s18, %s6270_s15 }
  0xcf   :  { %p6277_p4 = por %p6276_p3, %p6275_p2 }
  0xd1   :  { %p6278_p5 = pnand %p6277_p4, %p6271_p1 }
  0xd3   :  { %6281 = shalt.err (!%p6278_p5)
}
  0xd4   :  { %s6326_s30 = smov 1  }
  0xd5   :  { %267 = dma.hbm_to_vmem [thread:$0]  %s11840_s24, 144, %s262_s28, [#allocation29], %s6324_s9, %s6324_s9, %s6326_s30  }
  0xd6   :  { %6282 = dma.done.wait [#allocation3], 192  }
  0xd7   :  { %6283 = vsyncadd [#allocation3], 4294967104 }
  0xd8   :  { %6284 = dma.done.wait [#allocation5], 768  }
  0xd9   :  { %6285 = vsyncadd [#allocation5], 4294966528 }
  0xda   :  { %6286 = dma.done.wait [#allocation8], 768  }
  0xdb   :  { %6287 = vsyncadd [#allocation8], 4294966528 }
  0xdc   :  { %6288 = dma.done.wait [#allocation11], 768  }
  0xdd   :  { %6289 = vsyncadd [#allocation11], 4294966528 }
  0xde   :  { %6290 = dma.done.wait [#allocation14], 768  }
  0xdf   :  { %6291 = vsyncadd [#allocation14], 4294966528 }
  0xe0   :  { %6292 = dma.done.wait [#allocation17], 768  }
  0xe1   :  { %6293 = vsyncadd [#allocation17], 4294966528 }
  0xe2   :  { %6294 = dma.done.wait [#allocation20], 768  }
  0xe3   :  { %6295 = vsyncadd [#allocation20], 4294966528 }
  0xe4   :  { %6296 = dma.done.wait [#allocation23], 768  }
  0xe5   :  { %6297 = vsyncadd [#allocation23], 4294966528 }
  0xe6   :  { %6298 = dma.done.wait [#allocation26], 4160  }
  0xe7   :  { %6299 = vsyncadd [#allocation26], 4294963136 }
  0xe8   :  { %6300 = dma.done.wait [#allocation29], 144  }
  0xe9   :  { %6301 = vsyncadd [#allocation29], 4294967152  ;;  %s12205_s6 = sld [smem:[#allocation216_spill]]  ;;  %s6327_s17 = smov 111   ;;  %v11845_v4 = vmov 0   ;;  %v351_v5 = vlaneseq  ;;  %vm687_vm1 = vcmask 1043456  }
  0xea   :  { %s6328_s1 = smov 113   ;;  %s6329_s4 = smov 112   ;;  %732 = vmatprep.mubr.bf16.mxu0 %v11845_v4  ;;  %783 = vmatprep.mubr.bf16.mxu1 %v11845_v4  ;;  %v330_v10 = vld [vmem:[%s11839_s23 + $0x20] sm:$0xf]  ;;  %v328_v19 = vld [vmem:[%s11839_s23 + $0x18] sm:$0xf] }
  0xeb   :  { %s6330_s13 = smov 127   ;;  %s6331_s16 = smov 15   ;;  %5741 = vset.pattern.permute.xlu1 %v11845_v4  ;;  %5742 = vset.pattern.permute.xlu0 %v11845_v4  ;;  %v360_v6 = vshrl.u32 %v351_v5, 7  ;;  %v6657_v7 = vand.u32 127, %v351_v5  ;;  %v329_v24 = vld [vmem:[%s11839_s23 + $0x1c] sm:$0xf] }
  0xec   :  { %s6332_s27 = smov 17   ;;  %v327_v46 = vld [vmem:[%s11839_s23 + $0x14] sm:$0xf]  ;;  %vm680_vm9 = vcmask 588800   ;;  %s12238_s20 = sld [smem:[#allocation218_spill]]  ;;  %vm1401_vm10 = vcmask 719872  }
  0xed   :  { %v6659_v8 = vsub.s32 1, %v360_v6  ;;  %v6661_v9 = vsub.s32 0, %v360_v6  ;;  %vm619_vm0 = vcmp.lt.s32.totalorder %v6657_v7, 111  ;;  %v6682_v22 = vsub.s32 3, %v360_v6  ;;  %s12239_s18 = sld [smem:[#allocation219_spill]]  ;;  %s6335_s15 = smov 9  }
  0xee   :  { %v6684_v23 = vsub.s32 2, %v360_v6  ;;  %vm543_vm2 = vcmp.lt.s32.totalorder %v6657_v7, 113  ;;  %vm581_vm3 = vcmp.lt.s32.totalorder %v6657_v7, 112  ;;  %vm505_vm4 = vcmp.lt.s32.totalorder %v6657_v7, 127  ;;  %s6337_s29 = smov 120   ;;  %s6338_s2 = smov 121  }
  0xef   :  { %v6572_v0 = vld [vmem:[%s12205_s6 + $0x10] sm:$0xff]  ;;  %v6577_v1 = vld [vmem:[%s12205_s6] sm:$0xff]  ;;  %v6586_v2 = vld [vmem:[%s12205_s6 + $0x8] sm:$0xff]  ;;  %v6668_v13 = vrot.slane %v330_v10, %v6659_v8  ;;  %v6671_v14 = vrot.slane %v330_v10, %v6661_v9  ;;  %v6691_v29 = vrot.slane %v328_v19, %v6659_v8  ;;  %v6697_v31 = vrot.slane %v329_v24, %v6659_v8 }
  0xf0   :  { %615 = vrot.lane.b32.xlu1 %v6572_v0, %s6327_s17  ;;  %611 = vrot.lane.b32.xlu0 %v6577_v1, %s6327_s17  ;;  %v6595_v3 = vld [vmem:[%s12205_s6 + $0x18] sm:$0xff]  ;;  %v6700_v32 = vrot.slane %v330_v10, %v6682_v22  ;;  %v6703_v33 = vrot.slane %v330_v10, %v6684_v23  ;;  %v6708_v37 = vrot.slane %v329_v24, %v6661_v9  ;;  %vm429_vm5 = vcmp.lt.s32.totalorder %v6657_v7, 15 }
  0xf1   :  { %12206 = vst [vmem:[#allocation40_spill] sm:$0xff] %v6668_v13  ;;  %12207 = vst [vmem:[#allocation41_spill] sm:$0xff] %v6671_v14  ;;  %v6715_v40 = vrot.slane %v328_v19, %v6661_v9  ;;  %v6736_v57 = vrot.slane %v327_v46, %v6659_v8  ;;  %v6741_v62 = vrot.slane %v329_v24, %v6684_v23  ;;  %vm467_vm6 = vcmp.lt.s32.totalorder %v6657_v7, 1 }
  0xf2   :  { %12208 = vst [vmem:[#allocation42_spill] sm:$0xff] %v6691_v29  ;;  %12209 = vst [vmem:[#allocation43_spill] sm:$0xff] %v6697_v31  ;;  %v6745_v5 = vrot.slane %v329_v24, %v6682_v22  ;;  %v6748_v6 = vrot.slane %v328_v19, %v6684_v23  ;;  %v6751_v10 = vrot.slane %v328_v19, %v6682_v22  ;;  %vm353_vm7 = vcmp.lt.s32.totalorder %v6657_v7, 17 }
  0xf3   :  { %12210 = vst [vmem:[#allocation44_spill] sm:$0xff] %v6700_v32  ;;  %12211 = vst [vmem:[#allocation45_spill] sm:$0xff] %v6703_v33  ;;  %vm391_vm8 = vcmp.lt.s32.totalorder %v6657_v7, 16  ;;  %vm3589_vm11 = vcmask 392192   ;;  %v12858_v7 = vmov 0   ;;  %vm5394_vm12 = vcmask 195584  }
  0xf4   :  { %537 = vrot.lane.b32.xlu1 %v6586_v2, %s6328_s1  ;;  %613 = vrot.lane.b32.xlu0 %v6586_v2, %s6327_s17  ;;  %12212 = vst [vmem:[#allocation46_spill] sm:$0xff] %v6708_v37  ;;  %12213 = vst [vmem:[#allocation47_spill] sm:$0xff] %v6715_v40 }
  0xf5   :  { %12214 = vst [vmem:[#allocation48_spill] sm:$0xff] %v6736_v57  ;;  %12215 = vst [vmem:[#allocation49_spill] sm:$0xff] %v6741_v62 }
  0xf6   :  { %12216 = vst [vmem:[#allocation50_spill] sm:$0xff] %v6745_v5  ;;  %12217 = vst [vmem:[#allocation51_spill] sm:$0xff] %v6748_v6 }
  0xf7   :  { %12218 = vst [vmem:[#allocation52_spill] sm:$0xff] %v6751_v10 }
  0xf8   :  { %575 = vrot.lane.b32.xlu1 %v6586_v2, %s6329_s4  ;;  %539 = vrot.lane.b32.xlu0 %v6572_v0, %s6328_s1 }
  0xfc   :  { %617 = vrot.lane.b32.xlu1 %v6595_v3, %s6327_s17  ;;  %577 = vrot.lane.b32.xlu0 %v6572_v0, %s6329_s4 }
 0x100   :  { %573 = vrot.lane.b32.xlu1 %v6577_v1, %s6329_s4  ;;  %535 = vrot.lane.b32.xlu0 %v6577_v1, %s6328_s1 }
 0x104   :  { %501 = vrot.lane.b32.xlu1 %v6572_v0, %s6330_s13  ;;  %499 = vrot.lane.b32.xlu0 %v6586_v2, %s6330_s13 }
 0x108   :  { %579 = vrot.lane.b32.xlu1 %v6595_v3, %s6329_s4  ;;  %541 = vrot.lane.b32.xlu0 %v6595_v3, %s6328_s1 }
 0x10c   :  { %421 = vrot.lane.b32.xlu1 %v6577_v1, %s6331_s16  ;;  %497 = vrot.lane.b32.xlu0 %v6577_v1, %s6330_s13 }
 0x110   :  { %459 = vrot.lane.b32.xlu1 %v6577_v1, %s6326_s30  ;;  %423 = vrot.lane.b32.xlu0 %v6586_v2, %s6331_s16 }
 0x114   :  { %503 = vrot.lane.b32.xlu1 %v6595_v3, %s6330_s13  ;;  %461 = vrot.lane.b32.xlu0 %v6586_v2, %s6326_s30 }
 0x118   :  { %465 = vrot.lane.b32.xlu1 %v6595_v3, %s6326_s30  ;;  %427 = vrot.lane.b32.xlu0 %v6595_v3, %s6331_s16 }
 0x11c   :  { %345 = vrot.lane.b32.xlu1 %v6586_v2, %s6332_s27  ;;  %343 = vrot.lane.b32.xlu0 %v6577_v1, %s6332_s27 }
 0x120   :  { %385 = vrot.lane.b32.xlu1 %v6586_v2, %s6324_s9  ;;  %383 = vrot.lane.b32.xlu0 %v6577_v1, %s6324_s9 }
 0x124   :  { %463 = vrot.lane.b32.xlu1 %v6572_v0, %s6326_s30  ;;  %425 = vrot.lane.b32.xlu0 %v6572_v0, %s6331_s16 }
 0x128   :  { %389 = vrot.lane.b32.xlu1 %v6595_v3, %s6324_s9  ;;  %349 = vrot.lane.b32.xlu0 %v6595_v3, %s6332_s27 }
 0x12c   :  { %387 = vrot.lane.b32.xlu1 %v6572_v0, %s6324_s9  ;;  %347 = vrot.lane.b32.xlu0 %v6572_v0, %s6332_s27 }
 0x162   :  { %v616_v11 = vpop.permute.xlu1 %615  ;;  %v612_v12 = vpop.permute.xlu0 %611 }
 0x166   :  { %v538_v15 = vpop.permute.xlu1 %537  ;;  %v614_v16 = vpop.permute.xlu0 %613 }
 0x167   :  { %v622_v17 = vsel %vm619_vm0, %v612_v12, %v614_v16  ;;  %v621_v18 = vsel %vm619_vm0, %v614_v16, %v616_v11  ;;  %v6755_v16 = vrot.slane %v327_v46, %v6661_v9 }
 0x168   :  { %v646_v20 = vmul.f32 %v6668_v13, %v621_v18  ;;  %v645_v21 = vmul.f32 %v6671_v14, %v622_v17 }
 0x169   :  { %12219 = vst [vmem:[#allocation53_spill] sm:$0xff] %v6755_v16 }
 0x16a   :  { %v576_v25 = vpop.permute.xlu1 %575  ;;  %v540_v26 = vpop.permute.xlu0 %539  ;;  %v666_v27 = vpack.c.bf16 %v646_v20, %v646_v20  ;;  %v665_v28 = vpack.c.bf16 %v645_v21, %v645_v21 }
 0x16b   :  { %v545_v34 = vsel %vm543_vm2, %v538_v15, %v540_v26 }
 0x16c   :  { %5518 = vmatprep.subr.msk.bf16.mxu0 %vm687_vm1, %v666_v27  ;;  %v689_v30 = vsel %vm687_vm1, %v665_v28, 0  ;;  %v570_v42 = vmul.f32 %v6691_v29, %v545_v34 }
 0x16d   :  { %707 = vmatpush1.bf16.msra.mxu0 %v689_v30 }
 0x16e   :  { %v618_v35 = vpop.permute.xlu1 %617  ;;  %v578_v36 = vpop.permute.xlu0 %577 }
 0x16f   :  { %v620_v38 = vsel %vm619_vm0, %v616_v11, %v618_v35  ;;  %v583_v39 = vsel %vm581_vm3, %v576_v25, %v578_v36  ;;  %v623_v41 = vsel %vm619_vm0, %v618_v35, %v612_v12 }
 0x170   :  { %v608_v43 = vmul.f32 %v6697_v31, %v583_v39  ;;  %v648_v44 = vmul.f32 %v6700_v32, %v623_v41  ;;  %v647_v45 = vmul.f32 %v6703_v33, %v620_v38  ;;  %v326_v38 = vld [vmem:[%s11839_s23 + $0xc] sm:$0xf] }
 0x172   :  { %v574_v47 = vpop.permute.xlu1 %573  ;;  %v536_v48 = vpop.permute.xlu0 %535  ;;  %v662_v49 = vpack.c.bf16 %v608_v43, %v570_v42  ;;  %v668_v50 = vpack.c.bf16 %v648_v44, %v648_v44  ;;  %v667_v51 = vpack.c.bf16 %v647_v45, %v647_v45  ;;  %v6785_v44 = vrot.slane %v327_v46, %v6684_v23 }
 0x173   :  { %v584_v52 = vsel %vm581_vm3, %v574_v47, %v576_v25  ;;  %v546_v53 = vsel %vm543_vm2, %v536_v48, %v538_v15  ;;  %v6788_v45 = vrot.slane %v327_v46, %v6682_v22 }
 0x174   :  { %v607_v54 = vmul.f32 %v6708_v37, %v584_v52  ;;  %v569_v55 = vmul.f32 %v6715_v40, %v546_v53  ;;  %708 = vmatprep.subr.bf16.mxu0 %v662_v49  ;;  %5521 = vmatprep.subr.msk.bf16.mxu1 %vm687_vm1, %v668_v50  ;;  %v695_v56 = vsel %vm687_vm1, %v667_v51, 0  ;;  %12221 = vst [vmem:[#allocation55_spill] sm:$0xff] %v6785_v44 }
 0x175   :  { %758 = vmatpush1.bf16.msra.mxu1 %v695_v56  ;;  %12222 = vst [vmem:[#allocation56_spill] sm:$0xff] %v6788_v45  ;;  %v6796_v50 = vrot.slane %v326_v38, %v6661_v9 }
 0x176   :  { %v502_v58 = vpop.permute.xlu1 %501  ;;  %v500_v59 = vpop.permute.xlu0 %499  ;;  %v661_v60 = vpack.c.bf16 %v607_v54, %v569_v55 }
 0x177   :  { %v507_v61 = vsel %vm505_vm4, %v500_v59, %v502_v58  ;;  %12224 = vst [vmem:[#allocation58_spill] sm:$0xff] %v6796_v50 }
 0x178   :  { %v532_v63 = vmul.f32 %v6736_v57, %v507_v61  ;;  %709 = vmatpush1.bf16.msra.mxu0 %v661_v60 }
 0x17a   :  { %v580_v11 = vpop.permute.xlu1 %579  ;;  %v542_v12 = vpop.permute.xlu0 %541  ;;  %v658_v15 = vpack.c.bf16 %v532_v63, %v6586_v2 }
 0x17b   :  { %v582_v17 = vsel %vm581_vm3, %v578_v36, %v580_v11  ;;  %v585_v18 = vsel %vm581_vm3, %v580_v11, %v574_v47  ;;  %v544_v20 = vsel %vm543_vm2, %v540_v26, %v542_v12  ;;  %v547_v19 = vsel %vm543_vm2, %v542_v12, %v536_v48  ;;  %v325_v36 = vld [vmem:[%s11839_s23 + $0x8] sm:$0xf] }
 0x17c   :  { %v609_v21 = vmul.f32 %v6741_v62, %v582_v17  ;;  %v610_v24 = vmul.f32 %v6745_v5, %v585_v18  ;;  %v571_v2 = vmul.f32 %v6748_v6, %v544_v20  ;;  %v572_v25 = vmul.f32 %v6751_v10, %v547_v19  ;;  %710 = vmatprep.subr.bf16.mxu0 %v658_v15  ;;  %v323_v20 = vld [vmem:[%s11839_s23] sm:$0xf]  ;;  %v5777_v62 = vld [vmem:[#allocation4 + $0x4] ss:$8 sps:$4 sm:$0xff]  }
 0x17d   :  { %v6782_v43 = vrot.slane %v325_v36, %v6659_v8  ;;  %v6791_v47 = vrot.slane %v326_v38, %v6659_v8  ;;  %v6805_v53 = vrot.slane %v325_v36, %v6661_v9 }
 0x17e   :  { %v422_v27 = vpop.permute.xlu1 %421  ;;  %v498_v28 = vpop.permute.xlu0 %497  ;;  %v664_v30 = vpack.c.bf16 %v610_v24, %v572_v25  ;;  %v663_v34 = vpack.c.bf16 %v609_v21, %v571_v2  ;;  %v6828_v24 = vrot.slane %v323_v20, %v6659_v8 }
 0x17f   :  { %v508_v35 = vsel %vm505_vm4, %v498_v28, %v500_v59  ;;  %12220 = vst [vmem:[#allocation54_spill] sm:$0xff] %v6782_v43  ;;  %12223 = vst [vmem:[#allocation57_spill] sm:$0xff] %v6791_v47 }
 0x180   :  { %v531_v26 = vmul.f32 %v6755_v16, %v508_v35  ;;  %759 = vmatprep.subr.bf16.mxu1 %v664_v30  ;;  %12225 = vst [vmem:[#allocation59_spill] sm:$0xff] %v6805_v53  ;;  %12226 = vst [vmem:[#allocation60_spill] sm:$0xff] %v6828_v24  ;;  %v6841_v35 = vrot.slane %v326_v38, %v6682_v22 }
 0x181   :  { %760 = vmatpush1.bf16.msra.mxu1 %v663_v34  ;;  %v6838_v34 = vrot.slane %v326_v38, %v6684_v23 }
 0x182   :  { %v460_v39 = vpop.permute.xlu1 %459  ;;  %v424_v41 = vpop.permute.xlu0 %423  ;;  %v657_v42 = vpack.c.bf16 %v531_v26, %v6577_v1  ;;  %12229 = vst [vmem:[#allocation63_spill] sm:$0xff] %v6841_v35 }
 0x183   :  { %v432_v48 = vsel %vm429_vm5, %v422_v27, %v424_v41  ;;  %12228 = vst [vmem:[#allocation62_spill] sm:$0xff] %v6838_v34 }
 0x184   :  { %711 = vmatpush1.bf16.msra.mxu0 %v657_v42  ;;  %v456_v54 = vmul.f32 %v6782_v43, %v432_v48  ;;  %v6849_v42 = vrot.slane %v325_v36, %v6682_v22 }
 0x186   :  { %v504_v49 = vpop.permute.xlu1 %503  ;;  %v462_v1 = vpop.permute.xlu0 %461  ;;  %12231 = vst [vmem:[#allocation65_spill] sm:$0xff] %v6849_v42 }
 0x187   :  { %v506_v51 = vsel %vm505_vm4, %v502_v58, %v504_v49  ;;  %v509_v52 = vsel %vm505_vm4, %v504_v49, %v498_v28  ;;  %v470_v46 = vsel %vm467_vm6, %v460_v39, %v462_v1 }
 0x188   :  { %v533_v55 = vmul.f32 %v6785_v44, %v506_v51  ;;  %v534_v56 = vmul.f32 %v6788_v45, %v509_v52  ;;  %v494_v59 = vmul.f32 %v6791_v47, %v470_v46  ;;  %v6855_v46 = vrot.slane %v323_v20, %v6661_v9 }
 0x18a   :  { %v466_v60 = vpop.permute.xlu1 %465  ;;  %v428_v61 = vpop.permute.xlu0 %427  ;;  %v654_v58 = vpack.c.bf16 %v494_v59, %v456_v54  ;;  %v660_v63 = vpack.c.bf16 %v534_v56, %v6595_v3  ;;  %v659_v11 = vpack.c.bf16 %v533_v55, %v6572_v0  ;;  %v324_v0 = vld [vmem:[%s11839_s23 + $0x4] sm:$0xf]  ;;  %12233 = vst [vmem:[#allocation67_spill] sm:$0xff] %v6855_v46 }
 0x18b   :  { %v471_v12 = vsel %vm467_vm6, %v466_v60, %v460_v39  ;;  %v433_v15 = vsel %vm429_vm5, %v428_v61, %v422_v27  ;;  %v6831_v2 = vrot.slane %v324_v0, %v6659_v8  ;;  %v6846_v8 = vrot.slane %v325_v36, %v6684_v23 }
 0x18c   :  { %v493_v17 = vmul.f32 %v6796_v50, %v471_v12  ;;  %v455_v18 = vmul.f32 %v6805_v53, %v433_v15  ;;  %712 = vmatprep.subr.bf16.mxu0 %v654_v58  ;;  %761 = vmatprep.subr.bf16.mxu1 %v660_v63  ;;  %v6852_v52 = vrot.slane %v324_v0, %v6661_v9 }
 0x18d   :  { %762 = vmatpush1.bf16.msra.mxu1 %v659_v11  ;;  %12227 = vst [vmem:[#allocation61_spill] sm:$0xff] %v6831_v2  ;;  %12230 = vst [vmem:[#allocation64_spill] sm:$0xff] %v6846_v8  ;;  %v6877_v15 = vrot.slane %v324_v0, %v6682_v22 }
 0x18e   :  { %v346_v3 = vpop.permute.xlu1 %345  ;;  %v344_v19 = vpop.permute.xlu0 %343  ;;  %v653_v21 = vpack.c.bf16 %v493_v17, %v455_v18  ;;  %12232 = vst [vmem:[#allocation66_spill] sm:$0xff] %v6852_v52 }
 0x18f   :  { %v356_v25 = vsel %vm353_vm7, %v344_v19, %v346_v3  ;;  %12235 = vst [vmem:[#allocation69_spill] sm:$0xff] %v6877_v15 }
 0x190   :  { %713 = vmatpush1.bf16.msra.mxu0 %v653_v21  ;;  %v380_v26 = vmul.f32 %v6828_v24, %v356_v25  ;;  %v6882_v21 = vrot.slane %v323_v20, %v6684_v23  ;;  %v6885_v25 = vrot.slane %v323_v20, %v6682_v22 }
 0x192   :  { %v386_v27 = vpop.permute.xlu1 %385  ;;  %v384_v28 = vpop.permute.xlu0 %383  ;;  %12236 = vst [vmem:[#allocation70_spill] sm:$0xff] %v6882_v21  ;;  %12237 = vst [vmem:[#allocation71_spill] sm:$0xff] %v6885_v25 }
 0x193   :  { %v394_v30 = vsel %vm391_vm8, %v384_v28, %v386_v27 }
 0x194   :  { %v418_v39 = vmul.f32 %v6831_v2, %v394_v30 }
 0x196   :  { %v464_v48 = vpop.permute.xlu1 %463  ;;  %v426_v49 = vpop.permute.xlu0 %425  ;;  %v650_v51 = vpack.c.bf16 %v418_v39, %v380_v26 }
 0x197   :  { %v468_v38 = vsel %vm467_vm6, %v464_v48, %v466_v60  ;;  %v469_v54 = vsel %vm467_vm6, %v462_v1, %v464_v48  ;;  %v430_v55 = vsel %vm429_vm5, %v426_v49, %v428_v61  ;;  %v431_v36 = vsel %vm429_vm5, %v424_v41, %v426_v49  ;;  %v5773_v48 = vld [vmem:[#allocation2] sm:$0xff]  }
 0x198   :  { %v495_v56 = vmul.f32 %v6838_v34, %v469_v54  ;;  %v496_v59 = vmul.f32 %v6841_v35, %v468_v38  ;;  %v457_v58 = vmul.f32 %v6846_v8, %v431_v36  ;;  %v458_v9 = vmul.f32 %v6849_v42, %v430_v55  ;;  %714 = vmatprep.subr.bf16.mxu0 %v650_v51 }
 0x199   :  { %v6874_v41 = vrot.slane %v324_v0, %v6684_v23 }
 0x19a   :  { %v390_v63 = vpop.permute.xlu1 %389  ;;  %v350_v60 = vpop.permute.xlu0 %349  ;;  %v656_v11 = vpack.c.bf16 %v496_v59, %v458_v9  ;;  %v655_v12 = vpack.c.bf16 %v495_v56, %v457_v58 }
 0x19b   :  { %v395_v1 = vsel %vm391_vm8, %v390_v63, %v384_v28  ;;  %v357_v61 = vsel %vm353_vm7, %v350_v60, %v344_v19  ;;  %12234 = vst [vmem:[#allocation68_spill] sm:$0xff] %v6874_v41 }
 0x19c   :  { %v417_v17 = vmul.f32 %v6852_v52, %v395_v1  ;;  %v379_v18 = vmul.f32 %v6855_v46, %v357_v61  ;;  %763 = vmatprep.subr.bf16.mxu1 %v656_v11 }
 0x19d   :  { %764 = vmatpush1.bf16.msra.mxu1 %v655_v12 }
 0x19e   :  { %v388_v28 = vpop.permute.xlu1 %387  ;;  %v348_v19 = vpop.permute.xlu0 %347  ;;  %v649_v30 = vpack.c.bf16 %v417_v17, %v379_v18 }
 0x19f   :  { %v392_v0 = vsel %vm391_vm8, %v388_v28, %v390_v63  ;;  %v393_v26 = vsel %vm391_vm8, %v386_v27, %v388_v28  ;;  %v354_v39 = vsel %vm353_vm7, %v348_v19, %v350_v60  ;;  %v355_v23 = vsel %vm353_vm7, %v346_v3, %v348_v19  ;;  %v5774_v27 = vld [vmem:[#allocation2 + $0x8] ss:$0 sps:$4 sm:$0xff]  }
 0x1a0   :  { %v419_v22 = vmul.f32 %v6874_v41, %v393_v26  ;;  %v420_v20 = vmul.f32 %v6877_v15, %v392_v0  ;;  %v381_v49 = vmul.f32 %v6882_v21, %v355_v23  ;;  %v382_v51 = vmul.f32 %v6885_v25, %v354_v39  ;;  %715 = vmatpush1.bf16.msra.mxu0 %v649_v30 }
 0x1a2   :  { %v652_v38 = vpack.c.bf16 %v420_v20, %v382_v51  ;;  %v651_v54 = vpack.c.bf16 %v419_v22, %v381_v49 }
 0x1a3   :  { %5519 = vmatmul.mubr.msk.bf16.vlgmr.msra.gmra.mxu0 %vm680_vm9, %v5773_v48 }
 0x1a4   :  { %765 = vmatprep.subr.bf16.mxu1 %v652_v38  ;;  %742 = vmatprep.mubr.bf16.mxu0 %v11845_v4 }
 0x1a5   :  { %766 = vmatpush1.bf16.msra.mxu1 %v651_v54 }
 0x1a8   :  { %5522 = vmatmul.mubr.msk.bf16.vlgmr.msra.gmra.mxu1 %vm680_vm9, %v5773_v48 }
 0x1a9   :  { %793 = vmatprep.mubr.bf16.mxu1 %v11845_v4 }
 0x1ab   :  { %5520 = vmatmul.mubr.msk.bf16.gmra.mxu0 %vm680_vm9, %v5774_v27 }
 0x1ac   :  { %5529 = vmatprep.mubr.msk.bf16.mxu0 %vm1401_vm10, %v5777_v62 }
 0x1b0   :  { %5523 = vmatmul.mubr.msk.bf16.gmra.mxu1 %vm680_vm9, %v5774_v27 }
 0x1b1   :  { %5532 = vmatprep.mubr.msk.bf16.mxu1 %vm1401_vm10, %v5777_v62 }
 0x263   :  { %v6905_v3 = vpop.f32.mrf.mxu0 }
 0x264   :  { %v820_v55 = vmul.f32 %v6905_v3, %v6905_v3 }
 0x265   :  { %v6909_v36 = vpop.f32.mrf.mxu0 }
 0x266   :  { %v802_v56 = vadd.f32 %v6909_v36, %v6905_v3  ;;  %v821_v59 = vmul.f32 %v6909_v36, %v6909_v36 }
 0x267   :  { %v6915_v58 = vpop.f32.mrf.mxu0 }
 0x268   :  { %v6917_v9 = vpop.f32.mrf.mxu1  ;;  %v832_v63 = vadd.f32 %v821_v59, %v820_v55  ;;  %v824_v1 = vmul.f32 %v6915_v58, %v6915_v58 }
 0x269   :  { %v822_v60 = vmul.f32 %v6917_v9, %v6917_v9  ;;  %v6921_v11 = vpop.f32.mrf.mxu0  ;;  %v803_v12 = vadd.f32 %v802_v56, %v6917_v9 }
 0x26a   :  { %v807_v61 = vadd.f32 %v6921_v11, %v6915_v58  ;;  %v825_v17 = vmul.f32 %v6921_v11, %v6921_v11  ;;  %v6930_v18 = vpop.f32.mrf.mxu1 }
 0x26b   :  { %v6932_v28 = vpop.f32.mrf.mxu0  ;;  %v804_v19 = vadd.f32 %v803_v12, %v6930_v18  ;;  %v823_v30 = vmul.f32 %v6930_v18, %v6930_v18  ;;  %v833_v0 = vadd.f32 %v832_v63, %v822_v60 }
 0x26c   :  { %v828_v26 = vmul.f32 %v6932_v28, %v6932_v28  ;;  %v6939_v39 = vpop.f32.mrf.mxu1  ;;  %v837_v23 = vadd.f32 %v825_v17, %v824_v1 }
 0x26d   :  { %v826_v48 = vmul.f32 %v6939_v39, %v6939_v39  ;;  %805 = vadd.xlane.f32.xlu0 %v804_v19  ;;  %v6943_v22 = vpop.f32.mrf.mxu0  ;;  %v834_v20 = vadd.f32 %v833_v0, %v823_v30  ;;  %v808_v49 = vadd.f32 %v807_v61, %v6939_v39 }
 0x26e   :  { %v812_v51 = vadd.f32 %v6943_v22, %v6932_v28  ;;  %v829_v38 = vmul.f32 %v6943_v22, %v6943_v22  ;;  %v6950_v54 = vpop.f32.mrf.mxu1 }
 0x26f   :  { %835 = vadd.xlane.f32.xlu1 %v834_v20  ;;  %v809_v27 = vadd.f32 %v808_v49, %v6950_v54  ;;  %v827_v55 = vmul.f32 %v6950_v54, %v6950_v54  ;;  %v838_v56 = vadd.f32 %v837_v23, %v826_v48  ;;  %v748_v59 = vpop.f32.mrf.mxu0 }
 0x270   :  { %v6955_v63 = vpop.f32.mrf.mxu1  ;;  %v842_v60 = vadd.f32 %v829_v38, %v828_v26 }
 0x271   :  { %v830_v12 = vmul.f32 %v6955_v63, %v6955_v63  ;;  %810 = vadd.xlane.f32.xlu0 %v809_v27  ;;  %v839_v1 = vadd.f32 %v838_v56, %v827_v55  ;;  %v813_v61 = vadd.f32 %v812_v51, %v6955_v63  ;;  %v749_v17 = vpop.f32.mrf.mxu0 }
 0x272   :  { %v6960_v19 = vpop.f32.mrf.mxu1 }
 0x273   :  { %840 = vadd.xlane.f32.xlu1 %v839_v1  ;;  %v814_v30 = vadd.f32 %v813_v61, %v6960_v19  ;;  %v831_v0 = vmul.f32 %v6960_v19, %v6960_v19  ;;  %v843_v23 = vadd.f32 %v842_v60, %v830_v12 }
 0x274   :  { %v799_v48 = vpop.f32.mrf.mxu1 }
 0x275   :  { %815 = vadd.xlane.f32.xlu0 %v814_v30  ;;  %v844_v26 = vadd.f32 %v843_v23, %v831_v0 }
 0x276   :  { %v800_v20 = vpop.f32.mrf.mxu1 }
 0x279   :  { %845 = vadd.xlane.f32.xlu0 %v844_v26 }
 0x2f6   :  { %v806_v49 = vpop.xlane.xlu0 %805 }
 0x2f7   :  { %v817_v38 = vmul.f32 0.001953125, %v806_v49  ;;  %v862_v49 = vld [vmem:[%s12238_s20] sm:$0xff] }
 0x2f8   :  { %v836_v27 = vpop.xlane.xlu1 %835 }
 0x2f9   :  { %v850_v55 = vmul.f32 %v817_v38, %v817_v38  ;;  %v847_v51 = vmul.f32 0.001953125, %v836_v27 }
 0x2fa   :  { %v811_v56 = vpop.xlane.xlu0 %810 }
 0x2fb   :  { %v853_v59 = vsub.f32 %v847_v51, %v850_v55  ;;  %v818_v17 = vmul.f32 0.001953125, %v811_v56 }
 0x2fc   :  { %v841_v1 = vpop.xlane.xlu1 %840 }
 0x2fd   :  { %v856_v4 = vadd.f32 0.0001, %v853_v59  ;;  %v851_v61 = vmul.f32 %v818_v17, %v818_v17  ;;  %v848_v6 = vmul.f32 0.001953125, %v841_v1  ;;  %v864_v1 = vld [vmem:[%s12238_s20 + $0x10] sm:$0xff] }
 0x2fe   :  { %v816_v10 = vpop.xlane.xlu0 %815 }
 0x2ff   :  { %5885 = vrsqrt.f32 %v856_v4  ;;  %v854_v60 = vsub.f32 %v848_v6, %v851_v61  ;;  %v819_v12 = vmul.f32 0.001953125, %v816_v10  ;;  %v863_v4 = vld [vmem:[%s12238_s20 + $0x8] sm:$0xff]  ;;  %v868_v6 = vld [vmem:[%s12239_s18] sm:$0xff] }
 0x301   :  { %v857_v30 = vadd.f32 0.0001, %v854_v60  ;;  %v852_v0 = vmul.f32 %v819_v12, %v819_v12 }
 0x302   :  { %v846_v23 = vpop.xlane.xlu0 %845 }
 0x303   :  { %5887 = vrsqrt.f32 %v857_v30  ;;  %v849_v48 = vmul.f32 0.001953125, %v846_v23 }
 0x305   :  { %v855_v26 = vsub.f32 %v849_v48, %v852_v0  ;;  %v869_v0 = vld [vmem:[%s12239_s18 + $0x8] sm:$0xff] }
 0x307   :  { %v858_v20 = vadd.f32 0.0001, %v855_v26 }
 0x309   :  { %5889 = vrsqrt.f32 %v858_v20 }
 0x30c   :  { %v5886_v27 = vpop.eup %5885 }
 0x30d   :  { %v865_v55 = vmul.f32 %v5886_v27, %v862_v49 }
 0x30f   :  { %879 = vperm.xlu1 %5741, %v865_v55   ;;  %v871_v10 = vmul.f32 %v865_v55, %v817_v38  ;;  %v870_v38 = vld [vmem:[%s12239_s18 + $0x10] sm:$0xff]  ;;  %s6336_s18 = smov 119  }
 0x310   :  { %v5888_v51 = vpop.eup %5887 }
 0x311   :  { %v866_v56 = vmul.f32 %v5888_v51, %v863_v4  ;;  %v874_v59 = vsub.f32 %v868_v6, %v871_v10 }
 0x313   :  { %884 = vperm.xlu1 %5741, %v866_v56   ;;  %906 = vperm.xlu0 %5742, %v874_v59   ;;  %v872_v30 = vmul.f32 %v866_v56, %v818_v17 }
 0x315   :  { %v875_v48 = vsub.f32 %v869_v0, %v872_v30 }
 0x316   :  { %v5890_v61 = vpop.eup %5889 }
 0x317   :  { %v867_v60 = vmul.f32 %v5890_v61, %v864_v1 }
 0x319   :  { %889 = vperm.xlu1 %5741, %v867_v60   ;;  %v873_v23 = vmul.f32 %v867_v60, %v819_v12 }
 0x31b   :  { %v876_v26 = vsub.f32 %v870_v38, %v873_v23 }
 0x31d   :  { %911 = vperm.xlu1 %5741, %v875_v48  }
 0x321   :  { %916 = vperm.xlu1 %5741, %v876_v26  }
 0x38a   :  { %v880_v20 = vpop.permute.xlu1 %879 }
 0x38b   :  { %v892_v49 = vmul.f32 %v880_v20, %v6905_v3  ;;  %v893_v27 = vmul.f32 %v880_v20, %v6909_v36  ;;  %v894_v55 = vmul.f32 %v880_v20, %v6917_v9  ;;  %v895_v1 = vmul.f32 %v880_v20, %v6930_v18 }
 0x38e   :  { %v907_v17 = vpop.permute.xlu0 %906  ;;  %v885_v4 = vpop.permute.xlu1 %884 }
 0x38f   :  { %v919_v6 = vadd.f32 %v907_v17, %v892_v49  ;;  %v920_v10 = vadd.f32 %v907_v17, %v893_v27  ;;  %v921_v12 = vadd.f32 %v907_v17, %v894_v55  ;;  %v897_v9 = vmul.f32 %v885_v4, %v6921_v11 }
 0x390   :  { %v898_v59 = vmul.f32 %v885_v4, %v6939_v39  ;;  %v922_v0 = vadd.f32 %v907_v17, %v895_v1  ;;  %v896_v48 = vmul.f32 %v885_v4, %v6915_v58  ;;  %v899_v49 = vmul.f32 %v885_v4, %v6950_v54 }
 0x391   :  { %v6986_v51 = vmax.f32 %v919_v6, 0.0  ;;  %v6988_v56 = vmax.f32 %v920_v10, 0.0  ;;  %v6996_v36 = vmax.f32 %v921_v12, 0.0 }
 0x392   :  { %v7013_v11 = vmax.f32 %v922_v0, 0.0 }
 0x393   :  { %1141 = vrot.lane.b32.xlu1 %v6988_v56, %s6330_s13  ;;  %1087 = vrot.lane.b32.xlu0 %v6986_v51, %s6326_s30 }
 0x394   :  { %v6994_v3 = vpop.permute.xlu1 %889 }
 0x395   :  { %v900_v17 = vmul.f32 %v6994_v3, %v6932_v28  ;;  %v901_v4 = vmul.f32 %v6994_v3, %v6943_v22  ;;  %v903_v28 = vmul.f32 %v6994_v3, %v6960_v19  ;;  %v902_v0 = vmul.f32 %v6994_v3, %v6955_v63 }
 0x397   :  { %1147 = vrot.lane.b32.xlu1 %v6996_v36, %s6330_s13  ;;  %1039 = vrot.lane.b32.xlu0 %v6986_v51, %s6331_s16 }
 0x398   :  { %v912_v61 = vpop.permute.xlu1 %911 }
 0x399   :  { %v924_v60 = vadd.f32 %v912_v61, %v897_v9  ;;  %v925_v30 = vadd.f32 %v912_v61, %v898_v59  ;;  %v923_v26 = vadd.f32 %v912_v61, %v896_v48  ;;  %v926_v58 = vadd.f32 %v912_v61, %v899_v49 }
 0x39b   :  { %v7005_v23 = vmax.f32 %v924_v60, 0.0  ;;  %v7007_v38 = vmax.f32 %v925_v30, 0.0  ;;  %1045 = vrot.lane.b32.xlu0 %v6988_v56, %s6331_s16  ;;  %1135 = vrot.lane.b32.xlu1 %v6986_v51, %s6330_s13  ;;  %v7068_v20 = vmax.f32 %v923_v26, 0.0  ;;  %v7079_v27 = vmax.f32 %v926_v58, 0.0 }
 0x39c   :  { %v917_v54 = vpop.permute.xlu1 %916 }
 0x39d   :  { %v1352_v18 = vpack.c.bf16 %v7005_v23, %v6988_v56  ;;  %v1353_v39 = vpack.c.bf16 %v7007_v38, %v6996_v36  ;;  %v927_v55 = vadd.f32 %v917_v54, %v900_v17  ;;  %v928_v6 = vadd.f32 %v917_v54, %v901_v4 }
 0x39e   :  { %v930_v12 = vadd.f32 %v917_v54, %v903_v28  ;;  %v929_v58 = vadd.f32 %v917_v54, %v902_v0  ;;  %v1351_v0 = vpack.c.bf16 %v7068_v20, %v6986_v51 }
 0x39f   :  { %1057 = vrot.lane.b32.xlu0 %v7013_v11, %s6331_s16  ;;  %1153 = vrot.lane.b32.xlu1 %v7013_v11, %s6330_s13  ;;  %v7129_v10 = vmax.f32 %v927_v55, 0.0  ;;  %v7137_v22 = vmax.f32 %v928_v6, 0.0 }
 0x3a0   :  { %v7145_v1 = vmax.f32 %v930_v12, 0.0  ;;  %v7171_v6 = vmax.f32 %v929_v58, 0.0 }
 0x3a3   :  { %1051 = vrot.lane.b32.xlu0 %v6996_v36, %s6331_s16  ;;  %1093 = vrot.lane.b32.xlu1 %v6988_v56, %s6326_s30 }
 0x3a7   :  { %991 = vrot.lane.b32.xlu0 %v6986_v51, %s6324_s9  ;;  %1105 = vrot.lane.b32.xlu1 %v7013_v11, %s6326_s30 }
 0x3ab   :  { %943 = vrot.lane.b32.xlu0 %v6986_v51, %s6332_s27  ;;  %1099 = vrot.lane.b32.xlu1 %v6996_v36, %s6326_s30 }
 0x3af   :  { %949 = vrot.lane.b32.xlu0 %v6988_v56, %s6332_s27  ;;  %997 = vrot.lane.b32.xlu1 %v6988_v56, %s6324_s9 }
 0x3b3   :  { %961 = vrot.lane.b32.xlu0 %v7013_v11, %s6332_s27  ;;  %1009 = vrot.lane.b32.xlu1 %v7013_v11, %s6324_s9 }
 0x3b7   :  { %955 = vrot.lane.b32.xlu0 %v6996_v36, %s6332_s27  ;;  %1003 = vrot.lane.b32.xlu1 %v6996_v36, %s6324_s9 }
 0x3bb   :  { %1279 = vrot.lane.b32.xlu0 %v6986_v51, %s6327_s17  ;;  %1285 = vrot.lane.b32.xlu1 %v6988_v56, %s6327_s17 }
 0x3bf   :  { %1297 = vrot.lane.b32.xlu0 %v7013_v11, %s6327_s17  ;;  %1291 = vrot.lane.b32.xlu1 %v6996_v36, %s6327_s17 }
 0x3c3   :  { %1237 = vrot.lane.b32.xlu0 %v6988_v56, %s6329_s4  ;;  %1243 = vrot.lane.b32.xlu1 %v6996_v36, %s6329_s4 }
 0x3c7   :  { %1189 = vrot.lane.b32.xlu0 %v6988_v56, %s6328_s1  ;;  %1231 = vrot.lane.b32.xlu1 %v6986_v51, %s6329_s4  ;;  %v1354_v56 = vpack.c.bf16 %v7079_v27, %v7013_v11 }
 0x3cb   :  { %1195 = vrot.lane.b32.xlu0 %v6996_v36, %s6328_s1  ;;  %1249 = vrot.lane.b32.xlu1 %v7013_v11, %s6329_s4 }
 0x3cf   :  { %1183 = vrot.lane.b32.xlu0 %v6986_v51, %s6328_s1  ;;  %1041 = vrot.lane.b32.xlu1 %v7068_v20, %s6331_s16 }
 0x3d3   :  { %1089 = vrot.lane.b32.xlu0 %v7068_v20, %s6326_s30  ;;  %1047 = vrot.lane.b32.xlu1 %v7005_v23, %s6331_s16 }
 0x3d7   :  { %1095 = vrot.lane.b32.xlu0 %v7005_v23, %s6326_s30  ;;  %1059 = vrot.lane.b32.xlu1 %v7079_v27, %s6331_s16 }
 0x3db   :  { %1107 = vrot.lane.b32.xlu0 %v7079_v27, %s6326_s30  ;;  %1053 = vrot.lane.b32.xlu1 %v7007_v38, %s6331_s16 }
 0x3df   :  { %1101 = vrot.lane.b32.xlu0 %v7007_v38, %s6326_s30  ;;  %945 = vrot.lane.b32.xlu1 %v7068_v20, %s6332_s27 }
 0x3e3   :  { %993 = vrot.lane.b32.xlu0 %v7068_v20, %s6324_s9  ;;  %951 = vrot.lane.b32.xlu1 %v7005_v23, %s6332_s27 }
 0x3e7   :  { %999 = vrot.lane.b32.xlu0 %v7005_v23, %s6324_s9  ;;  %963 = vrot.lane.b32.xlu1 %v7079_v27, %s6332_s27 }
 0x3eb   :  { %1011 = vrot.lane.b32.xlu0 %v7079_v27, %s6324_s9  ;;  %957 = vrot.lane.b32.xlu1 %v7007_v38, %s6332_s27 }
 0x3ef   :  { %1005 = vrot.lane.b32.xlu0 %v7007_v38, %s6324_s9  ;;  %1281 = vrot.lane.b32.xlu1 %v7068_v20, %s6327_s17 }
 0x3f3   :  { %1287 = vrot.lane.b32.xlu0 %v7005_v23, %s6327_s17  ;;  %1299 = vrot.lane.b32.xlu1 %v7079_v27, %s6327_s17 }
 0x3f7   :  { %1293 = vrot.lane.b32.xlu0 %v7007_v38, %s6327_s17  ;;  %1191 = vrot.lane.b32.xlu1 %v7005_v23, %s6328_s1 }
 0x3fb   :  { %1239 = vrot.lane.b32.xlu0 %v7005_v23, %s6329_s4  ;;  %1197 = vrot.lane.b32.xlu1 %v7007_v38, %s6328_s1 }
 0x3ff   :  { %1245 = vrot.lane.b32.xlu0 %v7007_v38, %s6329_s4  ;;  %1185 = vrot.lane.b32.xlu1 %v7068_v20, %s6328_s1 }
 0x403   :  { %1233 = vrot.lane.b32.xlu0 %v7068_v20, %s6329_s4  ;;  %1091 = vrot.lane.b32.xlu1 %v7129_v10, %s6326_s30 }
 0x405   :  { %v1142_v9 = vpop.permute.xlu1 %1141  ;;  %v7139_v59 = vpop.permute.xlu0 %1087 }
 0x407   :  { %1251 = vrot.lane.b32.xlu0 %v7079_v27, %s6329_s4  ;;  %1097 = vrot.lane.b32.xlu1 %v7137_v22, %s6326_s30 }
 0x409   :  { %v1148_v19 = vpop.permute.xlu1 %1147  ;;  %v7147_v61 = vpop.permute.xlu0 %1039 }
 0x40a   :  { %v1162_v60 = vsel %vm505_vm4, %v1142_v9, %v1148_v19 }
 0x40b   :  { %v1172_v30 = vmul.f32 %v1162_v60, %v6736_v57  ;;  %1143 = vrot.lane.b32.xlu0 %v7005_v23, %s6330_s13  ;;  %1109 = vrot.lane.b32.xlu1 %v7145_v1, %s6326_s30 }
 0x40d   :  { %v7158_v48 = vpop.permute.xlu0 %1045  ;;  %v1136_v26 = vpop.permute.xlu1 %1135  ;;  %v1356_v49 = vpack.c.bf16 %v1172_v30, %v7137_v22 }
 0x40e   :  { %v1165_v17 = vsel %vm505_vm4, %v1136_v26, %v1142_v9 }
 0x40f   :  { %v1171_v55 = vmul.f32 %v1165_v17, %v6755_v16  ;;  %1420 = vmatprep.subr.bf16.mxu0 %v1356_v49  ;;  %1149 = vrot.lane.b32.xlu0 %v7007_v38, %s6330_s13 }
 0x410   :  { %1049 = vrot.lane.b32.xlu1 %v7137_v22, %s6331_s16 }
 0x411   :  { %v1355_v63 = vpack.c.bf16 %v1171_v55, %v7129_v10  ;;  %v7169_v3 = vpop.permute.xlu0 %1057  ;;  %v1154_v4 = vpop.permute.xlu1 %1153 }
 0x412   :  { %v1159_v54 = vsel %vm505_vm4, %v1148_v19, %v1154_v4  ;;  %v1168_v28 = vsel %vm505_vm4, %v1154_v4, %v1136_v26 }
 0x413   :  { %v1173_v12 = vmul.f32 %v1159_v54, %v6785_v44  ;;  %v1174_v9 = vmul.f32 %v1168_v28, %v6788_v45  ;;  %1043 = vrot.lane.b32.xlu0 %v7129_v10, %s6331_s16  ;;  %1421 = vmatpush1.bf16.msra.mxu0 %v1355_v63 }
 0x414   :  { %1103 = vrot.lane.b32.xlu1 %v7171_v6, %s6326_s30  ;;  %1422 = vmatprep.subr.bf16.mxu0 %v1352_v18 }
 0x415   :  { %v1357_v19 = vpack.c.bf16 %v1173_v12, %v7171_v6  ;;  %v7187_v60 = vpop.permute.xlu0 %1051  ;;  %v7189_v30 = vpop.permute.xlu1 %1093  ;;  %v1358_v26 = vpack.c.bf16 %v1174_v9, %v7145_v1 }
 0x417   :  { %1061 = vrot.lane.b32.xlu0 %v7145_v1, %s6331_s16  ;;  %1423 = vmatpush1.bf16.msra.mxu0 %v1351_v0 }
 0x418   :  { %995 = vrot.lane.b32.xlu1 %v7129_v10, %s6324_s9  ;;  %1471 = vmatprep.subr.bf16.mxu1 %v1358_v26 }
 0x419   :  { %1472 = vmatpush1.bf16.msra.mxu1 %v1357_v19  ;;  %v7200_v23 = vpop.permute.xlu0 %991  ;;  %v7202_v18 = vpop.permute.xlu1 %1105 }
 0x41a   :  { %1473 = vmatprep.subr.bf16.mxu1 %v1354_v56 }
 0x41b   :  { %1055 = vrot.lane.b32.xlu0 %v7171_v6, %s6331_s16 }
 0x41c   :  { %1001 = vrot.lane.b32.xlu1 %v7137_v22, %s6324_s9 }
 0x41d   :  { %1474 = vmatpush1.bf16.msra.mxu1 %v1353_v39  ;;  %v7211_v51 = vpop.permute.xlu0 %943  ;;  %v7213_v49 = vpop.permute.xlu1 %1099 }
 0x41f   :  { %947 = vrot.lane.b32.xlu0 %v7129_v10, %s6332_s27 }
 0x420   :  { %1013 = vrot.lane.b32.xlu1 %v7145_v1, %s6324_s9 }
 0x421   :  { %v7219_v58 = vpop.permute.xlu0 %949  ;;  %v7221_v17 = vpop.permute.xlu1 %997 }
 0x423   :  { %965 = vrot.lane.b32.xlu0 %v7145_v1, %s6332_s27 }
 0x424   :  { %953 = vrot.lane.b32.xlu1 %v7137_v22, %s6332_s27 }
 0x425   :  { %v7227_v36 = vpop.permute.xlu0 %961  ;;  %v7229_v38 = vpop.permute.xlu1 %1009 }
 0x427   :  { %959 = vrot.lane.b32.xlu0 %v7171_v6, %s6332_s27 }
 0x428   :  { %1007 = vrot.lane.b32.xlu1 %v7171_v6, %s6324_s9 }
 0x429   :  { %v7235_v39 = vpop.permute.xlu0 %955  ;;  %v7237_v55 = vpop.permute.xlu1 %1003 }
 0x42b   :  { %1283 = vrot.lane.b32.xlu0 %v7129_v10, %s6327_s17 }
 0x42c   :  { %1289 = vrot.lane.b32.xlu1 %v7137_v22, %s6327_s17 }
 0x42d   :  { %v7243_v63 = vpop.permute.xlu0 %1279  ;;  %v7245_v4 = vpop.permute.xlu1 %1285 }
 0x42e   :  { %12240 = vst [vmem:[#allocation72_spill] sm:$0xff] %v7243_v63  ;;  %12241 = vst [vmem:[#allocation73_spill] sm:$0xff] %v7245_v4 }
 0x42f   :  { %1295 = vrot.lane.b32.xlu0 %v7171_v6, %s6327_s17 }
 0x430   :  { %1203 = vrot.lane.b32.xlu1 %v7079_v27, %s6328_s1 }
 0x431   :  { %v7251_v54 = vpop.permute.xlu0 %1297  ;;  %v7253_v28 = vpop.permute.xlu1 %1291 }
 0x432   :  { %12242 = vst [vmem:[#allocation74_spill] sm:$0xff] %v7251_v54  ;;  %12243 = vst [vmem:[#allocation75_spill] sm:$0xff] %v7253_v28 }
 0x433   :  { %1201 = vrot.lane.b32.xlu0 %v7013_v11, %s6328_s1 }
 0x434   :  { %1301 = vrot.lane.b32.xlu1 %v7145_v1, %s6327_s17 }
 0x435   :  { %v7259_v12 = vpop.permute.xlu0 %1237  ;;  %v7261_v9 = vpop.permute.xlu1 %1243 }
 0x436   :  { %12244 = vst [vmem:[#allocation76_spill] sm:$0xff] %v7259_v12  ;;  %12245 = vst [vmem:[#allocation77_spill] sm:$0xff] %v7261_v9 }
 0x437   :  { %1193 = vrot.lane.b32.xlu0 %v7137_v22, %s6328_s1 }
 0x438   :  { %1241 = vrot.lane.b32.xlu1 %v7137_v22, %s6329_s4 }
 0x439   :  { %v7267_v19 = vpop.permute.xlu0 %1189  ;;  %v7269_v0 = vpop.permute.xlu1 %1231 }
 0x43a   :  { %12246 = vst [vmem:[#allocation78_spill] sm:$0xff] %v7267_v19  ;;  %12247 = vst [vmem:[#allocation79_spill] sm:$0xff] %v7269_v0 }
 0x43b   :  { %1187 = vrot.lane.b32.xlu0 %v7129_v10, %s6328_s1 }
 0x43c   :  { %1247 = vrot.lane.b32.xlu1 %v7171_v6, %s6329_s4 }
 0x43d   :  { %v7275_v11 = vpop.permute.xlu0 %1195  ;;  %v7277_v26 = vpop.permute.xlu1 %1249 }
 0x43e   :  { %12248 = vst [vmem:[#allocation80_spill] sm:$0xff] %v7275_v11  ;;  %12249 = vst [vmem:[#allocation81_spill] sm:$0xff] %v7277_v26 }
 0x43f   :  { %1205 = vrot.lane.b32.xlu0 %v7145_v1, %s6328_s1 }
 0x440   :  { %1235 = vrot.lane.b32.xlu1 %v7129_v10, %s6329_s4 }
 0x441   :  { %v7283_v56 = vpop.permute.xlu0 %1183  ;;  %v7285_v45 = vpop.permute.xlu1 %1041 }
 0x442   :  { %12250 = vst [vmem:[#allocation82_spill] sm:$0xff] %v7283_v56 }
 0x443   :  { %1137 = vrot.lane.b32.xlu0 %v7068_v20, %s6330_s13 }
 0x444   :  { %1199 = vrot.lane.b32.xlu1 %v7171_v6, %s6328_s1 }
 0x445   :  { %v1090_v44 = vpop.permute.xlu0 %1089  ;;  %v7291_v16 = vpop.permute.xlu1 %1047 }
 0x447   :  { %1155 = vrot.lane.b32.xlu0 %v7079_v27, %s6330_s13 }
 0x448   :  { %1253 = vrot.lane.b32.xlu1 %v7145_v1, %s6329_s4 }
 0x449   :  { %v1096_v57 = vpop.permute.xlu0 %1095  ;;  %v7297_v5 = vpop.permute.xlu1 %1059 }
 0x44c   :  { %1145 = vrot.lane.b32.xlu1 %v7137_v22, %s6330_s13 }
 0x44d   :  { %v1108_v20 = vpop.permute.xlu0 %1107  ;;  %v7301_v56 = vpop.permute.xlu1 %1053 }
 0x450   :  { %1151 = vrot.lane.b32.xlu1 %v7171_v6, %s6330_s13 }
 0x451   :  { %v1102_v27 = vpop.permute.xlu0 %1101  ;;  %v7307_v26 = vpop.permute.xlu1 %945 }
 0x454   :  { %1139 = vrot.lane.b32.xlu1 %v7129_v10, %s6330_s13 }
 0x455   :  { %v7311_v40 = vpop.permute.xlu0 %993  ;;  %v7313_v22 = vpop.permute.xlu1 %951 }
 0x458   :  { %1157 = vrot.lane.b32.xlu1 %v7145_v1, %s6330_s13 }
 0x459   :  { %v7317_v29 = vpop.permute.xlu0 %999  ;;  %v7319_v0 = vpop.permute.xlu1 %963 }
 0x45d   :  { %v7321_v62 = vpop.permute.xlu0 %1011  ;;  %v7323_v6 = vpop.permute.xlu1 %957 }
 0x461   :  { %v7325_v19 = vpop.permute.xlu0 %1005  ;;  %v7327_v11 = vpop.permute.xlu1 %1281 }
 0x462   :  { %12251 = vst [vmem:[#allocation83_spill] sm:$0xff] %v7327_v11  ;;  %v1118_v11 = vsel %vm467_vm6, %v1090_v44, %v1096_v57 }
 0x465   :  { %v7329_v10 = vpop.permute.xlu0 %1287  ;;  %v7331_v12 = vpop.permute.xlu1 %1299 }
 0x466   :  { %12252 = vst [vmem:[#allocation84_spill] sm:$0xff] %v7329_v10  ;;  %12253 = vst [vmem:[#allocation85_spill] sm:$0xff] %v7331_v12 }
 0x469   :  { %v7333_v9 = vpop.permute.xlu0 %1293  ;;  %v7335_v37 = vpop.permute.xlu1 %1191 }
 0x46a   :  { %12254 = vst [vmem:[#allocation86_spill] sm:$0xff] %v7333_v9  ;;  %12255 = vst [vmem:[#allocation87_spill] sm:$0xff] %v7335_v37 }
 0x46d   :  { %v7337_v1 = vpop.permute.xlu0 %1239  ;;  %v7339_v31 = vpop.permute.xlu1 %1197 }
 0x46e   :  { %12256 = vst [vmem:[#allocation88_spill] sm:$0xff] %v7337_v1  ;;  %12257 = vst [vmem:[#allocation89_spill] sm:$0xff] %v7339_v31  ;;  %v1128_v1 = vmul.f32 %v1118_v11, %v6791_v47 }
 0x471   :  { %v7341_v33 = vpop.permute.xlu0 %1245  ;;  %v7343_v32 = vpop.permute.xlu1 %1185 }
 0x472   :  { %12258 = vst [vmem:[#allocation90_spill] sm:$0xff] %v7341_v33  ;;  %12259 = vst [vmem:[#allocation91_spill] sm:$0xff] %v7343_v32  ;;  %v1121_v33 = vsel %vm467_vm6, %v1108_v20, %v1090_v44  ;;  %v1072_v44 = vsel %vm429_vm5, %v7169_v3, %v7147_v61 }
 0x473   :  { %v1075_v21 = vmul.f32 %v1072_v44, %v6805_v53 }
 0x475   :  { %v7345_v54 = vpop.permute.xlu0 %1233  ;;  %v1092_v13 = vpop.permute.xlu1 %1091 }
 0x476   :  { %12260 = vst [vmem:[#allocation92_spill] sm:$0xff] %v7345_v54 }
 0x479   :  { %v7349_v28 = vpop.permute.xlu0 %1251  ;;  %v1098_v12 = vpop.permute.xlu1 %1097 }
 0x47a   :  { %12261 = vst [vmem:[#allocation93_spill] sm:$0xff] %v7349_v28  ;;  %v1119_v37 = vsel %vm467_vm6, %v1092_v13, %v1098_v12  ;;  %v1127_v28 = vmul.f32 %v1121_v33, %v6796_v50 }
 0x47b   :  { %v1132_v31 = vmul.f32 %v1119_v37, %v6791_v47  ;;  %v1117_v37 = vsel %vm467_vm6, %v7139_v59, %v7189_v30 }
 0x47d   :  { %v7357_v32 = vpop.permute.xlu0 %1143  ;;  %v1110_v54 = vpop.permute.xlu1 %1109  ;;  %v1348_v63 = vpack.c.bf16 %v1132_v31, %v1128_v1  ;;  %v1112_v31 = vsel %vm467_vm6, %v1102_v27, %v1108_v20 }
 0x47e   :  { %12262 = vst [vmem:[#allocation94_spill] sm:$0xff] %v7357_v32  ;;  %v1122_v4 = vsel %vm467_vm6, %v1110_v54, %v1092_v13  ;;  %v1069_v13 = vsel %vm429_vm5, %v7147_v61, %v7158_v48 }
 0x47f   :  { %v1131_v14 = vmul.f32 %v1122_v4, %v6796_v50  ;;  %1424 = vmatprep.subr.bf16.mxu0 %v1348_v63  ;;  %v1124_v63 = vmul.f32 %v1117_v37, %v6791_v47  ;;  %v1070_v4 = vsel %vm429_vm5, %v7285_v45, %v7291_v16  ;;  %v1130_v37 = vmul.f32 %v1112_v31, %v6841_v35 }
 0x480   :  { %v1073_v31 = vsel %vm429_vm5, %v7297_v5, %v7285_v45  ;;  %v1063_v45 = vsel %vm429_vm5, %v7187_v60, %v7169_v3  ;;  %v1022_v3 = vsel %vm391_vm8, %v7311_v40, %v7317_v29 }
 0x481   :  { %v1347_v10 = vpack.c.bf16 %v1131_v14, %v1127_v28  ;;  %v7363_v9 = vpop.permute.xlu0 %1149  ;;  %v1115_v14 = vsel %vm467_vm6, %v1096_v57, %v1102_v27  ;;  %v1120_v57 = vsel %vm467_vm6, %v7202_v18, %v7139_v59  ;;  %v1111_v59 = vsel %vm467_vm6, %v7213_v49, %v7202_v18 }
 0x482   :  { %12263 = vst [vmem:[#allocation95_spill] sm:$0xff] %v7363_v9  ;;  %v1050_v11 = vpop.permute.xlu1 %1049  ;;  %v1129_v1 = vmul.f32 %v1115_v14, %v6838_v34  ;;  %v1076_v9 = vmul.f32 %v1069_v13, %v6782_v43  ;;  %v1064_v13 = vsel %vm429_vm5, %v7301_v56, %v7297_v5  ;;  %v1079_v44 = vmul.f32 %v1073_v31, %v6805_v53 }
 0x483   :  { %1425 = vmatpush1.bf16.msra.mxu0 %v1347_v10 }
 0x485   :  { %v1044_v33 = vpop.permute.xlu0 %1043 }
 0x486   :  { %v1071_v28 = vsel %vm429_vm5, %v1044_v33, %v1050_v11  ;;  %v1104_v20 = vpop.permute.xlu1 %1103 }
 0x487   :  { %v1084_v27 = vmul.f32 %v1071_v28, %v6782_v43  ;;  %v1113_v61 = vsel %vm467_vm6, %v1104_v20, %v1110_v54  ;;  %v1116_v10 = vsel %vm467_vm6, %v1098_v12, %v1104_v20  ;;  %v1114_v54 = vsel %vm467_vm6, %v7189_v30, %v7213_v49 }
 0x488   :  { %v1133_v47 = vmul.f32 %v1116_v10, %v6838_v34  ;;  %v1134_v32 = vmul.f32 %v1113_v61, %v6841_v35  ;;  %v1080_v12 = vmul.f32 %v1070_v4, %v6782_v43  ;;  %v1123_v30 = vmul.f32 %v1120_v57, %v6796_v50 }
 0x489   :  { %v1062_v28 = vpop.permute.xlu0 %1061  ;;  %v1344_v14 = vpack.c.bf16 %v1124_v63, %v1084_v27 }
 0x48a   :  { %v1349_v20 = vpack.c.bf16 %v1133_v47, %v1129_v1  ;;  %v1074_v61 = vsel %vm429_vm5, %v1062_v28, %v1044_v33  ;;  %v996_v10 = vpop.permute.xlu1 %995  ;;  %v1350_v18 = vpack.c.bf16 %v1134_v32, %v1130_v37  ;;  %v1066_v47 = vsel %vm429_vm5, %v7158_v48, %v7187_v60 }
 0x48b   :  { %v1083_v49 = vmul.f32 %v1074_v61, %v6805_v53  ;;  %1426 = vmatprep.subr.bf16.mxu0 %v1344_v14  ;;  %v1125_v32 = vmul.f32 %v1114_v54, %v6838_v34  ;;  %v1126_v33 = vmul.f32 %v1111_v59, %v6841_v35  ;;  %v1067_v60 = vsel %vm429_vm5, %v7291_v16, %v7301_v56 }
 0x48c   :  { %1475 = vmatprep.subr.bf16.mxu1 %v1350_v18  ;;  %v1340_v27 = vpack.c.bf16 %v1080_v12, %v1076_v9  ;;  %v1082_v1 = vmul.f32 %v1064_v13, %v6849_v42  ;;  %v1077_v16 = vmul.f32 %v1066_v47, %v6846_v8  ;;  %v1078_v56 = vmul.f32 %v1063_v45, %v6849_v42 }
 0x48d   :  { %v1343_v63 = vpack.c.bf16 %v1123_v30, %v1083_v49  ;;  %1476 = vmatpush1.bf16.msra.mxu1 %v1349_v20  ;;  %v1056_v48 = vpop.permute.xlu0 %1055  ;;  %v1339_v9 = vpack.c.bf16 %v1079_v44, %v1075_v21  ;;  %v1025_v12 = vsel %vm391_vm8, %v7321_v62, %v7311_v40  ;;  %v973_v61 = vsel %vm353_vm7, %v7211_v51, %v7219_v58 }
 0x48e   :  { %v1065_v5 = vsel %vm429_vm5, %v1056_v48, %v1062_v28  ;;  %v1068_v4 = vsel %vm429_vm5, %v1050_v11, %v1056_v48  ;;  %v7447_v57 = vpop.permute.xlu1 %1001  ;;  %v1032_v11 = vmul.f32 %v1022_v3, %v6831_v2  ;;  %v1021_v18 = vsel %vm391_vm8, %v7200_v23, %v7221_v17 }
 0x48f   :  { %v1085_v37 = vmul.f32 %v1068_v4, %v6846_v8  ;;  %v1086_v59 = vmul.f32 %v1065_v5, %v6849_v42  ;;  %v1023_v54 = vsel %vm391_vm8, %v996_v10, %v7447_v57  ;;  %1427 = vmatpush1.bf16.msra.mxu0 %v1343_v63  ;;  %v1081_v21 = vmul.f32 %v1067_v60, %v6846_v8 }
 0x490   :  { %v1036_v28 = vmul.f32 %v1023_v54, %v6831_v2  ;;  %1428 = vmatprep.subr.bf16.mxu0 %v1340_v27  ;;  %v974_v40 = vsel %vm353_vm7, %v7307_v26, %v7313_v22  ;;  %v1342_v47 = vpack.c.bf16 %v1082_v1, %v1078_v56  ;;  %v1031_v13 = vmul.f32 %v1025_v12, %v6852_v52 }
 0x491   :  { %v1345_v14 = vpack.c.bf16 %v1125_v32, %v1085_v37  ;;  %v948_v31 = vpop.permute.xlu0 %947  ;;  %v1346_v20 = vpack.c.bf16 %v1126_v33, %v1086_v59  ;;  %v1024_v32 = vsel %vm391_vm8, %v7229_v38, %v7200_v23  ;;  %v980_v44 = vmul.f32 %v973_v61, %v6828_v24 }
 0x492   :  { %v1014_v30 = vpop.permute.xlu1 %1013  ;;  %v1336_v49 = vpack.c.bf16 %v1036_v28, %v1032_v11  ;;  %v1028_v3 = vmul.f32 %v1021_v18, %v6831_v2  ;;  %v984_v48 = vmul.f32 %v974_v40, %v6828_v24  ;;  %v1027_v4 = vmul.f32 %v1024_v32, %v6852_v52 }
 0x493   :  { %v1026_v45 = vsel %vm391_vm8, %v1014_v30, %v996_v10  ;;  %1429 = vmatpush1.bf16.msra.mxu0 %v1339_v9  ;;  %1477 = vmatprep.subr.bf16.mxu1 %v1346_v20  ;;  %v1341_v10 = vpack.c.bf16 %v1081_v21, %v1077_v16  ;;  %v977_v27 = vsel %vm353_vm7, %v7319_v0, %v7307_v26 }
 0x494   :  { %v1035_v33 = vmul.f32 %v1026_v45, %v6852_v52  ;;  %1430 = vmatprep.subr.bf16.mxu0 %v1336_v49  ;;  %1478 = vmatpush1.bf16.msra.mxu1 %v1345_v14  ;;  %v1016_v59 = vsel %vm391_vm8, %v7325_v19, %v7321_v62  ;;  %v1019_v54 = vsel %vm391_vm8, %v7317_v29, %v7325_v19 }
 0x495   :  { %v966_v63 = vpop.permute.xlu0 %965  ;;  %1479 = vmatprep.subr.bf16.mxu1 %v1342_v47  ;;  %v976_v26 = vsel %vm353_vm7, %v7227_v36, %v7211_v51  ;;  %v1015_v56 = vsel %vm391_vm8, %v7237_v55, %v7229_v38  ;;  %v983_v28 = vmul.f32 %v977_v27, %v6855_v46  ;;  %v1328_v12 = vpack.c.bf16 %v984_v48, %v980_v44  ;;  %v12267_v48 = vld [vmem:[#allocation41_spill] sm:$0xff] }
 0x496   :  { %v1335_v60 = vpack.c.bf16 %v1035_v33, %v1031_v13  ;;  %v978_v5 = vsel %vm353_vm7, %v966_v63, %v948_v31  ;;  %v954_v23 = vpop.permute.xlu1 %953  ;;  %v1033_v14 = vmul.f32 %v1019_v54, %v6874_v41  ;;  %v979_v49 = vmul.f32 %v976_v26, %v6855_v46 }
 0x497   :  { %v987_v1 = vmul.f32 %v978_v5, %v6855_v46  ;;  %v975_v37 = vsel %vm353_vm7, %v948_v31, %v954_v23  ;;  %v1034_v31 = vmul.f32 %v1016_v59, %v6877_v15  ;;  %v968_v40 = vsel %vm353_vm7, %v7323_v6, %v7319_v0 }
 0x498   :  { %v988_v16 = vmul.f32 %v975_v37, %v6828_v24  ;;  %1431 = vmatpush1.bf16.msra.mxu0 %v1335_v60  ;;  %1480 = vmatpush1.bf16.msra.mxu1 %v1341_v10  ;;  %v1018_v47 = vsel %vm391_vm8, %v7221_v17, %v7237_v55  ;;  %v1030_v32 = vmul.f32 %v1015_v56, %v6877_v15  ;;  %v12265_v17 = vld [vmem:[#allocation86_spill] sm:$0xff]  ;;  %v12266_v55 = vld [vmem:[#allocation84_spill] sm:$0xff]  ;;  %v12270_v37 = vld [vmem:[#allocation75_spill] sm:$0xff] }
 0x499   :  { %v1331_v62 = vpack.c.bf16 %v1027_v4, %v987_v1  ;;  %v960_v11 = vpop.permute.xlu0 %959  ;;  %v1327_v44 = vpack.c.bf16 %v983_v28, %v979_v49  ;;  %v1307_v10 = vsel %vm619_vm0, %v12266_v55, %v12265_v17  ;;  %v12269_v4 = vld [vmem:[#allocation72_spill] sm:$0xff] }
 0x49a   :  { %v969_v29 = vsel %vm353_vm7, %v960_v11, %v966_v63  ;;  %v1008_v19 = vpop.permute.xlu1 %1007  ;;  %v1332_v9 = vpack.c.bf16 %v1028_v3, %v988_v16  ;;  %v972_v20 = vsel %vm353_vm7, %v954_v23, %v960_v11  ;;  %v986_v63 = vmul.f32 %v968_v40, %v6885_v25  ;;  %v12271_v16 = vld [vmem:[#allocation83_spill] sm:$0xff]  ;;  %v12272_v11 = vld [vmem:[#allocation40_spill] sm:$0xff] }
 0x49b   :  { %v1017_v51 = vsel %vm391_vm8, %v1008_v19, %v1014_v30  ;;  %v1020_v38 = vsel %vm391_vm8, %v7447_v57, %v1008_v19  ;;  %v990_v61 = vmul.f32 %v969_v29, %v6885_v25  ;;  %v967_v30 = vsel %vm353_vm7, %v7235_v39, %v7227_v36 }
 0x49c   :  { %v1037_v18 = vmul.f32 %v1020_v38, %v6874_v41  ;;  %v1038_v21 = vmul.f32 %v1017_v51, %v6877_v15  ;;  %1432 = vmatprep.subr.bf16.mxu0 %v1332_v9  ;;  %v970_v57 = vsel %vm353_vm7, %v7219_v58, %v7235_v39  ;;  %v971_v58 = vsel %vm353_vm7, %v7313_v22, %v7323_v6  ;;  %v12264_v39 = vld [vmem:[#allocation70_spill] sm:$0xff]  ;;  %v12268_v6 = vld [vmem:[#allocation73_spill] sm:$0xff] }
 0x49d   :  { %1433 = vmatpush1.bf16.msra.mxu0 %v1331_v62  ;;  %v1284_v45 = vpop.permute.xlu0 %1283  ;;  %v989_v0 = vmul.f32 %v972_v20, %v12264_v39  ;;  %v1334_v5 = vpack.c.bf16 %v1030_v32, %v990_v61  ;;  %v982_v23 = vmul.f32 %v967_v30, %v6885_v25  ;;  %v1029_v22 = vmul.f32 %v1018_v47, %v6874_v41  ;;  %v12273_v51 = vld [vmem:[#allocation85_spill] sm:$0xff] }
 0x49e   :  { %v1337_v36 = vpack.c.bf16 %v1037_v18, %v1033_v14  ;;  %v1290_v13 = vpop.permute.xlu1 %1289  ;;  %1434 = vmatprep.subr.bf16.mxu0 %v1328_v12  ;;  %v1338_v33 = vpack.c.bf16 %v1038_v21, %v1034_v31  ;;  %v1309_v27 = vsel %vm619_vm0, %v12269_v4, %v12268_v6  ;;  %v1306_v59 = vsel %vm619_vm0, %v12268_v6, %v12270_v37  ;;  %v12274_v21 = vld [vmem:[#allocation74_spill] sm:$0xff] }
 0x49f   :  { %v1311_v3 = vsel %vm619_vm0, %v1284_v45, %v1290_v13  ;;  %v985_v54 = vmul.f32 %v971_v58, %v12264_v39  ;;  %v1310_v26 = vsel %vm619_vm0, %v12271_v16, %v12266_v55  ;;  %v1320_v28 = vmul.f32 %v1307_v10, %v12272_v11 }
 0x4a0   :  { %v1323_v60 = vmul.f32 %v1311_v3, %v12267_v48  ;;  %1481 = vmatprep.subr.bf16.mxu1 %v1338_v33  ;;  %v1333_v29 = vpack.c.bf16 %v1029_v22, %v989_v0  ;;  %v981_v12 = vmul.f32 %v970_v57, %v12264_v39  ;;  %v1330_v14 = vpack.c.bf16 %v986_v63, %v982_v23  ;;  %v12275_v33 = vld [vmem:[#allocation44_spill] sm:$0xff]  ;;  %v12276_v0 = vld [vmem:[#allocation45_spill] sm:$0xff] }
 0x4a1   :  { %1435 = vmatpush1.bf16.msra.mxu0 %v1327_v44  ;;  %1482 = vmatpush1.bf16.msra.mxu1 %v1337_v36  ;;  %v1296_v1 = vpop.permute.xlu0 %1295  ;;  %v1316_v31 = vmul.f32 %v1306_v59, %v12272_v11  ;;  %v1313_v38 = vsel %vm619_vm0, %v12273_v51, %v12271_v16  ;;  %v1315_v18 = vmul.f32 %v1309_v27, %v12267_v48 }
 0x4a2   :  { %v1308_v56 = vsel %vm619_vm0, %v1290_v13, %v1296_v1  ;;  %1483 = vmatprep.subr.bf16.mxu1 %v1334_v5  ;;  %v7577_v62 = vpop.permute.xlu1 %1203  ;;  %v1379_v19 = vpack.c.bf16 %v1323_v60, %v1323_v60  ;;  %v1312_v49 = vsel %vm619_vm0, %v12274_v21, %v12269_v4  ;;  %v1329_v30 = vpack.c.bf16 %v985_v54, %v981_v12 }
 0x4a3   :  { %v1324_v9 = vmul.f32 %v1308_v56, %v12272_v11  ;;  %v1319_v57 = vmul.f32 %v1310_v26, %v12267_v48  ;;  %v1376_v13 = vpack.c.bf16 %v1320_v28, %v1316_v31  ;;  %v1322_v44 = vmul.f32 %v1313_v38, %v12275_v33  ;;  %v12279_v56 = vld [vmem:[#allocation43_spill] sm:$0xff] }
 0x4a4   :  { %v1409_v36 = vsel %vm687_vm1, %v1379_v19, 0  ;;  %v1304_v58 = vsel %vm619_vm0, %v12265_v17, %v12273_v51  ;;  %v1318_v55 = vmul.f32 %v1312_v49, %v12275_v33  ;;  %v12281_v51 = vld [vmem:[#allocation89_spill] sm:$0xff]  ;;  %v12282_v38 = vld [vmem:[#allocation87_spill] sm:$0xff] }
 0x4a5   :  { %v1380_v20 = vpack.c.bf16 %v1324_v9, %v1324_v9  ;;  %1484 = vmatpush1.bf16.msra.mxu1 %v1333_v29  ;;  %v7587_v61 = vpop.permute.xlu0 %1201  ;;  %v1375_v10 = vpack.c.bf16 %v1319_v57, %v1315_v18  ;;  %v1321_v17 = vmul.f32 %v1304_v58, %v12276_v0  ;;  %v12280_v9 = vld [vmem:[#allocation92_spill] sm:$0xff]  ;;  %v12288_v58 = vld [vmem:[#allocation79_spill] sm:$0xff] }
 0x4a6   :  { %1485 = vmatprep.subr.bf16.mxu1 %v1330_v14  ;;  %v1302_v40 = vpop.permute.xlu1 %1301  ;;  %v1378_v4 = vpack.c.bf16 %v1322_v44, %v1318_v55 }
 0x4a7   :  { %v1305_v47 = vsel %vm619_vm0, %v1296_v1, %v1302_v40  ;;  %v1314_v32 = vsel %vm619_vm0, %v1302_v40, %v1284_v45  ;;  %5528 = vmatprep.subr.msk.bf16.mxu0 %vm687_vm1, %v1380_v20  ;;  %v1303_v45 = vsel %vm619_vm0, %v12270_v37, %v12274_v21  ;;  %v12277_v1 = vld [vmem:[#allocation90_spill] sm:$0xff]  ;;  %v12278_v37 = vld [vmem:[#allocation88_spill] sm:$0xff]  ;;  %v1211_v20 = vsel %vm543_vm2, %v12282_v38, %v12281_v51  ;;  %v12284_v40 = vld [vmem:[#allocation77_spill] sm:$0xff] }
 0x4a8   :  { %v1325_v3 = vmul.f32 %v1305_v47, %v12276_v0  ;;  %v1326_v63 = vmul.f32 %v1314_v32, %v12275_v33  ;;  %1441 = vmatpush2.bf16.msra.mxu0 %v1409_v36  ;;  %v1317_v27 = vmul.f32 %v1303_v45, %v12276_v0  ;;  %v1259_v59 = vsel %vm581_vm3, %v12278_v37, %v12277_v1  ;;  %v12283_v21 = vld [vmem:[#allocation46_spill] sm:$0xff]  ;;  %v12285_v47 = vld [vmem:[#allocation76_spill] sm:$0xff] }
 0x4a9   :  { %1486 = vmatpush1.bf16.msra.mxu1 %v1329_v30  ;;  %1442 = vmatprep.subr.bf16.mxu0 %v1376_v13  ;;  %v1194_v23 = vpop.permute.xlu0 %1193  ;;  %v1272_v28 = vmul.f32 %v1259_v59, %v12279_v56  ;;  %v1262_v12 = vsel %vm581_vm3, %v12280_v9, %v12278_v37  ;;  %v1258_v32 = vsel %vm581_vm3, %v12285_v47, %v12284_v40  ;;  %v12286_v36 = vld [vmem:[#allocation80_spill] sm:$0xff]  ;;  %v12287_v13 = vld [vmem:[#allocation78_spill] sm:$0xff] }
 0x4aa   :  { %v1381_v60 = vpack.c.bf16 %v1325_v3, %v1325_v3  ;;  %v1382_v5 = vpack.c.bf16 %v1326_v63, %v1326_v63  ;;  %v1242_v22 = vpop.permute.xlu1 %1241  ;;  %v1377_v16 = vpack.c.bf16 %v1321_v17, %v1317_v27  ;;  %v1271_v49 = vmul.f32 %v1262_v12, %v12283_v21  ;;  %v12289_v63 = vld [vmem:[#allocation42_spill] sm:$0xff]  ;;  %v12291_v17 = vld [vmem:[#allocation93_spill] sm:$0xff] }
 0x4ab   :  { %v1210_v44 = vsel %vm543_vm2, %v12287_v13, %v12286_v36  ;;  %v1261_v3 = vsel %vm581_vm3, %v12288_v58, %v12285_v47  ;;  %v1224_v45 = vmul.f32 %v1211_v20, %v12289_v63  ;;  %v1268_v59 = vmul.f32 %v1258_v32, %v12279_v56  ;;  %v12295_v20 = vld [vmem:[#allocation49_spill] sm:$0xff]  ;;  %v12296_v47 = vld [vmem:[#allocation50_spill] sm:$0xff] }
 0x4ac   :  { %5531 = vmatprep.subr.msk.bf16.mxu1 %vm687_vm1, %v1382_v5  ;;  %1443 = vmatpush2.bf16.msra.mxu0 %v1375_v10  ;;  %v1415_v6 = vsel %vm687_vm1, %v1381_v60, 0  ;;  %v12290_v5 = vld [vmem:[#allocation91_spill] sm:$0xff] }
 0x4ad   :  { %1492 = vmatpush2.bf16.msra.mxu1 %v1415_v6  ;;  %v1188_v29 = vpop.permute.xlu0 %1187  ;;  %v1256_v6 = vsel %vm581_vm3, %v12277_v1, %v12291_v17  ;;  %v12293_v1 = vld [vmem:[#allocation81_spill] sm:$0xff] }
 0x4ae   :  { %1493 = vmatprep.subr.bf16.mxu1 %v1378_v4  ;;  %v1248_v54 = vpop.permute.xlu1 %1247  ;;  %v1215_v30 = vsel %vm543_vm2, %v1188_v29, %v1194_v23  ;;  %v12292_v4 = vld [vmem:[#allocation47_spill] sm:$0xff]  ;;  %v1264_v12 = vsel %vm581_vm3, %v12293_v1, %v12288_v58 }
 0x4af   :  { %v1260_v26 = vsel %vm581_vm3, %v1242_v22, %v1248_v54  ;;  %v1227_v27 = vmul.f32 %v1215_v30, %v12292_v4 }
 0x4b0   :  { %v1276_v19 = vmul.f32 %v1260_v26, %v12279_v56  ;;  %v1265_v26 = vsel %vm581_vm3, %v12291_v17, %v12280_v9 }
 0x4b1   :  { %1494 = vmatpush2.bf16.msra.mxu1 %v1377_v16  ;;  %v1206_v55 = vpop.permute.xlu0 %1205  ;;  %v1220_v16 = vmul.f32 %v1210_v44, %v12289_v63  ;;  %v1274_v32 = vmul.f32 %v1265_v26, %v12296_v47 }
 0x4b2   :  { %v1236_v14 = vpop.permute.xlu1 %1235  ;;  %v1372_v31 = vpack.c.bf16 %v1276_v19, %v1272_v28  ;;  %v1267_v19 = vmul.f32 %v1261_v3, %v12283_v21 }
 0x4b3   :  { %v1263_v18 = vsel %vm581_vm3, %v1236_v14, %v1242_v22  ;;  %v1214_v22 = vsel %vm543_vm2, %v12290_v5, %v12282_v38  ;;  %v1218_v38 = vsel %vm543_vm2, %v1206_v55, %v1188_v29 }
 0x4b4   :  { %v1275_v57 = vmul.f32 %v1263_v18, %v12283_v21  ;;  %1444 = vmatprep.subr.bf16.mxu0 %v1372_v31  ;;  %v1223_v9 = vmul.f32 %v1214_v22, %v12292_v4  ;;  %v1273_v18 = vmul.f32 %v1256_v6, %v12295_v20  ;;  %v1367_v44 = vpack.c.bf16 %v1267_v19, %v1227_v27 }
 0x4b5   :  { %v1138_v19 = vpop.permute.xlu0 %1137 }
 0x4b6   :  { %v1371_v10 = vpack.c.bf16 %v1275_v57, %v1271_v49  ;;  %v1200_v60 = vpop.permute.xlu1 %1199  ;;  %v1364_v57 = vpack.c.bf16 %v1224_v45, %v1220_v16  ;;  %v12298_v16 = vld [vmem:[#allocation51_spill] sm:$0xff] }
 0x4b7   :  { %v1212_v37 = vsel %vm543_vm2, %v1194_v23, %v1200_v60  ;;  %v12294_v23 = vld [vmem:[#allocation82_spill] sm:$0xff]  ;;  %v1209_v29 = vsel %vm543_vm2, %v1200_v60, %v1206_v55  ;;  %v1270_v55 = vmul.f32 %v1264_v12, %v12296_v47 }
 0x4b8   :  { %v1228_v28 = vmul.f32 %v1212_v37, %v12289_v63  ;;  %1445 = vmatpush2.bf16.msra.mxu0 %v1371_v10  ;;  %v1213_v31 = vsel %vm543_vm2, %v12294_v23, %v12287_v13  ;;  %v12297_v13 = vld [vmem:[#allocation52_spill] sm:$0xff]  ;;  %v1229_v26 = vmul.f32 %v1209_v29, %v12298_v16 }
 0x4b9   :  { %v1230_v10 = vmul.f32 %v1218_v38, %v12297_v13  ;;  %v1219_v45 = vmul.f32 %v1213_v31, %v12292_v4  ;;  %v12300_v31 = vld [vmem:[#allocation94_spill] sm:$0xff] }
 0x4ba   :  { %v1254_v49 = vpop.permute.xlu1 %1253  ;;  %v1368_v30 = vpack.c.bf16 %v1268_v59, %v1228_v28  ;;  %v1217_v59 = vsel %vm543_vm2, %v7577_v62, %v12290_v5  ;;  %v1207_v28 = vsel %vm543_vm2, %v12286_v36, %v7587_v61  ;;  %v1208_v5 = vsel %vm543_vm2, %v12281_v51, %v7577_v62  ;;  %v1156_v51 = vpop.permute.xlu0 %1155 }
 0x4bb   :  { %v1257_v58 = vsel %vm581_vm3, %v1248_v54, %v1254_v49  ;;  %v1266_v3 = vsel %vm581_vm3, %v1254_v49, %v1236_v14  ;;  %v1216_v54 = vsel %vm543_vm2, %v7587_v61, %v12294_v23  ;;  %v1255_v14 = vsel %vm581_vm3, %v12284_v40, %v12293_v1  ;;  %v12299_v23 = vld [vmem:[#allocation95_spill] sm:$0xff] }
 0x4bc   :  { %v1277_v22 = vmul.f32 %v1257_v58, %v12295_v20  ;;  %v1278_v17 = vmul.f32 %v1266_v3, %v12296_v47  ;;  %1446 = vmatprep.subr.bf16.mxu0 %v1368_v30  ;;  %v1363_v37 = vpack.c.bf16 %v1223_v9, %v1219_v45  ;;  %v1222_v40 = vmul.f32 %v1216_v54, %v12297_v13  ;;  %v12301_v30 = vld [vmem:[#allocation48_spill] sm:$0xff] }
 0x4bd   :  { %1447 = vmatpush2.bf16.msra.mxu0 %v1367_v44  ;;  %v1370_v1 = vpack.c.bf16 %v1270_v55, %v1230_v10  ;;  %v1269_v12 = vmul.f32 %v1255_v14, %v12295_v20  ;;  %v1163_v38 = vsel %vm505_vm4, %v12300_v31, %v12299_v23  ;;  %v1226_v61 = vmul.f32 %v1217_v59, %v12297_v13  ;;  %v1385_v14 = vld [vmem:[#allocation4 + $0x10] sm:$0xff] }
 0x4be   :  { %v1373_v60 = vpack.c.bf16 %v1277_v22, %v1273_v18  ;;  %v1146_v6 = vpop.permute.xlu1 %1145  ;;  %1448 = vmatprep.subr.bf16.mxu0 %v1364_v57  ;;  %v1374_v27 = vpack.c.bf16 %v1278_v17, %v1274_v32  ;;  %v1221_v9 = vmul.f32 %v1207_v28, %v12298_v16  ;;  %v1176_v57 = vmul.f32 %v1163_v38, %v12301_v30  ;;  %v12302_v17 = vld [vmem:[#allocation53_spill] sm:$0xff] }
 0x4bf   :  { %v1369_v18 = vpack.c.bf16 %v1269_v12, %v1229_v26  ;;  %v1366_v44 = vpack.c.bf16 %v1226_v61, %v1222_v40  ;;  %v1225_v58 = vmul.f32 %v1208_v5, %v12298_v16  ;;  %v1166_v62 = vsel %vm505_vm4, %v1138_v19, %v12300_v31  ;;  %v5775_v26 = vld [vmem:[#allocation4] ss:$8 sps:$4 sm:$0xff]   ;;  %v12303_v40 = vld [vmem:[#allocation55_spill] sm:$0xff] }
 0x4c0   :  { %1495 = vmatprep.subr.bf16.mxu1 %v1374_v27  ;;  %v1175_v45 = vmul.f32 %v1166_v62, %v12302_v17  ;;  %v1160_v55 = vsel %vm505_vm4, %v12299_v23, %v1156_v51  ;;  %v5527_v28 = vcombine.high %v1385_v14, %v1385_v14  ;;  %v12304_v12 = vld [vmem:[#allocation56_spill] sm:$0xff]  ;;  %v5526_v61 = vcombine.low %v1385_v14, %v1385_v14 }
 0x4c1   :  { %1449 = vmatpush2.bf16.msra.mxu0 %v1363_v37  ;;  %1496 = vmatpush2.bf16.msra.mxu1 %v1373_v60  ;;  %v1365_v29 = vpack.c.bf16 %v1225_v58, %v1221_v9  ;;  %v1169_v60 = vsel %vm505_vm4, %v1156_v51, %v1138_v19 }
 0x4c2   :  { %1497 = vmatprep.subr.bf16.mxu1 %v1370_v1  ;;  %v1152_v36 = vpop.permute.xlu1 %1151  ;;  %v1177_v1 = vmul.f32 %v1160_v55, %v12303_v40  ;;  %v1178_v31 = vmul.f32 %v1169_v60, %v12304_v12 }
 0x4c3   :  { %v1164_v49 = vsel %vm505_vm4, %v1146_v6, %v1152_v36 }
 0x4c4   :  { %v1180_v32 = vmul.f32 %v1164_v49, %v12301_v30 }
 0x4c5   :  { %1498 = vmatpush2.bf16.msra.mxu1 %v1369_v18 }
 0x4c6   :  { %1499 = vmatprep.subr.bf16.mxu1 %v1366_v44  ;;  %v1140_v3 = vpop.permute.xlu1 %1139  ;;  %v1360_v10 = vpack.c.bf16 %v1180_v32, %v1176_v57 }
 0x4c7   :  { %v1167_v22 = vsel %vm505_vm4, %v1140_v3, %v1146_v6 }
 0x4c8   :  { %v1179_v54 = vmul.f32 %v1167_v22, %v12302_v17  ;;  %1450 = vmatprep.subr.bf16.mxu0 %v1360_v10 }
 0x4c9   :  { %1500 = vmatpush2.bf16.msra.mxu1 %v1365_v29 }
 0x4ca   :  { %v1359_v27 = vpack.c.bf16 %v1179_v54, %v1175_v45  ;;  %v1158_v37 = vpop.permute.xlu1 %1157 }
 0x4cb   :  { %v1161_v59 = vsel %vm505_vm4, %v1152_v36, %v1158_v37  ;;  %v1170_v6 = vsel %vm505_vm4, %v1158_v37, %v1140_v3 }
 0x4cc   :  { %v1181_v23 = vmul.f32 %v1161_v59, %v12303_v40  ;;  %v1182_v38 = vmul.f32 %v1170_v6, %v12304_v12  ;;  %1451 = vmatpush2.bf16.msra.mxu0 %v1359_v27 }
 0x4ce   :  { %v1361_v19 = vpack.c.bf16 %v1181_v23, %v1177_v1  ;;  %v1362_v5 = vpack.c.bf16 %v1182_v38, %v1178_v31 }
 0x4cf   :  { %1453 = vmatmul.mubr.bf16.vlgmr.msra.gmra.mxu0 %v5775_v26 }
 0x4d0   :  { %1501 = vmatprep.subr.bf16.mxu1 %v1362_v5  ;;  %5530 = vmatprep.mubr.msk.bf16.mxu0 %vm1401_vm10, %v5527_v28 }
 0x4d1   :  { %1502 = vmatpush2.bf16.msra.mxu1 %v1361_v19 }
 0x4d4   :  { %1504 = vmatmul.mubr.bf16.vlgmr.msra.gmra.mxu1 %v5775_v26 }
 0x4d5   :  { %5533 = vmatprep.mubr.msk.bf16.mxu1 %vm1401_vm10, %v5527_v28 }
 0x4d7   :  { %1463 = vmatmul.mubr.bf16.gmra.mxu0 %v5526_v61 }
 0x4dc   :  { %1514 = vmatmul.mubr.bf16.gmra.mxu1 %v5526_v61 }
 0x58f   :  { %v7751_v36 = vpop.f32.mrf.mxu0 }
 0x590   :  { %v1540_v9 = vmul.f32 %v7751_v36, %v7751_v36 }
 0x591   :  { %v7755_v18 = vpop.f32.mrf.mxu0 }
 0x592   :  { %v1522_v49 = vadd.f32 %v7755_v18, %v7751_v36  ;;  %v1541_v57 = vmul.f32 %v7755_v18, %v7755_v18 }
 0x593   :  { %v7761_v32 = vpop.f32.mrf.mxu0 }
 0x594   :  { %v1552_v44 = vadd.f32 %v1541_v57, %v1540_v9  ;;  %v7763_v58 = vpop.f32.mrf.mxu1  ;;  %v1544_v10 = vmul.f32 %v7761_v32, %v7761_v32 }
 0x595   :  { %v1523_v62 = vadd.f32 %v1522_v49, %v7763_v58  ;;  %v1542_v51 = vmul.f32 %v7763_v58, %v7763_v58  ;;  %v7768_v3 = vpop.f32.mrf.mxu0 }
 0x596   :  { %v1527_v29 = vadd.f32 %v7768_v3, %v7761_v32  ;;  %v1545_v22 = vmul.f32 %v7768_v3, %v7768_v3  ;;  %v7776_v45 = vpop.f32.mrf.mxu1 }
 0x597   :  { %v1553_v54 = vadd.f32 %v1552_v44, %v1542_v51  ;;  %v1524_v14 = vadd.f32 %v1523_v62, %v7776_v45  ;;  %v1543_v55 = vmul.f32 %v7776_v45, %v7776_v45  ;;  %v7781_v60 = vpop.f32.mrf.mxu0 }
 0x598   :  { %v1557_v27 = vadd.f32 %v1545_v22, %v1544_v10  ;;  %v7783_v37 = vpop.f32.mrf.mxu1  ;;  %v1548_v59 = vmul.f32 %v7781_v60, %v7781_v60 }
 0x599   :  { %v1528_v6 = vadd.f32 %v1527_v29, %v7783_v37  ;;  %v1546_v26 = vmul.f32 %v7783_v37, %v7783_v37  ;;  %1525 = vadd.xlane.f32.xlu0 %v1524_v14  ;;  %v7790_v28 = vpop.f32.mrf.mxu0  ;;  %v1554_v61 = vadd.f32 %v1553_v54, %v1543_v55 }
 0x59a   :  { %v7792_v1 = vpop.f32.mrf.mxu1  ;;  %v1532_v31 = vadd.f32 %v7790_v28, %v7781_v60  ;;  %v1549_v23 = vmul.f32 %v7790_v28, %v7790_v28 }
 0x59b   :  { %v1558_v38 = vadd.f32 %v1557_v27, %v1546_v26  ;;  %v1529_v19 = vadd.f32 %v1528_v6, %v7792_v1  ;;  %v1547_v5 = vmul.f32 %v7792_v1, %v7792_v1  ;;  %v1468_v9 = vpop.f32.mrf.mxu0 }
 0x59c   :  { %v1562_v49 = vadd.f32 %v1549_v23, %v1548_v59  ;;  %v7801_v57 = vpop.f32.mrf.mxu1 }
 0x59d   :  { %1555 = vadd.xlane.f32.xlu0 %v1554_v61  ;;  %1530 = vadd.xlane.f32.xlu1 %v1529_v19  ;;  %v1533_v44 = vadd.f32 %v1532_v31, %v7801_v57  ;;  %v1550_v62 = vmul.f32 %v7801_v57, %v7801_v57  ;;  %v1469_v51 = vpop.f32.mrf.mxu0  ;;  %v1559_v14 = vadd.f32 %v1558_v38, %v1547_v5 }
 0x59e   :  { %v7806_v10 = vpop.f32.mrf.mxu1 }
 0x59f   :  { %v1563_v29 = vadd.f32 %v1562_v49, %v1550_v62  ;;  %v1534_v22 = vadd.f32 %v1533_v44, %v7806_v10  ;;  %v1551_v54 = vmul.f32 %v7806_v10, %v7806_v10 }
 0x5a0   :  { %v1519_v55 = vpop.f32.mrf.mxu1 }
 0x5a1   :  { %1560 = vadd.xlane.f32.xlu0 %v1559_v14  ;;  %1535 = vadd.xlane.f32.xlu1 %v1534_v22  ;;  %v1564_v27 = vadd.f32 %v1563_v29, %v1551_v54 }
 0x5a2   :  { %v1520_v59 = vpop.f32.mrf.mxu1 }
 0x5a3   :  { %v1582_v59 = vld [vmem:[#allocation6] sm:$0xff] }
 0x5a5   :  { %1565 = vadd.xlane.f32.xlu0 %v1564_v27 }
 0x622   :  { %v1526_v6 = vpop.xlane.xlu0 %1525 }
 0x623   :  { %v1537_v26 = vmul.f32 0.001953125, %v1526_v6 }
 0x625   :  { %v1570_v19 = vmul.f32 %v1537_v26, %v1537_v26 }
 0x626   :  { %v1556_v31 = vpop.xlane.xlu0 %1555  ;;  %v1531_v23 = vpop.xlane.xlu1 %1530 }
 0x627   :  { %v1567_v61 = vmul.f32 0.001953125, %v1556_v31  ;;  %v1538_v9 = vmul.f32 0.001953125, %v1531_v23  ;;  %v1583_v23 = vld [vmem:[#allocation6 + $0x8] sm:$0xff] }
 0x629   :  { %v1573_v49 = vsub.f32 %v1567_v61, %v1570_v19  ;;  %v1571_v0 = vmul.f32 %v1538_v9, %v1538_v9  ;;  %v1588_v19 = vld [vmem:[#allocation7] sm:$0xff] }
 0x62a   :  { %v1561_v62 = vpop.xlane.xlu0 %1560  ;;  %v1536_v44 = vpop.xlane.xlu1 %1535 }
 0x62b   :  { %v1576_v51 = vadd.f32 0.0001, %v1573_v49  ;;  %v1568_v33 = vmul.f32 0.001953125, %v1561_v62  ;;  %v1539_v38 = vmul.f32 0.001953125, %v1536_v44 }
 0x62d   :  { %5891 = vrsqrt.f32 %v1576_v51  ;;  %v1574_v5 = vsub.f32 %v1568_v33, %v1571_v0  ;;  %v1572_v22 = vmul.f32 %v1539_v38, %v1539_v38  ;;  %v1589_v51 = vld [vmem:[#allocation7 + $0x8] sm:$0xff]  ;;  %v1584_v33 = vld [vmem:[#allocation6 + $0x10] sm:$0xff] }
 0x62e   :  { %v1566_v29 = vpop.xlane.xlu0 %1565 }
 0x62f   :  { %v1577_v54 = vadd.f32 0.0001, %v1574_v5  ;;  %v1569_v14 = vmul.f32 0.001953125, %v1566_v29 }
 0x631   :  { %5893 = vrsqrt.f32 %v1577_v54  ;;  %v1575_v55 = vsub.f32 %v1569_v14, %v1572_v22  ;;  %v1590_v54 = vld [vmem:[#allocation7 + $0x10] sm:$0xff] }
 0x633   :  { %v1578_v27 = vadd.f32 0.0001, %v1575_v55 }
 0x635   :  { %5895 = vrsqrt.f32 %v1578_v27 }
 0x63a   :  { %v5892_v6 = vpop.eup %5891 }
 0x63b   :  { %v1585_v31 = vmul.f32 %v5892_v6, %v1582_v59 }
 0x63d   :  { %1599 = vperm.xlu1 %5741, %v1585_v31   ;;  %v1591_v61 = vmul.f32 %v1585_v31, %v1537_v26 }
 0x63e   :  { %v5894_v49 = vpop.eup %5893 }
 0x63f   :  { %v1586_v62 = vmul.f32 %v5894_v49, %v1583_v23  ;;  %v1594_v44 = vsub.f32 %v1588_v19, %v1591_v61 }
 0x641   :  { %1604 = vperm.xlu0 %5742, %v1586_v62   ;;  %1626 = vperm.xlu1 %5741, %v1594_v44   ;;  %v1592_v0 = vmul.f32 %v1586_v62, %v1538_v9 }
 0x642   :  { %v5896_v5 = vpop.eup %5895 }
 0x643   :  { %v1595_v29 = vsub.f32 %v1589_v51, %v1592_v0  ;;  %v1587_v22 = vmul.f32 %v5896_v5, %v1584_v33 }
 0x645   :  { %1631 = vperm.xlu1 %5741, %v1595_v29   ;;  %1609 = vperm.xlu0 %5742, %v1587_v22   ;;  %v1593_v14 = vmul.f32 %v1587_v22, %v1539_v38 }
 0x647   :  { %v1596_v55 = vsub.f32 %v1590_v54, %v1593_v14 }
 0x649   :  { %1636 = vperm.xlu1 %5741, %v1596_v55  }
 0x6b8   :  { %v1600_v27 = vpop.permute.xlu1 %1599 }
 0x6b9   :  { %v1612_v26 = vmul.f32 %v1600_v27, %v7751_v36  ;;  %v1613_v31 = vmul.f32 %v1600_v27, %v7755_v18  ;;  %v1614_v62 = vmul.f32 %v1600_v27, %v7763_v58 }
 0x6bc   :  { %v1627_v59 = vpop.permute.xlu1 %1626  ;;  %v1605_v6 = vpop.permute.xlu0 %1604 }
 0x6bd   :  { %v1639_v23 = vadd.f32 %v1627_v59, %v1612_v26  ;;  %v1616_v19 = vmul.f32 %v1605_v6, %v7761_v32  ;;  %v1640_v9 = vadd.f32 %v1627_v59, %v1613_v31  ;;  %v1617_v38 = vmul.f32 %v1605_v6, %v7768_v3 }
 0x6be   :  { %v1641_v36 = vadd.f32 %v1627_v59, %v1614_v62  ;;  %v1615_v32 = vmul.f32 %v1600_v27, %v7776_v45  ;;  %v1618_v0 = vmul.f32 %v1605_v6, %v7783_v37  ;;  %v1619_v14 = vmul.f32 %v1605_v6, %v7792_v1 }
 0x6bf   :  { %v7814_v61 = vmax.f32 %v1639_v23, 0.0  ;;  %v7820_v51 = vmax.f32 %v1640_v9, 0.0  ;;  %v5782_v9 = vld [vmem:[%s11837_s21 + $0x38] sm:$0xff]  }
 0x6c0   :  { %v1632_v49 = vpop.permute.xlu1 %1631  ;;  %v1610_v58 = vpop.permute.xlu0 %1609  ;;  %v1642_v3 = vadd.f32 %v1627_v59, %v1615_v32  ;;  %v7830_v5 = vmax.f32 %v1641_v36, 0.0  ;;  %v5785_v36 = vld [vmem:[%s11837_s21 + $0xf0] sm:$0xff]  }
 0x6c1   :  { %12305 = vst [vmem:[#allocation86_spill] sm:$0xff] %v7814_v61  ;;  %v1643_v44 = vadd.f32 %v1632_v49, %v1616_v19  ;;  %1727 = vrot.lane.b32.xlu0 %v7814_v61, %s6330_s13  ;;  %12306 = vst [vmem:[#allocation84_spill] sm:$0xff] %v7820_v51  ;;  %v1644_v33 = vadd.f32 %v1632_v49, %v1617_v38  ;;  %v1645_v29 = vadd.f32 %v1632_v49, %v1618_v0  ;;  %v5787_v32 = vld [vmem:[%s11837_s21 + $0xb0] sm:$0xff]   ;;  %v5788_v0 = vld [vmem:[%s11837_s21 + $0x68] sm:$0xff]  }
 0x6c2   :  { %12308 = vst [vmem:[#allocation72_spill] sm:$0xff] %v7830_v5  ;;  %v1620_v45 = vmul.f32 %v1610_v58, %v7781_v60  ;;  %v7840_v37 = vmax.f32 %v1642_v3, 0.0  ;;  %v1646_v55 = vadd.f32 %v1632_v49, %v1619_v14  ;;  %v1621_v59 = vmul.f32 %v1610_v58, %v7790_v28  ;;  %v5780_v28 = vld [vmem:[%s11837_s21 + $0x78] sm:$0xff]   ;;  %v5784_v49 = vld [vmem:[%s11837_s21 + $0x70] sm:$0xff]   ;;  %v5792_v14 = vld [vmem:[%s11837_s21 + $0x60] sm:$0xff]  }
 0x6c3   :  { %v7822_v18 = vmax.f32 %v1643_v44, 0.0  ;;  %v7832_v22 = vmax.f32 %v1644_v33, 0.0  ;;  %v7842_v27 = vmax.f32 %v1645_v29, 0.0  ;;  %v1622_v31 = vmul.f32 %v1610_v58, %v7801_v57  ;;  %v5781_v57 = vld [vmem:[%s11837_s21 + $0xf8] sm:$0xff]   ;;  %5648 = vmatprep.subr.bf16.mxu0 %v5780_v28  ;;  %v5786_v33 = vld [vmem:[%s11837_s21 + $0x30] sm:$0xff]   ;;  %v5790_v29 = vld [vmem:[%s11837_s21 + $0x28] sm:$0xff]  }
 0x6c4   :  { %v1637_v54 = vpop.permute.xlu1 %1636  ;;  %12310 = vst [vmem:[#allocation83_spill] sm:$0xff] %v7840_v37  ;;  %v7850_v60 = vmax.f32 %v1646_v55, 0.0  ;;  %v1623_v19 = vmul.f32 %v1610_v58, %v7806_v10  ;;  %v5783_v10 = vld [vmem:[%s11837_s21 + $0xb8] sm:$0xff]   ;;  %5676 = vmatprep.subr.bf16.mxu1 %v5781_v57  ;;  %5649 = vmatpush3.bf16.msra.mxu0 %v5782_v9  ;;  %v5789_v58 = vld [vmem:[%s11837_s21 + $0xe8] sm:$0xff]   ;;  %v5794_v55 = vld [vmem:[%s11837_s21 + $0x20] sm:$0xff]  }
 0x6c5   :  { %12307 = vst [vmem:[#allocation73_spill] sm:$0xff] %v7822_v18  ;;  %1733 = vrot.lane.b32.xlu0 %v7820_v51, %s6330_s13  ;;  %1729 = vrot.lane.b32.xlu1 %v7822_v18, %s6330_s13  ;;  %12309 = vst [vmem:[#allocation75_spill] sm:$0xff] %v7832_v22  ;;  %v1647_v26 = vadd.f32 %v1637_v54, %v1620_v45  ;;  %v1648_v1 = vadd.f32 %v1637_v54, %v1621_v59  ;;  %v5793_v45 = vld [vmem:[%s11837_s21 + $0xe0] sm:$0xff]   ;;  %v5800_v9 = vld [vmem:[%s11837_s21 + $0x50] sm:$0xff]  }
 0x6c6   :  { %12311 = vst [vmem:[#allocation85_spill] sm:$0xff] %v7842_v27  ;;  %12312 = vst [vmem:[#allocation74_spill] sm:$0xff] %v7850_v60  ;;  %v1649_v6 = vadd.f32 %v1637_v54, %v1622_v31  ;;  %v1650_v62 = vadd.f32 %v1637_v54, %v1623_v19  ;;  %5677 = vmatpush3.bf16.msra.mxu1 %v5783_v10  ;;  %5650 = vmatprep.subr.bf16.mxu0 %v5784_v49  ;;  %v5791_v54 = vld [vmem:[%s11837_s21 + $0xa8] sm:$0xff]   ;;  %v5796_v31 = vld [vmem:[%s11837_s21 + $0x58] sm:$0xff]  }
 0x6c7   :  { %v7852_v23 = vmax.f32 %v1647_v26, 0.0  ;;  %v7874_v38 = vmax.f32 %v1648_v1, 0.0  ;;  %5678 = vmatprep.subr.bf16.mxu1 %v5785_v36  ;;  %v5795_v26 = vld [vmem:[%s11837_s21 + $0xa0] sm:$0xff]   ;;  %v5797_v1 = vld [vmem:[%s11837_s21 + $0xd8] sm:$0xff]   ;;  %v5801_v10 = vld [vmem:[%s11837_s21 + $0xd0] sm:$0xff]  }
 0x6c8   :  { %v7876_v44 = vmax.f32 %v1649_v6, 0.0  ;;  %v7897_v3 = vmax.f32 %v1650_v62, 0.0  ;;  %5651 = vmatpush3.bf16.msra.mxu0 %v5786_v33  ;;  %v5798_v6 = vld [vmem:[%s11837_s21 + $0x18] sm:$0xff]   ;;  %v5802_v49 = vld [vmem:[%s11837_s21 + $0x10] sm:$0xff]  }
 0x6c9   :  { %1739 = vrot.lane.b32.xlu0 %v7830_v5, %s6330_s13  ;;  %1735 = vrot.lane.b32.xlu1 %v7832_v22, %s6330_s13  ;;  %12313 = vst [vmem:[#allocation90_spill] sm:$0xff] %v7852_v23  ;;  %12314 = vst [vmem:[#allocation88_spill] sm:$0xff] %v7874_v38  ;;  %v5799_v19 = vld [vmem:[%s11837_s21 + $0x98] sm:$0xff]   ;;  %v5803_v62 = vld [vmem:[%s11837_s21 + $0x90] sm:$0xff]  }
 0x6ca   :  { %12315 = vst [vmem:[#allocation92_spill] sm:$0xff] %v7876_v44  ;;  %12316 = vst [vmem:[#allocation89_spill] sm:$0xff] %v7897_v3  ;;  %5679 = vmatpush3.bf16.msra.mxu1 %v5787_v32  ;;  %5652 = vmatprep.subr.bf16.mxu0 %v5788_v0  ;;  %v5804_v0 = vld [vmem:[%s11837_s21 + $0x48] sm:$0xff]  }
 0x6cb   :  { %5680 = vmatprep.subr.bf16.mxu1 %v5789_v58  ;;  %v5805_v58 = vld [vmem:[%s11837_s21 + $0xc8] sm:$0xff]  }
 0x6cc   :  { %5653 = vmatpush3.bf16.msra.mxu0 %v5790_v29 }
 0x6cd   :  { %1745 = vrot.lane.b32.xlu0 %v7840_v37, %s6330_s13  ;;  %1741 = vrot.lane.b32.xlu1 %v7842_v27, %s6330_s13 }
 0x6ce   :  { %5681 = vmatpush3.bf16.msra.mxu1 %v5791_v54  ;;  %5654 = vmatprep.subr.bf16.mxu0 %v5792_v14  ;;  %v5806_v54 = vld [vmem:[%s11837_s21 + $0x8] sm:$0xff]  }
 0x6cf   :  { %5682 = vmatprep.subr.bf16.mxu1 %v5793_v45  ;;  %v5807_v14 = vld [vmem:[%s11837_s21 + $0x88] sm:$0xff]  }
 0x6d0   :  { %5655 = vmatpush3.bf16.msra.mxu0 %v5794_v55 }
 0x6d1   :  { %1747 = vrot.lane.b32.xlu1 %v7850_v60, %s6330_s13  ;;  %1731 = vrot.lane.b32.xlu0 %v7852_v23, %s6330_s13 }
 0x6d2   :  { %5683 = vmatpush3.bf16.msra.mxu1 %v5795_v26  ;;  %5656 = vmatprep.subr.bf16.mxu0 %v5796_v31 }
 0x6d3   :  { %5684 = vmatprep.subr.bf16.mxu1 %v5797_v1 }
 0x6d4   :  { %5657 = vmatpush3.bf16.msra.mxu0 %v5798_v6 }
 0x6d5   :  { %1737 = vrot.lane.b32.xlu1 %v7874_v38, %s6330_s13  ;;  %1743 = vrot.lane.b32.xlu0 %v7876_v44, %s6330_s13 }
 0x6d6   :  { %5685 = vmatpush3.bf16.msra.mxu1 %v5799_v19  ;;  %5658 = vmatprep.subr.bf16.mxu0 %v5800_v9  ;;  %v5808_v19 = vld [vmem:[%s11837_s21 + $0x40] sm:$0xff]  }
 0x6d7   :  { %5686 = vmatprep.subr.bf16.mxu1 %v5801_v10  ;;  %v5809_v9 = vld [vmem:[%s11837_s21 + $0xc0] sm:$0xff]  }
 0x6d8   :  { %5659 = vmatpush3.bf16.msra.mxu0 %v5802_v49  ;;  %v5810_v10 = vld [vmem:[%s11837_s21] sm:$0xff]  }
 0x6d9   :  { %1749 = vrot.lane.b32.xlu1 %v7897_v3, %s6330_s13  ;;  %5660 = vmatprep.subr.bf16.mxu0 %v5804_v0  ;;  %v5811_v49 = vld [vmem:[%s11837_s21 + $0x80] sm:$0xff]   ;;  %s6334_s21 = smov 7  }
 0x6da   :  { %5687 = vmatpush3.bf16.msra.mxu1 %v5803_v62 }
 0x6db   :  { %5688 = vmatprep.subr.bf16.mxu1 %v5805_v58 }
 0x6dc   :  { %5661 = vmatpush3.bf16.msra.mxu0 %v5806_v54 }
 0x6dd   :  { %5662 = vmatprep.subr.bf16.mxu0 %v5808_v19 }
 0x6de   :  { %5689 = vmatpush3.bf16.msra.mxu1 %v5807_v14 }
 0x6df   :  { %5690 = vmatprep.subr.bf16.mxu1 %v5809_v9 }
 0x6e0   :  { %5663 = vmatpush3.bf16.msra.mxu0 %v5810_v10 }
 0x6e2   :  { %5691 = vmatpush3.bf16.msra.mxu1 %v5811_v49 }
 0x733   :  { %v1728_v59 = vpop.permute.xlu0 %1727 }
 0x737   :  { %v1734_v28 = vpop.permute.xlu0 %1733  ;;  %v1730_v57 = vpop.permute.xlu1 %1729 }
 0x738   :  { %v7945_v36 = vsel %vm505_vm4, %v1728_v59, %v1734_v28 }
 0x739   :  { %v7963_v45 = vmax.f32 %v7814_v61, %v7945_v36 }
 0x73b   :  { %v1740_v33 = vpop.permute.xlu0 %1739  ;;  %v1736_v32 = vpop.permute.xlu1 %1735 }
 0x73c   :  { %v1758_v29 = vsel %vm505_vm4, %v1730_v57, %v1736_v32  ;;  %v7970_v26 = vsel %vm505_vm4, %v1734_v28, %v1740_v33 }
 0x73d   :  { %v7966_v55 = vmax.f32 %v7822_v18, %v1758_v29  ;;  %v7990_v62 = vmax.f32 %v7820_v51, %v7970_v26 }
 0x73f   :  { %v5743_v31 = vpack.i.bf16 %v7966_v55, %v7963_v45  ;;  %v1746_v1 = vpop.permute.xlu0 %1745  ;;  %v1742_v6 = vpop.permute.xlu1 %1741 }
 0x740   :  { %v1755_v28 = vsel %vm505_vm4, %v1736_v32, %v1742_v6  ;;  %v7995_v0 = vsel %vm505_vm4, %v1740_v33, %v1746_v1  ;;  %v7999_v32 = vsel %vm505_vm4, %v1746_v1, %v1728_v59  ;;  %v12319_v59 = vmov 0  }
 0x741   :  { %5744 = vrot.lane.b32.xlu0 %v5743_v31, %s6329_s4  ;;  %12317 = vst [vmem:[#allocation87_spill] sm:$0xff] %v7995_v0  ;;  %12318 = vst [vmem:[#allocation77_spill] sm:$0xff] %v7999_v32  ;;  %v8002_v58 = vmax.f32 %v7832_v22, %v1755_v28  ;;  %2280 = vmatprep.subr.bf16.mxu0 %v12319_v59  ;;  %v8013_v1 = vmax.f32 %v7830_v5, %v7995_v0 }
 0x742   :  { %v8017_v19 = vmax.f32 %v7840_v37, %v7999_v32  ;;  %v8031_v0 = vmul.f32 %v1758_v29, %v12302_v17  ;;  %v8034_v32 = vmul.f32 %v1755_v28, %v12301_v30 }
 0x743   :  { %v1732_v54 = vpop.permute.xlu0 %1731  ;;  %v1748_v14 = vpop.permute.xlu1 %1747  ;;  %v5748_v31 = vpack.i.bf16 %v8002_v58, %v7990_v62 }
 0x744   :  { %v1761_v33 = vsel %vm505_vm4, %v1748_v14, %v1730_v57  ;;  %v1752_v35 = vsel %vm505_vm4, %v1742_v6, %v1748_v14  ;;  %12320 = vst [vmem:[#allocation76_spill] sm:$0xff] %v8031_v0  ;;  %12321 = vst [vmem:[#allocation80_spill] sm:$0xff] %v8034_v32 }
 0x745   :  { %v8020_v9 = vmax.f32 %v7850_v60, %v1761_v33  ;;  %v8023_v10 = vmax.f32 %v7842_v27, %v1752_v35  ;;  %5749 = vrot.lane.b32.xlu1 %v5748_v31, %s6329_s4 }
 0x747   :  { %v5758_v57 = vpack.i.bf16 %v8020_v9, %v8017_v19  ;;  %v5753_v6 = vpack.i.bf16 %v8023_v10, %v8013_v1  ;;  %v1744_v49 = vpop.permute.xlu0 %1743  ;;  %v1738_v14 = vpop.permute.xlu1 %1737 }
 0x748   :  { %v1756_v34 = vsel %vm505_vm4, %v1738_v14, %v1744_v49  ;;  %v1759_v31 = vsel %vm505_vm4, %v1732_v54, %v1738_v14 }
 0x749   :  { %v8041_v16 = vmax.f32 %v7852_v23, %v1759_v31  ;;  %v8044_v13 = vmax.f32 %v7874_v38, %v1756_v34  ;;  %v8047_v20 = vmul.f32 %v1759_v31, %v12302_v17  ;;  %v8050_v29 = vmul.f32 %v1756_v34, %v12301_v30  ;;  %5754 = vrot.lane.b32.xlu0 %v5753_v6, %s6329_s4 }
 0x74a   :  { %5759 = vrot.lane.b32.xlu1 %v5758_v57, %s6329_s4  ;;  %v8061_v31 = vmul.f32 %v1761_v33, %v12304_v12  ;;  %v8064_v34 = vmul.f32 %v1752_v35, %v12303_v40 }
 0x74b   :  { %12322 = vst [vmem:[#allocation78_spill] sm:$0xff] %v8047_v20  ;;  %12323 = vst [vmem:[#allocation79_spill] sm:$0xff] %v8050_v29  ;;  %v5763_v14 = vpack.i.bf16 %v8044_v13, %v8041_v16  ;;  %v1750_v47 = vpop.permute.xlu1 %1749 }
 0x74c   :  { %12324 = vst [vmem:[#allocation91_spill] sm:$0xff] %v8061_v31  ;;  %12325 = vst [vmem:[#allocation93_spill] sm:$0xff] %v8064_v34  ;;  %v1753_v6 = vsel %vm505_vm4, %v1744_v49, %v1750_v47  ;;  %v1762_v57 = vsel %vm505_vm4, %v1750_v47, %v1732_v54 }
 0x74d   :  { %v1773_v28 = vmax.f32 %v7876_v44, %v1753_v6  ;;  %v1774_v25 = vmax.f32 %v7897_v3, %v1762_v57  ;;  %v8073_v0 = vmul.f32 %v1753_v6, %v12303_v40  ;;  %v8076_v39 = vmul.f32 %v1762_v57, %v12304_v12  ;;  %5764 = vrot.lane.b32.xlu0 %v5763_v14, %s6329_s4 }
 0x74f   :  { %12326 = vst [vmem:[#allocation81_spill] sm:$0xff] %v8073_v0  ;;  %12327 = vst [vmem:[#allocation82_spill] sm:$0xff] %v8076_v39  ;;  %v5768_v33 = vpack.i.bf16 %v1774_v25, %v1773_v28 }
 0x751   :  { %5769 = vrot.lane.b32.xlu1 %v5768_v33, %s6329_s4 }
 0x7b3   :  { %v5745_v47 = vpop.permute.xlu0 %5744 }
 0x7b4   :  { %v5747_v20 = vunpack.i.h.bf16 %v5745_v47  ;;  %v5746_v32 = vunpack.i.l.bf16 %v5745_v47 }
 0x7b7   :  { %v5750_v54 = vpop.permute.xlu1 %5749 }
 0x7b8   :  { %v5752_v6 = vunpack.i.h.bf16 %v5750_v54  ;;  %v5751_v40 = vunpack.i.l.bf16 %v5750_v54 }
 0x7ba   :  { %v1806_v57 = vsel %vm581_vm3, %v5747_v20, %v5752_v6  ;;  %v1805_v14 = vsel %vm581_vm3, %v5746_v32, %v5751_v40 }
 0x7bb   :  { %v5755_v12 = vpop.permute.xlu0 %5754  ;;  %v1815_v33 = vmax.f32 %v7966_v55, %v1806_v57  ;;  %v1811_v31 = vmax.f32 %v7963_v45, %v1805_v14 }
 0x7bc   :  { %v5757_v35 = vunpack.i.h.bf16 %v5755_v12  ;;  %v5756_v34 = vunpack.i.l.bf16 %v5755_v12  ;;  %v5760_v0 = vpop.permute.xlu1 %5759 }
 0x7bd   :  { %v5762_v29 = vunpack.i.h.bf16 %v5760_v0  ;;  %v5761_v49 = vunpack.i.l.bf16 %v5760_v0  ;;  %v1823_v50 = vpack.c.bf16 %v1815_v33, %v1811_v31 }
 0x7be   :  { %v1802_v47 = vsel %vm581_vm3, %v5751_v40, %v5756_v34  ;;  %v1803_v54 = vsel %vm581_vm3, %v5752_v6, %v5757_v35 }
 0x7bf   :  { %v1800_v39 = vsel %vm581_vm3, %v5757_v35, %v5762_v29  ;;  %v1799_v15 = vsel %vm581_vm3, %v5756_v34, %v5761_v49  ;;  %v5765_v12 = vpop.permute.xlu0 %5764  ;;  %v1812_v41 = vmax.f32 %v7990_v62, %v1802_v47  ;;  %v1816_v0 = vmax.f32 %v8002_v58, %v1803_v54 }
 0x7c0   :  { %v1817_v55 = vmax.f32 %v8023_v10, %v1800_v39  ;;  %v1813_v45 = vmax.f32 %v8013_v1, %v1799_v15  ;;  %v5767_v57 = vunpack.i.h.bf16 %v5765_v12  ;;  %v5766_v40 = vunpack.i.l.bf16 %v5765_v12 }
 0x7c1   :  { %v1824_v14 = vpack.c.bf16 %v1816_v0, %v1812_v41  ;;  %v1808_v6 = vsel %vm581_vm3, %v5761_v49, %v5746_v32  ;;  %v1809_v35 = vsel %vm581_vm3, %v5762_v29, %v5747_v20 }
 0x7c2   :  { %v1814_v34 = vmax.f32 %v8017_v19, %v1808_v6  ;;  %v1818_v62 = vmax.f32 %v8020_v9, %v1809_v35  ;;  %v1825_v47 = vpack.c.bf16 %v1817_v55, %v1813_v45  ;;  %v1807_v15 = vsel %vm581_vm3, %v5766_v40, %v5767_v57 }
 0x7c3   :  { %v5770_v58 = vpop.permute.xlu1 %5769  ;;  %2055 = vmatprep.mubr.bf16.mxu0 %v1824_v14  ;;  %v1819_v19 = vmax.f32 %v8041_v16, %v1807_v15 }
 0x7c4   :  { %v5772_v39 = vunpack.i.h.bf16 %v5770_v58  ;;  %v5771_v1 = vunpack.i.l.bf16 %v5770_v58  ;;  %v1826_v41 = vpack.c.bf16 %v1818_v62, %v1814_v34  ;;  %2056 = vmatmul.mubr.bf16.vlgmr.msra.gmra.mxu0 %v1823_v50 }
 0x7c5   :  { %v1827_v50 = vpack.c.bf16 %v1819_v19, %v1819_v19 }
 0x7c6   :  { %2103 = vmatprep.mubr.bf16.mxu1 %v1826_v41  ;;  %v1804_v32 = vsel %vm581_vm3, %v5767_v57, %v5771_v1  ;;  %v1810_v20 = vsel %vm581_vm3, %v5772_v39, %v5766_v40  ;;  %v1801_v9 = vsel %vm581_vm3, %v5771_v1, %v5772_v39 }
 0x7c7   :  { %2104 = vmatmul.mubr.bf16.vlgmr.msra.gmra.mxu1 %v1825_v47  ;;  %v1820_v10 = vmax.f32 %v8044_v13, %v1804_v32  ;;  %v1822_v29 = vmax.f32 %v1774_v25, %v1810_v20  ;;  %v1821_v31 = vmax.f32 %v1773_v28, %v1801_v9 }
 0x7c9   :  { %v1828_v49 = vpack.c.bf16 %v1820_v10, %v1820_v10  ;;  %v1830_v33 = vpack.c.bf16 %v1822_v29, %v1822_v29  ;;  %v1829_v54 = vpack.c.bf16 %v1821_v31, %v1821_v31  ;;  %v5814_v29 = vld [vmem:[#allocation9 + $0x4] ss:$8 sps:$4 sm:$0xff]   ;;  %v8129_v31 = vld [vmem:[#allocation28 + $0x5] ss:$0 sm:$0xff] }
 0x7cb   :  { %2063 = vmatprep.mubr.bf16.mxu0 %v1828_v49  ;;  %2111 = vmatprep.mubr.bf16.mxu1 %v1830_v33 }
 0x7cc   :  { %2064 = vmatmul.mubr.bf16.gmra.mxu0 %v1827_v50 }
 0x7cd   :  { %5578 = vmatprep.mubr.msk.bf16.mxu0 %vm1401_vm10, %v5814_v29 }
 0x7cf   :  { %2112 = vmatmul.mubr.bf16.gmra.mxu1 %v1829_v54 }
 0x7d0   :  { %2641 = vmatprep.mubr.bf16.mxu1 %v12319_v59 }
 0x884   :  { %v5664_v12 = vpop.f32.mrf.mxu0 }
 0x886   :  { %v5665_v16 = vpop.f32.mrf.mxu0 }
 0x887   :  { %v5692_v0 = vpop.f32.mrf.mxu1  ;;  %v5666_v55 = vadd.f32 %v5665_v16, %v5664_v12  ;;  %v5569_v12 = vld [vmem:[#allocation28 + $0x3] ss:$0 sm:$0xff] }
 0x888   :  { %v5667_v45 = vpop.f32.mrf.mxu0 }
 0x889   :  { %v5693_v57 = vpop.f32.mrf.mxu1 }
 0x88a   :  { %v5694_v40 = vadd.f32 %v5693_v57, %v5692_v0  ;;  %v5668_v13 = vpop.f32.mrf.mxu0  ;;  %v5568_v57 = vld [vmem:[#allocation28 + $0x2] ss:$0 sm:$0xff] }
 0x88b   :  { %v5695_v25 = vpop.f32.mrf.mxu1  ;;  %v5669_v14 = vadd.f32 %v5668_v13, %v5667_v45 }
 0x88c   :  { %v2106_v28 = vadd.f32 %v5694_v40, %v5666_v55  ;;  %v5670_v6 = vpop.f32.mrf.mxu0 }
 0x88d   :  { %v5696_v35 = vpop.f32.mrf.mxu1 }
 0x88e   :  { %v5697_v34 = vadd.f32 %v5696_v35, %v5695_v25  ;;  %2179 = vrot.lane.b32.xlu0 %v2106_v28, %s6330_s13  ;;  %v5671_v62 = vpop.f32.mrf.mxu0 }
 0x88f   :  { %v5698_v47 = vpop.f32.mrf.mxu1  ;;  %v5672_v15 = vadd.f32 %v5671_v62, %v5670_v6 }
 0x890   :  { %v2109_v58 = vadd.f32 %v5697_v34, %v5669_v14  ;;  %v5673_v39 = vpop.f32.mrf.mxu0 }
 0x891   :  { %v5699_v1 = vpop.f32.mrf.mxu1 }
 0x892   :  { %v5700_v41 = vadd.f32 %v5699_v1, %v5698_v47  ;;  %2166 = vrot.lane.b32.xlu1 %v2109_v58, %s6326_s30  ;;  %v5674_v32 = vpop.f32.mrf.mxu0  ;;  %v2245_v20 = vpack.c.bf16 %v2109_v58, %v2106_v28 }
 0x893   :  { %v5701_v19 = vpop.f32.mrf.mxu1 }
 0x894   :  { %v2114_v9 = vadd.f32 %v5700_v41, %v5672_v15 }
 0x895   :  { %v5702_v10 = vpop.f32.mrf.mxu1 }
 0x896   :  { %2153 = vrot.lane.b32.xlu1 %v2114_v9, %s6334_s21  ;;  %2168 = vrot.lane.b32.xlu0 %v2114_v9, %s6326_s30 }
 0x89a   :  { %2149 = vrot.lane.b32.xlu1 %v2106_v28, %s6334_s21  ;;  %2164 = vrot.lane.b32.xlu0 %v2106_v28, %s6326_s30 }
 0x89e   :  { %2136 = vrot.lane.b32.xlu1 %v2109_v58, %s6304_s7  ;;  %2151 = vrot.lane.b32.xlu0 %v2109_v58, %s6334_s21 }
 0x8a2   :  { %2123 = vrot.lane.b32.xlu1 %v2114_v9, %s6335_s15  ;;  %2138 = vrot.lane.b32.xlu0 %v2114_v9, %s6304_s7 }
 0x8a6   :  { %2119 = vrot.lane.b32.xlu1 %v2106_v28, %s6335_s15  ;;  %2134 = vrot.lane.b32.xlu0 %v2106_v28, %s6304_s7 }
 0x8aa   :  { %2228 = vrot.lane.b32.xlu1 %v2114_v9, %s6336_s18  ;;  %2121 = vrot.lane.b32.xlu0 %v2109_v58, %s6335_s15 }
 0x8ae   :  { %2226 = vrot.lane.b32.xlu1 %v2109_v58, %s6336_s18  ;;  %2224 = vrot.lane.b32.xlu0 %v2106_v28, %s6336_s18 }
 0x8b2   :  { %2213 = vrot.lane.b32.xlu1 %v2114_v9, %s6337_s29  ;;  %2211 = vrot.lane.b32.xlu0 %v2109_v58, %s6337_s29 }
 0x8b6   :  { %2209 = vrot.lane.b32.xlu1 %v2106_v28, %s6337_s29  ;;  %2198 = vrot.lane.b32.xlu0 %v2114_v9, %s6338_s2 }
 0x8ba   :  { %2196 = vrot.lane.b32.xlu1 %v2109_v58, %s6338_s2  ;;  %2194 = vrot.lane.b32.xlu0 %v2106_v28, %s6338_s2 }
 0x8be   :  { %2183 = vrot.lane.b32.xlu1 %v2114_v9, %s6330_s13  ;;  %2181 = vrot.lane.b32.xlu0 %v2109_v58, %s6330_s13  ;;  %v5567_v58 = vld [vmem:[#allocation28 + $0x1] ss:$0 sm:$0xff] }
 0x900   :  { %v2180_v49 = vpop.permute.xlu0 %2179 }
 0x901   :  { %v2191_v33 = vmul.f32 %v8129_v31, %v2180_v49 }
 0x903   :  { %v2246_v50 = vpack.c.bf16 %v2191_v33, %v2114_v9  ;;  %v5573_v33 = vld [vmem:[#allocation28 + $0x8] ss:$0 sm:$0xff] }
 0x904   :  { %v2167_v54 = vpop.permute.xlu1 %2166 }
 0x905   :  { %2281 = vmatpush1.bf16.msra.mxu0 %v2246_v50  ;;  %v2177_v55 = vmul.f32 %v5569_v12, %v2167_v54 }
 0x906   :  { %2282 = vmatprep.subr.bf16.mxu0 %v12319_v59 }
 0x908   :  { %v2154_v16 = vpop.permute.xlu1 %2153  ;;  %v2169_v0 = vpop.permute.xlu0 %2168 }
 0x909   :  { %v2178_v45 = vmul.f32 %v5569_v12, %v2169_v0  ;;  %2283 = vmatpush1.bf16.msra.mxu0 %v2245_v20  ;;  %v2163_v28 = vmul.f32 %v5568_v57, %v2154_v16  ;;  %v5566_v20 = vld [vmem:[#allocation28] ss:$0 sm:$0xff] }
 0x90a   :  { %2284 = vmatprep.subr.bf16.mxu0 %v12319_v59 }
 0x90b   :  { %v2244_v40 = vpack.c.bf16 %v2178_v45, %v2177_v55 }
 0x90c   :  { %v2150_v13 = vpop.permute.xlu1 %2149  ;;  %v2165_v25 = vpop.permute.xlu0 %2164 }
 0x90d   :  { %v2176_v14 = vmul.f32 %v5569_v12, %v2165_v25  ;;  %2285 = vmatpush1.bf16.msra.mxu0 %v2244_v40  ;;  %v2161_v62 = vmul.f32 %v5568_v57, %v2150_v13 }
 0x90e   :  { %2286 = vmatprep.subr.bf16.mxu0 %v12319_v59 }
 0x90f   :  { %v2243_v6 = vpack.c.bf16 %v2176_v14, %v2163_v28  ;;  %v5572_v14 = vld [vmem:[#allocation28 + $0x7] ss:$0 sm:$0xff] }
 0x910   :  { %v2137_v35 = vpop.permute.xlu1 %2136  ;;  %v2152_v34 = vpop.permute.xlu0 %2151 }
 0x911   :  { %v2162_v47 = vmul.f32 %v5568_v57, %v2152_v34  ;;  %2287 = vmatpush1.bf16.msra.mxu0 %v2243_v6  ;;  %v2147_v41 = vmul.f32 %v5567_v58, %v2137_v35 }
 0x912   :  { %2288 = vmatprep.subr.bf16.mxu0 %v12319_v59 }
 0x913   :  { %v2242_v15 = vpack.c.bf16 %v2162_v47, %v2161_v62 }
 0x914   :  { %v2124_v39 = vpop.permute.xlu1 %2123  ;;  %v2139_v1 = vpop.permute.xlu0 %2138 }
 0x915   :  { %v2148_v32 = vmul.f32 %v5567_v58, %v2139_v1  ;;  %2289 = vmatpush1.bf16.msra.mxu0 %v2242_v15  ;;  %v2133_v29 = vmul.f32 %v5566_v20, %v2124_v39  ;;  %v5571_v39 = vld [vmem:[#allocation28 + $0x6] ss:$0 sm:$0xff] }
 0x916   :  { %2290 = vmatprep.subr.bf16.mxu0 %v12319_v59 }
 0x917   :  { %v2241_v19 = vpack.c.bf16 %v2148_v32, %v2147_v41 }
 0x918   :  { %v2120_v9 = vpop.permute.xlu1 %2119  ;;  %v2135_v10 = vpop.permute.xlu0 %2134 }
 0x919   :  { %v2146_v49 = vmul.f32 %v5567_v58, %v2135_v10  ;;  %2291 = vmatpush1.bf16.msra.mxu0 %v2241_v19  ;;  %v2131_v16 = vmul.f32 %v5566_v20, %v2120_v9 }
 0x91a   :  { %2292 = vmatprep.subr.bf16.mxu0 %v12319_v59 }
 0x91b   :  { %v2240_v50 = vpack.c.bf16 %v2146_v49, %v2133_v29 }
 0x91c   :  { %v2229_v54 = vpop.permute.xlu1 %2228  ;;  %v2122_v12 = vpop.permute.xlu0 %2121 }
 0x91d   :  { %v2238_v0 = vmul.f32 %v5573_v33, %v2229_v54  ;;  %v2132_v55 = vmul.f32 %v5566_v20, %v2122_v12  ;;  %2293 = vmatpush1.bf16.msra.mxu0 %v2240_v50 }
 0x91e   :  { %2294 = vmatprep.subr.bf16.mxu0 %v12319_v59 }
 0x91f   :  { %v2239_v45 = vpack.c.bf16 %v2132_v55, %v2131_v16  ;;  %v2252_v57 = vpack.c.bf16 %v2238_v0, %v2238_v0  ;;  %v2255_v0 = vld [vmem:[#allocation9 + $0x10] sm:$0xff] }
 0x920   :  { %v2227_v40 = vpop.permute.xlu1 %2226  ;;  %v2225_v13 = vpop.permute.xlu0 %2224 }
 0x921   :  { %2295 = vmatpush1.bf16.msra.mxu0 %v2239_v45  ;;  %v2237_v25 = vmul.f32 %v5573_v33, %v2227_v40  ;;  %v2236_v28 = vmul.f32 %v5573_v33, %v2225_v13  ;;  %v2278_v34 = vsel %vm687_vm1, %v2252_v57, 0  ;;  %v5812_v45 = vld [vmem:[#allocation9] ss:$8 sps:$4 sm:$0xff]   ;;  %v5577_v57 = vcombine.high %v2255_v0, %v2255_v0 }
 0x922   :  { %2300 = vmatprep.subr.bf16.mxu0 %v12319_v59  ;;  %v5576_v40 = vcombine.low %v2255_v0, %v2255_v0 }
 0x923   :  { %v2251_v62 = vpack.c.bf16 %v2237_v25, %v2236_v28 }
 0x924   :  { %v2214_v6 = vpop.permute.xlu1 %2213  ;;  %v2212_v35 = vpop.permute.xlu0 %2211 }
 0x925   :  { %2301 = vmatpush2.bf16.msra.mxu0 %v2278_v34  ;;  %v2223_v47 = vmul.f32 %v5572_v14, %v2214_v6  ;;  %v2222_v58 = vmul.f32 %v5572_v14, %v2212_v35 }
 0x926   :  { %2302 = vmatprep.subr.bf16.mxu0 %v12319_v59 }
 0x927   :  { %v2250_v41 = vpack.c.bf16 %v2223_v47, %v2222_v58 }
 0x928   :  { %v2210_v15 = vpop.permute.xlu1 %2209  ;;  %v2199_v1 = vpop.permute.xlu0 %2198 }
 0x929   :  { %2303 = vmatpush2.bf16.msra.mxu0 %v2251_v62  ;;  %v2221_v32 = vmul.f32 %v5572_v14, %v2210_v15  ;;  %v2208_v20 = vmul.f32 %v5571_v39, %v2199_v1  ;;  %v5819_v1 = vld [vmem:[#allocation27 + $0xe4] ss:$16 sps:$4 sm:$0xff]  }
 0x92a   :  { %2304 = vmatprep.subr.bf16.mxu0 %v12319_v59  ;;  %2609 = vmatprep.subr.bf16.mxu1 %v5819_v1  ;;  %v5829_v1 = vld [vmem:[#allocation27 + $0x60] ss:$16 sps:$4 sm:$0xff]  }
 0x92b   :  { %v2249_v10 = vpack.c.bf16 %v2221_v32, %v2208_v20 }
 0x92c   :  { %v2197_v19 = vpop.permute.xlu1 %2196  ;;  %v2195_v9 = vpop.permute.xlu0 %2194 }
 0x92d   :  { %2305 = vmatpush2.bf16.msra.mxu0 %v2250_v41  ;;  %v2207_v29 = vmul.f32 %v5571_v39, %v2197_v19  ;;  %v2206_v49 = vmul.f32 %v5571_v39, %v2195_v9  ;;  %v5817_v41 = vld [vmem:[#allocation27 + $0xe0] ss:$16 sps:$4 sm:$0xff]  }
 0x92e   :  { %2306 = vmatprep.subr.bf16.mxu0 %v12319_v59  ;;  %2610 = vmatpush1.bf16.msra.mxu1 %v5817_v41  ;;  %v2361_v41 = vld [vmem:[#allocation10] sm:$0xff] }
 0x92f   :  { %v2248_v54 = vpack.c.bf16 %v2207_v29, %v2206_v49  ;;  %v5822_v29 = vld [vmem:[#allocation27 + $0xc4] ss:$16 sps:$4 sm:$0xff]  }
 0x930   :  { %v2184_v33 = vpop.permute.xlu1 %2183  ;;  %v2182_v50 = vpop.permute.xlu0 %2181  ;;  %2611 = vmatprep.subr.bf16.mxu1 %v5822_v29  ;;  %v2367_v29 = vld [vmem:[#allocation12] sm:$0xff] }
 0x931   :  { %2307 = vmatpush2.bf16.msra.mxu0 %v2249_v10  ;;  %v2193_v12 = vmul.f32 %v8129_v31, %v2184_v33  ;;  %v2192_v16 = vmul.f32 %v8129_v31, %v2182_v50  ;;  %v5820_v33 = vld [vmem:[#allocation27 + $0xc0] ss:$16 sps:$4 sm:$0xff]  }
 0x932   :  { %2308 = vmatprep.subr.bf16.mxu0 %v12319_v59  ;;  %2612 = vmatpush1.bf16.msra.mxu1 %v5820_v33  ;;  %v5837_v33 = vld [vmem:[#allocation27 + $0x24] ss:$16 sps:$4 sm:$0xff]  }
 0x933   :  { %v2247_v55 = vpack.c.bf16 %v2193_v12, %v2192_v16 }
 0x935   :  { %2309 = vmatpush2.bf16.msra.mxu0 %v2248_v54 }
 0x936   :  { %2310 = vmatprep.subr.bf16.mxu0 %v12319_v59 }
 0x939   :  { %2311 = vmatpush2.bf16.msra.mxu0 %v2247_v55 }
 0x93c   :  { %2313 = vmatmul.mubr.bf16.vlgmr.msra.gmra.mxu0 %v5812_v45  ;;  %v5825_v45 = vld [vmem:[#allocation27 + $0xa4] ss:$16 sps:$4 sm:$0xff]  }
 0x93d   :  { %5579 = vmatprep.mubr.msk.bf16.mxu0 %vm1401_vm10, %v5577_v57  ;;  %2613 = vmatprep.subr.bf16.mxu1 %v5825_v45  ;;  %v2368_v45 = vld [vmem:[#allocation12 + $0x8] sm:$0xff] }
 0x944   :  { %2321 = vmatmul.mubr.bf16.gmra.mxu0 %v5576_v40 }
 0x9fc   :  { %v8149_v13 = vpop.f32.mrf.mxu0 }
 0x9fd   :  { %2328 = vadd.xlane.f32.xlu0 %v8149_v13  ;;  %v2337_v31 = vmul.f32 %v8149_v13, %v8149_v13 }
 0x9fe   :  { %v2316_v25 = vpop.f32.mrf.mxu0 }
 0x9ff   :  { %v5823_v25 = vld [vmem:[#allocation27 + $0xa0] ss:$16 sps:$4 sm:$0xff]  }
 0xa00   :  { %v8154_v28 = vpop.f32.mrf.mxu0  ;;  %2614 = vmatpush1.bf16.msra.mxu1 %v5823_v25 }
 0xa01   :  { %2340 = vadd.xlane.f32.xlu0 %v2337_v31  ;;  %2330 = vadd.xlane.f32.xlu1 %v8154_v28  ;;  %v2338_v6 = vmul.f32 %v8154_v28, %v8154_v28 }
 0xa02   :  { %v2319_v14 = vpop.f32.mrf.mxu0 }
 0xa04   :  { %v8159_v35 = vpop.f32.mrf.mxu0 }
 0xa05   :  { %2342 = vadd.xlane.f32.xlu0 %v2338_v6  ;;  %v2339_v34 = vmul.f32 %v8159_v35, %v8159_v35  ;;  %2332 = vadd.xlane.f32.xlu1 %v8159_v35 }
 0xa06   :  { %v2324_v62 = vpop.f32.mrf.mxu0 }
 0xa08   :  { %v2325_v47 = vpop.f32.mrf.mxu0 }
 0xa09   :  { %2344 = vadd.xlane.f32.xlu0 %v2339_v34  ;;  %v5828_v34 = vld [vmem:[#allocation27 + $0x84] ss:$16 sps:$4 sm:$0xff]   ;;  %v5826_v47 = vld [vmem:[#allocation27 + $0x80] ss:$16 sps:$4 sm:$0xff]  }
 0xa0a   :  { %v2326_v58 = vpop.f32.mrf.mxu0  ;;  %2615 = vmatprep.subr.bf16.mxu1 %v5828_v34 }
 0xa0b   :  { %2616 = vmatpush1.bf16.msra.mxu1 %v5826_v47 }
 0xa86   :  { %v2329_v15 = vpop.xlane.xlu0 %2328 }
 0xa87   :  { %v2334_v39 = vmul.f32 0.0078125, %v2329_v15  ;;  %v5831_v15 = vld [vmem:[#allocation27 + $0x64] ss:$16 sps:$4 sm:$0xff]  }
 0xa88   :  { %2617 = vmatprep.subr.bf16.mxu1 %v5831_v15 }
 0xa89   :  { %v2349_v19 = vmul.f32 %v2334_v39, %v2334_v39  ;;  %2618 = vmatpush1.bf16.msra.mxu1 %v5829_v1 }
 0xa8a   :  { %v2341_v32 = vpop.xlane.xlu0 %2340  ;;  %v2331_v20 = vpop.xlane.xlu1 %2330 }
 0xa8b   :  { %v2346_v9 = vmul.f32 0.0078125, %v2341_v32  ;;  %v2335_v10 = vmul.f32 0.0078125, %v2331_v20  ;;  %v5834_v32 = vld [vmem:[#allocation27 + $0x44] ss:$16 sps:$4 sm:$0xff]   ;;  %v5832_v20 = vld [vmem:[#allocation27 + $0x40] ss:$16 sps:$4 sm:$0xff]  }
 0xa8c   :  { %2619 = vmatprep.subr.bf16.mxu1 %v5834_v32 }
 0xa8d   :  { %v2352_v49 = vsub.f32 %v2346_v9, %v2349_v19  ;;  %v2350_v16 = vmul.f32 %v2335_v10, %v2335_v10  ;;  %2620 = vmatpush1.bf16.msra.mxu1 %v5832_v20 }
 0xa8e   :  { %v2343_v50 = vpop.xlane.xlu0 %2342  ;;  %v2333_v54 = vpop.xlane.xlu1 %2332  ;;  %2621 = vmatprep.subr.bf16.mxu1 %v5837_v33 }
 0xa8f   :  { %v2355_v12 = vadd.f32 0.0001, %v2352_v49  ;;  %v2347_v0 = vmul.f32 0.0078125, %v2343_v50  ;;  %v2336_v55 = vmul.f32 0.0078125, %v2333_v54  ;;  %v2362_v49 = vld [vmem:[#allocation10 + $0x8] sm:$0xff] }
 0xa90   :  { %v5835_v54 = vld [vmem:[#allocation27 + $0x20] ss:$16 sps:$4 sm:$0xff]  }
 0xa91   :  { %5897 = vrsqrt.f32 %v2355_v12  ;;  %v2353_v57 = vsub.f32 %v2347_v0, %v2350_v16  ;;  %v2351_v40 = vmul.f32 %v2336_v55, %v2336_v55  ;;  %2622 = vmatpush1.bf16.msra.mxu1 %v5835_v54  ;;  %v5841_v54 = vld [vmem:[#allocation27 + $0xe8] ss:$16 sps:$4 sm:$0xff]  }
 0xa92   :  { %v2345_v31 = vpop.xlane.xlu0 %2344 }
 0xa93   :  { %v2356_v14 = vadd.f32 0.0001, %v2353_v57  ;;  %v2348_v6 = vmul.f32 0.0078125, %v2345_v31  ;;  %v2363_v57 = vld [vmem:[#allocation10 + $0x10] sm:$0xff] }
 0xa94   :  { %v5838_v31 = vld [vmem:[#allocation27] ss:$16 sps:$4 sm:$0xff]  }
 0xa95   :  { %5899 = vrsqrt.f32 %v2356_v14  ;;  %v2354_v62 = vsub.f32 %v2348_v6, %v2351_v40  ;;  %v5840_v40 = vld [vmem:[#allocation27 + $0x4] ss:$16 sps:$4 sm:$0xff]  }
 0xa96   :  { %2623 = vmatprep.subr.bf16.mxu1 %v5840_v40  ;;  %v5847_v40 = vld [vmem:[#allocation27 + $0xa8] ss:$16 sps:$4 sm:$0xff]  }
 0xa97   :  { %v2357_v58 = vadd.f32 0.0001, %v2354_v62  ;;  %2624 = vmatpush1.bf16.msra.mxu1 %v5838_v31  ;;  %v2369_v62 = vld [vmem:[#allocation12 + $0x10] sm:$0xff]  ;;  %v5852_v31 = vld [vmem:[#allocation27 + $0x8c] ss:$16 sps:$4 sm:$0xff]  }
 0xa99   :  { %5901 = vrsqrt.f32 %v2357_v58 }
 0xa9e   :  { %v5898_v19 = vpop.eup %5897 }
 0xa9f   :  { %v2364_v9 = vmul.f32 %v5898_v19, %v2361_v41 }
 0xaa1   :  { %2378 = vperm.xlu1 %5741, %v2364_v9   ;;  %v2370_v50 = vmul.f32 %v2364_v9, %v2334_v39  ;;  %v5843_v39 = vld [vmem:[#allocation27 + $0xec] ss:$16 sps:$4 sm:$0xff]  }
 0xaa2   :  { %v5900_v12 = vpop.eup %5899  ;;  %2660 = vmatprep.subr.bf16.mxu1 %v5843_v39 }
 0xaa3   :  { %v2373_v16 = vsub.f32 %v2367_v29, %v2370_v50  ;;  %v2365_v0 = vmul.f32 %v5900_v12, %v2362_v49 }
 0xaa5   :  { %2396 = vperm.xlu1 %5741, %v2373_v16   ;;  %2383 = vperm.xlu0 %5742, %v2365_v0   ;;  %v2371_v25 = vmul.f32 %v2365_v0, %v2335_v10  ;;  %v5846_v16 = vld [vmem:[#allocation27 + $0xcc] ss:$16 sps:$4 sm:$0xff]   ;;  %v5844_v0 = vld [vmem:[#allocation27 + $0xc8] ss:$16 sps:$4 sm:$0xff]  }
 0xaa6   :  { %v5902_v14 = vpop.eup %5901 }
 0xaa7   :  { %v2374_v6 = vsub.f32 %v2368_v45, %v2371_v25  ;;  %v2366_v34 = vmul.f32 %v5902_v14, %v2363_v57 }
 0xaa9   :  { %2401 = vperm.xlu1 %5741, %v2374_v6   ;;  %2388 = vperm.xlu0 %5742, %v2366_v34   ;;  %v2372_v47 = vmul.f32 %v2366_v34, %v2336_v55  ;;  %v5850_v6 = vld [vmem:[#allocation27 + $0x88] ss:$16 sps:$4 sm:$0xff]   ;;  %v5855_v34 = vld [vmem:[#allocation27 + $0x6c] ss:$16 sps:$4 sm:$0xff]  }
 0xaab   :  { %v2375_v58 = vsub.f32 %v2369_v62, %v2372_v47  ;;  %v5853_v47 = vld [vmem:[#allocation27 + $0x68] ss:$16 sps:$4 sm:$0xff]  }
 0xaad   :  { %3271 = vrot.lane.b32.xlu0 %v7832_v22, %s6329_s4  ;;  %2406 = vperm.xlu1 %5741, %v2375_v58   ;;  %v5858_v58 = vld [vmem:[#allocation27 + $0x4c] ss:$16 sps:$4 sm:$0xff]  }
 0xab1   :  { %3283 = vrot.lane.b32.xlu0 %v7842_v27, %s6329_s4  ;;  %2909 = vrot.lane.b32.xlu1 %v7814_v61, %s6331_s16 }
 0xab5   :  { %3259 = vrot.lane.b32.xlu0 %v7822_v18, %s6329_s4  ;;  %2921 = vrot.lane.b32.xlu1 %v7820_v51, %s6331_s16 }
 0xab9   :  { %2815 = vrot.lane.b32.xlu0 %v7822_v18, %s6324_s9  ;;  %3273 = vrot.lane.b32.xlu1 %v7874_v38, %s6329_s4 }
 0xabd   :  { %2827 = vrot.lane.b32.xlu0 %v7832_v22, %s6324_s9  ;;  %3285 = vrot.lane.b32.xlu1 %v7876_v44, %s6329_s4 }
 0xac1   :  { %2851 = vrot.lane.b32.xlu0 %v7850_v60, %s6324_s9  ;;  %2945 = vrot.lane.b32.xlu1 %v7840_v37, %s6331_s16 }
 0xac5   :  { %3175 = vrot.lane.b32.xlu0 %v7832_v22, %s6328_s1  ;;  %3261 = vrot.lane.b32.xlu1 %v7852_v23, %s6329_s4 }
 0xac9   :  { %3187 = vrot.lane.b32.xlu0 %v7842_v27, %s6328_s1  ;;  %3269 = vrot.lane.b32.xlu1 %v7820_v51, %s6329_s4 }
 0xacd   :  { %3163 = vrot.lane.b32.xlu0 %v7822_v18, %s6328_s1  ;;  %3281 = vrot.lane.b32.xlu1 %v7830_v5, %s6329_s4 }
 0xad1   :  { %2719 = vrot.lane.b32.xlu0 %v7822_v18, %s6332_s27  ;;  %3257 = vrot.lane.b32.xlu1 %v7814_v61, %s6329_s4 }
 0xad5   :  { %2731 = vrot.lane.b32.xlu0 %v7832_v22, %s6332_s27  ;;  %2817 = vrot.lane.b32.xlu1 %v7852_v23, %s6324_s9 }
 0xad9   :  { %2755 = vrot.lane.b32.xlu0 %v7850_v60, %s6332_s27  ;;  %2829 = vrot.lane.b32.xlu1 %v7874_v38, %s6324_s9 }
 0xadd   :  { %3369 = vrot.lane.b32.xlu0 %v7874_v38, %s6327_s17  ;;  %2853 = vrot.lane.b32.xlu1 %v7897_v3, %s6324_s9 }
 0xae1   :  { %3381 = vrot.lane.b32.xlu0 %v7876_v44, %s6327_s17  ;;  %2813 = vrot.lane.b32.xlu1 %v7814_v61, %s6324_s9 }
 0xae5   :  { %3357 = vrot.lane.b32.xlu0 %v7852_v23, %s6327_s17  ;;  %2825 = vrot.lane.b32.xlu1 %v7820_v51, %s6324_s9 }
 0xae9   :  { %3365 = vrot.lane.b32.xlu0 %v7820_v51, %s6327_s17  ;;  %3177 = vrot.lane.b32.xlu1 %v7874_v38, %s6328_s1 }
 0xaed   :  { %3377 = vrot.lane.b32.xlu0 %v7830_v5, %s6327_s17  ;;  %3189 = vrot.lane.b32.xlu1 %v7876_v44, %s6328_s1 }
 0xaf1   :  { %3353 = vrot.lane.b32.xlu0 %v7814_v61, %s6327_s17  ;;  %2849 = vrot.lane.b32.xlu1 %v7840_v37, %s6324_s9 }
 0xaf5   :  { %2933 = vrot.lane.b32.xlu0 %v7830_v5, %s6331_s16  ;;  %3165 = vrot.lane.b32.xlu1 %v7852_v23, %s6328_s1 }
 0xaf9   :  { %3009 = vrot.lane.b32.xlu0 %v7852_v23, %s6326_s30  ;;  %3173 = vrot.lane.b32.xlu1 %v7820_v51, %s6328_s1 }
 0xafd   :  { %3021 = vrot.lane.b32.xlu0 %v7874_v38, %s6326_s30  ;;  %3185 = vrot.lane.b32.xlu1 %v7830_v5, %s6328_s1 }
 0xb01   :  { %3045 = vrot.lane.b32.xlu0 %v7897_v3, %s6326_s30  ;;  %3161 = vrot.lane.b32.xlu1 %v7814_v61, %s6328_s1 }
 0xb05   :  { %2841 = vrot.lane.b32.xlu0 %v7876_v44, %s6324_s9  ;;  %2721 = vrot.lane.b32.xlu1 %v7852_v23, %s6332_s27 }
 0xb09   :  { %3005 = vrot.lane.b32.xlu0 %v7814_v61, %s6326_s30  ;;  %2733 = vrot.lane.b32.xlu1 %v7874_v38, %s6332_s27 }
 0xb0d   :  { %3017 = vrot.lane.b32.xlu0 %v7820_v51, %s6326_s30  ;;  %2757 = vrot.lane.b32.xlu1 %v7897_v3, %s6332_s27 }
 0xb11   :  { %3041 = vrot.lane.b32.xlu0 %v7840_v37, %s6326_s30  ;;  %2717 = vrot.lane.b32.xlu1 %v7814_v61, %s6332_s27 }
 0xb15   :  { %2837 = vrot.lane.b32.xlu0 %v7830_v5, %s6324_s9  ;;  %2729 = vrot.lane.b32.xlu1 %v7820_v51, %s6332_s27 }
 0xb19   :  { %2753 = vrot.lane.b32.xlu1 %v7840_v37, %s6332_s27 }
 0xb1c   :  { %v2379_v10 = vpop.permute.xlu1 %2378 }
 0xb1d   :  { %3367 = vrot.lane.b32.xlu1 %v7832_v22, %s6327_s17  ;;  %v2391_v1 = vmul.f32 %v2379_v10, %v8149_v13 }
 0xb20   :  { %v2397_v55 = vpop.permute.xlu1 %2396  ;;  %v2384_v15 = vpop.permute.xlu0 %2383 }
 0xb21   :  { %3379 = vrot.lane.b32.xlu1 %v7842_v27, %s6327_s17  ;;  %v2409_v41 = vadd.f32 %v2397_v55, %v2391_v1  ;;  %v2392_v32 = vmul.f32 %v2384_v15, %v8154_v28  ;;  %v5856_v15 = vld [vmem:[#allocation27 + $0x48] ss:$16 sps:$4 sm:$0xff]   ;;  %v5861_v1 = vld [vmem:[#allocation27 + $0x2c] ss:$16 sps:$4 sm:$0xff]  }
 0xb23   :  { %v2412_v29 = vmax.f32 %v2409_v41, 0.0 }
 0xb24   :  { %v2402_v20 = vpop.permute.xlu1 %2401  ;;  %v2389_v19 = vpop.permute.xlu0 %2388 }
 0xb25   :  { %v2410_v9 = vadd.f32 %v2402_v20, %v2392_v32  ;;  %3355 = vrot.lane.b32.xlu1 %v7822_v18, %s6327_s17  ;;  %v2393_v33 = vmul.f32 %v2389_v19, %v8159_v35  ;;  %v5849_v35 = vld [vmem:[#allocation27 + $0xac] ss:$16 sps:$4 sm:$0xff]   ;;  %v5859_v20 = vld [vmem:[#allocation27 + $0x28] ss:$16 sps:$4 sm:$0xff]  }
 0xb26   :  { %v5864_v19 = vld [vmem:[#allocation27 + $0xc] ss:$16 sps:$4 sm:$0xff]  }
 0xb27   :  { %v2413_v49 = vmax.f32 %v2410_v9, 0.0 }
 0xb28   :  { %v2407_v50 = vpop.permute.xlu1 %2406  ;;  %v3272_v62 = vpop.permute.xlu0 %3271 }
 0xb29   :  { %v2415_v12 = vpack.c.bf16 %v2413_v49, %v2412_v29  ;;  %v2411_v13 = vadd.f32 %v2407_v50, %v2393_v33  ;;  %3007 = vrot.lane.b32.xlu1 %v7822_v18, %s6326_s30  ;;  %v5862_v50 = vld [vmem:[#allocation27 + $0x8] ss:$16 sps:$4 sm:$0xff]  }
 0xb2b   :  { %2642 = vmatmul.mubr.bf16.vlgmr.msra.gmra.mxu1 %v2415_v12  ;;  %v2414_v45 = vmax.f32 %v2411_v13, 0.0 }
 0xb2c   :  { %2661 = vmatpush1.bf16.msra.mxu1 %v5841_v54  ;;  %v8283_v28 = vpop.permute.xlu1 %2909  ;;  %2651 = vmatprep.mubr.bf16.mxu1 %v12319_v59  ;;  %v8297_v10 = vpop.permute.xlu0 %3283 }
 0xb2d   :  { %3019 = vrot.lane.b32.xlu1 %v7832_v22, %s6326_s30  ;;  %2662 = vmatprep.subr.bf16.mxu1 %v5846_v16  ;;  %v2416_v25 = vpack.c.bf16 %v2414_v45, %v2414_v45  ;;  %12330 = vst [vmem:[#allocation96_spill] sm:$0xff] %v8297_v10  ;;  %v3309_v9 = vsel %vm581_vm3, %v3272_v62, %v8297_v10 }
 0xb2e   :  { %v3340_v54 = vmul.f32 %v3309_v9, %v12279_v56 }
 0xb30   :  { %2663 = vmatpush1.bf16.msra.mxu1 %v5844_v0  ;;  %v8288_v57 = vpop.permute.xlu1 %2921  ;;  %v8309_v29 = vpop.permute.xlu0 %3259 }
 0xb31   :  { %12328 = vst [vmem:[#allocation95_spill] sm:$0xff] %v8288_v57  ;;  %3043 = vrot.lane.b32.xlu1 %v7850_v60, %s6326_s30  ;;  %2664 = vmatprep.subr.bf16.mxu1 %v5849_v35  ;;  %12332 = vst [vmem:[#allocation98_spill] sm:$0xff] %v8309_v29  ;;  %v3315_v13 = vsel %vm581_vm3, %v8309_v29, %v3272_v62 }
 0xb32   :  { %v3339_v45 = vmul.f32 %v3315_v13, %v12283_v21 }
 0xb33   :  { %2652 = vmatmul.mubr.bf16.gmra.mxu1 %v2416_v25 }
 0xb34   :  { %2665 = vmatpush1.bf16.msra.mxu1 %v5847_v40  ;;  %v3274_v14 = vpop.permute.xlu1 %3273  ;;  %2692 = vmatprep.mubr.bf16.mxu1 %v12319_v59 }
 0xb35   :  { %2839 = vrot.lane.b32.xlu1 %v7842_v27, %s6324_s9  ;;  %2666 = vmatprep.subr.bf16.mxu1 %v5852_v31 }
 0xb38   :  { %2667 = vmatpush1.bf16.msra.mxu1 %v5850_v6  ;;  %v8295_v39 = vpop.permute.xlu1 %3285 }
 0xb39   :  { %12329 = vst [vmem:[#allocation94_spill] sm:$0xff] %v8295_v39  ;;  %2668 = vmatprep.subr.bf16.mxu1 %v5855_v34  ;;  %v3310_v41 = vsel %vm581_vm3, %v3274_v14, %v8295_v39  ;;  %v8330_v34 = vpop.permute.xlu0 %2815 }
 0xb3a   :  { %v3344_v49 = vmul.f32 %v3310_v41, %v12279_v56 }
 0xb3c   :  { %2669 = vmatpush1.bf16.msra.mxu1 %v5853_v47  ;;  %v8299_v55 = vpop.permute.xlu1 %2945  ;;  %v3536_v0 = vpack.c.bf16 %v3344_v49, %v3340_v54 }
 0xb3d   :  { %2670 = vmatprep.subr.bf16.mxu1 %v5858_v58  ;;  %v8334_v47 = vpop.permute.xlu0 %2827 }
 0xb3e   :  { %12335 = vst [vmem:[#allocation101_spill] sm:$0xff] %v8334_v47 }
 0xb40   :  { %2671 = vmatpush1.bf16.msra.mxu1 %v5856_v15  ;;  %v8304_v32 = vpop.permute.xlu1 %3261 }
 0xb41   :  { %12331 = vst [vmem:[#allocation97_spill] sm:$0xff] %v8304_v32  ;;  %2672 = vmatprep.subr.bf16.mxu1 %v5861_v1  ;;  %v3316_v33 = vsel %vm581_vm3, %v8304_v32, %v3274_v14 }
 0xb42   :  { %v3343_v16 = vmul.f32 %v3316_v33, %v12283_v21 }
 0xb44   :  { %2673 = vmatpush1.bf16.msra.mxu1 %v5859_v20  ;;  %v3535_v35 = vpack.c.bf16 %v3343_v16, %v3339_v45  ;;  %v8322_v40 = vpop.permute.xlu1 %3269 }
 0xb45   :  { %2674 = vmatprep.subr.bf16.mxu1 %v5864_v19 }
 0xb48   :  { %2675 = vmatpush1.bf16.msra.mxu1 %v5862_v50  ;;  %v8324_v31 = vpop.permute.xlu1 %3281 }
 0xb49   :  { %3647 = vmatprep.subr.bf16.mxu1 %v3536_v0  ;;  %12333 = vst [vmem:[#allocation99_spill] sm:$0xff] %v8324_v31 }
 0xb4b   :  { %2693 = vmatmul.mubr.bf16.vlgmr.msra.gmra.mxu1 %v2415_v12  ;;  %v8338_v12 = vpop.permute.xlu0 %2851 }
 0xb4c   :  { %3648 = vmatpush1.bf16.msra.mxu1 %v3535_v35  ;;  %2702 = vmatprep.mubr.bf16.mxu1 %v12319_v59  ;;  %v8326_v14 = vpop.permute.xlu1 %3257  ;;  %12336 = vst [vmem:[#allocation102_spill] sm:$0xff] %v8338_v12 }
 0xb4d   :  { %12334 = vst [vmem:[#allocation100_spill] sm:$0xff] %v8326_v14 }
 0xb50   :  { %v8328_v6 = vpop.permute.xlu1 %2817 }
 0xb53   :  { %2703 = vmatmul.mubr.bf16.gmra.mxu1 %v2416_v25  ;;  %v8342_v25 = vpop.permute.xlu0 %3175 }
 0xb54   :  { %v8332_v62 = vpop.permute.xlu1 %2829 }
 0xb57   :  { %v8346_v41 = vpop.permute.xlu0 %3187 }
 0xb58   :  { %v8336_v58 = vpop.permute.xlu1 %2853  ;;  %12337 = vst [vmem:[#allocation103_spill] sm:$0xff] %v8346_v41 }
 0xb5b   :  { %v8358_v49 = vpop.permute.xlu0 %3163 }
 0xb5c   :  { %v8340_v15 = vpop.permute.xlu1 %2813  ;;  %12340 = vst [vmem:[#allocation106_spill] sm:$0xff] %v8358_v49 }
 0xb5f   :  { %v8372_v16 = vpop.permute.xlu0 %2719 }
 0xb60   :  { %v8344_v1 = vpop.permute.xlu1 %2825 }
 0xb63   :  { %v8386_v10 = vpop.permute.xlu0 %2731 }
 0xb64   :  { %v8348_v20 = vpop.permute.xlu1 %3177  ;;  %12347 = vst [vmem:[#allocation113_spill] sm:$0xff] %v8386_v10 }
 0xb67   :  { %v8394_v32 = vpop.permute.xlu0 %2755 }
 0xb68   :  { %v8360_v33 = vpop.permute.xlu1 %3189  ;;  %12349 = vst [vmem:[#allocation115_spill] sm:$0xff] %v8394_v32 }
 0xb69   :  { %12341 = vst [vmem:[#allocation107_spill] sm:$0xff] %v8360_v33 }
 0xb6c   :  { %v8374_v0 = vpop.permute.xlu1 %2849 }
 0xb6d   :  { %12345 = vst [vmem:[#allocation111_spill] sm:$0xff] %v8374_v0 }
 0xb70   :  { %v8388_v39 = vpop.permute.xlu1 %3165 }
 0xb71   :  { %12348 = vst [vmem:[#allocation114_spill] sm:$0xff] %v8388_v39 }
 0xbeb   :  { %v8350_v19 = vpop.f32.mrf.mxu1 }
 0xbec   :  { %12338 = vst [vmem:[#allocation104_spill] sm:$0xff] %v8350_v19  ;;  %3095 = vrot.lane.b32.xlu1 %v8350_v19, %s6330_s13  ;;  %2903 = vrot.lane.b32.xlu0 %v8350_v19, %s6331_s16 }
 0xbed   :  { %v8356_v9 = vpop.f32.mrf.mxu1 }
 0xbee   :  { %12339 = vst [vmem:[#allocation105_spill] sm:$0xff] %v8356_v9 }
 0xbef   :  { %v8362_v50 = vpop.f32.mrf.mxu1 }
 0xbf0   :  { %12342 = vst [vmem:[#allocation108_spill] sm:$0xff] %v8362_v50  ;;  %3347 = vrot.lane.b32.xlu1 %v8350_v19, %s6327_s17  ;;  %3251 = vrot.lane.b32.xlu0 %v8350_v19, %s6329_s4 }
 0xbf1   :  { %v8368_v54 = vpop.f32.mrf.mxu1 }
 0xbf2   :  { %12343 = vst [vmem:[#allocation109_spill] sm:$0xff] %v8368_v54 }
 0xbf3   :  { %v8370_v13 = vpop.f32.mrf.mxu1 }
 0xbf4   :  { %12344 = vst [vmem:[#allocation110_spill] sm:$0xff] %v8370_v13  ;;  %2999 = vrot.lane.b32.xlu1 %v8350_v19, %s6326_s30  ;;  %2807 = vrot.lane.b32.xlu0 %v8350_v19, %s6324_s9 }
 0xbf5   :  { %v8380_v45 = vpop.f32.mrf.mxu1 }
 0xbf6   :  { %12346 = vst [vmem:[#allocation112_spill] sm:$0xff] %v8380_v45 }
 0xbf7   :  { %v2657_v35 = vpop.f32.mrf.mxu1 }
 0xbf8   :  { %3155 = vrot.lane.b32.xlu0 %v8350_v19, %s6328_s1  ;;  %3101 = vrot.lane.b32.xlu1 %v8356_v9, %s6330_s13  ;;  %v8396_v35 = vpop.permute.xlu1 %3173 }
 0xbf9   :  { %v2658_v59 = vpop.f32.mrf.mxu1  ;;  %12350 = vst [vmem:[#allocation116_spill] sm:$0xff] %v8396_v35 }
 0xbfa   :  { %v8406_v59 = vpop.permute.xlu0 %3369 }
 0xbfc   :  { %2711 = vrot.lane.b32.xlu0 %v8350_v19, %s6332_s27  ;;  %3359 = vrot.lane.b32.xlu1 %v8356_v9, %s6327_s17  ;;  %v8408_v29 = vpop.permute.xlu1 %3185 }
 0xbfd   :  { %12351 = vst [vmem:[#allocation117_spill] sm:$0xff] %v8408_v29 }
 0xbfe   :  { %v8416_v19 = vpop.permute.xlu0 %3381 }
 0xbff   :  { %12353 = vst [vmem:[#allocation119_spill] sm:$0xff] %v8416_v19 }
 0xc00   :  { %2915 = vrot.lane.b32.xlu0 %v8356_v9, %s6331_s16  ;;  %2905 = vrot.lane.b32.xlu1 %v8362_v50, %s6331_s16  ;;  %v8418_v51 = vpop.permute.xlu1 %3161 }
 0xc01   :  { %12354 = vst [vmem:[#allocation120_spill] sm:$0xff] %v8418_v51 }
 0xc02   :  { %v8434_v8 = vpop.permute.xlu0 %3357 }
 0xc03   :  { %12358 = vst [vmem:[#allocation124_spill] sm:$0xff] %v8434_v8 }
 0xc04   :  { %3263 = vrot.lane.b32.xlu0 %v8356_v9, %s6329_s4  ;;  %3253 = vrot.lane.b32.xlu1 %v8362_v50, %s6329_s4  ;;  %v8436_v51 = vpop.permute.xlu1 %2721 }
 0xc05   :  { %12359 = vst [vmem:[#allocation125_spill] sm:$0xff] %v8436_v51 }
 0xc06   :  { %v8446_v11 = vpop.permute.xlu0 %3365 }
 0xc07   :  { %12362 = vst [vmem:[#allocation128_spill] sm:$0xff] %v8446_v11 }
 0xc08   :  { %2819 = vrot.lane.b32.xlu0 %v8356_v9, %s6324_s9  ;;  %2809 = vrot.lane.b32.xlu1 %v8362_v50, %s6324_s9  ;;  %v8448_v46 = vpop.permute.xlu1 %2733 }
 0xc09   :  { %12363 = vst [vmem:[#allocation129_spill] sm:$0xff] %v8448_v46 }
 0xc0a   :  { %v8458_v24 = vpop.permute.xlu0 %3377 }
 0xc0b   :  { %v8414_v61 = vpop.f32.mrf.mxu1  ;;  %12364 = vst [vmem:[#allocation130_spill] sm:$0xff] %v8458_v24 }
 0xc0c   :  { %12352 = vst [vmem:[#allocation118_spill] sm:$0xff] %v8414_v61  ;;  %3167 = vrot.lane.b32.xlu0 %v8356_v9, %s6328_s1  ;;  %3157 = vrot.lane.b32.xlu1 %v8362_v50, %s6328_s1 }
 0xc0d   :  { %v8424_v42 = vpop.f32.mrf.mxu1 }
 0xc0e   :  { %12355 = vst [vmem:[#allocation121_spill] sm:$0xff] %v8424_v42  ;;  %v8466_v46 = vpop.permute.xlu0 %3353 }
 0xc0f   :  { %v8426_v35 = vpop.f32.mrf.mxu1  ;;  %12366 = vst [vmem:[#allocation132_spill] sm:$0xff] %v8466_v46 }
 0xc10   :  { %12356 = vst [vmem:[#allocation122_spill] sm:$0xff] %v8426_v35  ;;  %2723 = vrot.lane.b32.xlu0 %v8356_v9, %s6332_s27  ;;  %2713 = vrot.lane.b32.xlu1 %v8362_v50, %s6332_s27 }
 0xc11   :  { %v8432_v29 = vpop.f32.mrf.mxu1 }
 0xc12   :  { %12357 = vst [vmem:[#allocation123_spill] sm:$0xff] %v8432_v29 }
 0xc13   :  { %v8438_v0 = vpop.f32.mrf.mxu1 }
 0xc14   :  { %12360 = vst [vmem:[#allocation126_spill] sm:$0xff] %v8438_v0  ;;  %3097 = vrot.lane.b32.xlu0 %v8362_v50, %s6330_s13  ;;  %2917 = vrot.lane.b32.xlu1 %v8368_v54, %s6331_s16 }
 0xc15   :  { %v8444_v39 = vpop.f32.mrf.mxu1 }
 0xc16   :  { %12361 = vst [vmem:[#allocation127_spill] sm:$0xff] %v8444_v39 }
 0xc17   :  { %v2708_v48 = vpop.f32.mrf.mxu1 }
 0xc18   :  { %3349 = vrot.lane.b32.xlu0 %v8362_v50, %s6327_s17  ;;  %3265 = vrot.lane.b32.xlu1 %v8368_v54, %s6329_s4  ;;  %v8460_v48 = vpop.permute.xlu1 %2757 }
 0xc19   :  { %v2709_v51 = vpop.f32.mrf.mxu1  ;;  %12365 = vst [vmem:[#allocation131_spill] sm:$0xff] %v8460_v48 }
 0xc1a   :  { %v8478_v51 = vpop.permute.xlu0 %2933 }
 0xc1b   :  { %12368 = vst [vmem:[#allocation134_spill] sm:$0xff] %v8478_v51 }
 0xc1c   :  { %3103 = vrot.lane.b32.xlu0 %v8368_v54, %s6330_s13  ;;  %2821 = vrot.lane.b32.xlu1 %v8368_v54, %s6324_s9  ;;  %v8468_v11 = vpop.permute.xlu1 %2717 }
 0xc1d   :  { %12367 = vst [vmem:[#allocation133_spill] sm:$0xff] %v8468_v11 }
 0xc1e   :  { %v8486_v11 = vpop.permute.xlu0 %3009 }
 0xc1f   :  { %12370 = vst [vmem:[#allocation136_spill] sm:$0xff] %v8486_v11 }
 0xc20   :  { %3361 = vrot.lane.b32.xlu0 %v8368_v54, %s6327_s17  ;;  %3169 = vrot.lane.b32.xlu1 %v8368_v54, %s6328_s1  ;;  %v8480_v48 = vpop.permute.xlu1 %2729 }
 0xc21   :  { %12369 = vst [vmem:[#allocation135_spill] sm:$0xff] %v8480_v48 }
 0xc22   :  { %v8498_v48 = vpop.permute.xlu0 %3021 }
 0xc23   :  { %12372 = vst [vmem:[#allocation138_spill] sm:$0xff] %v8498_v48 }
 0xc24   :  { %2725 = vrot.lane.b32.xlu1 %v8368_v54, %s6332_s27  ;;  %2907 = vrot.lane.b32.xlu0 %v8370_v13, %s6331_s16  ;;  %v8488_v46 = vpop.permute.xlu1 %2753 }
 0xc25   :  { %12371 = vst [vmem:[#allocation137_spill] sm:$0xff] %v8488_v46 }
 0xc26   :  { %v8506_v46 = vpop.permute.xlu0 %3045 }
 0xc27   :  { %12374 = vst [vmem:[#allocation140_spill] sm:$0xff] %v8506_v46 }
 0xc28   :  { %3351 = vrot.lane.b32.xlu1 %v8370_v13, %s6327_s17  ;;  %3255 = vrot.lane.b32.xlu0 %v8370_v13, %s6329_s4  ;;  %v8500_v51 = vpop.permute.xlu1 %3367 }
 0xc29   :  { %12373 = vst [vmem:[#allocation139_spill] sm:$0xff] %v8500_v51 }
 0xc2c   :  { %3003 = vrot.lane.b32.xlu1 %v8370_v13, %s6326_s30  ;;  %2811 = vrot.lane.b32.xlu0 %v8370_v13, %s6324_s9  ;;  %v8508_v11 = vpop.permute.xlu1 %3379 }
 0xc2d   :  { %12375 = vst [vmem:[#allocation141_spill] sm:$0xff] %v8508_v11 }
 0xc30   :  { %3159 = vrot.lane.b32.xlu0 %v8370_v13, %s6328_s1  ;;  %3363 = vrot.lane.b32.xlu1 %v8380_v45, %s6327_s17  ;;  %v8520_v51 = vpop.permute.xlu1 %3355 }
 0xc31   :  { %12377 = vst [vmem:[#allocation143_spill] sm:$0xff] %v8520_v51 }
 0xc34   :  { %2715 = vrot.lane.b32.xlu0 %v8370_v13, %s6332_s27  ;;  %3015 = vrot.lane.b32.xlu1 %v8380_v45, %s6326_s30  ;;  %v8528_v46 = vpop.permute.xlu1 %3007 }
 0xc35   :  { %12379 = vst [vmem:[#allocation145_spill] sm:$0xff] %v8528_v46 }
 0xc38   :  { %3099 = vrot.lane.b32.xlu0 %v8370_v13, %s6330_s13  ;;  %3107 = vrot.lane.b32.xlu1 %v8414_v61, %s6330_s13  ;;  %v8518_v13 = vpop.permute.xlu0 %2841 }
 0xc39   :  { %12376 = vst [vmem:[#allocation142_spill] sm:$0xff] %v8518_v13  ;;  %v8540_v13 = vpop.permute.xlu1 %3019 }
 0xc3a   :  { %12381 = vst [vmem:[#allocation147_spill] sm:$0xff] %v8540_v13 }
 0xc3c   :  { %2919 = vrot.lane.b32.xlu0 %v8380_v45, %s6331_s16  ;;  %3371 = vrot.lane.b32.xlu1 %v8414_v61, %s6327_s17  ;;  %v8526_v11 = vpop.permute.xlu0 %3005 }
 0xc3d   :  { %12378 = vst [vmem:[#allocation144_spill] sm:$0xff] %v8526_v11  ;;  %v8548_v11 = vpop.permute.xlu1 %3043 }
 0xc3e   :  { %12383 = vst [vmem:[#allocation149_spill] sm:$0xff] %v8548_v11 }
 0xc40   :  { %3267 = vrot.lane.b32.xlu0 %v8380_v45, %s6329_s4  ;;  %2927 = vrot.lane.b32.xlu1 %v8414_v61, %s6331_s16  ;;  %v8538_v51 = vpop.permute.xlu0 %3017 }
 0xc41   :  { %12380 = vst [vmem:[#allocation146_spill] sm:$0xff] %v8538_v51  ;;  %v8560_v51 = vpop.permute.xlu1 %2839 }
 0xc42   :  { %12385 = vst [vmem:[#allocation151_spill] sm:$0xff] %v8560_v51 }
 0xc44   :  { %3277 = vrot.lane.b32.xlu1 %v8426_v35, %s6329_s4  ;;  %2823 = vrot.lane.b32.xlu0 %v8380_v45, %s6324_s9  ;;  %v8546_v46 = vpop.permute.xlu0 %3041 }
 0xc45   :  { %12382 = vst [vmem:[#allocation148_spill] sm:$0xff] %v8546_v46 }
 0xc48   :  { %3181 = vrot.lane.b32.xlu1 %v8426_v35, %s6328_s1  ;;  %3171 = vrot.lane.b32.xlu0 %v8380_v45, %s6328_s1  ;;  %v8558_v13 = vpop.permute.xlu0 %2837 }
 0xc49   :  { %12384 = vst [vmem:[#allocation150_spill] sm:$0xff] %v8558_v13 }
 0xc4c   :  { %2941 = vrot.lane.b32.xlu1 %v8432_v29, %s6331_s16  ;;  %2727 = vrot.lane.b32.xlu0 %v8380_v45, %s6332_s27 }
 0xc50   :  { %2845 = vrot.lane.b32.xlu1 %v8432_v29, %s6324_s9  ;;  %3105 = vrot.lane.b32.xlu0 %v8380_v45, %s6330_s13 }
 0xc54   :  { %2749 = vrot.lane.b32.xlu1 %v8432_v29, %s6332_s27  ;;  %3275 = vrot.lane.b32.xlu0 %v8414_v61, %s6329_s4 }
 0xc58   :  { %3111 = vrot.lane.b32.xlu1 %v8438_v0, %s6330_s13  ;;  %3179 = vrot.lane.b32.xlu0 %v8414_v61, %s6328_s1 }
 0xc5c   :  { %3375 = vrot.lane.b32.xlu1 %v8438_v0, %s6327_s17  ;;  %2939 = vrot.lane.b32.xlu0 %v8424_v42, %s6331_s16 }
 0xc5e   :  { %v8566_v45 = vpop.permute.xlu1 %3095  ;;  %v8568_v11 = vpop.permute.xlu0 %2903 }
 0xc5f   :  { %12386 = vst [vmem:[#allocation152_spill] sm:$0xff] %v8566_v45  ;;  %12387 = vst [vmem:[#allocation153_spill] sm:$0xff] %v8568_v11 }
 0xc60   :  { %2931 = vrot.lane.b32.xlu1 %v8438_v0, %s6331_s16  ;;  %2843 = vrot.lane.b32.xlu0 %v8424_v42, %s6324_s9 }
 0xc62   :  { %v8574_v46 = vpop.permute.xlu1 %3347  ;;  %v8576_v13 = vpop.permute.xlu0 %3251 }
 0xc63   :  { %12388 = vst [vmem:[#allocation154_spill] sm:$0xff] %v8574_v46  ;;  %12389 = vst [vmem:[#allocation155_spill] sm:$0xff] %v8576_v13 }
 0xc64   :  { %2835 = vrot.lane.b32.xlu1 %v8438_v0, %s6324_s9  ;;  %2747 = vrot.lane.b32.xlu0 %v8424_v42, %s6332_s27 }
 0xc66   :  { %v8582_v51 = vpop.permute.xlu1 %2999  ;;  %v8584_v45 = vpop.permute.xlu0 %2807 }
 0xc67   :  { %12390 = vst [vmem:[#allocation156_spill] sm:$0xff] %v8582_v51  ;;  %12391 = vst [vmem:[#allocation157_spill] sm:$0xff] %v8584_v45 }
 0xc68   :  { %3011 = vrot.lane.b32.xlu1 %v8356_v9, %s6326_s30  ;;  %3109 = vrot.lane.b32.xlu0 %v8426_v35, %s6330_s13 }
 0xc6a   :  { %v8590_v11 = vpop.permute.xlu1 %3101  ;;  %v8592_v46 = vpop.permute.xlu0 %3155 }
 0xc6b   :  { %12392 = vst [vmem:[#allocation158_spill] sm:$0xff] %v8590_v11  ;;  %12393 = vst [vmem:[#allocation159_spill] sm:$0xff] %v8592_v46 }
 0xc6c   :  { %3035 = vrot.lane.b32.xlu1 %v8424_v42, %s6326_s30  ;;  %3373 = vrot.lane.b32.xlu0 %v8426_v35, %s6327_s17 }
 0xc6e   :  { %v8598_v48 = vpop.permute.xlu1 %3359  ;;  %v8600_v51 = vpop.permute.xlu0 %2711 }
 0xc6f   :  { %12394 = vst [vmem:[#allocation160_spill] sm:$0xff] %v8598_v48  ;;  %12395 = vst [vmem:[#allocation161_spill] sm:$0xff] %v8600_v51 }
 0xc70   :  { %2831 = vrot.lane.b32.xlu1 %v8414_v61, %s6324_s9  ;;  %2929 = vrot.lane.b32.xlu0 %v8426_v35, %s6331_s16 }
 0xc72   :  { %v8606_v9 = vpop.permute.xlu1 %2905  ;;  %v8608_v11 = vpop.permute.xlu0 %2915 }
 0xc73   :  { %12396 = vst [vmem:[#allocation162_spill] sm:$0xff] %v8606_v9  ;;  %12397 = vst [vmem:[#allocation163_spill] sm:$0xff] %v8608_v11 }
 0xc74   :  { %2911 = vrot.lane.b32.xlu1 %v7822_v18, %s6331_s16  ;;  %3279 = vrot.lane.b32.xlu0 %v8438_v0, %s6329_s4 }
 0xc76   :  { %v8614_v45 = vpop.permute.xlu1 %3253  ;;  %v8616_v48 = vpop.permute.xlu0 %3263 }
 0xc77   :  { %12398 = vst [vmem:[#allocation164_spill] sm:$0xff] %v8614_v45 }
 0xc78   :  { %2923 = vrot.lane.b32.xlu1 %v7832_v22, %s6331_s16  ;;  %3183 = vrot.lane.b32.xlu0 %v8438_v0, %s6328_s1  ;;  %v8854_v22 = vmul.f32 %v7970_v26, %v12301_v30  ;;  %v3213_v26 = vsel %vm543_vm2, %v8342_v25, %v8346_v41  ;;  %v2775_v41 = vsel %vm353_vm7, %v8372_v16, %v8386_v10 }
 0xc7a   :  { %v8622_v51 = vpop.permute.xlu1 %2809  ;;  %v8624_v46 = vpop.permute.xlu0 %2819 }
 0xc7b   :  { %12399 = vst [vmem:[#allocation165_spill] sm:$0xff] %v8622_v51  ;;  %12400 = vst [vmem:[#allocation166_spill] sm:$0xff] %v8624_v46 }
 0xc7c   :  { %2947 = vrot.lane.b32.xlu1 %v7850_v60, %s6331_s16  ;;  %2943 = vrot.lane.b32.xlu0 %v8444_v39, %s6331_s16 }
 0xc7e   :  { %v8630_v11 = vpop.permute.xlu1 %3157  ;;  %v8632_v9 = vpop.permute.xlu0 %3167 }
 0xc7f   :  { %12401 = vst [vmem:[#allocation167_spill] sm:$0xff] %v8630_v11  ;;  %12402 = vst [vmem:[#allocation168_spill] sm:$0xff] %v8632_v9 }
 0xc80   :  { %2743 = vrot.lane.b32.xlu1 %v7842_v27, %s6332_s27  ;;  %3001 = vrot.lane.b32.xlu0 %v8362_v50, %s6326_s30 }
 0xc82   :  { %v8638_v13 = vpop.permute.xlu1 %2713  ;;  %v8640_v51 = vpop.permute.xlu0 %2723 }
 0xc83   :  { %12403 = vst [vmem:[#allocation169_spill] sm:$0xff] %v8638_v13  ;;  %12404 = vst [vmem:[#allocation170_spill] sm:$0xff] %v8640_v51 }
 0xc84   :  { %3295 = vrot.lane.b32.xlu1 %v7850_v60, %s6329_s4  ;;  %3013 = vrot.lane.b32.xlu0 %v8368_v54, %s6326_s30 }
 0xc86   :  { %v8646_v46 = vpop.permute.xlu1 %2917  ;;  %v8648_v11 = vpop.permute.xlu0 %3097 }
 0xc87   :  { %12405 = vst [vmem:[#allocation171_spill] sm:$0xff] %v8646_v46  ;;  %12406 = vst [vmem:[#allocation172_spill] sm:$0xff] %v8648_v11 }
 0xc88   :  { %2739 = vrot.lane.b32.xlu1 %v8438_v0, %s6332_s27  ;;  %2847 = vrot.lane.b32.xlu0 %v8444_v39, %s6324_s9 }
 0xc8a   :  { %v8654_v50 = vpop.permute.xlu1 %3265  ;;  %v8656_v13 = vpop.permute.xlu0 %3349 }
 0xc8b   :  { %12407 = vst [vmem:[#allocation173_spill] sm:$0xff] %v8654_v50  ;;  %12408 = vst [vmem:[#allocation174_spill] sm:$0xff] %v8656_v13  ;;  %v5867_v13 = vld [vmem:[%s11826_s10 + $0xc] ss:$16 sps:$4 sm:$0xff]  }
 0xc8c   :  { %2735 = vrot.lane.b32.xlu1 %v8414_v61, %s6332_s27  ;;  %3037 = vrot.lane.b32.xlu0 %v8432_v29, %s6326_s30 }
 0xc8d   :  { %5620 = vmatprep.mubr.msk.bf16.mxu1 %vm3589_vm11, %v5867_v13 }
 0xc8e   :  { %v8662_v54 = vpop.permute.xlu1 %2821  ;;  %v8664_v51 = vpop.permute.xlu0 %3103 }
 0xc8f   :  { %12409 = vst [vmem:[#allocation175_spill] sm:$0xff] %v8662_v54  ;;  %12410 = vst [vmem:[#allocation176_spill] sm:$0xff] %v8664_v51 }
 0xc90   :  { %3287 = vrot.lane.b32.xlu1 %v8424_v42, %s6329_s4  ;;  %2833 = vrot.lane.b32.xlu0 %v8426_v35, %s6324_s9 }
 0xc92   :  { %v8670_v11 = vpop.permute.xlu1 %3169  ;;  %v8672_v9 = vpop.permute.xlu0 %3361 }
 0xc93   :  { %12411 = vst [vmem:[#allocation177_spill] sm:$0xff] %v8670_v11  ;;  %12412 = vst [vmem:[#allocation178_spill] sm:$0xff] %v8672_v9 }
 0xc94   :  { %3039 = vrot.lane.b32.xlu1 %v8444_v39, %s6326_s30  ;;  %2751 = vrot.lane.b32.xlu0 %v8444_v39, %s6332_s27 }
 0xc96   :  { %v8682_v51 = vpop.permute.xlu1 %2725  ;;  %v8684_v54 = vpop.permute.xlu0 %2907 }
 0xc97   :  { %12413 = vst [vmem:[#allocation179_spill] sm:$0xff] %v8682_v51 }
 0xc98   :  { %3113 = vrot.lane.b32.xlu1 %v8424_v42, %s6330_s13  ;;  %2913 = vrot.lane.b32.xlu0 %v7852_v23, %s6331_s16  ;;  %v12458_v23 = vld [vmem:[#allocation134_spill] sm:$0xff] }
 0xc9a   :  { %v8690_v9 = vpop.permute.xlu1 %3351  ;;  %v8692_v11 = vpop.permute.xlu0 %3255 }
 0xc9b   :  { %12414 = vst [vmem:[#allocation180_spill] sm:$0xff] %v8690_v9  ;;  %12415 = vst [vmem:[#allocation181_spill] sm:$0xff] %v8692_v11 }
 0xc9c   :  { %3199 = vrot.lane.b32.xlu1 %v7850_v60, %s6328_s1  ;;  %2925 = vrot.lane.b32.xlu0 %v7874_v38, %s6331_s16 }
 0xc9e   :  { %v8698_v13 = vpop.permute.xlu1 %3003  ;;  %v8700_v51 = vpop.permute.xlu0 %2811 }
 0xc9f   :  { %12416 = vst [vmem:[#allocation182_spill] sm:$0xff] %v8698_v13  ;;  %12417 = vst [vmem:[#allocation183_spill] sm:$0xff] %v8700_v51 }
 0xca0   :  { %3191 = vrot.lane.b32.xlu1 %v8424_v42, %s6328_s1  ;;  %2949 = vrot.lane.b32.xlu0 %v7897_v3, %s6331_s16 }
 0xca2   :  { %v8706_v46 = vpop.permute.xlu1 %3363  ;;  %v8708_v9 = vpop.permute.xlu0 %3159 }
 0xca3   :  { %12418 = vst [vmem:[#allocation184_spill] sm:$0xff] %v8706_v46  ;;  %12419 = vst [vmem:[#allocation185_spill] sm:$0xff] %v8708_v9 }
 0xca4   :  { %3291 = vrot.lane.b32.xlu1 %v8444_v39, %s6329_s4  ;;  %2745 = vrot.lane.b32.xlu0 %v7876_v44, %s6332_s27 }
 0xca6   :  { %v8714_v45 = vpop.permute.xlu1 %3015  ;;  %v8716_v13 = vpop.permute.xlu0 %2715 }
 0xca7   :  { %12420 = vst [vmem:[#allocation186_spill] sm:$0xff] %v8714_v45  ;;  %12421 = vst [vmem:[#allocation187_spill] sm:$0xff] %v8716_v13  ;;  %v2966_v45 = vsel %vm429_vm5, %v8283_v28, %v8288_v57 }
 0xca8   :  { %3031 = vrot.lane.b32.xlu1 %v7842_v27, %s6326_s30  ;;  %3297 = vrot.lane.b32.xlu0 %v7897_v3, %s6329_s4 }
 0xcaa   :  { %v8722_v51 = vpop.permute.xlu1 %3107  ;;  %v8724_v46 = vpop.permute.xlu0 %3099 }
 0xcab   :  { %12422 = vst [vmem:[#allocation188_spill] sm:$0xff] %v8722_v51  ;;  %12423 = vst [vmem:[#allocation189_spill] sm:$0xff] %v8724_v46  ;;  %v2988_v46 = vmul.f32 %v2966_v45, %v6782_v43 }
 0xcac   :  { %3029 = vrot.lane.b32.xlu1 %v7830_v5, %s6326_s30  ;;  %2741 = vrot.lane.b32.xlu0 %v7830_v5, %s6332_s27  ;;  %v8751_v5 = vld [vmem:[%s11826_s10 + $0x4] ss:$16 sps:$4 sm:$0xff]  }
 0xcad   :  { %12426 = vst [vmem:[#allocation192_spill] sm:$0xff] %v8751_v5  ;;  %3628 = vmatprep.mubr.bf16.mxu0 %v8751_v5 }
 0xcae   :  { %v8734_v13 = vpop.permute.xlu1 %3371  ;;  %v8736_v9 = vpop.permute.xlu0 %2919 }
 0xcaf   :  { %12424 = vst [vmem:[#allocation190_spill] sm:$0xff] %v8734_v13  ;;  %12425 = vst [vmem:[#allocation191_spill] sm:$0xff] %v8736_v9  ;;  %v2965_v51 = vsel %vm429_vm5, %v8684_v54, %v8736_v9 }
 0xcb0   :  { %v2984_v50 = vmul.f32 %v2965_v51, %v6782_v43  ;;  %3195 = vrot.lane.b32.xlu1 %v8444_v39, %s6328_s1  ;;  %3293 = vrot.lane.b32.xlu0 %v7840_v37, %s6329_s4 }
 0xcb2   :  { %v8753_v13 = vpop.permute.xlu1 %2927  ;;  %v8755_v57 = vpop.permute.xlu0 %3267  ;;  %v3472_v9 = vpack.c.bf16 %v2988_v46, %v2984_v50 }
 0xcb3   :  { %12427 = vst [vmem:[#allocation193_spill] sm:$0xff] %v8753_v13 }
 0xcb4   :  { %3393 = vrot.lane.b32.xlu1 %v7897_v3, %s6327_s17  ;;  %2737 = vrot.lane.b32.xlu0 %v8426_v35, %s6332_s27 }
 0xcb5   :  { %3596 = vmatprep.subr.bf16.mxu0 %v3472_v9 }
 0xcb6   :  { %v8762_v45 = vpop.permute.xlu1 %3277  ;;  %v8764_v51 = vpop.permute.xlu0 %2823 }
 0xcb7   :  { %12428 = vst [vmem:[#allocation194_spill] sm:$0xff] %v8762_v45  ;;  %12429 = vst [vmem:[#allocation195_spill] sm:$0xff] %v8764_v51 }
 0xcb8   :  { %3025 = vrot.lane.b32.xlu1 %v8426_v35, %s6326_s30  ;;  %3289 = vrot.lane.b32.xlu0 %v8432_v29, %s6329_s4 }
 0xcba   :  { %v8770_v46 = vpop.permute.xlu1 %3181  ;;  %v8772_v50 = vpop.permute.xlu0 %3171 }
 0xcbb   :  { %12430 = vst [vmem:[#allocation196_spill] sm:$0xff] %v8770_v46 }
 0xcbc   :  { %3117 = vrot.lane.b32.xlu1 %v8444_v39, %s6330_s13  ;;  %3115 = vrot.lane.b32.xlu0 %v8432_v29, %s6330_s13 }
 0xcbe   :  { %v8778_v9 = vpop.permute.xlu1 %2941  ;;  %v8780_v5 = vpop.permute.xlu0 %2727 }
 0xcbf   :  { %12431 = vst [vmem:[#allocation197_spill] sm:$0xff] %v8778_v9  ;;  %12432 = vst [vmem:[#allocation198_spill] sm:$0xff] %v8780_v5 }
 0xcc0   :  { %3389 = vrot.lane.b32.xlu1 %v7840_v37, %s6327_s17  ;;  %3201 = vrot.lane.b32.xlu0 %v7897_v3, %s6328_s1 }
 0xcc2   :  { %v8786_v35 = vpop.permute.xlu1 %2845  ;;  %v8788_v13 = vpop.permute.xlu0 %3105 }
 0xcc3   :  { %12433 = vst [vmem:[#allocation199_spill] sm:$0xff] %v8786_v35  ;;  %12434 = vst [vmem:[#allocation200_spill] sm:$0xff] %v8788_v13 }
 0xcc4   :  { %2937 = vrot.lane.b32.xlu1 %v7876_v44, %s6331_s16  ;;  %3197 = vrot.lane.b32.xlu0 %v7840_v37, %s6328_s1 }
 0xcc6   :  { %v8794_v51 = vpop.permute.xlu1 %2749  ;;  %v8796_v46 = vpop.permute.xlu0 %3275 }
 0xcc7   :  { %12435 = vst [vmem:[#allocation201_spill] sm:$0xff] %v8794_v51  ;;  %12436 = vst [vmem:[#allocation202_spill] sm:$0xff] %v8796_v46 }
 0xcc8   :  { %3385 = vrot.lane.b32.xlu1 %v8432_v29, %s6327_s17  ;;  %3193 = vrot.lane.b32.xlu0 %v8432_v29, %s6328_s1 }
 0xcca   :  { %v8802_v5 = vpop.permute.xlu1 %3111  ;;  %v8804_v35 = vpop.permute.xlu0 %3179 }
 0xccb   :  { %12437 = vst [vmem:[#allocation203_spill] sm:$0xff] %v8802_v5  ;;  %12438 = vst [vmem:[#allocation204_spill] sm:$0xff] %v8804_v35 }
 0xccc   :  { %3033 = vrot.lane.b32.xlu0 %v7876_v44, %s6326_s30  ;;  %v3314_v44 = vsel %vm581_vm3, %v8326_v14, %v8322_v40 }
 0xcce   :  { %v8808_v13 = vpop.permute.xlu1 %3375  ;;  %v8810_v37 = vpop.permute.xlu0 %2939 }
 0xccf   :  { %12439 = vst [vmem:[#allocation205_spill] sm:$0xff] %v8808_v13 }
 0xcd0   :  { %3027 = vrot.lane.b32.xlu0 %v8438_v0, %s6326_s30  ;;  %v2871_v0 = vsel %vm391_vm8, %v8330_v34, %v8334_v47 }
 0xcd1   :  { %v8865_v47 = vmul.f32 %v2871_v0, %v6831_v2 }
 0xcd2   :  { %v8814_v51 = vpop.permute.xlu1 %2931  ;;  %v8816_v9 = vpop.permute.xlu0 %2843 }
 0xcd3   :  { %12440 = vst [vmem:[#allocation206_spill] sm:$0xff] %v8814_v51  ;;  %v8850_v51 = vmul.f32 %v7945_v36, %v12302_v17  ;;  %v2877_v36 = vsel %vm391_vm8, %v8338_v12, %v8330_v34  ;;  %v3219_v34 = vsel %vm543_vm2, %v8358_v49, %v8342_v25  ;;  %v12462_v12 = vld [vmem:[#allocation173_spill] sm:$0xff] }
 0xcd4   :  { %3391 = vrot.lane.b32.xlu0 %v7850_v60, %s6327_s17  ;;  %v8915_v49 = vmul.f32 %v2877_v36, %v6852_v52  ;;  %v2870_v36 = vsel %vm391_vm8, %v8340_v15, %v8344_v1 }
 0xcd6   :  { %v8820_v29 = vpop.permute.xlu1 %2835  ;;  %v8822_v5 = vpop.permute.xlu0 %2747 }
 0xcd7   :  { %12441 = vst [vmem:[#allocation207_spill] sm:$0xff] %v8820_v29  ;;  %12442 = vst [vmem:[#allocation208_spill] sm:$0xff] %v8822_v5  ;;  %v2972_v29 = vsel %vm429_vm5, %v8299_v55, %v8283_v28  ;;  %v2872_v28 = vsel %vm391_vm8, %v8328_v6, %v8332_v62 }
 0xcd8   :  { %3023 = vrot.lane.b32.xlu0 %v8414_v61, %s6326_s30  ;;  %v3308_v61 = vsel %vm581_vm3, %v8322_v40, %v8324_v31  ;;  %v8884_v0 = vmul.f32 %v2972_v29, %v6805_v53  ;;  %v8899_v60 = vmul.f32 %v2872_v28, %v6831_v2  ;;  %v2781_v29 = vsel %vm353_vm7, %v8394_v32, %v8372_v16  ;;  %v12451_v32 = vld [vmem:[#allocation128_spill] sm:$0xff] }
 0xcd9   :  { %v3214_v40 = vsel %vm543_vm2, %v8348_v20, %v8360_v33  ;;  %v8918_v28 = vmul.f32 %v3213_v26, %v12289_v63  ;;  %v3336_v3 = vmul.f32 %v3308_v61, %v12279_v56  ;;  %v3406_v16 = vsel %vm619_vm0, %v8406_v59, %v8416_v19  ;;  %v12449_v19 = vld [vmem:[#allocation60_spill] sm:$0xff] }
 0xcda   :  { %v8826_v13 = vpop.permute.xlu1 %3011  ;;  %v8828_v35 = vpop.permute.xlu0 %3109  ;;  %v3335_v33 = vmul.f32 %v3314_v44, %v12283_v21  ;;  %v3412_v61 = vsel %vm619_vm0, %v8434_v8, %v8406_v59  ;;  %v8942_v31 = vmul.f32 %v2775_v41, %v12449_v19  ;;  %v8948_v44 = vmul.f32 %v3214_v40, %v12289_v63  ;;  %v12452_v8 = vld [vmem:[#allocation40_spill] sm:$0xff] }
 0xcdb   :  { %12443 = vst [vmem:[#allocation209_spill] sm:$0xff] %v8826_v13  ;;  %12444 = vst [vmem:[#allocation210_spill] sm:$0xff] %v8828_v35  ;;  %v2878_v13 = vsel %vm391_vm8, %v8336_v58, %v8328_v6  ;;  %v3404_v10 = vsel %vm619_vm0, %v12451_v32, %v8458_v24  ;;  %v3313_v41 = vsel %vm581_vm3, %v8692_v11, %v8755_v57  ;;  %v12453_v24 = vld [vmem:[#allocation41_spill] sm:$0xff] }
 0xcdc   :  { %2935 = vrot.lane.b32.xlu0 %v7842_v27, %s6331_s16  ;;  %v8906_v25 = vmul.f32 %v2878_v13, %v6852_v52  ;;  %v8926_v13 = vmul.f32 %v3219_v34, %v12292_v4  ;;  %v12450_v34 = vld [vmem:[#allocation67_spill] sm:$0xff]  ;;  %v8968_v40 = vmul.f32 %v2870_v36, %v6831_v2  ;;  %v3305_v11 = vsel %vm581_vm3, %v8616_v48, %v8796_v46 }
 0xcdd   :  { %v8945_v14 = vmul.f32 %v2781_v29, %v12450_v34  ;;  %v12456_v29 = vld [vmem:[#allocation111_spill] sm:$0xff] }
 0xcde   :  { %v8879_v27 = vpop.permute.xlu1 %3035  ;;  %v8881_v6 = vpop.permute.xlu0 %3373  ;;  %v2876_v36 = vsel %vm391_vm8, %v12456_v29, %v8340_v15  ;;  %v3306_v15 = vsel %vm581_vm3, %v12462_v12, %v8762_v45 }
 0xcdf   :  { %12445 = vst [vmem:[#allocation211_spill] sm:$0xff] %v8879_v27  ;;  %12446 = vst [vmem:[#allocation212_spill] sm:$0xff] %v8881_v6  ;;  %v8971_v27 = vmul.f32 %v3412_v61, %v12453_v24  ;;  %v12457_v61 = vld [vmem:[#allocation132_spill] sm:$0xff] }
 0xce0   :  { %3387 = vrot.lane.b32.xlu0 %v8444_v39, %s6327_s17  ;;  %v3410_v18 = vsel %vm619_vm0, %v12457_v61, %v12451_v32  ;;  %v3524_v61 = vpack.c.bf16 %v8948_v44, %v8918_v28  ;;  %v2954_v28 = vsel %vm429_vm5, %v12458_v23, %v8299_v55  ;;  %v12465_v44 = vld [vmem:[#allocation64_spill] sm:$0xff]  ;;  %v12472_v55 = vld [vmem:[#allocation138_spill] sm:$0xff] }
 0xce2   :  { %v8937_v26 = vpop.permute.xlu1 %2831  ;;  %v8939_v39 = vpop.permute.xlu0 %2929 }
 0xce3   :  { %12447 = vst [vmem:[#allocation213_spill] sm:$0xff] %v8937_v26  ;;  %12448 = vst [vmem:[#allocation214_spill] sm:$0xff] %v8939_v39  ;;  %v8957_v26 = vmul.f32 %v3406_v16, %v12452_v8  ;;  %v12454_v16 = vld [vmem:[#allocation114_spill] sm:$0xff]  ;;  %v3324_v39 = vmul.f32 %v3305_v11, %v12279_v56 }
 0xce4   :  { %3383 = vrot.lane.b32.xlu0 %v8424_v42, %s6327_s17  ;;  %v3220_v59 = vsel %vm543_vm2, %v12454_v16, %v8348_v20  ;;  %v8982_v42 = vmul.f32 %v3404_v10, %v12452_v8  ;;  %v12459_v20 = vld [vmem:[#allocation95_spill] sm:$0xff]  ;;  %v3331_v10 = vmul.f32 %v3313_v41, %v12283_v21 }
 0xce5   :  { %v2960_v16 = vsel %vm429_vm5, %v12459_v20, %v12458_v23  ;;  %v9012_v20 = vmul.f32 %v3220_v59, %v12292_v4 }
 0xce6   :  { %12455 = vst [vmem:[#allocation128_spill] sm:$0xff] %v8982_v42  ;;  %v8996_v38 = vpop.permute.xlu1 %2911  ;;  %v8998_v46 = vpop.permute.xlu0 %3279  ;;  %v9021_v42 = vmul.f32 %v2876_v36, %v6852_v52  ;;  %v9031_v59 = vmul.f32 %v2960_v16, %v12465_v44  ;;  %v12473_v16 = vld [vmem:[#allocation136_spill] sm:$0xff] }
 0xce7   :  { %12460 = vst [vmem:[#allocation111_spill] sm:$0xff] %v8996_v38  ;;  %12461 = vst [vmem:[#allocation134_spill] sm:$0xff] %v8998_v46  ;;  %v3307_v32 = vsel %vm581_vm3, %v8755_v57, %v8998_v46  ;;  %v12463_v38 = vld [vmem:[#allocation164_spill] sm:$0xff]  ;;  %v9024_v57 = vmul.f32 %v3410_v18, %v12453_v24  ;;  %v12467_v46 = vld [vmem:[#allocation117_spill] sm:$0xff]  ;;  %v3328_v18 = vmul.f32 %v3306_v15, %v12279_v56 }
 0xce8   :  { %v3312_v41 = vsel %vm581_vm3, %v12463_v38, %v12462_v12  ;;  %v3332_v45 = vmul.f32 %v3307_v32, %v12279_v56  ;;  %12466 = vst [vmem:[#allocation173_spill] sm:$0xff] %v9031_v59  ;;  %v12468_v12 = vld [vmem:[#allocation116_spill] sm:$0xff]  ;;  %v12469_v32 = vld [vmem:[#allocation155_spill] sm:$0xff]  ;;  %v3064_v59 = vsel %vm467_vm6, %v12473_v16, %v12472_v55  ;;  %v3523_v15 = vpack.c.bf16 %v9012_v20, %v8926_v13  ;;  %v12475_v56 = vld [vmem:[#allocation65_spill] sm:$0xff] }
 0xce9   :  { %12464 = vst [vmem:[#allocation95_spill] sm:$0xff] %v9024_v57  ;;  %v3212_v11 = vsel %vm543_vm2, %v12468_v12, %v12467_v46  ;;  %v3311_v36 = vsel %vm581_vm3, %v12469_v32, %v8616_v48  ;;  %v12474_v44 = vld [vmem:[#allocation120_spill] sm:$0xff]  ;;  %v3327_v35 = vmul.f32 %v3312_v41, %v12283_v21  ;;  %v3531_v48 = vpack.c.bf16 %v3335_v33, %v3331_v10  ;;  %v12480_v20 = vld [vmem:[#allocation57_spill] sm:$0xff] }
 0xcea   :  { %v9042_v38 = vpop.permute.xlu1 %2923  ;;  %v9044_v57 = vpop.permute.xlu0 %3183  ;;  %v3532_v23 = vpack.c.bf16 %v3336_v3, %v3332_v45  ;;  %v3218_v46 = vsel %vm543_vm2, %v12474_v44, %v12468_v12  ;;  %v9058_v32 = vmul.f32 %v2954_v28, %v12475_v56  ;;  %v12477_v3 = vld [vmem:[#allocation171_spill] sm:$0xff]  ;;  %v12478_v45 = vld [vmem:[#allocation162_spill] sm:$0xff]  ;;  %v3528_v55 = vpack.c.bf16 %v3328_v18, %v3324_v39  ;;  %v12479_v12 = vld [vmem:[#allocation140_spill] sm:$0xff] }
 0xceb   :  { %12470 = vst [vmem:[#allocation116_spill] sm:$0xff] %v9042_v38  ;;  %12471 = vst [vmem:[#allocation215_spill] sm:$0xff] %v9044_v57  ;;  %v2964_v38 = vsel %vm429_vm5, %v12478_v45, %v12477_v3  ;;  %v3240_v5 = vmul.f32 %v3212_v11, %v12289_v63  ;;  %v3070_v33 = vsel %vm467_vm6, %v12479_v12, %v12473_v16  ;;  %v12482_v28 = vld [vmem:[#allocation129_spill] sm:$0xff]  ;;  %v12487_v44 = vld [vmem:[#allocation58_spill] sm:$0xff] }
 0xcec   :  { %12476 = vst [vmem:[#allocation136_spill] sm:$0xff] %v9058_v32  ;;  %3649 = vmatprep.subr.bf16.mxu1 %v3532_v23  ;;  %v3323_v10 = vmul.f32 %v3311_v36, %v12283_v21  ;;  %v3211_v13 = vsel %vm543_vm2, %v8772_v50, %v9044_v57  ;;  %v9075_v41 = vmul.f32 %v3064_v59, %v12480_v20  ;;  %v12483_v11 = vld [vmem:[#allocation125_spill] sm:$0xff]  ;;  %v12484_v23 = vld [vmem:[#allocation163_spill] sm:$0xff] }
 0xced   :  { %3650 = vmatpush1.bf16.msra.mxu1 %v3531_v48  ;;  %v3239_v39 = vmul.f32 %v3218_v46, %v12292_v4  ;;  %v2776_v18 = vsel %vm353_vm7, %v12483_v11, %v12482_v28  ;;  %v12485_v16 = vld [vmem:[#allocation153_spill] sm:$0xff]  ;;  %v2980_v59 = vmul.f32 %v2964_v38, %v6782_v43  ;;  %v9100_v28 = vmul.f32 %v3070_v33, %v12487_v44 }
 0xcee   :  { %12481 = vst [vmem:[#allocation65_spill] sm:$0xff] %v9075_v41  ;;  %v2963_v36 = vsel %vm429_vm5, %v12485_v16, %v12484_v23  ;;  %v9086_v21 = vpop.permute.xlu1 %2947  ;;  %3651 = vmatprep.subr.bf16.mxu1 %v3528_v55  ;;  %v9088_v12 = vpop.permute.xlu0 %2943  ;;  %v3527_v48 = vpack.c.bf16 %v3327_v35, %v3323_v10  ;;  %v2969_v46 = vsel %vm429_vm5, %v8810_v37, %v12485_v16  ;;  %v12489_v55 = vld [vmem:[#allocation185_spill] sm:$0xff]  ;;  %v12490_v10 = vld [vmem:[#allocation142_spill] sm:$0xff]  ;;  %v12493_v23 = vld [vmem:[#allocation168_spill] sm:$0xff] }
 0xcef   :  { %12486 = vst [vmem:[#allocation162_spill] sm:$0xff] %v9086_v21  ;;  %v2971_v57 = vsel %vm429_vm5, %v9088_v12, %v8684_v54  ;;  %12488 = vst [vmem:[#allocation125_spill] sm:$0xff] %v9100_v28  ;;  %v3217_v21 = vsel %vm543_vm2, %v12489_v55, %v8772_v50  ;;  %v3236_v38 = vmul.f32 %v3211_v13, %v12289_v63  ;;  %v12491_v54 = vld [vmem:[#allocation197_spill] sm:$0xff]  ;;  %v12492_v28 = vld [vmem:[#allocation204_spill] sm:$0xff] }
 0xcf0   :  { %v2983_v35 = vmul.f32 %v2971_v57, %v6805_v53  ;;  %v2866_v16 = vsel %vm391_vm8, %v8332_v62, %v12490_v10  ;;  %v2976_v41 = vmul.f32 %v2963_v36, %v6782_v43  ;;  %v2970_v33 = vsel %vm429_vm5, %v12491_v54, %v12478_v45  ;;  %v12494_v13 = vld [vmem:[#allocation131_spill] sm:$0xff]  ;;  %v12497_v32 = vld [vmem:[#allocation177_spill] sm:$0xff] }
 0xcf1   :  { %v3209_v50 = vsel %vm543_vm2, %v12493_v23, %v12492_v28  ;;  %3652 = vmatpush1.bf16.msra.mxu1 %v3527_v48  ;;  %v9122_v57 = vmul.f32 %v2776_v18, %v12449_v19  ;;  %v2782_v62 = vsel %vm353_vm7, %v12494_v13, %v12483_v11  ;;  %v2975_v36 = vmul.f32 %v2969_v46, %v6805_v53  ;;  %v12498_v28 = vld [vmem:[#allocation167_spill] sm:$0xff]  ;;  %v12499_v48 = vld [vmem:[#allocation196_spill] sm:$0xff] }
 0xcf2   :  { %v3471_v55 = vpack.c.bf16 %v8884_v0, %v2983_v35  ;;  %v9130_v43 = vpop.permute.xlu1 %2743  ;;  %3653 = vmatprep.subr.bf16.mxu1 %v3524_v61  ;;  %v9132_v45 = vpop.permute.xlu0 %3001  ;;  %v3216_v18 = vsel %vm543_vm2, %v12498_v28, %v12497_v32  ;;  %v3210_v3 = vsel %vm543_vm2, %v12497_v32, %v12499_v48  ;;  %v3235_v11 = vmul.f32 %v3217_v21, %v12292_v4  ;;  %v12500_v13 = vld [vmem:[#allocation195_spill] sm:$0xff]  ;;  %v12502_v32 = vld [vmem:[#allocation68_spill] sm:$0xff]  ;;  %v12504_v21 = vld [vmem:[#allocation146_spill] sm:$0xff] }
 0xcf3   :  { %12495 = vst [vmem:[#allocation153_spill] sm:$0xff] %v9130_v43  ;;  %12496 = vst [vmem:[#allocation142_spill] sm:$0xff] %v9132_v45  ;;  %v3468_v46 = vpack.c.bf16 %v2980_v59, %v2976_v41  ;;  %v12501_v0 = vld [vmem:[#allocation183_spill] sm:$0xff]  ;;  %v2979_v35 = vmul.f32 %v2970_v33, %v6805_v53  ;;  %v3228_v45 = vmul.f32 %v3209_v50, %v12289_v63  ;;  %v12505_v41 = vld [vmem:[#allocation144_spill] sm:$0xff] }
 0xcf4   :  { %v2869_v61 = vsel %vm391_vm8, %v12501_v0, %v12500_v13  ;;  %3597 = vmatpush1.bf16.msra.mxu0 %v3471_v55  ;;  %v3520_v43 = vpack.c.bf16 %v3240_v5, %v3236_v38  ;;  %v2860_v28 = vsel %vm391_vm8, %v12490_v10, %v8336_v58  ;;  %v9154_v48 = vmul.f32 %v2866_v16, %v12502_v32  ;;  %v12506_v5 = vld [vmem:[#allocation159_spill] sm:$0xff] }
 0xcf5   :  { %v3062_v59 = vsel %vm467_vm6, %v12505_v41, %v12504_v21  ;;  %3598 = vmatprep.subr.bf16.mxu0 %v3468_v46  ;;  %3654 = vmatpush1.bf16.msra.mxu1 %v3523_v15  ;;  %v9161_v33 = vmul.f32 %v2782_v62, %v12450_v34  ;;  %v3215_v55 = vsel %vm543_vm2, %v12506_v5, %v12493_v23  ;;  %v12508_v50 = vld [vmem:[#allocation175_spill] sm:$0xff]  ;;  %v12509_v21 = vld [vmem:[#allocation165_spill] sm:$0xff] }
 0xcf6   :  { %12503 = vst [vmem:[#allocation197_spill] sm:$0xff] %v9154_v48  ;;  %v3232_v58 = vmul.f32 %v3210_v3, %v12289_v63  ;;  %v3467_v38 = vpack.c.bf16 %v2979_v35, %v2975_v36  ;;  %v9168_v10 = vpop.permute.xlu1 %3295  ;;  %3655 = vmatprep.subr.bf16.mxu1 %v3520_v43  ;;  %v9170_v16 = vpop.permute.xlu0 %3013  ;;  %v2868_v15 = vsel %vm391_vm8, %v12509_v21, %v12508_v50  ;;  %v12510_v48 = vld [vmem:[#allocation69_spill] sm:$0xff]  ;;  %v12511_v35 = vld [vmem:[#allocation148_spill] sm:$0xff] }
 0xcf7   :  { %12507 = vst [vmem:[#allocation168_spill] sm:$0xff] %v9168_v10  ;;  %v3231_v62 = vmul.f32 %v3216_v18, %v12292_v4  ;;  %v2888_v46 = vmul.f32 %v2869_v61, %v6831_v2  ;;  %v3519_v53 = vpack.c.bf16 %v3239_v39, %v3235_v11  ;;  %v9179_v23 = vmul.f32 %v2860_v28, %v12510_v48  ;;  %v12512_v61 = vld [vmem:[#allocation203_spill] sm:$0xff]  ;;  %v12513_v39 = vld [vmem:[#allocation200_spill] sm:$0xff] }
 0xcf8   :  { %v9182_v3 = vmul.f32 %v3062_v59, %v12480_v20  ;;  %3599 = vmatpush1.bf16.msra.mxu0 %v3467_v38  ;;  %v3516_v43 = vpack.c.bf16 %v3232_v58, %v3228_v45  ;;  %v3068_v63 = vsel %vm467_vm6, %v12511_v35, %v12505_v41  ;;  %v3227_v18 = vmul.f32 %v3215_v55, %v12292_v4  ;;  %v12515_v59 = vld [vmem:[#allocation141_spill] sm:$0xff]  ;;  %v12516_v58 = vld [vmem:[#allocation139_spill] sm:$0xff]  ;;  %v12517_v38 = vld [vmem:[#allocation166_spill] sm:$0xff] }
 0xcf9   :  { %v3124_v28 = vsel %vm505_vm4, %v12513_v39, %v12512_v61  ;;  %v12514_v11 = vpack.c.bf16 %v8899_v60, %v8865_v47  ;;  %3656 = vmatpush1.bf16.msra.mxu1 %v3519_v53  ;;  %v3405_v41 = vsel %vm619_vm0, %v12516_v58, %v12515_v59  ;;  %v12518_v55 = vld [vmem:[#allocation157_spill] sm:$0xff]  ;;  %v2884_v4 = vmul.f32 %v2868_v15, %v6831_v2 }
 0xcfa   :  { %v2867_v36 = vsel %vm391_vm8, %v12518_v55, %v12517_v38  ;;  %v9209_v61 = vpop.permute.xlu1 %2739  ;;  %3657 = vmatprep.subr.bf16.mxu1 %v3516_v43  ;;  %v9211_v60 = vpop.permute.xlu0 %2847  ;;  %v3515_v53 = vpack.c.bf16 %v3231_v62, %v3227_v18  ;;  %v2873_v47 = vsel %vm391_vm8, %v8816_v9, %v12518_v55  ;;  %v3460_v45 = vpack.c.bf16 %v8968_v40, %v2888_v46  ;;  %v12520_v43 = vld [vmem:[#allocation189_spill] sm:$0xff]  ;;  %v12523_v46 = vld [vmem:[#allocation199_spill] sm:$0xff] }
 0xcfb   :  { %3600 = vmatprep.subr.bf16.mxu0 %v12514_v11  ;;  %v2875_v11 = vsel %vm391_vm8, %v9211_v60, %v12501_v0  ;;  %v9223_v15 = vmul.f32 %v3068_v63, %v12487_v44  ;;  %v3127_v62 = vsel %vm505_vm4, %v12520_v43, %v12513_v39  ;;  %v3140_v18 = vmul.f32 %v3124_v28, %v12301_v30  ;;  %v12522_v0 = vld [vmem:[#allocation143_spill] sm:$0xff] }
 0xcfc   :  { %v2887_v59 = vmul.f32 %v2875_v11, %v6852_v52  ;;  %v12521_v55 = vpack.c.bf16 %v8906_v25, %v8915_v49  ;;  %v3411_v40 = vsel %vm619_vm0, %v12522_v0, %v12516_v58  ;;  %v2880_v63 = vmul.f32 %v2867_v36, %v6831_v2  ;;  %v12524_v28 = vld [vmem:[#allocation135_spill] sm:$0xff]  ;;  %v12525_v11 = vld [vmem:[#allocation133_spill] sm:$0xff]  ;;  %v12528_v2 = vld [vmem:[#allocation80_spill] sm:$0xff] }
 0xcfd   :  { %12519 = vst [vmem:[#allocation177_spill] sm:$0xff] %v9223_v15  ;;  %v2874_v39 = vsel %vm391_vm8, %v12523_v46, %v12509_v21  ;;  %3658 = vmatpush1.bf16.msra.mxu1 %v3515_v53  ;;  %v2774_v49 = vsel %vm353_vm7, %v12525_v11, %v12524_v28  ;;  %v3436_v25 = vmul.f32 %v3405_v41, %v12452_v8  ;;  %v12527_v36 = vld [vmem:[#allocation79_spill] sm:$0xff]  ;;  %v12532_v41 = vld [vmem:[#allocation137_spill] sm:$0xff] }
 0xcfe   :  { %3601 = vmatpush1.bf16.msra.mxu0 %v12521_v55  ;;  %v2879_v55 = vmul.f32 %v2873_v47, %v6852_v52  ;;  %v3459_v58 = vpack.c.bf16 %v9021_v42, %v2887_v59  ;;  %v9250_v0 = vpop.permute.xlu1 %2735  ;;  %v12529_v43 = vpack.c.bf16 %v12527_v36, %v12528_v2  ;;  %v9255_v21 = vpop.permute.xlu0 %3037  ;;  %v2780_v47 = vsel %vm353_vm7, %v12532_v41, %v12525_v11  ;;  %v12533_v2 = vld [vmem:[#allocation198_spill] sm:$0xff]  ;;  %v12544_v28 = vld [vmem:[#allocation169_spill] sm:$0xff] }
 0xcff   :  { %3602 = vmatprep.subr.bf16.mxu0 %v3460_v45  ;;  %12526 = vst [vmem:[#allocation195_spill] sm:$0xff] %v9250_v0  ;;  %12530 = vst [vmem:[#allocation183_spill] sm:$0xff] %v9255_v21  ;;  %v12531_v45 = vld [vmem:[#allocation150_spill] sm:$0xff]  ;;  %v3139_v42 = vmul.f32 %v3127_v62, %v12302_v17  ;;  %v3456_v59 = vpack.c.bf16 %v2884_v4, %v2880_v63  ;;  %v3435_v35 = vmul.f32 %v3411_v40, %v12453_v24  ;;  %v12535_v4 = vld [vmem:[#allocation205_spill] sm:$0xff] }
 0xd00   :  { %3659 = vmatprep.subr.bf16.mxu1 %v12529_v43  ;;  %v9261_v53 = vsel %vm391_vm8, %v12531_v45, %v12456_v29  ;;  %v12534_v43 = vld [vmem:[#allocation187_spill] sm:$0xff]  ;;  %v2883_v5 = vmul.f32 %v2874_v39, %v6852_v52  ;;  %v3508_v29 = vpack.c.bf16 %v8854_v22, %v3140_v18  ;;  %v2796_v15 = vmul.f32 %v2774_v49, %v12449_v19  ;;  %v12536_v40 = vld [vmem:[#allocation184_spill] sm:$0xff]  ;;  %v12537_v11 = vld [vmem:[#allocation78_spill] sm:$0xff] }
 0xd01   :  { %v2773_v36 = vsel %vm353_vm7, %v12534_v43, %v12533_v2  ;;  %v9280_v62 = vsel %vm391_vm8, %v8344_v1, %v12531_v45  ;;  %v3403_v63 = vsel %vm619_vm0, %v12536_v40, %v12535_v4  ;;  %v12538_v0 = vld [vmem:[#allocation76_spill] sm:$0xff]  ;;  %v2795_v22 = vmul.f32 %v2780_v47, %v12450_v34  ;;  %v12540_v18 = vld [vmem:[#allocation170_spill] sm:$0xff]  ;;  %v12541_v49 = vld [vmem:[#allocation161_spill] sm:$0xff] }
 0xd02   :  { %3603 = vmatpush1.bf16.msra.mxu0 %v3459_v58  ;;  %v12539_v39 = vpack.c.bf16 %v12537_v11, %v12538_v0  ;;  %v2771_v58 = vsel %vm353_vm7, %v12541_v49, %v12540_v18  ;;  %v3455_v52 = vpack.c.bf16 %v2883_v5, %v2879_v55  ;;  %v9294_v1 = vpop.permute.xlu1 %3287  ;;  %v9296_v45 = vpop.permute.xlu0 %2833  ;;  %v3548_v4 = vpack.c.bf16 %v8957_v26, %v3436_v25  ;;  %v12545_v47 = vld [vmem:[#allocation180_spill] sm:$0xff]  ;;  %v12548_v25 = vld [vmem:[#allocation149_spill] sm:$0xff]  ;;  %v12556_v21 = vld [vmem:[#allocation190_spill] sm:$0xff] }
 0xd03   :  { %3604 = vmatprep.subr.bf16.mxu0 %v3456_v59  ;;  %12542 = vst [vmem:[#allocation144_spill] sm:$0xff] %v9294_v1  ;;  %v12543_v59 = vld [vmem:[#allocation179_spill] sm:$0xff]  ;;  %v3409_v11 = vsel %vm619_vm0, %v12545_v47, %v12536_v40  ;;  %v3507_v5 = vpack.c.bf16 %v8850_v51, %v3139_v42  ;;  %v3547_v55 = vpack.c.bf16 %v8971_v27, %v3435_v35  ;;  %v12547_v1 = vld [vmem:[#allocation145_spill] sm:$0xff]  ;;  %v12550_v47 = vld [vmem:[#allocation152_spill] sm:$0xff] }
 0xd04   :  { %3660 = vmatpush1.bf16.msra.mxu1 %v12539_v39  ;;  %v2772_v0 = vsel %vm353_vm7, %v12544_v28, %v12543_v59  ;;  %v2792_v39 = vmul.f32 %v2773_v36, %v12449_v19  ;;  %v9320_v18 = vsel %vm467_vm6, %v12548_v25, %v12547_v1  ;;  %v3428_v40 = vmul.f32 %v3403_v63, %v12452_v8  ;;  %v12549_v36 = vld [vmem:[#allocation158_spill] sm:$0xff]  ;;  %v12551_v51 = vld [vmem:[#allocation160_spill] sm:$0xff] }
 0xd05   :  { %3661 = vmatprep.subr.bf16.mxu1 %v3508_v29  ;;  %v12546_v29 = vld [vmem:[#allocation147_spill] sm:$0xff]  ;;  %v3125_v27 = vsel %vm505_vm4, %v12550_v47, %v12549_v36  ;;  %v12552_v35 = vld [vmem:[#allocation154_spill] sm:$0xff]  ;;  %v2788_v47 = vmul.f32 %v2772_v0, %v12449_v19 }
 0xd06   :  { %v9314_v26 = vsel %vm467_vm6, %v12547_v1, %v12546_v29  ;;  %3605 = vmatpush1.bf16.msra.mxu0 %v3455_v52  ;;  %v3407_v42 = vsel %vm619_vm0, %v12552_v35, %v12551_v51  ;;  %v12553_v29 = vld [vmem:[#allocation178_spill] sm:$0xff]  ;;  %v12554_v1 = vpack.c.bf16 %v9122_v57, %v8942_v31  ;;  %v2784_v52 = vmul.f32 %v2771_v58, %v12449_v19  ;;  %v9345_v10 = vpop.permute.xlu1 %3039  ;;  %v12557_v57 = vld [vmem:[#allocation208_spill] sm:$0xff] }
 0xd07   :  { %v3402_v59 = vsel %vm619_vm0, %v12553_v29, %v8881_v6  ;;  %v12555_v63 = vld [vmem:[#allocation174_spill] sm:$0xff]  ;;  %v3427_v35 = vmul.f32 %v3409_v11, %v12453_v24  ;;  %v9347_v6 = vpop.permute.xlu0 %2751  ;;  %v3401_v31 = vsel %vm619_vm0, %v12551_v51, %v12556_v21  ;;  %v2777_v58 = vsel %vm353_vm7, %v12557_v57, %v12541_v49  ;;  %v12561_v49 = vld [vmem:[#allocation128_spill] sm:$0xff] }
 0xd08   :  { %3606 = vmatprep.subr.bf16.mxu0 %v12554_v1  ;;  %3662 = vmatpush1.bf16.msra.mxu1 %v3507_v5  ;;  %v3408_v25 = vsel %vm619_vm0, %v12555_v63, %v12553_v29  ;;  %v2779_v0 = vsel %vm353_vm7, %v9347_v6, %v12534_v43  ;;  %v3448_v11 = vpack.c.bf16 %v2796_v15, %v2792_v39  ;;  %v12558_v5 = vld [vmem:[#allocation210_spill] sm:$0xff]  ;;  %v12562_v63 = vld [vmem:[#allocation172_spill] sm:$0xff]  ;;  %v12563_v43 = vld [vmem:[#allocation201_spill] sm:$0xff] }
 0xd09   :  { %3673 = vmatprep.subr.bf16.mxu1 %v3548_v4  ;;  %v12559_v4 = vld [vmem:[#allocation176_spill] sm:$0xff]  ;;  %v3424_v1 = vmul.f32 %v3402_v59, %v12452_v8  ;;  %v2791_v51 = vmul.f32 %v2779_v0, %v12450_v34  ;;  %v12560_v19 = vpack.c.bf16 %v9161_v33, %v8945_v14  ;;  %v3544_v21 = vpack.c.bf16 %v12561_v49, %v3428_v40  ;;  %v12564_v59 = vld [vmem:[#allocation206_spill] sm:$0xff] }
 0xd0a   :  { %v3123_v29 = vsel %vm505_vm4, %v12559_v4, %v12558_v5  ;;  %v3126_v15 = vsel %vm505_vm4, %v12562_v63, %v12559_v4  ;;  %v2778_v39 = vsel %vm353_vm7, %v12563_v43, %v12544_v28  ;;  %v2953_v0 = vsel %vm429_vm5, %v12564_v59, %v9088_v12  ;;  %v12565_v14 = vld [vmem:[#allocation188_spill] sm:$0xff]  ;;  %v9389_v49 = vpop.permute.xlu1 %3113  ;;  %v12566_v12 = vld [vmem:[#allocation95_spill] sm:$0xff] }
 0xd0b   :  { %3607 = vmatpush1.bf16.msra.mxu0 %v12560_v19  ;;  %v3122_v19 = vsel %vm505_vm4, %v12549_v36, %v12565_v14  ;;  %v3420_v33 = vmul.f32 %v3401_v31, %v12452_v8  ;;  %v2783_v40 = vmul.f32 %v2777_v58, %v12450_v34  ;;  %v3447_v4 = vpack.c.bf16 %v2795_v22, %v2791_v51  ;;  %v9391_v28 = vpop.permute.xlu0 %2913  ;;  %v12567_v36 = vld [vmem:[#allocation191_spill] sm:$0xff]  ;;  %v12599_v8 = vld [vmem:[#allocation105_spill] sm:$0xff] }
 0xd0c   :  { %3608 = vmatprep.subr.bf16.mxu0 %v3448_v11  ;;  %3674 = vmatpush2.bf16.msra.mxu1 %v3547_v55  ;;  %v3423_v63 = vmul.f32 %v3408_v25, %v12453_v24  ;;  %v3543_v11 = vpack.c.bf16 %v12566_v12, %v3427_v35  ;;  %v3136_v55 = vmul.f32 %v3123_v29, %v12301_v30  ;;  %v12568_v35 = vld [vmem:[#allocation214_spill] sm:$0xff]  ;;  %v12570_v29 = vld [vmem:[#allocation151_spill] sm:$0xff] }
 0xd0d   :  { %3675 = vmatprep.subr.bf16.mxu1 %v3544_v21  ;;  %v3444_v5 = vpack.c.bf16 %v2788_v47, %v2784_v52  ;;  %v2787_v43 = vmul.f32 %v2778_v39, %v12450_v34  ;;  %v2959_v31 = vsel %vm429_vm5, %v12567_v36, %v12564_v59  ;;  %v2986_v22 = vmul.f32 %v2953_v0, %v12475_v56  ;;  %v12569_v52 = vld [vmem:[#allocation102_spill] sm:$0xff]  ;;  %v12571_v39 = vld [vmem:[#allocation101_spill] sm:$0xff]  ;;  %v3556_v36 = vld [vmem:[%s11826_s10 + $0x28] sm:$0xff] }
 0xd0e   :  { %v3540_v21 = vpack.c.bf16 %v3424_v1, %v3420_v33  ;;  %v3419_v58 = vmul.f32 %v3407_v42, %v12453_v24  ;;  %v3132_v25 = vmul.f32 %v3122_v19, %v12301_v30  ;;  %v2952_v47 = vsel %vm429_vm5, %v12568_v35, %v12491_v54  ;;  %v9417_v0 = vpop.permute.xlu1 %3199 }
 0xd0f   :  { %3609 = vmatpush1.bf16.msra.mxu0 %v3447_v4  ;;  %v2859_v51 = vsel %vm391_vm8, %v12570_v29, %v12569_v52  ;;  %v2865_v1 = vsel %vm391_vm8, %v12571_v39, %v12570_v29  ;;  %v3135_v42 = vmul.f32 %v3126_v15, %v12302_v17  ;;  %v3443_v59 = vpack.c.bf16 %v2787_v43, %v2783_v40  ;;  %v9419_v19 = vpop.permute.xlu0 %2925  ;;  %v12573_v4 = vld [vmem:[#allocation64_spill] sm:$0xff]  ;;  %v12574_v43 = vld [vmem:[#allocation171_spill] sm:$0xff] }
 0xd10   :  { %3610 = vmatprep.subr.bf16.mxu0 %v3444_v5  ;;  %3676 = vmatpush2.bf16.msra.mxu1 %v3543_v11  ;;  %v3539_v54 = vpack.c.bf16 %v3423_v63, %v3419_v58  ;;  %v12572_v5 = vld [vmem:[#allocation193_spill] sm:$0xff]  ;;  %v2985_v12 = vmul.f32 %v2959_v31, %v12573_v4  ;;  %v3504_v11 = vpack.c.bf16 %v3136_v55, %v3132_v25 }
 0xd11   :  { %3677 = vmatprep.subr.bf16.mxu1 %v3540_v21  ;;  %v2951_v33 = vsel %vm429_vm5, %v12572_v5, %v8810_v37  ;;  %v3131_v15 = vmul.f32 %v3125_v27, %v12302_v17  ;;  %v2958_v40 = vsel %vm429_vm5, %v12574_v43, %v12568_v35  ;;  %v2982_v63 = vmul.f32 %v2952_v47, %v12475_v56  ;;  %v12575_v21 = vld [vmem:[#allocation136_spill] sm:$0xff]  ;;  %v12600_v17 = vld [vmem:[#allocation109_spill] sm:$0xff] }
 0xd12   :  { %v3474_v58 = vpack.c.bf16 %v12575_v21, %v2986_v22  ;;  %v9439_v37 = vld [vmem:[%s11826_s10 + $0x8] ss:$16 sps:$4 sm:$0xff]   ;;  %v9443_v55 = vmul.f32 %v9314_v26, %v12480_v20  ;;  %v9447_v27 = vmul.f32 %v9320_v18, %v12487_v44  ;;  %v9450_v31 = vmul.f32 %v2865_v1, %v12502_v32  ;;  %v9457_v52 = vpop.permute.xlu1 %3191 }
 0xd13   :  { %3611 = vmatpush1.bf16.msra.mxu0 %v3443_v59  ;;  %v3503_v25 = vpack.c.bf16 %v3135_v42, %v3131_v15  ;;  %v12576_v22 = vld [vmem:[#allocation163_spill] sm:$0xff]  ;;  %v2978_v47 = vmul.f32 %v2951_v33, %v12475_v56  ;;  %v9459_v26 = vpop.permute.xlu0 %2949  ;;  %v9461_v18 = vcombine.high %v3556_v36, %v3556_v36  ;;  %v9465_v29 = vmul.f32 %v9280_v62, %v12502_v32  ;;  %v12578_v1 = vld [vmem:[#allocation173_spill] sm:$0xff] }
 0xd14   :  { %3612 = vmatprep.subr.bf16.mxu0 %v3504_v11  ;;  %3678 = vmatpush2.bf16.msra.mxu1 %v3539_v54  ;;  %v2957_v35 = vsel %vm429_vm5, %v12576_v22, %v12572_v5  ;;  %v2898_v39 = vmul.f32 %v2859_v51, %v12510_v48  ;;  %v3473_v42 = vpack.c.bf16 %v12578_v1, %v2985_v12  ;;  %v12579_v54 = vld [vmem:[#allocation186_spill] sm:$0xff]  ;;  %v12581_v11 = vld [vmem:[#allocation207_spill] sm:$0xff] }
 0xd15   :  { %3698 = vmatprep.subr.bf16.mxu1 %v3474_v58  ;;  %12577 = vst [vmem:[#allocation175_spill] sm:$0xff] %v9461_v18  ;;  %v2981_v59 = vmul.f32 %v2958_v40, %v12573_v4  ;;  %v12580_v5 = vld [vmem:[#allocation182_spill] sm:$0xff]  ;;  %v2863_v15 = vsel %vm391_vm8, %v12500_v13, %v12581_v11  ;;  %v3470_v62 = vpack.c.bf16 %v2982_v63, %v2978_v47  ;;  %v12582_v40 = vld [vmem:[#allocation88_spill] sm:$0xff]  ;;  %v12583_v21 = vld [vmem:[#allocation75_spill] sm:$0xff] }
 0xd16   :  { %v3061_v33 = vsel %vm467_vm6, %v12580_v5, %v12579_v54  ;;  %v2894_v51 = vmul.f32 %v9261_v53, %v12510_v48  ;;  %v2977_v12 = vmul.f32 %v2957_v35, %v12573_v4  ;;  %v2857_v43 = vsel %vm391_vm8, %v12581_v11, %v9211_v60  ;;  %v12585_v13 = vld [vmem:[#allocation125_spill] sm:$0xff]  ;;  %v12588_v11 = vld [vmem:[#allocation112_spill] sm:$0xff] }
 0xd17   :  { %3613 = vmatpush2.bf16.msra.mxu0 %v3503_v25  ;;  %3680 = vmatmul.mubr.bf16.vlgmr.msra.gmra.mxu1 %v9439_v37  ;;  %v12584_v58 = vpack.c.bf16 %v12582_v40, %v12583_v21  ;;  %v12586_v63 = vld [vmem:[#allocation197_spill] sm:$0xff]  ;;  %v2746_v53 = vpop.permute.xlu0 %2745  ;;  %v9498_v60 = vmul.f32 %v3061_v33, %v12480_v20  ;;  %v2889_v1 = vmul.f32 %v2863_v15, %v12502_v32  ;;  %v12589_v40 = vld [vmem:[#allocation84_spill] sm:$0xff] }
 0xd18   :  { %3699 = vmatpush1.bf16.msra.mxu1 %v3473_v42  ;;  %v3465_v22 = vpack.c.bf16 %v12586_v63, %v9450_v31  ;;  %v12587_v35 = vld [vmem:[#allocation65_spill] sm:$0xff]  ;;  %5621 = vmatprep.mubr.msk.bf16.mxu1 %vm3589_vm11, %v9461_v18  ;;  %v3469_v42 = vpack.c.bf16 %v2981_v59, %v2977_v12  ;;  %v3496_v21 = vpack.c.bf16 %v12589_v40, %v12588_v11  ;;  %v12591_v25 = vld [vmem:[#allocation156_spill] sm:$0xff]  ;;  %v12592_v63 = vld [vmem:[#allocation90_spill] sm:$0xff] }
 0xd19   :  { %3614 = vmatprep.subr.bf16.mxu0 %v12584_v58  ;;  %3700 = vmatprep.subr.bf16.mxu1 %v3470_v62  ;;  %v3488_v47 = vpack.c.bf16 %v12587_v35, %v9443_v55  ;;  %v12590_v58 = vld [vmem:[#allocation209_spill] sm:$0xff]  ;;  %v2890_v62 = vmul.f32 %v2857_v43, %v12510_v48  ;;  %v9508_v55 = vpop.permute.xlu1 %3291  ;;  %v3466_v33 = vpack.c.bf16 %v9179_v23, %v2898_v39  ;;  %v12595_v15 = vld [vmem:[#allocation104_spill] sm:$0xff]  ;;  %v12597_v40 = vld [vmem:[#allocation110_spill] sm:$0xff] }
 0xd1a   :  { %v3059_v31 = vsel %vm467_vm6, %v12591_v25, %v12590_v58  ;;  %v12593_v35 = vld [vmem:[#allocation73_spill] sm:$0xff]  ;;  %v12596_v59 = vld [vmem:[#allocation108_spill] sm:$0xff]  ;;  %v2856_v11 = vsel %vm391_vm8, %v9296_v45, %v12523_v46  ;;  %v12598_v43 = vld [vmem:[#allocation86_spill] sm:$0xff]  ;;  %v3492_v30 = vpack.c.bf16 %v12600_v17, %v12599_v8  ;;  %v3461_v8 = vpack.c.bf16 %v9465_v29, %v2889_v1 }
 0xd1b   :  { %v12594_v24 = vpack.c.bf16 %v12592_v63, %v12593_v35  ;;  %v3491_v12 = vpack.c.bf16 %v12596_v59, %v12595_v15  ;;  %v3495_v34 = vpack.c.bf16 %v12598_v43, %v12597_v40  ;;  %v12602_v39 = vld [vmem:[#allocation213_spill] sm:$0xff]  ;;  %v9532_v46 = vpop.permute.xlu0 %3297  ;;  %v9536_v15 = vcombine.low %v3556_v36, %v3556_v36  ;;  %v12607_v59 = vld [vmem:[#allocation111_spill] sm:$0xff] }
 0xd1c   :  { %3701 = vmatpush1.bf16.msra.mxu1 %v3469_v42  ;;  %v2861_v63 = vsel %vm391_vm8, %v12517_v38, %v12602_v39  ;;  %v12603_v42 = vld [vmem:[#allocation118_spill] sm:$0xff]  ;;  %v9540_v17 = vmul.f32 %v3059_v31, %v12480_v20  ;;  %v3484_v38 = vpack.c.bf16 %v9182_v3, %v9498_v60  ;;  %v2862_v36 = vsel %vm391_vm8, %v12508_v50, %v9296_v45  ;;  %v12608_v3 = vld [vmem:[#allocation131_spill] sm:$0xff]  ;;  %v12610_v35 = vld [vmem:[#allocation113_spill] sm:$0xff] }
 0xd1d   :  { %3615 = vmatpush2.bf16.msra.mxu0 %v12594_v24  ;;  %v12601_v24 = vld [vmem:[#allocation211_spill] sm:$0xff]  ;;  %3702 = vmatprep.subr.bf16.mxu1 %v3466_v33  ;;  %12605 = vst [vmem:[#allocation165_spill] sm:$0xff] %v9536_v15  ;;  %v12606_v33 = vld [vmem:[#allocation116_spill] sm:$0xff]  ;;  %v2886_v29 = vmul.f32 %v2856_v11, %v12510_v48  ;;  %v3462_v1 = vpack.c.bf16 %v2894_v51, %v2890_v62  ;;  %v9573_v51 = vpop.permute.xlu1 %3031 }
 0xd1e   :  { %3616 = vmatprep.subr.bf16.mxu0 %v3496_v21  ;;  %v3065_v23 = vsel %vm467_vm6, %v12601_v24, %v12591_v25  ;;  %v12604_v21 = vld [vmem:[#allocation122_spill] sm:$0xff]  ;;  %v2855_v25 = vsel %vm391_vm8, %v12602_v39, %v8816_v9  ;;  %v2967_v40 = vsel %vm429_vm5, %v12607_v59, %v12606_v33  ;;  %v2881_v9 = vmul.f32 %v2861_v63, %v12502_v32  ;;  %v12609_v39 = vld [vmem:[#allocation153_spill] sm:$0xff]  ;;  %v12613_v11 = vld [vmem:[#allocation115_spill] sm:$0xff] }
 0xd1f   :  { %v9558_v31 = vmul.f32 %v3065_v23, %v12487_v44  ;;  %v2764_v60 = vsel %vm353_vm7, %v2746_v53, %v12608_v3  ;;  %v2882_v43 = vmul.f32 %v2855_v25, %v12510_v48  ;;  %v2769_v50 = vsel %vm353_vm7, %v12610_v35, %v12609_v39  ;;  %v2742_v62 = vpop.permute.xlu0 %2741  ;;  %3690 = vmatmul.mubr.bf16.gmra.mxu1 %v9536_v15  ;;  %v12614_v25 = vld [vmem:[#allocation192_spill] sm:$0xff]  ;;  %v12616_v3 = vld [vmem:[#allocation129_spill] sm:$0xff]  ;;  %v12617_v15 = vld [vmem:[#allocation71_spill] sm:$0xff] }
 0xd20   :  { %3703 = vmatpush1.bf16.msra.mxu1 %v3465_v22  ;;  %v2763_v23 = vsel %vm353_vm7, %v12609_v39, %v12613_v11  ;;  %v2885_v63 = vmul.f32 %v2862_v36, %v12502_v32  ;;  %v3067_v35 = vsel %vm467_vm6, %v9345_v10, %v12580_v5  ;;  %3730 = vmatprep.mubr.bf16.mxu1 %v12614_v25  ;;  %v12618_v11 = vld [vmem:[#allocation70_spill] sm:$0xff] }
 0xd21   :  { %3617 = vmatpush2.bf16.msra.mxu0 %v3495_v34  ;;  %v12611_v34 = vld [vmem:[#allocation142_spill] sm:$0xff]  ;;  %3704 = vmatprep.subr.bf16.mxu1 %v3462_v1  ;;  %v2770_v48 = vsel %vm353_vm7, %v12616_v3, %v2746_v53  ;;  %v2806_v39 = vmul.f32 %v2764_v60, %v12617_v15  ;;  %v3458_v36 = vpack.c.bf16 %v2886_v29, %v2882_v43 }
 0xd22   :  { %3618 = vmatprep.subr.bf16.mxu0 %v3492_v30  ;;  %v3060_v45 = vsel %vm467_vm6, %v12611_v34, %v9170_v16  ;;  %v12612_v30 = vld [vmem:[#allocation54_spill] sm:$0xff]  ;;  %v2801_v32 = vmul.f32 %v2769_v50, %v12618_v11  ;;  %v2762_v5 = vsel %vm353_vm7, %v2742_v62, %v12532_v41  ;;  %v2767_v53 = vsel %vm353_vm7, %v12533_v2, %v9209_v61 }
 0xd23   :  { %v9577_v22 = vmul.f32 %v2967_v40, %v12612_v30  ;;  %v12615_v1 = vld [vmem:[#allocation162_spill] sm:$0xff]  ;;  %v3076_v18 = vmul.f32 %v3060_v45, %v12480_v20  ;;  %v3079_v60 = vmul.f32 %v3067_v35, %v12487_v44  ;;  %v9612_v43 = vpop.permute.xlu0 %3293  ;;  %v3457_v41 = vpack.c.bf16 %v2885_v63, %v2881_v9  ;;  %v12622_v9 = vld [vmem:[#allocation135_spill] sm:$0xff] }
 0xd24   :  { %v2973_v40 = vsel %vm429_vm5, %v12615_v1, %v12607_v59  ;;  %3705 = vmatpush1.bf16.msra.mxu1 %v3461_v8  ;;  %v2802_v59 = vmul.f32 %v2763_v23, %v12617_v15  ;;  %v2968_v2 = vsel %vm429_vm5, %v9391_v28, %v9419_v19  ;;  %v2805_v8 = vmul.f32 %v2770_v48, %v12618_v11  ;;  %v12620_v50 = vld [vmem:[#allocation98_spill] sm:$0xff]  ;;  %v9627_v23 = vpop.permute.xlu1 %3029 }
 0xd25   :  { %3619 = vmatpush2.bf16.msra.mxu0 %v3491_v12  ;;  %v12619_v12 = vld [vmem:[#allocation183_spill] sm:$0xff]  ;;  %3706 = vmatprep.subr.bf16.mxu1 %v3458_v36  ;;  %v2768_v63 = vsel %vm353_vm7, %v12622_v9, %v2742_v62  ;;  %v2793_v48 = vmul.f32 %v2767_v53, %v12618_v11  ;;  %v3480_v3 = vpack.c.bf16 %v3076_v18, %v9540_v17  ;;  %v12626_v17 = vld [vmem:[#allocation201_spill] sm:$0xff] }
 0xd26   :  { %3620 = vmatprep.subr.bf16.mxu0 %v3488_v47  ;;  %v3066_v29 = vsel %vm467_vm6, %v12619_v12, %v12611_v34  ;;  %v2761_v47 = vsel %vm353_vm7, %v9209_v61, %v9347_v6  ;;  %v12621_v34 = vld [vmem:[#allocation168_spill] sm:$0xff]  ;;  %v2798_v6 = vmul.f32 %v2762_v5, %v12617_v15  ;;  %v12623_v61 = vpack.c.bf16 %v12585_v13, %v9447_v27  ;;  %v12624_v36 = vld [vmem:[#allocation195_spill] sm:$0xff] }
 0xd27   :  { %v3321_v45 = vsel %vm581_vm3, %v12621_v34, %v12620_v50  ;;  %v3454_v35 = vpack.c.bf16 %v2806_v39, %v2802_v59  ;;  %v3075_v25 = vmul.f32 %v3066_v29, %v12487_v44  ;;  %v2759_v62 = vsel %vm353_vm7, %v12624_v36, %v12557_v57  ;;  %v12625_v50 = vld [vmem:[#allocation177_spill] sm:$0xff]  ;;  %v2738_v13 = vpop.permute.xlu0 %2737  ;;  %v12628_v29 = vld [vmem:[#allocation179_spill] sm:$0xff] }
 0xd28   :  { %3707 = vmatpush1.bf16.msra.mxu1 %v3457_v41  ;;  %v3483_v5 = vpack.c.bf16 %v12625_v50, %v3079_v60  ;;  %v2794_v9 = vmul.f32 %v2761_v47, %v12617_v15  ;;  %v2996_v27 = vmul.f32 %v2968_v2, %v12612_v30  ;;  %v3453_v39 = vpack.c.bf16 %v2805_v8, %v2801_v32  ;;  %v12627_v59 = vld [vmem:[#allocation97_spill] sm:$0xff]  ;;  %v12629_v32 = vld [vmem:[#allocation170_spill] sm:$0xff] }
 0xd29   :  { %3621 = vmatpush2.bf16.msra.mxu0 %v12623_v61  ;;  %3708 = vmatprep.subr.bf16.mxu1 %v3454_v35  ;;  %v2797_v18 = vmul.f32 %v2768_v63, %v12618_v11  ;;  %v2760_v57 = vsel %vm353_vm7, %v2738_v13, %v12626_v17  ;;  %v3322_v53 = vsel %vm581_vm3, %v9532_v46, %v12627_v59  ;;  %v12630_v61 = vld [vmem:[#allocation152_spill] sm:$0xff]  ;;  %v12631_v35 = vld [vmem:[#allocation59_spill] sm:$0xff] }
 0xd2a   :  { %3622 = vmatprep.subr.bf16.mxu0 %v3484_v38  ;;  %v2974_v38 = vsel %vm429_vm5, %v9459_v26, %v9391_v28  ;;  %v2766_v60 = vsel %vm353_vm7, %v12628_v29, %v2738_v13  ;;  %v2790_v41 = vmul.f32 %v2760_v57, %v12617_v15  ;;  %v3450_v28 = vpack.c.bf16 %v2798_v6, %v2794_v9  ;;  %v12635_v57 = vld [vmem:[#allocation55_spill] sm:$0xff]  ;;  %v12636_v59 = vld [vmem:[#allocation100_spill] sm:$0xff]  ;;  %v12638_v29 = vld [vmem:[#allocation181_spill] sm:$0xff] }
 0xd2b   :  { %v2765_v47 = vsel %vm353_vm7, %v12629_v32, %v12624_v36  ;;  %v2786_v2 = vmul.f32 %v2759_v62, %v12617_v15  ;;  %v3479_v8 = vpack.c.bf16 %v3075_v25, %v9558_v31  ;;  %v3119_v63 = vsel %vm505_vm4, %v12565_v14, %v9389_v49  ;;  %v3290_v36 = vpop.permute.xlu0 %3289  ;;  %v12632_v25 = vld [vmem:[#allocation94_spill] sm:$0xff] }
 0xd2c   :  { %3709 = vmatpush1.bf16.msra.mxu1 %v3453_v39  ;;  %v3128_v6 = vsel %vm505_vm4, %v9389_v49, %v12630_v61  ;;  %v2995_v50 = vmul.f32 %v2974_v38, %v12631_v35  ;;  %v3476_v31 = vpack.c.bf16 %v2996_v27, %v9577_v22  ;;  %v12633_v62 = vld [vmem:[#allocation50_spill] sm:$0xff]  ;;  %v3449_v9 = vpack.c.bf16 %v2797_v18, %v2793_v48  ;;  %v12634_v38 = vld [vmem:[#allocation96_spill] sm:$0xff] }
 0xd2d   :  { %3623 = vmatpush2.bf16.msra.mxu0 %v3483_v5  ;;  %v9677_v5 = vpop.permute.xlu1 %3195  ;;  %3710 = vmatprep.subr.bf16.mxu1 %v3450_v28  ;;  %v3346_v14 = vmul.f32 %v3322_v53, %v12633_v62  ;;  %v2789_v13 = vmul.f32 %v2766_v60, %v12618_v11  ;;  %v2991_v49 = vmul.f32 %v2973_v40, %v12631_v35  ;;  %v12637_v40 = vld [vmem:[#allocation56_spill] sm:$0xff]  ;;  %v12640_v32 = vld [vmem:[#allocation210_spill] sm:$0xff] }
 0xd2e   :  { %3624 = vmatprep.subr.bf16.mxu0 %v3480_v3  ;;  %v3304_v3 = vsel %vm581_vm3, %v12632_v25, %v9532_v46  ;;  %v3303_v39 = vsel %vm581_vm3, %v12634_v38, %v12621_v34  ;;  %v3342_v17 = vmul.f32 %v3321_v45, %v12633_v62  ;;  %v3446_v22 = vpack.c.bf16 %v2790_v41, %v2786_v2  ;;  %v12639_v45 = vld [vmem:[#allocation49_spill] sm:$0xff]  ;;  %v12641_v2 = vld [vmem:[#allocation172_spill] sm:$0xff] }
 0xd2f   :  { %v2785_v27 = vmul.f32 %v2765_v47, %v12618_v11  ;;  %v3133_v46 = vmul.f32 %v3119_v63, %v12635_v57  ;;  %v3320_v48 = vsel %vm581_vm3, %v9612_v43, %v12636_v59  ;;  %v3134_v18 = vmul.f32 %v3128_v6, %v12637_v40  ;;  %v3116_v41 = vpop.permute.xlu0 %3115  ;;  %v9713_v61 = vld [vmem:[%s11826_s10] ss:$16 sps:$4 sm:$0xff]  }
 0xd30   :  { %3711 = vmatpush1.bf16.msra.mxu1 %v3449_v9  ;;  %v3475_v53 = vpack.c.bf16 %v2995_v50, %v2991_v49  ;;  %v3319_v34 = vsel %vm581_vm3, %v9508_v55, %v12638_v29  ;;  %v3345_v60 = vmul.f32 %v3304_v3, %v12639_v45  ;;  %v3120_v47 = vsel %vm505_vm4, %v12640_v32, %v3116_v41  ;;  %v12642_v6 = vld [vmem:[#allocation99_spill] sm:$0xff]  ;;  %v12643_v49 = vld [vmem:[#allocation164_spill] sm:$0xff] }
 0xd31   :  { %3625 = vmatpush2.bf16.msra.mxu0 %v3479_v8  ;;  %3712 = vmatprep.subr.bf16.mxu1 %v3446_v22  ;;  %v3445_v28 = vpack.c.bf16 %v2789_v13, %v2785_v27  ;;  %v3129_v8 = vsel %vm505_vm4, %v3116_v41, %v12641_v2  ;;  %v3538_v63 = vpack.c.bf16 %v3346_v14, %v3342_v17  ;;  %v9720_v25 = vpop.permute.xlu1 %3393  ;;  %v3555_v14 = vld [vmem:[%s11826_s10 + $0x20] sm:$0xff]  ;;  %v12648_v32 = vld [vmem:[#allocation144_spill] sm:$0xff] }
 0xd32   :  { %3626 = vmatprep.subr.bf16.mxu0 %v3476_v31  ;;  %v3302_v50 = vsel %vm581_vm3, %v12642_v6, %v9612_v43  ;;  %v3338_v31 = vmul.f32 %v3320_v48, %v12633_v62  ;;  %v3137_v3 = vmul.f32 %v3120_v47, %v12635_v57  ;;  %v3138_v9 = vmul.f32 %v3129_v8, %v12637_v40  ;;  %v12644_v43 = vld [vmem:[#allocation121_spill] sm:$0xff]  ;;  %v12645_v17 = vld [vmem:[#allocation123_spill] sm:$0xff]  ;;  %v12646_v27 = vld [vmem:[#allocation134_spill] sm:$0xff] }
 0xd33   :  { %v3341_v13 = vmul.f32 %v3303_v39, %v12639_v45  ;;  %v3318_v38 = vsel %vm581_vm3, %v3290_v36, %v12643_v49  ;;  %v3301_v59 = vsel %vm581_vm3, %v12646_v27, %v9508_v55  ;;  %v3334_v48 = vmul.f32 %v3319_v34, %v12633_v62  ;;  %v3202_v29 = vpop.permute.xlu0 %3201  ;;  %v12647_v39 = vld [vmem:[#allocation155_spill] sm:$0xff]  ;;  %v12650_v34 = vld [vmem:[#allocation126_spill] sm:$0xff]  ;;  %v12651_v6 = vld [vmem:[#allocation72_spill] sm:$0xff] }
 0xd34   :  { %3713 = vmatpush1.bf16.msra.mxu1 %v3445_v28  ;;  %v3506_v41 = vpack.c.bf16 %v3138_v9, %v3134_v18  ;;  %v3317_v47 = vsel %vm581_vm3, %v12648_v32, %v12647_v39  ;;  %v3337_v2 = vmul.f32 %v3302_v50, %v12639_v45  ;;  %v9744_v8 = vcombine.high %v3555_v14, %v3555_v14  ;;  %v12654_v49 = vld [vmem:[#allocation83_spill] sm:$0xff]  ;;  %v5921_v22 = vld [vmem:[%s11826_s10 + $0xc] ss:$16 sps:$4 sm:$0xff]  }
 0xd35   :  { %3627 = vmatpush2.bf16.msra.mxu0 %v3475_v53  ;;  %v3505_v53 = vpack.c.bf16 %v3137_v3, %v3133_v46  ;;  %v3537_v28 = vpack.c.bf16 %v3345_v60, %v3341_v13  ;;  %v3330_v46 = vmul.f32 %v3318_v38, %v12633_v62  ;;  %v3534_v18 = vpack.c.bf16 %v3338_v31, %v3334_v48  ;;  %v12652_v60 = vld [vmem:[#allocation114_spill] sm:$0xff]  ;;  %v12653_v13 = vld [vmem:[#allocation127_spill] sm:$0xff]  ;;  %v9763_v48 = vpop.permute.xlu1 %3025 }
 0xd36   :  { %3749 = vmatprep.subr.bf16.mxu0 %v3538_v63  ;;  %v12649_v63 = vld [vmem:[#allocation194_spill] sm:$0xff]  ;;  %3714 = vmatprep.subr.bf16.mxu1 %v3506_v41  ;;  %v3497_v3 = vpack.c.bf16 %v12651_v6, %v12650_v34  ;;  %v3333_v9 = vmul.f32 %v3301_v59, %v12639_v45  ;;  %v3226_v50 = vsel %vm543_vm2, %v3202_v29, %v12652_v60  ;;  %v12656_v59 = vld [vmem:[#allocation89_spill] sm:$0xff]  ;;  %v12660_v60 = vld [vmem:[#allocation107_spill] sm:$0xff] }
 0xd37   :  { %v3300_v55 = vsel %vm581_vm3, %v12649_v63, %v3290_v36  ;;  %v3498_v27 = vpack.c.bf16 %v12654_v49, %v12653_v13  ;;  %v12655_v36 = vld [vmem:[#allocation202_spill] sm:$0xff]  ;;  %v3326_v31 = vmul.f32 %v3317_v47, %v12633_v62  ;;  %v3198_v63 = vpop.permute.xlu0 %3197  ;;  %v3208_v47 = vsel %vm543_vm2, %v12660_v60, %v3202_v29  ;;  %v12662_v13 = vld [vmem:[#allocation52_spill] sm:$0xff] }
 0xd38   :  { %3629 = vmatmul.mubr.bf16.vlgmr.msra.gmra.mxu0 %v9713_v61  ;;  %3715 = vmatpush2.bf16.msra.mxu1 %v3505_v53  ;;  %v3299_v38 = vsel %vm581_vm3, %v12655_v36, %v12648_v32  ;;  %v12657_v41 = vld [vmem:[#allocation74_spill] sm:$0xff]  ;;  %v3533_v6 = vpack.c.bf16 %v3337_v2, %v3333_v9  ;;  %v3329_v32 = vmul.f32 %v3300_v55, %v12639_v45  ;;  %v12663_v36 = vld [vmem:[#allocation120_spill] sm:$0xff]  ;;  %v12664_v9 = vld [vmem:[#allocation149_spill] sm:$0xff] }
 0xd39   :  { %3750 = vmatpush1.bf16.msra.mxu0 %v3537_v28  ;;  %v12658_v39 = vpack.c.bf16 %v12656_v59, %v12657_v41  ;;  %v9768_v28 = vcombine.low %v3555_v14, %v3555_v14  ;;  %v12659_v53 = vld [vmem:[#allocation106_spill] sm:$0xff]  ;;  %3638 = vmatprep.mubr.bf16.mxu0 %v9744_v8  ;;  %v3250_v49 = vmul.f32 %v3226_v50, %v12662_v13  ;;  %v12665_v41 = vld [vmem:[#allocation147_spill] sm:$0xff]  ;;  %v12667_v50 = vld [vmem:[#allocation85_spill] sm:$0xff] }
 0xd3a   :  { %3751 = vmatprep.subr.bf16.mxu0 %v3534_v18  ;;  %v3225_v34 = vsel %vm543_vm2, %v9417_v0, %v12659_v53  ;;  %v12661_v18 = vld [vmem:[#allocation103_spill] sm:$0xff]  ;;  %v3224_v59 = vsel %vm543_vm2, %v3198_v63, %v12663_v36  ;;  %v3530_v2 = vpack.c.bf16 %v3330_v46, %v3326_v31  ;;  %v3325_v55 = vmul.f32 %v3299_v38, %v12639_v45  ;;  %v12669_v46 = vld [vmem:[#allocation185_spill] sm:$0xff]  ;;  %v12682_v62 = vld [vmem:[#allocation196_spill] sm:$0xff] }
 0xd3b   :  { %3716 = vmatprep.subr.bf16.mxu1 %v12658_v39  ;;  %v3207_v14 = vsel %vm543_vm2, %v12661_v18, %v9417_v0  ;;  %v3051_v29 = vsel %vm467_vm6, %v9573_v51, %v12664_v9  ;;  %v3057_v39 = vsel %vm467_vm6, %v12665_v41, %v9573_v51  ;;  %v12666_v0 = vld [vmem:[#allocation92_spill] sm:$0xff]  ;;  %v3246_v60 = vmul.f32 %v3225_v34, %v12662_v13  ;;  %v12670_v31 = vld [vmem:[#allocation51_spill] sm:$0xff]  ;;  %v3194_v36 = vpop.permute.xlu0 %3193 }
 0xd3c   :  { %v12668_v53 = vpack.c.bf16 %v12666_v0, %v12667_v50  ;;  %v3223_v38 = vsel %vm543_vm2, %v9677_v5, %v12669_v46  ;;  %v3249_v18 = vmul.f32 %v3208_v47, %v12670_v31  ;;  %v3245_v9 = vmul.f32 %v3207_v14, %v12670_v31  ;;  %v12671_v51 = vld [vmem:[#allocation159_spill] sm:$0xff]  ;;  %v12672_v0 = vld [vmem:[#allocation62_spill] sm:$0xff]  ;;  %v3118_v47 = vpop.permute.xlu1 %3117 }
 0xd3d   :  { %3752 = vmatpush1.bf16.msra.mxu0 %v3533_v6  ;;  %v3221_v6 = vsel %vm543_vm2, %v9457_v52, %v12671_v51  ;;  %v3529_v41 = vpack.c.bf16 %v3329_v32, %v3325_v55  ;;  %v3242_v34 = vmul.f32 %v3224_v59, %v12662_v13  ;;  %v3089_v50 = vmul.f32 %v3057_v39, %v12672_v0  ;;  %v12675_v32 = vld [vmem:[#allocation148_spill] sm:$0xff] }
 0xd3e   :  { %3717 = vmatpush2.bf16.msra.mxu1 %v12668_v53  ;;  %3753 = vmatprep.subr.bf16.mxu0 %v3530_v2  ;;  %v12673_v53 = vld [vmem:[#allocation63_spill] sm:$0xff]  ;;  %v12674_v2 = vld [vmem:[#allocation117_spill] sm:$0xff]  ;;  %v3526_v14 = vpack.c.bf16 %v3250_v49, %v3246_v60  ;;  %v3050_v59 = vsel %vm467_vm6, %v9627_v23, %v12675_v32  ;;  %v3238_v55 = vmul.f32 %v3223_v38, %v12662_v13 }
 0xd3f   :  { %3718 = vmatprep.subr.bf16.mxu1 %v3498_v27  ;;  %v3090_v46 = vmul.f32 %v3051_v29, %v12673_v53  ;;  %v3206_v27 = vsel %vm543_vm2, %v12674_v2, %v3198_v63  ;;  %v12676_v29 = vld [vmem:[#allocation167_spill] sm:$0xff]  ;;  %v12677_v63 = vld [vmem:[#allocation146_spill] sm:$0xff]  ;;  %v3525_v51 = vpack.c.bf16 %v3249_v18, %v3245_v9  ;;  %v12679_v38 = vpack.c.bf16 %v12645_v17, %v12644_v43  ;;  %v3034_v2 = vpop.permute.xlu0 %3033  ;;  %v12683_v9 = vld [vmem:[#allocation204_spill] sm:$0xff] }
 0xd40   :  { %3639 = vmatmul.mubr.bf16.gmra.mxu0 %v9768_v28  ;;  %v3222_v39 = vsel %vm543_vm2, %v3194_v36, %v12676_v29  ;;  %v3056_v49 = vsel %vm467_vm6, %v12677_v63, %v9627_v23  ;;  %v12681_v29 = vld [vmem:[#allocation138_spill] sm:$0xff]  ;;  %v3522_v63 = vpack.c.bf16 %v3242_v34, %v3238_v55  ;;  %v12684_v34 = vpack.c.bf16 %v12604_v21, %v12603_v42  ;;  %v9864_v55 = vpop.permute.xlu1 %3389  ;;  %v12685_v21 = vld [vmem:[#allocation189_spill] sm:$0xff] }
 0xd41   :  { %5622 = vmatprep.mubr.msk.bf16.mxu0 %vm3589_vm11, %v5921_v22  ;;  %3754 = vmatpush1.bf16.msra.mxu0 %v3529_v41  ;;  %v12678_v22 = vld [vmem:[#allocation215_spill] sm:$0xff]  ;;  %v3241_v41 = vmul.f32 %v3206_v27, %v12670_v31  ;;  %v3058_v23 = vsel %vm467_vm6, %v12681_v29, %v3034_v2  ;;  %v3234_v18 = vmul.f32 %v3222_v39, %v12662_v13 }
 0xd42   :  { %3719 = vmatpush2.bf16.msra.mxu1 %v3497_v3  ;;  %v3205_v60 = vsel %vm543_vm2, %v12678_v22, %v9677_v5  ;;  %3755 = vmatprep.subr.bf16.mxu0 %v3526_v14  ;;  %v12680_v3 = vld [vmem:[#allocation140_spill] sm:$0xff]  ;;  %v3204_v5 = vsel %vm543_vm2, %v12682_v62, %v3194_v36  ;;  %v3093_v43 = vmul.f32 %v3058_v23, %v12672_v0  ;;  %v12686_v29 = vld [vmem:[#allocation203_spill] sm:$0xff] }
 0xd43   :  { %3720 = vmatprep.subr.bf16.mxu1 %v12679_v38  ;;  %v3052_v32 = vsel %vm467_vm6, %v3034_v2, %v12680_v3  ;;  %v3203_v27 = vsel %vm543_vm2, %v12683_v9, %v9457_v52  ;;  %v3230_v14 = vmul.f32 %v3221_v6, %v12662_v13  ;;  %v3237_v22 = vmul.f32 %v3205_v60, %v12670_v31  ;;  %v3028_v38 = vpop.permute.xlu0 %3027 }
 0xd44   :  { %v3094_v17 = vmul.f32 %v3052_v32, %v12673_v53  ;;  %v3085_v62 = vmul.f32 %v3056_v49, %v12672_v0  ;;  %v3086_v36 = vmul.f32 %v3050_v59, %v12673_v53  ;;  %v3489_v39 = vpack.c.bf16 %v3093_v43, %v3089_v50 }
 0xd45   :  { %3756 = vmatpush1.bf16.msra.mxu0 %v3525_v51  ;;  %v3521_v52 = vpack.c.bf16 %v3241_v41, %v3237_v22  ;;  %v3233_v6 = vmul.f32 %v3204_v5, %v12670_v31  ;;  %v3049_v60 = vsel %vm467_vm6, %v3028_v38, %v9345_v10  ;;  %v3055_v42 = vsel %vm467_vm6, %v12579_v54, %v3028_v38 }
 0xd46   :  { %3721 = vmatpush2.bf16.msra.mxu1 %v12684_v34  ;;  %3757 = vmatprep.subr.bf16.mxu0 %v3522_v63  ;;  %v3490_v2 = vpack.c.bf16 %v3094_v17, %v3090_v46  ;;  %v3130_v59 = vsel %vm505_vm4, %v3118_v47, %v12685_v21  ;;  %v3081_v50 = vmul.f32 %v3055_v42, %v12672_v0  ;;  %v12688_v17 = vld [vmem:[#allocation77_spill] sm:$0xff] }
 0xd47   :  { %v3082_v49 = vmul.f32 %v3049_v60, %v12673_v53  ;;  %v3518_v46 = vpack.c.bf16 %v3234_v18, %v3230_v14  ;;  %v3229_v51 = vmul.f32 %v3203_v27, %v12670_v31  ;;  %v3048_v10 = vsel %vm467_vm6, %v9763_v48, %v12619_v12  ;;  %v3392_v41 = vpop.permute.xlu0 %3391  ;;  %v2938_v18 = vpop.permute.xlu1 %2937  ;;  %v12687_v12 = vld [vmem:[#allocation87_spill] sm:$0xff]  ;;  %v12694_v42 = vld [vmem:[#allocation141_spill] sm:$0xff] }
 0xd48   :  { %3722 = vmatprep.subr.bf16.mxu1 %v3490_v2  ;;  %v3485_v54 = vpack.c.bf16 %v3085_v62, %v3081_v50  ;;  %v3054_v32 = vsel %vm467_vm6, %v9170_v16, %v9763_v48  ;;  %v3121_v23 = vsel %vm505_vm4, %v12686_v29, %v3118_v47  ;;  %v3142_v63 = vmul.f32 %v3130_v59, %v12637_v40  ;;  %v12689_v27 = vld [vmem:[#allocation143_spill] sm:$0xff]  ;;  %v12690_v16 = vld [vmem:[#allocation124_spill] sm:$0xff]  ;;  %v12691_v62 = vld [vmem:[#allocation82_spill] sm:$0xff] }
 0xd49   :  { %3758 = vmatpush1.bf16.msra.mxu0 %v3521_v52  ;;  %v3486_v3 = vpack.c.bf16 %v3086_v36, %v3082_v49  ;;  %v3517_v5 = vpack.c.bf16 %v3233_v6, %v3229_v51  ;;  %v3145_v43 = vmul.f32 %v12687_v12, %v12635_v57  ;;  %v3146_v9 = vmul.f32 %v12688_v17, %v12637_v40  ;;  %v12692_v36 = vld [vmem:[#allocation91_spill] sm:$0xff]  ;;  %v12695_v59 = vld [vmem:[#allocation44_spill] sm:$0xff]  ;;  %v12701_v12 = vld [vmem:[#allocation45_spill] sm:$0xff] }
 0xd4a   :  { %3723 = vmatpush2.bf16.msra.mxu1 %v3489_v39  ;;  %3759 = vmatprep.subr.bf16.mxu0 %v3518_v46  ;;  %v3417_v14 = vsel %vm619_vm0, %v3392_v41, %v12689_v27  ;;  %v3418_v48 = vsel %vm619_vm0, %v9720_v25, %v12690_v16  ;;  %v3077_v47 = vmul.f32 %v3054_v32, %v12672_v0  ;;  %v12700_v32 = vld [vmem:[#allocation130_spill] sm:$0xff] }
 0xd4b   :  { %3724 = vmatprep.subr.bf16.mxu1 %v3486_v3  ;;  %v3078_v22 = vmul.f32 %v3048_v10, %v12673_v53  ;;  %v3141_v34 = vmul.f32 %v3121_v23, %v12635_v57  ;;  %v12693_v39 = vpack.c.bf16 %v12691_v62, %v12692_v36  ;;  %v3024_v38 = vpop.permute.xlu0 %3023  ;;  %v2962_v2 = vsel %vm429_vm5, %v9419_v19, %v2938_v18  ;;  %v12696_v19 = vld [vmem:[#allocation119_spill] sm:$0xff]  ;;  %v12697_v10 = vld [vmem:[#allocation81_spill] sm:$0xff] }
 0xd4c   :  { %v3047_v52 = vsel %vm467_vm6, %v3024_v38, %v12601_v24  ;;  %v3053_v6 = vsel %vm467_vm6, %v12590_v58, %v3024_v38  ;;  %v3510_v60 = vpack.c.bf16 %v3146_v9, %v3142_v63  ;;  %v3399_v21 = vsel %vm619_vm0, %v12694_v42, %v3392_v41 }
 0xd4d   :  { %3760 = vmatpush1.bf16.msra.mxu0 %v3517_v5  ;;  %v3438_v50 = vmul.f32 %v3417_v14, %v12695_v59  ;;  %v3073_v49 = vmul.f32 %v3053_v6, %v12672_v0  ;;  %v3074_v46 = vmul.f32 %v3047_v52, %v12673_v53  ;;  %v3400_v24 = vsel %vm619_vm0, %v12696_v19, %v9720_v25  ;;  %v12705_v6 = vld [vmem:[#allocation212_spill] sm:$0xff] }
 0xd4e   :  { %3725 = vmatpush2.bf16.msra.mxu1 %v3485_v54  ;;  %3761 = vmatprep.subr.bf16.mxu0 %v12693_v39  ;;  %v3442_v51 = vmul.f32 %v3418_v48, %v12695_v59  ;;  %v2956_v58 = vsel %vm429_vm5, %v2938_v18, %v9459_v26  ;;  %v12698_v54 = vld [vmem:[#allocation93_spill] sm:$0xff]  ;;  %v3509_v3 = vpack.c.bf16 %v3145_v43, %v3141_v34  ;;  %v12702_v48 = vld [vmem:[#allocation132_spill] sm:$0xff] }
 0xd4f   :  { %v12699_v41 = vpack.c.bf16 %v12697_v10, %v12698_v54  ;;  %v3398_v29 = vsel %vm619_vm0, %v12700_v32, %v9864_v55  ;;  %v3481_v23 = vpack.c.bf16 %v3077_v47, %v3073_v49  ;;  %v2936_v63 = vpop.permute.xlu0 %2935  ;;  %v3482_v25 = vpack.c.bf16 %v3078_v22, %v3074_v46  ;;  %v12703_v39 = vld [vmem:[#allocation205_spill] sm:$0xff]  ;;  %v12708_v54 = vld [vmem:[#allocation154_spill] sm:$0xff] }
 0xd50   :  { %v2997_v5 = vmul.f32 %v2962_v2, %v12573_v4  ;;  %v3437_v17 = vmul.f32 %v3399_v21, %v12701_v12  ;;  %v2955_v26 = vsel %vm429_vm5, %v2936_v63, %v12615_v1  ;;  %v2961_v18 = vsel %vm429_vm5, %v12606_v33, %v2936_v63  ;;  %v3386_v1 = vpop.permute.xlu1 %3385  ;;  %v12704_v2 = vld [vmem:[#allocation180_spill] sm:$0xff] }
 0xd51   :  { %3762 = vmatpush1.bf16.msra.mxu0 %v12699_v41  ;;  %v2998_v43 = vmul.f32 %v2956_v58, %v12475_v56  ;;  %v2993_v9 = vmul.f32 %v2961_v18, %v12573_v4  ;;  %v2994_v27 = vmul.f32 %v2955_v26, %v12475_v56  ;;  %3726 = vmatprep.subr.bf16.mxu1 %v3482_v25  ;;  %v12707_v58 = vld [vmem:[#allocation190_spill] sm:$0xff]  ;;  %v12709_v25 = vld [vmem:[#allocation175_spill] sm:$0xff] }
 0xd52   :  { %3763 = vmatprep.subr.bf16.mxu0 %v3510_v60  ;;  %v3550_v14 = vpack.c.bf16 %v3442_v51, %v3438_v50  ;;  %v3441_v16 = vmul.f32 %v3400_v24, %v12701_v12  ;;  %v3416_v47 = vsel %vm619_vm0, %v9864_v55, %v12702_v48  ;;  %3727 = vmatpush2.bf16.msra.mxu1 %v3481_v23  ;;  %v12706_v50 = vld [vmem:[#allocation174_spill] sm:$0xff] }
 0xd53   :  { %v3477_v22 = vpack.c.bf16 %v2997_v5, %v2993_v9  ;;  %v3388_v33 = vpop.permute.xlu0 %3387  ;;  %v3478_v34 = vpack.c.bf16 %v2998_v43, %v2994_v27  ;;  %v3433_v62 = vmul.f32 %v3398_v29, %v12701_v12  ;;  %v3434_v55 = vmul.f32 %v3416_v47, %v12695_v59  ;;  %v12710_v5 = vld [vmem:[#allocation165_spill] sm:$0xff] }
 0xd54   :  { %v3549_v36 = vpack.c.bf16 %v3441_v16, %v3437_v17  ;;  %v3397_v38 = vsel %vm619_vm0, %v12703_v39, %v3388_v33  ;;  %v3415_v52 = vsel %vm619_vm0, %v3388_v33, %v12704_v2  ;;  %v3396_v60 = vsel %vm619_vm0, %v12705_v6, %v3386_v1 }
 0xd55   :  { %3764 = vmatpush1.bf16.msra.mxu0 %v3509_v3  ;;  %v3429_v42 = vmul.f32 %v3397_v38, %v12701_v12  ;;  %v3430_v21 = vmul.f32 %v3415_v52, %v12695_v59  ;;  %3728 = vmatprep.subr.bf16.mxu1 %v3478_v34  ;;  %v3414_v49 = vsel %vm619_vm0, %v3386_v1, %v12706_v50 }
 0xd56   :  { %3775 = vmatprep.subr.bf16.mxu0 %v3550_v14  ;;  %3729 = vmatpush2.bf16.msra.mxu1 %v3477_v22  ;;  %v3425_v51 = vmul.f32 %v3396_v60, %v12701_v12  ;;  %v3426_v3 = vmul.f32 %v3414_v49, %v12695_v59 }
 0xd57   :  { %v3545_v46 = vpack.c.bf16 %v3433_v62, %v3429_v42  ;;  %v3384_v19 = vpop.permute.xlu0 %3383  ;;  %v3546_v24 = vpack.c.bf16 %v3434_v55, %v3430_v21 }
 0xd58   :  { %v3395_v10 = vsel %vm619_vm0, %v12707_v58, %v3384_v19  ;;  %v3413_v41 = vsel %vm619_vm0, %v3384_v19, %v12708_v54 }
 0xd59   :  { %3776 = vmatpush2.bf16.msra.mxu0 %v3549_v36  ;;  %v3421_v32 = vmul.f32 %v3395_v10, %v12701_v12  ;;  %v3422_v29 = vmul.f32 %v3413_v41, %v12695_v59  ;;  %3731 = vmatmul.mubr.bf16.vlgmr.msra.gmra.mxu1 %v9713_v61 }
 0xd5a   :  { %3777 = vmatprep.subr.bf16.mxu0 %v3546_v24  ;;  %3740 = vmatprep.mubr.bf16.mxu1 %v9744_v8 }
 0xd5b   :  { %v3541_v23 = vpack.c.bf16 %v3425_v51, %v3421_v32  ;;  %v3542_v63 = vpack.c.bf16 %v3426_v3, %v3422_v29 }
 0xd5d   :  { %3778 = vmatpush2.bf16.msra.mxu0 %v3545_v46 }
 0xd5e   :  { %3779 = vmatprep.subr.bf16.mxu0 %v3542_v63 }
 0xd61   :  { %3780 = vmatpush2.bf16.msra.mxu0 %v3541_v23  ;;  %3741 = vmatmul.mubr.bf16.gmra.mxu1 %v9768_v28 }
 0xd64   :  { %3782 = vmatmul.mubr.bf16.vlgmr.msra.gmra.mxu0 %v9439_v37 }
 0xd65   :  { %5623 = vmatprep.mubr.msk.bf16.mxu0 %vm3589_vm11, %v12709_v25 }
 0xd6c   :  { %3792 = vmatmul.mubr.bf16.gmra.mxu0 %v12710_v5 }
 0xdd7   :  { %v3681_v17 = vpop.f32.mrf.mxu1 }
 0xdd9   :  { %v3683_v26 = vpop.f32.mrf.mxu1 }
 0xddb   :  { %v3685_v18 = vpop.f32.mrf.mxu1 }
 0xddd   :  { %v3687_v61 = vpop.f32.mrf.mxu1 }
 0xddf   :  { %v3691_v43 = vpop.f32.mrf.mxu1 }
 0xde1   :  { %v3693_v9 = vpop.f32.mrf.mxu1 }
 0xde3   :  { %v3695_v8 = vpop.f32.mrf.mxu1 }
 0xde5   :  { %v3696_v27 = vpop.f32.mrf.mxu1 }
 0xdf8   :  { %v3630_v14 = vpop.f32.mrf.mxu0 }
 0xdf9   :  { %v9989_v39 = vadd.f32 %v3681_v17, %v3630_v14 }
 0xdfa   :  { %v3632_v16 = vpop.f32.mrf.mxu0 }
 0xdfb   :  { %v9987_v62 = vadd.f32 %v3683_v26, %v3632_v16  ;;  %v3818_v42 = vmul.f32 %v9989_v39, %v9989_v39 }
 0xdfc   :  { %v3634_v48 = vpop.f32.mrf.mxu0 }
 0xdfd   :  { %v3819_v52 = vmul.f32 %v9987_v62, %v9987_v62  ;;  %v9995_v55 = vadd.f32 %v3685_v18, %v3634_v48  ;;  %v3800_v21 = vadd.f32 %v9987_v62, %v9989_v39 }
 0xdfe   :  { %v3636_v47 = vpop.f32.mrf.mxu0 }
 0xdff   :  { %v9991_v38 = vadd.f32 %v3687_v61, %v3636_v47  ;;  %v3830_v58 = vadd.f32 %v3819_v52, %v3818_v42  ;;  %v3822_v3 = vmul.f32 %v9995_v55, %v9995_v55 }
 0xe00   :  { %v3640_v37 = vpop.f32.mrf.mxu0 }
 0xe01   :  { %v3823_v49 = vmul.f32 %v9991_v38, %v9991_v38  ;;  %v10005_v46 = vadd.f32 %v3691_v43, %v3640_v37  ;;  %v3805_v32 = vadd.f32 %v9991_v38, %v9995_v55 }
 0xe02   :  { %v3642_v1 = vpop.f32.mrf.mxu0 }
 0xe03   :  { %v10007_v19 = vadd.f32 %v3693_v9, %v3642_v1  ;;  %v3835_v26 = vadd.f32 %v3823_v49, %v3822_v3  ;;  %v3826_v18 = vmul.f32 %v10005_v46, %v10005_v46 }
 0xe04   :  { %v3644_v28 = vpop.f32.mrf.mxu0 }
 0xe05   :  { %v3827_v61 = vmul.f32 %v10007_v19, %v10007_v19  ;;  %v3810_v48 = vadd.f32 %v10007_v19, %v10005_v46 }
 0xe06   :  { %v3645_v22 = vpop.f32.mrf.mxu0 }
 0xe19   :  { %v3732_v33 = vpop.f32.mrf.mxu1 }
 0xe1b   :  { %v3734_v34 = vpop.f32.mrf.mxu1 }
 0xe1d   :  { %v3736_v36 = vpop.f32.mrf.mxu1 }
 0xe1f   :  { %v3738_v2 = vpop.f32.mrf.mxu1 }
 0xe21   :  { %v3742_v60 = vpop.f32.mrf.mxu1 }
 0xe23   :  { %v3744_v51 = vpop.f32.mrf.mxu1 }
 0xe24   :  { %v3783_v6 = vpop.f32.mrf.mxu0 }
 0xe25   :  { %v10001_v50 = vadd.f32 %v3783_v6, %v3732_v33  ;;  %v3746_v23 = vpop.f32.mrf.mxu1  ;;  %v3840_v33 = vadd.f32 %v3827_v61, %v3826_v18 }
 0xe26   :  { %v3785_v24 = vpop.f32.mrf.mxu0 }
 0xe27   :  { %v3801_v10 = vadd.f32 %v3800_v21, %v10001_v50  ;;  %v3820_v54 = vmul.f32 %v10001_v50, %v10001_v50  ;;  %v10012_v41 = vadd.f32 %v3785_v24, %v3734_v34  ;;  %v3747_v9 = vpop.f32.mrf.mxu1 }
 0xe28   :  { %v3787_v29 = vpop.f32.mrf.mxu0 }
 0xe29   :  { %v3821_v63 = vmul.f32 %v10012_v41, %v10012_v41  ;;  %v10020_v25 = vadd.f32 %v3787_v29, %v3736_v36  ;;  %v3802_v5 = vadd.f32 %v3801_v10, %v10012_v41  ;;  %v3831_v17 = vadd.f32 %v3830_v58, %v3820_v54 }
 0xe2a   :  { %v3789_v43 = vpop.f32.mrf.mxu0 }
 0xe2b   :  { %v3806_v8 = vadd.f32 %v3805_v32, %v10020_v25  ;;  %v3824_v27 = vmul.f32 %v10020_v25, %v10020_v25  ;;  %v10030_v14 = vadd.f32 %v3789_v43, %v3738_v2  ;;  %3803 = vadd.xlane.f32.xlu0 %v3802_v5  ;;  %v3832_v16 = vadd.f32 %v3831_v17, %v3821_v63 }
 0xe2c   :  { %v3793_v47 = vpop.f32.mrf.mxu0 }
 0xe2d   :  { %v3825_v37 = vmul.f32 %v10030_v14, %v10030_v14  ;;  %v10036_v1 = vadd.f32 %v3793_v47, %v3742_v60  ;;  %3833 = vadd.xlane.f32.xlu1 %v3832_v16  ;;  %v3807_v28 = vadd.f32 %v3806_v8, %v10030_v14  ;;  %v3836_v22 = vadd.f32 %v3835_v26, %v3824_v27 }
 0xe2e   :  { %v3795_v34 = vpop.f32.mrf.mxu0 }
 0xe2f   :  { %v3811_v36 = vadd.f32 %v3810_v48, %v10036_v1  ;;  %v3828_v2 = vmul.f32 %v10036_v1, %v10036_v1  ;;  %v10042_v52 = vadd.f32 %v3795_v34, %v3744_v51  ;;  %3808 = vadd.xlane.f32.xlu0 %v3807_v28  ;;  %v3837_v6 = vadd.f32 %v3836_v22, %v3825_v37  ;;  %v3860_v28 = vld [vmem:[#allocation13] sm:$0xff]  ;;  %v3866_v34 = vld [vmem:[#allocation15] sm:$0xff] }
 0xe30   :  { %v3797_v42 = vpop.f32.mrf.mxu0 }
 0xe31   :  { %v3829_v60 = vmul.f32 %v10042_v52, %v10042_v52  ;;  %3838 = vadd.xlane.f32.xlu1 %v3837_v6  ;;  %v3812_v21 = vadd.f32 %v3811_v36, %v10042_v52  ;;  %v3841_v49 = vadd.f32 %v3840_v33, %v3828_v2  ;;  %v3861_v36 = vld [vmem:[#allocation13 + $0x8] sm:$0xff] }
 0xe32   :  { %v3798_v24 = vpop.f32.mrf.mxu0 }
 0xe33   :  { %3813 = vadd.xlane.f32.xlu0 %v3812_v21  ;;  %v3842_v58 = vadd.f32 %v3841_v49, %v3829_v60  ;;  %v3867_v21 = vld [vmem:[#allocation15 + $0x8] sm:$0xff]  ;;  %v3862_v24 = vld [vmem:[#allocation13 + $0x10] sm:$0xff] }
 0xe37   :  { %3843 = vadd.xlane.f32.xlu0 %v3842_v58 }
 0xeb4   :  { %v3804_v10 = vpop.xlane.xlu0 %3803 }
 0xeb5   :  { %v3815_v54 = vmul.f32 0.001953125, %v3804_v10 }
 0xeb6   :  { %v3834_v3 = vpop.xlane.xlu1 %3833 }
 0xeb7   :  { %v3848_v32 = vmul.f32 %v3815_v54, %v3815_v54  ;;  %v3845_v51 = vmul.f32 0.001953125, %v3834_v3 }
 0xeb8   :  { %v3809_v29 = vpop.xlane.xlu0 %3808 }
 0xeb9   :  { %v3851_v23 = vsub.f32 %v3845_v51, %v3848_v32  ;;  %v3816_v63 = vmul.f32 0.001953125, %v3809_v29  ;;  %v3868_v32 = vld [vmem:[#allocation15 + $0x10] sm:$0xff] }
 0xeba   :  { %v3839_v5 = vpop.xlane.xlu1 %3838 }
 0xebb   :  { %v3854_v17 = vadd.f32 0.0001, %v3851_v23  ;;  %v3849_v26 = vmul.f32 %v3816_v63, %v3816_v63  ;;  %v3846_v18 = vmul.f32 0.001953125, %v3839_v5 }
 0xebc   :  { %v3814_v61 = vpop.xlane.xlu0 %3813 }
 0xebd   :  { %5903 = vrsqrt.f32 %v3854_v17  ;;  %v3852_v43 = vsub.f32 %v3846_v18, %v3849_v26  ;;  %v3817_v9 = vmul.f32 0.001953125, %v3814_v61 }
 0xebf   :  { %v3855_v8 = vadd.f32 0.0001, %v3852_v43  ;;  %v3850_v16 = vmul.f32 %v3817_v9, %v3817_v9 }
 0xec0   :  { %v3844_v27 = vpop.xlane.xlu0 %3843 }
 0xec1   :  { %5905 = vrsqrt.f32 %v3855_v8  ;;  %v3847_v48 = vmul.f32 0.001953125, %v3844_v27 }
 0xec3   :  { %v3853_v47 = vsub.f32 %v3847_v48, %v3850_v16 }
 0xec5   :  { %v3856_v37 = vadd.f32 0.0001, %v3853_v47 }
 0xec7   :  { %5907 = vrsqrt.f32 %v3856_v37 }
 0xeca   :  { %v5904_v22 = vpop.eup %5903 }
 0xecb   :  { %v3863_v33 = vmul.f32 %v5904_v22, %v3860_v28 }
 0xecd   :  { %3877 = vperm.xlu1 %5741, %v3863_v33   ;;  %v3869_v2 = vmul.f32 %v3863_v33, %v3815_v54 }
 0xece   :  { %v5906_v6 = vpop.eup %5905 }
 0xecf   :  { %v3872_v42 = vsub.f32 %v3866_v34, %v3869_v2  ;;  %v3864_v60 = vmul.f32 %v5906_v6, %v3861_v36 }
 0xed1   :  { %3904 = vperm.xlu0 %5742, %v3872_v42   ;;  %3882 = vperm.xlu1 %5741, %v3864_v60   ;;  %v3870_v49 = vmul.f32 %v3864_v60, %v3816_v63 }
 0xed3   :  { %v3873_v58 = vsub.f32 %v3867_v21, %v3870_v49 }
 0xed4   :  { %v5908_v10 = vpop.eup %5907 }
 0xed5   :  { %3909 = vperm.xlu0 %5742, %v3873_v58   ;;  %v3865_v3 = vmul.f32 %v5908_v10, %v3862_v24 }
 0xed7   :  { %3887 = vperm.xlu1 %5741, %v3865_v3   ;;  %v3871_v51 = vmul.f32 %v3865_v3, %v3817_v9 }
 0xed9   :  { %v3874_v29 = vsub.f32 %v3868_v32, %v3871_v51 }
 0xedb   :  { %3914 = vperm.xlu1 %5741, %v3874_v29   ;;  %v12711_v29 = vld [vmem:[#allocation48_spill] sm:$0xff] }
 0xf48   :  { %v3878_v23 = vpop.permute.xlu1 %3877 }
 0xf49   :  { %v3891_v54 = vmul.f32 %v3878_v23, %v9987_v62  ;;  %v3892_v5 = vmul.f32 %v3878_v23, %v10001_v50  ;;  %v3890_v26 = vmul.f32 %v3878_v23, %v9989_v39  ;;  %v3893_v63 = vmul.f32 %v3878_v23, %v10012_v41 }
 0xf4c   :  { %v3905_v17 = vpop.permute.xlu0 %3904  ;;  %v3883_v39 = vpop.permute.xlu1 %3882 }
 0xf4d   :  { %v3918_v18 = vadd.f32 %v3905_v17, %v3891_v54  ;;  %v3919_v61 = vadd.f32 %v3905_v17, %v3892_v5  ;;  %v3917_v43 = vadd.f32 %v3905_v17, %v3890_v26  ;;  %v3920_v8 = vadd.f32 %v3905_v17, %v3893_v63 }
 0xf4e   :  { %v3894_v9 = vmul.f32 %v3883_v39, %v9995_v55  ;;  %v3895_v47 = vmul.f32 %v3883_v39, %v9991_v38  ;;  %v3897_v55 = vmul.f32 %v3883_v39, %v10030_v14  ;;  %v3896_v38 = vmul.f32 %v3883_v39, %v10020_v25 }
 0xf4f   :  { %v10051_v27 = vmax.f32 %v3918_v18, 0.0  ;;  %v10053_v16 = vmax.f32 %v3919_v61, 0.0  ;;  %v10059_v62 = vmax.f32 %v3917_v43, 0.0  ;;  %v10061_v50 = vmax.f32 %v3920_v8, 0.0  ;;  %v12712_v43 = vld [vmem:[#allocation53_spill] sm:$0xff] }
 0xf50   :  { %v3910_v41 = vpop.permute.xlu0 %3909 }
 0xf51   :  { %4145 = vrot.lane.b32.xlu1 %v10053_v16, %s6330_s13  ;;  %4139 = vrot.lane.b32.xlu0 %v10051_v27, %s6330_s13  ;;  %v3921_v48 = vadd.f32 %v3910_v41, %v3894_v9  ;;  %v3922_v37 = vadd.f32 %v3910_v41, %v3895_v47  ;;  %v3924_v22 = vadd.f32 %v3910_v41, %v3897_v55 }
 0xf52   :  { %v3923_v34 = vadd.f32 %v3910_v41, %v3896_v38  ;;  %v3888_v25 = vpop.permute.xlu1 %3887 }
 0xf53   :  { %v10113_v28 = vmax.f32 %v3921_v48, 0.0  ;;  %v10120_v33 = vmax.f32 %v3922_v37, 0.0  ;;  %v10127_v36 = vmax.f32 %v3924_v22, 0.0  ;;  %v3898_v6 = vmul.f32 %v3888_v25, %v10005_v46 }
 0xf54   :  { %v10133_v14 = vmax.f32 %v3923_v34, 0.0  ;;  %v3899_v60 = vmul.f32 %v3888_v25, %v10007_v19  ;;  %v3901_v46 = vmul.f32 %v3888_v25, %v10042_v52  ;;  %v3900_v10 = vmul.f32 %v3888_v25, %v10036_v1 }
 0xf55   :  { %4151 = vrot.lane.b32.xlu1 %v10061_v50, %s6330_s13  ;;  %4133 = vrot.lane.b32.xlu0 %v10059_v62, %s6330_s13  ;;  %v4350_v55 = vpack.c.bf16 %v10120_v33, %v10051_v27  ;;  %v4352_v22 = vpack.c.bf16 %v10127_v36, %v10061_v50  ;;  %v4349_v25 = vpack.c.bf16 %v10113_v28, %v10059_v62 }
 0xf56   :  { %v3915_v2 = vpop.permute.xlu1 %3914 }
 0xf57   :  { %v3925_v42 = vadd.f32 %v3915_v2, %v3898_v6  ;;  %v3926_v21 = vadd.f32 %v3915_v2, %v3899_v60  ;;  %v3928_v24 = vadd.f32 %v3915_v2, %v3901_v46  ;;  %v3927_v52 = vadd.f32 %v3915_v2, %v3900_v10 }
 0xf59   :  { %4091 = vrot.lane.b32.xlu1 %v10051_v27, %s6326_s30  ;;  %4085 = vrot.lane.b32.xlu0 %v10059_v62, %s6326_s30  ;;  %v10177_v49 = vmax.f32 %v3925_v42, 0.0  ;;  %v10184_v58 = vmax.f32 %v3926_v21, 0.0  ;;  %v10190_v19 = vmax.f32 %v3928_v24, 0.0  ;;  %v10204_v1 = vmax.f32 %v3927_v52, 0.0 }
 0xf5d   :  { %4103 = vrot.lane.b32.xlu1 %v10061_v50, %s6326_s30  ;;  %4037 = vrot.lane.b32.xlu0 %v10059_v62, %s6331_s16 }
 0xf61   :  { %4097 = vrot.lane.b32.xlu1 %v10053_v16, %s6326_s30  ;;  %4043 = vrot.lane.b32.xlu0 %v10051_v27, %s6331_s16 }
 0xf65   :  { %3995 = vrot.lane.b32.xlu1 %v10051_v27, %s6324_s9  ;;  %4055 = vrot.lane.b32.xlu0 %v10061_v50, %s6331_s16 }
 0xf69   :  { %4007 = vrot.lane.b32.xlu1 %v10061_v50, %s6324_s9  ;;  %4049 = vrot.lane.b32.xlu0 %v10053_v16, %s6331_s16 }
 0xf6d   :  { %4001 = vrot.lane.b32.xlu1 %v10053_v16, %s6324_s9  ;;  %3989 = vrot.lane.b32.xlu0 %v10059_v62, %s6324_s9 }
 0xf71   :  { %4283 = vrot.lane.b32.xlu1 %v10051_v27, %s6327_s17  ;;  %3941 = vrot.lane.b32.xlu0 %v10059_v62, %s6332_s27 }
 0xf75   :  { %4289 = vrot.lane.b32.xlu1 %v10053_v16, %s6327_s17  ;;  %3947 = vrot.lane.b32.xlu0 %v10051_v27, %s6332_s27 }
 0xf79   :  { %4241 = vrot.lane.b32.xlu1 %v10053_v16, %s6329_s4  ;;  %3959 = vrot.lane.b32.xlu0 %v10061_v50, %s6332_s27 }
 0xf7d   :  { %4229 = vrot.lane.b32.xlu1 %v10059_v62, %s6329_s4  ;;  %3953 = vrot.lane.b32.xlu0 %v10053_v16, %s6332_s27 }
 0xf81   :  { %4247 = vrot.lane.b32.xlu1 %v10061_v50, %s6329_s4  ;;  %4277 = vrot.lane.b32.xlu0 %v10059_v62, %s6327_s17 }
 0xf85   :  { %4295 = vrot.lane.b32.xlu0 %v10061_v50, %s6327_s17  ;;  %4039 = vrot.lane.b32.xlu1 %v10113_v28, %s6331_s16 }
 0xf89   :  { %4235 = vrot.lane.b32.xlu0 %v10051_v27, %s6329_s4  ;;  %4045 = vrot.lane.b32.xlu1 %v10120_v33, %s6331_s16 }
 0xf8d   :  { %4187 = vrot.lane.b32.xlu0 %v10051_v27, %s6328_s1  ;;  %4057 = vrot.lane.b32.xlu1 %v10127_v36, %s6331_s16  ;;  %v4351_v27 = vpack.c.bf16 %v10133_v14, %v10053_v16 }
 0xf91   :  { %4193 = vrot.lane.b32.xlu0 %v10053_v16, %s6328_s1  ;;  %4051 = vrot.lane.b32.xlu1 %v10133_v14, %s6331_s16 }
 0xf95   :  { %4181 = vrot.lane.b32.xlu0 %v10059_v62, %s6328_s1  ;;  %3943 = vrot.lane.b32.xlu1 %v10113_v28, %s6332_s27 }
 0xf99   :  { %3949 = vrot.lane.b32.xlu1 %v10120_v33, %s6332_s27  ;;  %4087 = vrot.lane.b32.xlu0 %v10113_v28, %s6326_s30 }
 0xf9d   :  { %3961 = vrot.lane.b32.xlu1 %v10127_v36, %s6332_s27  ;;  %4093 = vrot.lane.b32.xlu0 %v10120_v33, %s6326_s30 }
 0xfa1   :  { %3955 = vrot.lane.b32.xlu1 %v10133_v14, %s6332_s27  ;;  %4105 = vrot.lane.b32.xlu0 %v10127_v36, %s6326_s30 }
 0xfa5   :  { %4279 = vrot.lane.b32.xlu1 %v10113_v28, %s6327_s17  ;;  %4099 = vrot.lane.b32.xlu0 %v10133_v14, %s6326_s30 }
 0xfa9   :  { %4297 = vrot.lane.b32.xlu1 %v10127_v36, %s6327_s17  ;;  %3991 = vrot.lane.b32.xlu0 %v10113_v28, %s6324_s9 }
 0xfad   :  { %4189 = vrot.lane.b32.xlu1 %v10120_v33, %s6328_s1  ;;  %3997 = vrot.lane.b32.xlu0 %v10120_v33, %s6324_s9 }
 0xfb1   :  { %4195 = vrot.lane.b32.xlu1 %v10133_v14, %s6328_s1  ;;  %4009 = vrot.lane.b32.xlu0 %v10127_v36, %s6324_s9 }
 0xfb5   :  { %4183 = vrot.lane.b32.xlu1 %v10113_v28, %s6328_s1  ;;  %4003 = vrot.lane.b32.xlu0 %v10133_v14, %s6324_s9 }
 0xfb9   :  { %4089 = vrot.lane.b32.xlu1 %v10177_v49, %s6326_s30  ;;  %4285 = vrot.lane.b32.xlu0 %v10120_v33, %s6327_s17 }
 0xfbd   :  { %4095 = vrot.lane.b32.xlu1 %v10184_v58, %s6326_s30  ;;  %4291 = vrot.lane.b32.xlu0 %v10133_v14, %s6327_s17 }
 0xfc1   :  { %4107 = vrot.lane.b32.xlu1 %v10190_v19, %s6326_s30  ;;  %4237 = vrot.lane.b32.xlu0 %v10120_v33, %s6329_s4 }
 0xfc3   :  { %v4146_v3 = vpop.permute.xlu1 %4145  ;;  %v4140_v32 = vpop.permute.xlu0 %4139 }
 0xfc4   :  { %v4160_v51 = vsel %vm505_vm4, %v4140_v32, %v4146_v3 }
 0xfc5   :  { %v4170_v23 = vmul.f32 %v4160_v51, %v12711_v29  ;;  %4047 = vrot.lane.b32.xlu1 %v10184_v58, %s6331_s16  ;;  %4243 = vrot.lane.b32.xlu0 %v10133_v14, %s6329_s4 }
 0xfc7   :  { %v4152_v54 = vpop.permute.xlu1 %4151  ;;  %v4134_v5 = vpop.permute.xlu0 %4133  ;;  %v4354_v17 = vpack.c.bf16 %v4170_v23, %v10184_v58 }
 0xfc8   :  { %v4157_v26 = vsel %vm505_vm4, %v4146_v3, %v4152_v54  ;;  %v4163_v63 = vsel %vm505_vm4, %v4134_v5, %v4140_v32  ;;  %v4166_v18 = vsel %vm505_vm4, %v4152_v54, %v4134_v5 }
 0xfc9   :  { %v4171_v61 = vmul.f32 %v4157_v26, %v12635_v57  ;;  %v4169_v8 = vmul.f32 %v4163_v63, %v12712_v43  ;;  %v4172_v39 = vmul.f32 %v4166_v18, %v12637_v40  ;;  %4101 = vrot.lane.b32.xlu1 %v10204_v1, %s6326_s30  ;;  %4231 = vrot.lane.b32.xlu0 %v10113_v28, %s6329_s4 }
 0xfca   :  { %4417 = vmatprep.subr.bf16.mxu0 %v4354_v17 }
 0xfcb   :  { %v4355_v41 = vpack.c.bf16 %v4171_v61, %v10204_v1  ;;  %v4353_v9 = vpack.c.bf16 %v4169_v8, %v10177_v49  ;;  %v10222_v48 = vpop.permute.xlu1 %4091  ;;  %v10224_v47 = vpop.permute.xlu0 %4085  ;;  %v4356_v37 = vpack.c.bf16 %v4172_v39, %v10190_v19  ;;  %v5877_v39 = vld [vmem:[#allocation16 + $0x4] ss:$8 sps:$4 sm:$0xff]  }
 0xfcc   :  { %5629 = vmatprep.mubr.msk.bf16.mxu0 %vm1401_vm10, %v5877_v39  ;;  %5632 = vmatprep.mubr.msk.bf16.mxu1 %vm1401_vm10, %v5877_v39 }
 0xfcd   :  { %3993 = vrot.lane.b32.xlu1 %v10177_v49, %s6324_s9  ;;  %4249 = vrot.lane.b32.xlu0 %v10127_v36, %s6329_s4 }
 0xfce   :  { %4418 = vmatpush1.bf16.msra.mxu0 %v4353_v9  ;;  %4468 = vmatprep.subr.bf16.mxu1 %v4356_v37 }
 0xfcf   :  { %4419 = vmatprep.subr.bf16.mxu0 %v4350_v55  ;;  %4469 = vmatpush1.bf16.msra.mxu1 %v4355_v41  ;;  %v10235_v38 = vpop.permute.xlu1 %4103  ;;  %v10237_v34 = vpop.permute.xlu0 %4037 }
 0xfd0   :  { %4470 = vmatprep.subr.bf16.mxu1 %v4352_v22 }
 0xfd1   :  { %3999 = vrot.lane.b32.xlu1 %v10184_v58, %s6324_s9  ;;  %4141 = vrot.lane.b32.xlu0 %v10120_v33, %s6330_s13 }
 0xfd2   :  { %4420 = vmatpush1.bf16.msra.mxu0 %v4349_v25 }
 0xfd3   :  { %4471 = vmatpush1.bf16.msra.mxu1 %v4351_v27  ;;  %v10247_v2 = vpop.permute.xlu1 %4097  ;;  %v10249_v6 = vpop.permute.xlu0 %4043 }
 0xfd5   :  { %4011 = vrot.lane.b32.xlu1 %v10190_v19, %s6324_s9  ;;  %4147 = vrot.lane.b32.xlu0 %v10133_v14, %s6330_s13 }
 0xfd7   :  { %v10255_v62 = vpop.permute.xlu1 %3995  ;;  %v10257_v42 = vpop.permute.xlu0 %4055 }
 0xfd9   :  { %3951 = vrot.lane.b32.xlu1 %v10184_v58, %s6332_s27  ;;  %4041 = vrot.lane.b32.xlu0 %v10177_v49, %s6331_s16 }
 0xfdb   :  { %v10263_v16 = vpop.permute.xlu1 %4007  ;;  %v10265_v33 = vpop.permute.xlu0 %4049 }
 0xfdd   :  { %4005 = vrot.lane.b32.xlu1 %v10204_v1, %s6324_s9  ;;  %4059 = vrot.lane.b32.xlu0 %v10190_v19, %s6331_s16 }
 0xfdf   :  { %v10271_v14 = vpop.permute.xlu1 %4001  ;;  %v10273_v60 = vpop.permute.xlu0 %3989 }
 0xfe1   :  { %4287 = vrot.lane.b32.xlu1 %v10184_v58, %s6327_s17  ;;  %4053 = vrot.lane.b32.xlu0 %v10204_v1, %s6331_s16 }
 0xfe3   :  { %v10279_v21 = vpop.permute.xlu1 %4283  ;;  %v10281_v46 = vpop.permute.xlu0 %3941 }
 0xfe5   :  { %4201 = vrot.lane.b32.xlu1 %v10127_v36, %s6328_s1  ;;  %3945 = vrot.lane.b32.xlu0 %v10177_v49, %s6332_s27 }
 0xfe7   :  { %v10287_v24 = vpop.permute.xlu1 %4289  ;;  %v10289_v10 = vpop.permute.xlu0 %3947 }
 0xfe9   :  { %4299 = vrot.lane.b32.xlu1 %v10190_v19, %s6327_s17  ;;  %3963 = vrot.lane.b32.xlu0 %v10190_v19, %s6332_s27 }
 0xfeb   :  { %v10295_v52 = vpop.permute.xlu1 %4241  ;;  %v10297_v3 = vpop.permute.xlu0 %3959 }
 0xfed   :  { %4239 = vrot.lane.b32.xlu1 %v10184_v58, %s6329_s4  ;;  %3957 = vrot.lane.b32.xlu0 %v10204_v1, %s6332_s27 }
 0xfef   :  { %v10303_v32 = vpop.permute.xlu1 %4229  ;;  %v10305_v51 = vpop.permute.xlu0 %3953 }
 0xff0   :  { %12713 = vst [vmem:[#allocation200_spill] sm:$0xff] %v10303_v32 }
 0xff1   :  { %4245 = vrot.lane.b32.xlu1 %v10204_v1, %s6329_s4  ;;  %4281 = vrot.lane.b32.xlu0 %v10177_v49, %s6327_s17 }
 0xff3   :  { %v10311_v23 = vpop.permute.xlu1 %4247  ;;  %v10313_v54 = vpop.permute.xlu0 %4277 }
 0xff5   :  { %4233 = vrot.lane.b32.xlu1 %v10177_v49, %s6329_s4  ;;  %4293 = vrot.lane.b32.xlu0 %v10204_v1, %s6327_s17 }
 0xff7   :  { %v10319_v5 = vpop.permute.xlu1 %4039  ;;  %v10321_v17 = vpop.permute.xlu0 %4295 }
 0xff9   :  { %4197 = vrot.lane.b32.xlu1 %v10204_v1, %s6328_s1  ;;  %4199 = vrot.lane.b32.xlu0 %v10061_v50, %s6328_s1 }
 0xffb   :  { %v10327_v26 = vpop.permute.xlu1 %4045  ;;  %v10329_v63 = vpop.permute.xlu0 %4235 }
 0xffc   :  { %12714 = vst [vmem:[#allocation139_spill] sm:$0xff] %v10329_v63 }
 0xffd   :  { %4251 = vrot.lane.b32.xlu1 %v10190_v19, %s6329_s4  ;;  %4191 = vrot.lane.b32.xlu0 %v10184_v58, %s6328_s1 }
 0xfff   :  { %v10335_v18 = vpop.permute.xlu1 %4057  ;;  %v10337_v61 = vpop.permute.xlu0 %4187 }
0x1000   :  { %12715 = vst [vmem:[#allocation166_spill] sm:$0xff] %v10337_v61 }
0x1001   :  { %4143 = vrot.lane.b32.xlu1 %v10184_v58, %s6330_s13  ;;  %4185 = vrot.lane.b32.xlu0 %v10177_v49, %s6328_s1 }
0x1003   :  { %v10343_v50 = vpop.permute.xlu1 %4051  ;;  %v10345_v8 = vpop.permute.xlu0 %4193 }
0x1004   :  { %12716 = vst [vmem:[#allocation157_spill] sm:$0xff] %v10345_v8 }
0x1005   :  { %4149 = vrot.lane.b32.xlu1 %v10204_v1, %s6330_s13  ;;  %4203 = vrot.lane.b32.xlu0 %v10190_v19, %s6328_s1 }
0x1007   :  { %v10352_v41 = vpop.permute.xlu1 %3943  ;;  %v10354_v9 = vpop.permute.xlu0 %4181 }
0x1008   :  { %12717 = vst [vmem:[#allocation199_spill] sm:$0xff] %v10354_v9 }
0x1009   :  { %4137 = vrot.lane.b32.xlu1 %v10177_v49, %s6330_s13  ;;  %4135 = vrot.lane.b32.xlu0 %v10113_v28, %s6330_s13 }
0x100b   :  { %v10361_v58 = vpop.permute.xlu1 %3949  ;;  %v4088_v1 = vpop.permute.xlu0 %4087 }
0x100d   :  { %4155 = vrot.lane.b32.xlu1 %v10190_v19, %s6330_s13  ;;  %4153 = vrot.lane.b32.xlu0 %v10127_v36, %s6330_s13 }
0x100f   :  { %v10367_v37 = vpop.permute.xlu1 %3961  ;;  %v4094_v55 = vpop.permute.xlu0 %4093 }
0x1010   :  { %v4116_v9 = vsel %vm467_vm6, %v4088_v1, %v4094_v55 }
0x1013   :  { %v10369_v22 = vpop.permute.xlu1 %3955  ;;  %v4106_v25 = vpop.permute.xlu0 %4105 }
0x1017   :  { %v10371_v27 = vpop.permute.xlu1 %4279  ;;  %v4100_v49 = vpop.permute.xlu0 %4099 }
0x1018   :  { %12718 = vst [vmem:[#allocation133_spill] sm:$0xff] %v10371_v27 }
0x101b   :  { %v10373_v39 = vpop.permute.xlu1 %4297  ;;  %v10375_v28 = vpop.permute.xlu0 %3991 }
0x101c   :  { %12719 = vst [vmem:[#allocation79_spill] sm:$0xff] %v10373_v39 }
0x101f   :  { %v10377_v40 = vpop.permute.xlu1 %4189  ;;  %v10379_v57 = vpop.permute.xlu0 %3997 }
0x1020   :  { %12720 = vst [vmem:[#allocation80_spill] sm:$0xff] %v10377_v40  ;;  %v4126_v40 = vmul.f32 %v4116_v9, %v12480_v20 }
0x1023   :  { %v10381_v19 = vpop.permute.xlu1 %4195  ;;  %v10383_v36 = vpop.permute.xlu0 %4009 }
0x1024   :  { %12721 = vst [vmem:[#allocation150_spill] sm:$0xff] %v10381_v19 }
0x1027   :  { %v10385_v43 = vpop.permute.xlu1 %4183  ;;  %v10387_v31 = vpop.permute.xlu0 %4003 }
0x1028   :  { %12722 = vst [vmem:[#allocation137_spill] sm:$0xff] %v10385_v43  ;;  %v4119_v43 = vsel %vm467_vm6, %v4106_v25, %v4088_v1 }
0x102b   :  { %v4090_v29 = vpop.permute.xlu1 %4089  ;;  %v10389_v13 = vpop.permute.xlu0 %4285 }
0x102c   :  { %12723 = vst [vmem:[#allocation198_spill] sm:$0xff] %v10389_v13  ;;  %v4125_v13 = vmul.f32 %v4119_v43, %v12487_v44 }
0x102f   :  { %v4096_v61 = vpop.permute.xlu1 %4095  ;;  %v10393_v8 = vpop.permute.xlu0 %4291 }
0x1030   :  { %12724 = vst [vmem:[#allocation187_spill] sm:$0xff] %v10393_v8  ;;  %v4117_v45 = vsel %vm467_vm6, %v4090_v29, %v4096_v61 }
0x1031   :  { %v4130_v19 = vmul.f32 %v4117_v45, %v12480_v20  ;;  %v4110_v45 = vsel %vm467_vm6, %v4100_v49, %v4106_v25 }
0x1032   :  { %v4128_v43 = vmul.f32 %v4110_v45, %v12673_v53  ;;  %v4115_v45 = vsel %vm467_vm6, %v10224_v47, %v10222_v48 }
0x1033   :  { %v4108_v63 = vpop.permute.xlu1 %4107  ;;  %v10401_v12 = vpop.permute.xlu0 %4237  ;;  %v4346_v32 = vpack.c.bf16 %v4130_v19, %v4126_v40  ;;  %v4113_v40 = vsel %vm467_vm6, %v4094_v55, %v4100_v49 }
0x1034   :  { %12725 = vst [vmem:[#allocation184_spill] sm:$0xff] %v10401_v12  ;;  %v4120_v59 = vsel %vm467_vm6, %v4108_v63, %v4090_v29 }
0x1035   :  { %v4129_v8 = vmul.f32 %v4120_v59, %v12487_v44  ;;  %4421 = vmatprep.subr.bf16.mxu0 %v4346_v32  ;;  %v4127_v59 = vmul.f32 %v4113_v40, %v12672_v0 }
0x1037   :  { %v4345_v39 = vpack.c.bf16 %v4129_v8, %v4125_v13  ;;  %v10407_v27 = vpop.permute.xlu1 %4047  ;;  %v10409_v9 = vpop.permute.xlu0 %4243 }
0x1038   :  { %12726 = vst [vmem:[#allocation78_spill] sm:$0xff] %v10409_v9  ;;  %v12736_v9 = vld [vmem:[#allocation40_spill] sm:$0xff] }
0x1039   :  { %4422 = vmatpush1.bf16.msra.mxu0 %v4345_v39 }
0x103b   :  { %v4102_v1 = vpop.permute.xlu1 %4101  ;;  %v10415_v19 = vpop.permute.xlu0 %4231 }
0x103c   :  { %12727 = vst [vmem:[#allocation76_spill] sm:$0xff] %v10415_v19  ;;  %v4111_v29 = vsel %vm467_vm6, %v4102_v1, %v4108_v63  ;;  %v4114_v13 = vsel %vm467_vm6, %v4096_v61, %v4102_v1  ;;  %v4118_v1 = vsel %vm467_vm6, %v10235_v38, %v10224_v47  ;;  %v4070_v47 = vsel %vm429_vm5, %v10257_v42, %v10237_v34 }
0x103d   :  { %v4131_v32 = vmul.f32 %v4114_v13, %v12672_v0  ;;  %v4132_v8 = vmul.f32 %v4111_v29, %v12673_v53  ;;  %v4112_v29 = vsel %vm467_vm6, %v10222_v48, %v10247_v2  ;;  %v4109_v13 = vsel %vm467_vm6, %v10247_v2, %v10235_v38 }
0x103e   :  { %v4064_v48 = vsel %vm429_vm5, %v10249_v6, %v10265_v33  ;;  %v4121_v2 = vmul.f32 %v4118_v1, %v12487_v44 }
0x103f   :  { %v4347_v25 = vpack.c.bf16 %v4131_v32, %v4127_v59  ;;  %v3994_v39 = vpop.permute.xlu1 %3993  ;;  %v10425_v55 = vpop.permute.xlu0 %4249  ;;  %v4348_v49 = vpack.c.bf16 %v4132_v8, %v4128_v43  ;;  %v4122_v59 = vmul.f32 %v4115_v45, %v12480_v20  ;;  %v4067_v43 = vsel %vm429_vm5, %v10237_v34, %v10249_v6  ;;  %v12731_v20 = vld [vmem:[#allocation68_spill] sm:$0xff] }
0x1040   :  { %12728 = vst [vmem:[#allocation161_spill] sm:$0xff] %v10425_v55  ;;  %v10468_v8 = vmul.f32 %v4112_v29, %v12672_v0  ;;  %v4061_v6 = vsel %vm429_vm5, %v10265_v33, %v10257_v42  ;;  %v4016_v45 = vsel %vm391_vm8, %v10255_v62, %v10271_v14  ;;  %v4074_v29 = vmul.f32 %v4067_v43, %v12612_v30 }
0x1041   :  { %4472 = vmatprep.subr.bf16.mxu1 %v4348_v49  ;;  %v10478_v49 = vmul.f32 %v4109_v13, %v12673_v53  ;;  %v4073_v0 = vmul.f32 %v4070_v47, %v12631_v35  ;;  %v10492_v44 = vmul.f32 %v4064_v48, %v12573_v4  ;;  %v4013_v13 = vsel %vm391_vm8, %v10271_v14, %v10263_v16 }
0x1042   :  { %4473 = vmatpush1.bf16.msra.mxu1 %v4347_v25  ;;  %v4068_v25 = vsel %vm429_vm5, %v10319_v5, %v10327_v26  ;;  %v4019_v42 = vsel %vm391_vm8, %v10273_v60, %v10255_v62  ;;  %v4022_v33 = vsel %vm391_vm8, %v10263_v16, %v10273_v60  ;;  %v4076_v53 = vmul.f32 %v4061_v6, %v12475_v56  ;;  %v12734_v6 = vld [vmem:[#allocation66_spill] sm:$0xff] }
0x1043   :  { %v10427_v19 = vpop.permute.xlu1 %3999  ;;  %v10429_v63 = vpop.permute.xlu0 %4141  ;;  %v4078_v43 = vmul.f32 %v4068_v25, %v12612_v30  ;;  %v4071_v62 = vsel %vm429_vm5, %v10335_v18, %v10319_v5  ;;  %v4062_v60 = vsel %vm429_vm5, %v10343_v50, %v10335_v18  ;;  %v10529_v5 = vmul.f32 %v4022_v33, %v12734_v6 }
0x1044   :  { %12729 = vst [vmem:[#allocation169_spill] sm:$0xff] %v10429_v63  ;;  %v10509_v63 = vmul.f32 %v4016_v45, %v12731_v20  ;;  %v12735_v45 = vld [vmem:[#allocation61_spill] sm:$0xff]  ;;  %v3971_v18 = vsel %vm353_vm7, %v10281_v46, %v10289_v10  ;;  %v4020_v33 = vsel %vm391_vm8, %v10375_v28, %v10379_v57  ;;  %v4080_v55 = vmul.f32 %v4062_v60, %v12475_v56 }
0x1047   :  { %v10431_v61 = vpop.permute.xlu1 %4011  ;;  %v10433_v40 = vpop.permute.xlu0 %4147 }
0x1048   :  { %12730 = vst [vmem:[#allocation145_spill] sm:$0xff] %v10433_v40  ;;  %v12732_v40 = vld [vmem:[#allocation69_spill] sm:$0xff] }
0x1049   :  { %v10518_v16 = vmul.f32 %v4013_v13, %v12732_v40  ;;  %v4077_v13 = vmul.f32 %v4071_v62, %v12631_v35  ;;  %v4024_v62 = vsel %vm391_vm8, %v10431_v61, %v3994_v39 }
0x104b   :  { %v10464_v32 = vpop.permute.xlu1 %3951  ;;  %v4042_v38 = vpop.permute.xlu0 %4041  ;;  %12733 = vst [vmem:[#allocation158_spill] sm:$0xff] %v10518_v16 }
0x104c   :  { %v4069_v34 = vsel %vm429_vm5, %v4042_v38, %v10407_v27 }
0x104d   :  { %v4082_v1 = vmul.f32 %v4069_v34, %v12612_v30  ;;  %v4065_v30 = vsel %vm429_vm5, %v10327_v26, %v10343_v50 }
0x104f   :  { %v4006_v47 = vpop.permute.xlu1 %4005  ;;  %v4060_v48 = vpop.permute.xlu0 %4059  ;;  %v4342_v34 = vpack.c.bf16 %v4122_v59, %v4082_v1  ;;  %v4021_v59 = vsel %vm391_vm8, %v3994_v39, %v10427_v19  ;;  %v4304_v1 = vsel %vm619_vm0, %v10279_v21, %v10287_v24  ;;  %v4023_v39 = vsel %vm391_vm8, %v10383_v36, %v10375_v28 }
0x1050   :  { %v4072_v14 = vsel %vm429_vm5, %v4060_v48, %v4042_v38  ;;  %v10532_v38 = vmul.f32 %v4019_v42, %v12735_v45  ;;  %v4034_v12 = vmul.f32 %v4021_v59, %v12735_v45  ;;  %v10559_v16 = vmul.f32 %v4304_v1, %v12736_v9 }
0x1051   :  { %v4081_v25 = vmul.f32 %v4072_v14, %v12631_v35  ;;  %4423 = vmatprep.subr.bf16.mxu0 %v4342_v34  ;;  %v4338_v14 = vpack.c.bf16 %v4078_v43, %v4074_v29  ;;  %v4030_v29 = vmul.f32 %v4020_v33, %v12735_v45  ;;  %v4033_v59 = vmul.f32 %v4024_v62, %v12734_v6 }
0x1053   :  { %v4341_v34 = vpack.c.bf16 %v4121_v2, %v4081_v25  ;;  %v10547_v42 = vpop.permute.xlu1 %4287  ;;  %v4054_v35 = vpop.permute.xlu0 %4053  ;;  %v3974_v2 = vsel %vm353_vm7, %v10297_v3, %v10281_v46  ;;  %v4337_v46 = vpack.c.bf16 %v4077_v13, %v4073_v0  ;;  %v4334_v33 = vpack.c.bf16 %v4034_v12, %v4030_v29 }
0x1054   :  { %v4063_v26 = vsel %vm429_vm5, %v4054_v35, %v4060_v48  ;;  %v4066_v50 = vsel %vm429_vm5, %v10407_v27, %v4054_v35  ;;  %v4079_v48 = vmul.f32 %v4065_v30, %v12573_v4  ;;  %v4015_v35 = vsel %vm391_vm8, %v4006_v47, %v10431_v61 }
0x1055   :  { %4424 = vmatpush1.bf16.msra.mxu0 %v4341_v34  ;;  %v4083_v43 = vmul.f32 %v4066_v50, %v12573_v4  ;;  %v4084_v60 = vmul.f32 %v4063_v26, %v12475_v56  ;;  %v4340_v34 = vpack.c.bf16 %v4080_v55, %v4076_v53  ;;  %v3972_v30 = vsel %vm353_vm7, %v10352_v41, %v10361_v58  ;;  %v12737_v55 = vld [vmem:[#allocation60_spill] sm:$0xff] }
0x1056   :  { %4425 = vmatprep.subr.bf16.mxu0 %v4338_v14  ;;  %v4029_v0 = vmul.f32 %v4023_v39, %v12734_v6  ;;  %v4014_v61 = vsel %vm391_vm8, %v10387_v31, %v10383_v36  ;;  %v4018_v53 = vsel %vm391_vm8, %v10427_v19, %v4006_v47  ;;  %v4036_v12 = vmul.f32 %v4015_v35, %v12732_v40 }
0x1057   :  { %v10582_v27 = vpop.permute.xlu1 %4201  ;;  %v4343_v25 = vpack.c.bf16 %v10468_v8, %v4083_v43  ;;  %v3946_v1 = vpop.permute.xlu0 %3945  ;;  %v4344_v28 = vpack.c.bf16 %v10478_v49, %v4084_v60  ;;  %v3965_v36 = vsel %vm353_vm7, %v10305_v51, %v10297_v3  ;;  %v3968_v13 = vsel %vm353_vm7, %v10289_v10, %v10305_v51 }
0x1058   :  { %v3973_v8 = vsel %vm353_vm7, %v3946_v1, %v10464_v32  ;;  %v4339_v14 = vpack.c.bf16 %v4079_v48, %v10492_v44  ;;  %v4333_v62 = vpack.c.bf16 %v4033_v59, %v4029_v0  ;;  %v3975_v47 = vsel %vm353_vm7, %v10367_v37, %v10352_v41 }
0x1059   :  { %4426 = vmatpush1.bf16.msra.mxu0 %v4337_v46  ;;  %v3986_v49 = vmul.f32 %v3973_v8, %v12737_v55  ;;  %4474 = vmatprep.subr.bf16.mxu1 %v4344_v28  ;;  %v4017_v3 = vsel %vm391_vm8, %v10379_v57, %v10387_v31  ;;  %v4032_v26 = vmul.f32 %v4014_v61, %v12732_v40  ;;  %v12738_v31 = vld [vmem:[#allocation67_spill] sm:$0xff] }
0x105a   :  { %4427 = vmatprep.subr.bf16.mxu0 %v4334_v33  ;;  %4475 = vmatpush1.bf16.msra.mxu1 %v4343_v25  ;;  %v3982_v51 = vmul.f32 %v3972_v30, %v12737_v55  ;;  %v3966_v50 = vsel %vm353_vm7, %v10369_v22, %v10367_v37  ;;  %v4035_v41 = vmul.f32 %v4018_v53, %v12731_v20  ;;  %v12739_v53 = vld [vmem:[#allocation133_spill] sm:$0xff] }
0x105b   :  { %v10612_v19 = vpop.permute.xlu1 %4299  ;;  %4476 = vmatprep.subr.bf16.mxu1 %v4340_v34  ;;  %v3964_v10 = vpop.permute.xlu0 %3963  ;;  %v4330_v44 = vpack.c.bf16 %v10532_v38, %v3986_v49  ;;  %v3978_v57 = vmul.f32 %v3971_v18, %v12737_v55  ;;  %v3977_v39 = vmul.f32 %v3974_v2, %v12738_v31  ;;  %v4336_v38 = vpack.c.bf16 %v4036_v12, %v4032_v26  ;;  %v12740_v12 = vld [vmem:[#allocation79_spill] sm:$0xff] }
0x105c   :  { %v3976_v29 = vsel %vm353_vm7, %v3964_v10, %v3946_v1  ;;  %v10636_v60 = vmul.f32 %v3968_v13, %v12618_v11  ;;  %v3980_v46 = vmul.f32 %v3965_v36, %v12617_v15  ;;  %v3981_v37 = vmul.f32 %v3975_v47, %v12738_v31  ;;  %v12741_v13 = vld [vmem:[#allocation158_spill] sm:$0xff] }
0x105d   :  { %4428 = vmatpush1.bf16.msra.mxu0 %v4333_v62  ;;  %v3985_v43 = vmul.f32 %v3976_v29, %v12738_v31  ;;  %v4031_v48 = vmul.f32 %v4017_v3, %v12731_v20  ;;  %v10647_v18 = vsel %vm581_vm3, %v10295_v52, %v10311_v23  ;;  %v3969_v2 = vsel %vm353_vm7, %v10361_v58, %v10369_v22  ;;  %v12742_v47 = vld [vmem:[#allocation198_spill] sm:$0xff]  ;;  %v12746_v29 = vld [vmem:[#allocation200_spill] sm:$0xff] }
0x105e   :  { %4429 = vmatprep.subr.bf16.mxu0 %v4330_v44  ;;  %4477 = vmatpush1.bf16.msra.mxu1 %v4339_v14  ;;  %v3984_v35 = vmul.f32 %v3966_v50, %v12617_v15  ;;  %v4326_v30 = vpack.c.bf16 %v3982_v51, %v3978_v57  ;;  %v4307_v58 = vsel %vm619_vm0, %v10313_v54, %v10279_v21  ;;  %v12744_v44 = vld [vmem:[#allocation41_spill] sm:$0xff]  ;;  %v12745_v50 = vld [vmem:[#allocation44_spill] sm:$0xff] }
0x105f   :  { %v10641_v59 = vpop.permute.xlu1 %4239  ;;  %v4329_v25 = vpack.c.bf16 %v10529_v5, %v3985_v43  ;;  %4478 = vmatprep.subr.bf16.mxu1 %v4336_v38  ;;  %v3958_v1 = vpop.permute.xlu0 %3957  ;;  %v4335_v28 = vpack.c.bf16 %v4035_v41, %v4031_v48  ;;  %v4301_v22 = vsel %vm619_vm0, %v10287_v24, %v10321_v17  ;;  %v4325_v61 = vpack.c.bf16 %v3981_v37, %v3977_v39  ;;  %v12747_v43 = vld [vmem:[#allocation45_spill] sm:$0xff] }
0x1060   :  { %v3967_v33 = vsel %vm353_vm7, %v3958_v1, %v3964_v10  ;;  %v3970_v34 = vsel %vm353_vm7, %v10464_v32, %v3958_v1  ;;  %v4310_v32 = vsel %vm619_vm0, %v10321_v17, %v10313_v54  ;;  %v3983_v8 = vmul.f32 %v3969_v2, %v12618_v11  ;;  %v12743_v17 = vld [vmem:[#allocation187_spill] sm:$0xff] }
0x1061   :  { %v3987_v5 = vmul.f32 %v3970_v34, %v12618_v11  ;;  %v3988_v0 = vmul.f32 %v3967_v33, %v12617_v15  ;;  %4430 = vmatpush1.bf16.msra.mxu0 %v4329_v25  ;;  %v4311_v24 = vsel %vm619_vm0, %v12740_v12, %v12739_v53  ;;  %v4328_v62 = vpack.c.bf16 %v3984_v35, %v3980_v46  ;;  %v12748_v2 = vld [vmem:[#allocation139_spill] sm:$0xff] }
0x1062   :  { %4431 = vmatprep.subr.bf16.mxu0 %v4326_v30  ;;  %4479 = vmatpush1.bf16.msra.mxu1 %v4335_v28  ;;  %v4308_v54 = vsel %vm619_vm0, %v12739_v53, %v12742_v47  ;;  %v4302_v3 = vsel %vm619_vm0, %v12743_v17, %v12740_v12  ;;  %v4305_v10 = vsel %vm619_vm0, %v12742_v47, %v12743_v17  ;;  %v12751_v53 = vld [vmem:[#allocation78_spill] sm:$0xff]  ;;  %v12752_v12 = vld [vmem:[#allocation184_spill] sm:$0xff] }
0x1063   :  { %v10675_v21 = vpop.permute.xlu1 %4245  ;;  %v4331_v49 = vpack.c.bf16 %v10509_v63, %v3987_v5  ;;  %v4282_v36 = vpop.permute.xlu0 %4281  ;;  %v4332_v14 = vpack.c.bf16 %v12741_v13, %v3988_v0  ;;  %v10707_v57 = vsel %vm581_vm3, %v10311_v23, %v12746_v29  ;;  %v4313_v39 = vmul.f32 %v4307_v58, %v12744_v44  ;;  %v12749_v0 = vld [vmem:[#allocation150_spill] sm:$0xff]  ;;  %v12754_v17 = vld [vmem:[#allocation76_spill] sm:$0xff] }
0x1064   :  { %v4309_v26 = vsel %vm619_vm0, %v4282_v36, %v10547_v42  ;;  %v4312_v63 = vsel %vm619_vm0, %v10612_v19, %v4282_v36  ;;  %v4315_v38 = vmul.f32 %v4301_v22, %v12747_v43  ;;  %v4320_v46 = vmul.f32 %v4311_v24, %v12745_v50 }
0x1065   :  { %v4321_v51 = vmul.f32 %v4309_v26, %v12744_v44  ;;  %v4324_v41 = vmul.f32 %v4312_v63, %v12745_v50  ;;  %4432 = vmatpush1.bf16.msra.mxu0 %v4325_v61  ;;  %4480 = vmatprep.subr.bf16.mxu1 %v4332_v14  ;;  %v4316_v48 = vmul.f32 %v4310_v32, %v12745_v50  ;;  %v12750_v32 = vld [vmem:[#allocation80_spill] sm:$0xff]  ;;  %v12755_v63 = vld [vmem:[#allocation43_spill] sm:$0xff] }
0x1066   :  { %4481 = vmatpush1.bf16.msra.mxu1 %v4331_v49  ;;  %v4256_v35 = vsel %vm581_vm3, %v12748_v2, %v10295_v52  ;;  %v4327_v25 = vpack.c.bf16 %v3983_v8, %v10636_v60  ;;  %v4317_v23 = vmul.f32 %v4308_v54, %v12744_v44  ;;  %v4318_v28 = vmul.f32 %v4305_v10, %v12736_v9  ;;  %v12753_v49 = vld [vmem:[#allocation161_spill] sm:$0xff] }
0x1067   :  { %v4234_v37 = vpop.permute.xlu1 %4233  ;;  %4482 = vmatprep.subr.bf16.mxu1 %v4328_v62  ;;  %v4294_v1 = vpop.permute.xlu0 %4293  ;;  %v4319_v33 = vmul.f32 %v4302_v3, %v12747_v43  ;;  %v4377_v58 = vpack.c.bf16 %v4321_v51, %v4321_v51  ;;  %v4380_v52 = vpack.c.bf16 %v4324_v41, %v4324_v41  ;;  %v4259_v5 = vsel %vm581_vm3, %v12746_v29, %v12748_v2  ;;  %v12757_v2 = vld [vmem:[#allocation50_spill] sm:$0xff] }
0x1068   :  { %v4303_v34 = vsel %vm619_vm0, %v4294_v1, %v10612_v19  ;;  %v4306_v30 = vsel %vm619_vm0, %v10547_v42, %v4294_v1  ;;  %v4209_v19 = vsel %vm543_vm2, %v12750_v32, %v12749_v0  ;;  %v4258_v42 = vsel %vm581_vm3, %v10641_v59, %v10675_v21 }
0x1069   :  { %v4322_v60 = vmul.f32 %v4306_v30, %v12736_v9  ;;  %v4323_v22 = vmul.f32 %v4303_v34, %v12747_v43  ;;  %v4376_v8 = vpack.c.bf16 %v4320_v46, %v4316_v48  ;;  %v4257_v24 = vsel %vm581_vm3, %v12752_v12, %v12751_v53 }
0x106a   :  { %4483 = vmatpush1.bf16.msra.mxu1 %v4327_v25  ;;  %v4254_v36 = vsel %vm581_vm3, %v12751_v53, %v12753_v49  ;;  %v4373_v47 = vpack.c.bf16 %v4317_v23, %v4313_v39  ;;  %v4375_v54 = vpack.c.bf16 %v4319_v33, %v4315_v38  ;;  %v4263_v3 = vsel %vm581_vm3, %v12753_v49, %v12754_v17 }
0x106b   :  { %v10741_v61 = vpop.permute.xlu1 %4197  ;;  %v4378_v13 = vpack.c.bf16 %v4322_v60, %v4322_v60  ;;  %v4379_v14 = vpack.c.bf16 %v4323_v22, %v4323_v22  ;;  %5631 = vmatprep.subr.msk.bf16.mxu1 %vm687_vm1, %v4380_v52  ;;  %v4200_v62 = vpop.permute.xlu0 %4199  ;;  %v4374_v26 = vpack.c.bf16 %v4318_v28, %v10559_v16  ;;  %v4274_v10 = vmul.f32 %v4258_v42, %v12755_v63  ;;  %v12756_v16 = vld [vmem:[#allocation49_spill] sm:$0xff]  ;;  %v12758_v28 = vld [vmem:[#allocation46_spill] sm:$0xff] }
0x106c   :  { %v4261_v51 = vsel %vm581_vm3, %v4234_v37, %v10641_v59  ;;  %v4406_v41 = vsel %vm687_vm1, %v4377_v58, 0  ;;  %v4270_v39 = vmul.f32 %v4257_v24, %v12755_v63  ;;  %v4260_v38 = vsel %vm581_vm3, %v12754_v17, %v12752_v12  ;;  %v12759_v52 = vld [vmem:[#allocation157_spill] sm:$0xff]  ;;  %v12760_v60 = vld [vmem:[#allocation166_spill] sm:$0xff] }
0x106d   :  { %5628 = vmatprep.subr.msk.bf16.mxu0 %vm687_vm1, %v4378_v13  ;;  %v4412_v29 = vsel %vm687_vm1, %v4379_v14, 0  ;;  %v4271_v46 = vmul.f32 %v4254_v36, %v12756_v16  ;;  %v4272_v59 = vmul.f32 %v4263_v3, %v12757_v2  ;;  %v4273_v33 = vmul.f32 %v4261_v51, %v12758_v28  ;;  %v12761_v22 = vld [vmem:[#allocation42_spill] sm:$0xff]  ;;  %v12762_v14 = vld [vmem:[#allocation137_spill] sm:$0xff] }
0x106e   :  { %4438 = vmatpush2.bf16.msra.mxu0 %v4406_v41  ;;  %4489 = vmatpush2.bf16.msra.mxu1 %v4412_v29  ;;  %v4269_v53 = vmul.f32 %v4260_v38, %v12758_v28  ;;  %v4267_v36 = vmul.f32 %v10647_v18, %v12756_v16  ;;  %v4266_v13 = vmul.f32 %v4256_v35, %v12755_v63  ;;  %v12763_v35 = vld [vmem:[#allocation199_spill] sm:$0xff] }
0x106f   :  { %v4252_v48 = vpop.permute.xlu1 %4251  ;;  %4439 = vmatprep.subr.bf16.mxu0 %v4374_v26  ;;  %4490 = vmatprep.subr.bf16.mxu1 %v4376_v8  ;;  %v4192_v1 = vpop.permute.xlu0 %4191  ;;  %v4370_v8 = vpack.c.bf16 %v4274_v10, %v4270_v39  ;;  %v4268_v3 = vmul.f32 %v10707_v57, %v12757_v2  ;;  %v4265_v18 = vmul.f32 %v4259_v5, %v12758_v28  ;;  %v12766_v5 = vld [vmem:[#allocation169_spill] sm:$0xff] }
0x1070   :  { %v4255_v25 = vsel %vm581_vm3, %v10675_v21, %v4252_v48  ;;  %v4264_v23 = vsel %vm581_vm3, %v4252_v48, %v4234_v37  ;;  %v4210_v58 = vsel %vm543_vm2, %v4192_v1, %v10741_v61  ;;  %v4208_v21 = vsel %vm543_vm2, %v12760_v60, %v12759_v52 }
0x1071   :  { %v4275_v34 = vmul.f32 %v4255_v25, %v12756_v16  ;;  %v4276_v30 = vmul.f32 %v4264_v23, %v12757_v2  ;;  %v4222_v37 = vmul.f32 %v4209_v19, %v12761_v22  ;;  %v4226_v42 = vmul.f32 %v4210_v58, %v12761_v22  ;;  %v12767_v58 = vld [vmem:[#allocation52_spill] sm:$0xff] }
0x1072   :  { %4440 = vmatpush2.bf16.msra.mxu0 %v4373_v47  ;;  %4491 = vmatpush2.bf16.msra.mxu1 %v4375_v54  ;;  %v4212_v19 = vsel %vm543_vm2, %v12762_v14, %v12750_v32  ;;  %v4218_v47 = vmul.f32 %v4208_v21, %v12761_v22  ;;  %v4369_v54 = vpack.c.bf16 %v4273_v33, %v4269_v53  ;;  %v12764_v32 = vld [vmem:[#allocation47_spill] sm:$0xff] }
0x1073   :  { %v4371_v12 = vpack.c.bf16 %v4275_v34, %v4271_v46  ;;  %v4144_v24 = vpop.permute.xlu1 %4143  ;;  %v4372_v49 = vpack.c.bf16 %v4276_v30, %v4272_v59  ;;  %4441 = vmatprep.subr.bf16.mxu0 %v4370_v8  ;;  %v4186_v17 = vpop.permute.xlu0 %4185  ;;  %v4211_v10 = vsel %vm543_vm2, %v12763_v35, %v12760_v60  ;;  %v4366_v41 = vpack.c.bf16 %v4266_v13, %v4226_v42  ;;  %v12765_v46 = vld [vmem:[#allocation145_spill] sm:$0xff]  ;;  %v12768_v60 = vld [vmem:[#allocation48_spill] sm:$0xff] }
0x1074   :  { %v4213_v26 = vsel %vm543_vm2, %v4186_v17, %v4192_v1  ;;  %v4221_v29 = vmul.f32 %v4212_v19, %v12764_v32  ;;  %v4214_v57 = vsel %vm543_vm2, %v4200_v62, %v12763_v35  ;;  %v4362_v38 = vpack.c.bf16 %v4222_v37, %v4218_v47  ;;  %v12769_v37 = vld [vmem:[#allocation51_spill] sm:$0xff] }
0x1075   :  { %4492 = vmatprep.subr.bf16.mxu1 %v4372_v49  ;;  %v4225_v51 = vmul.f32 %v4213_v26, %v12764_v32  ;;  %v4161_v48 = vsel %vm505_vm4, %v12766_v5, %v12765_v46  ;;  %v4205_v59 = vsel %vm543_vm2, %v12759_v52, %v4200_v62  ;;  %v4206_v33 = vsel %vm543_vm2, %v12749_v0, %v10582_v27 }
0x1076   :  { %4442 = vmatpush2.bf16.msra.mxu0 %v4369_v54  ;;  %4493 = vmatpush2.bf16.msra.mxu1 %v4371_v12  ;;  %v4215_v34 = vsel %vm543_vm2, %v10582_v27, %v12762_v14  ;;  %v4220_v52 = vmul.f32 %v4214_v57, %v12767_v58  ;;  %v4217_v8 = vmul.f32 %v4211_v10, %v12764_v32  ;;  %v12770_v54 = vld [vmem:[#allocation53_spill] sm:$0xff] }
0x1077   :  { %v4150_v39 = vpop.permute.xlu1 %4149  ;;  %v4365_v25 = vpack.c.bf16 %v4265_v18, %v4225_v51  ;;  %4443 = vmatprep.subr.bf16.mxu0 %v4366_v41  ;;  %v4204_v1 = vpop.permute.xlu0 %4203  ;;  %v4174_v53 = vmul.f32 %v4161_v48, %v12768_v60  ;;  %v4219_v27 = vmul.f32 %v4205_v59, %v12769_v37  ;;  %v4223_v47 = vmul.f32 %v4206_v33, %v12769_v37  ;;  %v12772_v59 = vld [vmem:[#allocation56_spill] sm:$0xff] }
0x1078   :  { %v4162_v23 = vsel %vm505_vm4, %v4144_v24, %v4150_v39  ;;  %v4207_v62 = vsel %vm543_vm2, %v10741_v61, %v4204_v1  ;;  %v4216_v30 = vsel %vm543_vm2, %v4204_v1, %v4186_v17  ;;  %v4224_v61 = vmul.f32 %v4215_v34, %v12767_v58  ;;  %v5875_v34 = vld [vmem:[#allocation16] ss:$8 sps:$4 sm:$0xff]  }
0x1079   :  { %v4178_v21 = vmul.f32 %v4162_v23, %v12768_v60  ;;  %v4227_v42 = vmul.f32 %v4207_v62, %v12769_v37  ;;  %v4228_v0 = vmul.f32 %v4216_v30, %v12767_v58  ;;  %v4361_v17 = vpack.c.bf16 %v4221_v29, %v4217_v8  ;;  %v5882_v37 = vld [vmem:[#allocation21 + $0x4] ss:$8 sps:$4 sm:$0xff]  }
0x107a   :  { %4444 = vmatpush2.bf16.msra.mxu0 %v4365_v25  ;;  %v4363_v51 = vpack.c.bf16 %v4223_v47, %v4219_v27 }
0x107b   :  { %v4138_v12 = vpop.permute.xlu1 %4137  ;;  %v4367_v49 = vpack.c.bf16 %v4267_v36, %v4227_v42  ;;  %4445 = vmatprep.subr.bf16.mxu0 %v4362_v38  ;;  %v4136_v14 = vpop.permute.xlu0 %4135  ;;  %v4368_v19 = vpack.c.bf16 %v4268_v3, %v4228_v0  ;;  %v4358_v10 = vpack.c.bf16 %v4178_v21, %v4174_v53  ;;  %v4364_v36 = vpack.c.bf16 %v4224_v61, %v4220_v52  ;;  %v4383_v38 = vld [vmem:[#allocation16 + $0x10] sm:$0xff] }
0x107c   :  { %v4165_v13 = vsel %vm505_vm4, %v4138_v12, %v4144_v24  ;;  %v4164_v18 = vsel %vm505_vm4, %v4136_v14, %v12766_v5  ;;  %v12771_v5 = vld [vmem:[#allocation55_spill] sm:$0xff]  ;;  %v5627_v62 = vcombine.high %v4383_v38, %v4383_v38 }
0x107d   :  { %v4177_v26 = vmul.f32 %v4165_v13, %v12770_v54  ;;  %v4173_v35 = vmul.f32 %v4164_v18, %v12770_v54  ;;  %4494 = vmatprep.subr.bf16.mxu1 %v4368_v19 }
0x107e   :  { %4446 = vmatpush2.bf16.msra.mxu0 %v4361_v17  ;;  %4495 = vmatpush2.bf16.msra.mxu1 %v4367_v49 }
0x107f   :  { %v4156_v24 = vpop.permute.xlu1 %4155  ;;  %v4357_v41 = vpack.c.bf16 %v4177_v26, %v4173_v35  ;;  %4447 = vmatprep.subr.bf16.mxu0 %v4358_v10  ;;  %4496 = vmatprep.subr.bf16.mxu1 %v4364_v36  ;;  %v4154_v57 = vpop.permute.xlu0 %4153 }
0x1080   :  { %v4159_v3 = vsel %vm505_vm4, %v4150_v39, %v4156_v24  ;;  %v4168_v29 = vsel %vm505_vm4, %v4156_v24, %v4138_v12  ;;  %v4158_v23 = vsel %vm505_vm4, %v12765_v46, %v4154_v57  ;;  %v4167_v1 = vsel %vm505_vm4, %v4154_v57, %v4136_v14 }
0x1081   :  { %v4179_v48 = vmul.f32 %v4159_v3, %v12771_v5  ;;  %v4180_v25 = vmul.f32 %v4168_v29, %v12772_v59  ;;  %v4175_v39 = vmul.f32 %v4158_v23, %v12771_v5  ;;  %v4176_v33 = vmul.f32 %v4167_v1, %v12772_v59 }
0x1082   :  { %4448 = vmatpush2.bf16.msra.mxu0 %v4357_v41  ;;  %4497 = vmatpush2.bf16.msra.mxu1 %v4363_v51  ;;  %v5626_v46 = vcombine.low %v4383_v38, %v4383_v38 }
0x1083   :  { %v4359_v30 = vpack.c.bf16 %v4179_v48, %v4175_v39  ;;  %v4360_v52 = vpack.c.bf16 %v4180_v25, %v4176_v33 }
0x1085   :  { %4450 = vmatmul.mubr.bf16.vlgmr.msra.gmra.mxu0 %v5875_v34  ;;  %4498 = vmatprep.subr.bf16.mxu1 %v4360_v52 }
0x1086   :  { %4499 = vmatpush2.bf16.msra.mxu1 %v4359_v30  ;;  %5630 = vmatprep.mubr.msk.bf16.mxu0 %vm1401_vm10, %v5627_v62 }
0x1089   :  { %4501 = vmatmul.mubr.bf16.vlgmr.msra.gmra.mxu1 %v5875_v34 }
0x108a   :  { %5633 = vmatprep.mubr.msk.bf16.mxu1 %vm1401_vm10, %v5627_v62 }
0x108d   :  { %4460 = vmatmul.mubr.bf16.gmra.mxu0 %v5626_v46 }
0x108e   :  { %5639 = vmatprep.mubr.msk.bf16.mxu0 %vm1401_vm10, %v5882_v37 }
0x1091   :  { %4511 = vmatmul.mubr.bf16.gmra.mxu1 %v5626_v46 }
0x1092   :  { %5642 = vmatprep.mubr.msk.bf16.mxu1 %vm1401_vm10, %v5882_v37 }
0x1145   :  { %v10864_v21 = vpop.f32.mrf.mxu0 }
0x1146   :  { %v4537_v0 = vmul.f32 %v10864_v21, %v10864_v21 }
0x1147   :  { %v10866_v42 = vpop.f32.mrf.mxu0 }
0x1148   :  { %v4519_v8 = vadd.f32 %v10866_v42, %v10864_v21  ;;  %v4538_v53 = vmul.f32 %v10866_v42, %v10866_v42 }
0x1149   :  { %v10874_v27 = vpop.f32.mrf.mxu0  ;;  %v10876_v12 = vpop.f32.mrf.mxu1 }
0x114a   :  { %v4549_v61 = vadd.f32 %v4538_v53, %v4537_v0  ;;  %v4520_v49 = vadd.f32 %v4519_v8, %v10876_v12  ;;  %v4539_v13 = vmul.f32 %v10876_v12, %v10876_v12  ;;  %v4541_v14 = vmul.f32 %v10874_v27, %v10874_v27 }
0x114b   :  { %v10883_v19 = vpop.f32.mrf.mxu0  ;;  %v10885_v17 = vpop.f32.mrf.mxu1 }
0x114c   :  { %v4550_v47 = vadd.f32 %v4549_v61, %v4539_v13  ;;  %v4524_v26 = vadd.f32 %v10883_v19, %v10874_v27  ;;  %v4542_v18 = vmul.f32 %v10883_v19, %v10883_v19  ;;  %v4521_v35 = vadd.f32 %v4520_v49, %v10885_v17 }
0x114d   :  { %v4540_v10 = vmul.f32 %v10885_v17, %v10885_v17  ;;  %v10894_v36 = vpop.f32.mrf.mxu0  ;;  %v10896_v51 = vpop.f32.mrf.mxu1 }
0x114e   :  { %v4554_v24 = vadd.f32 %v4542_v18, %v4541_v14  ;;  %v4545_v41 = vmul.f32 %v10894_v36, %v10894_v36  ;;  %v4525_v3 = vadd.f32 %v4524_v26, %v10896_v51  ;;  %v4543_v29 = vmul.f32 %v10896_v51, %v10896_v51  ;;  %4522 = vadd.xlane.f32.xlu0 %v4521_v35 }
0x114f   :  { %v10903_v57 = vpop.f32.mrf.mxu0  ;;  %v10905_v38 = vpop.f32.mrf.mxu1  ;;  %v4551_v48 = vadd.f32 %v4550_v47, %v4540_v10 }
0x1150   :  { %v4555_v25 = vadd.f32 %v4554_v24, %v4543_v29  ;;  %v4529_v23 = vadd.f32 %v10903_v57, %v10894_v36  ;;  %v4546_v1 = vmul.f32 %v10903_v57, %v10903_v57  ;;  %v4526_v39 = vadd.f32 %v4525_v3, %v10905_v38 }
0x1151   :  { %v4544_v33 = vmul.f32 %v10905_v38, %v10905_v38  ;;  %4552 = vadd.xlane.f32.xlu1 %v4551_v48  ;;  %v10914_v34 = vpop.f32.mrf.mxu1  ;;  %v4465_v62 = vpop.f32.mrf.mxu0 }
0x1152   :  { %v4559_v30 = vadd.f32 %v4546_v1, %v4545_v41  ;;  %v4530_v52 = vadd.f32 %v4529_v23, %v10914_v34  ;;  %v4547_v46 = vmul.f32 %v10914_v34, %v10914_v34  ;;  %4527 = vadd.xlane.f32.xlu0 %v4526_v39 }
0x1153   :  { %v10919_v0 = vpop.f32.mrf.mxu1  ;;  %v4556_v8 = vadd.f32 %v4555_v25, %v4544_v33  ;;  %v4466_v53 = vpop.f32.mrf.mxu0 }
0x1154   :  { %v4560_v61 = vadd.f32 %v4559_v30, %v4547_v46  ;;  %v4531_v49 = vadd.f32 %v4530_v52, %v10919_v0  ;;  %v4548_v13 = vmul.f32 %v10919_v0, %v10919_v0 }
0x1155   :  { %4557 = vadd.xlane.f32.xlu1 %v4556_v8  ;;  %v4516_v14 = vpop.f32.mrf.mxu1 }
0x1156   :  { %4532 = vadd.xlane.f32.xlu0 %v4531_v49  ;;  %v4561_v47 = vadd.f32 %v4560_v61, %v4548_v13  ;;  %v4579_v13 = vld [vmem:[#allocation18] sm:$0xff] }
0x1157   :  { %v4517_v26 = vpop.f32.mrf.mxu1 }
0x1158   :  { %v4580_v26 = vld [vmem:[#allocation18 + $0x8] sm:$0xff] }
0x115a   :  { %4562 = vadd.xlane.f32.xlu0 %v4561_v47 }
0x11d7   :  { %v4523_v18 = vpop.xlane.xlu0 %4522 }
0x11d8   :  { %v4534_v35 = vmul.f32 0.001953125, %v4523_v18  ;;  %v4585_v18 = vld [vmem:[#allocation19] sm:$0xff] }
0x11da   :  { %v4567_v10 = vmul.f32 %v4534_v35, %v4534_v35  ;;  %v4553_v24 = vpop.xlane.xlu1 %4552 }
0x11db   :  { %v4564_v41 = vmul.f32 0.001953125, %v4553_v24  ;;  %v4528_v3 = vpop.xlane.xlu0 %4527 }
0x11dc   :  { %v4535_v29 = vmul.f32 0.001953125, %v4528_v3 }
0x11dd   :  { %v4570_v48 = vsub.f32 %v4564_v41, %v4567_v10 }
0x11de   :  { %v4568_v25 = vmul.f32 %v4535_v29, %v4535_v29  ;;  %v4558_v23 = vpop.xlane.xlu1 %4557 }
0x11df   :  { %v4573_v1 = vadd.f32 0.0001, %v4570_v48  ;;  %v4565_v39 = vmul.f32 0.001953125, %v4558_v23  ;;  %v4533_v33 = vpop.xlane.xlu0 %4532  ;;  %v4586_v48 = vld [vmem:[#allocation19 + $0x8] sm:$0xff]  ;;  %v4581_v23 = vld [vmem:[#allocation18 + $0x10] sm:$0xff] }
0x11e0   :  { %v4536_v62 = vmul.f32 0.001953125, %v4533_v33 }
0x11e1   :  { %5909 = vrsqrt.f32 %v4573_v1  ;;  %v4571_v30 = vsub.f32 %v4565_v39, %v4568_v25 }
0x11e2   :  { %v4569_v52 = vmul.f32 %v4536_v62, %v4536_v62 }
0x11e3   :  { %v4574_v46 = vadd.f32 0.0001, %v4571_v30  ;;  %v4563_v8 = vpop.xlane.xlu0 %4562  ;;  %v4587_v30 = vld [vmem:[#allocation19 + $0x10] sm:$0xff] }
0x11e4   :  { %v4566_v53 = vmul.f32 0.001953125, %v4563_v8 }
0x11e5   :  { %5911 = vrsqrt.f32 %v4574_v46 }
0x11e6   :  { %v4572_v61 = vsub.f32 %v4566_v53, %v4569_v52 }
0x11e8   :  { %v4575_v49 = vadd.f32 0.0001, %v4572_v61 }
0x11ea   :  { %5913 = vrsqrt.f32 %v4575_v49 }
0x11ee   :  { %v5910_v14 = vpop.eup %5909 }
0x11ef   :  { %v4582_v47 = vmul.f32 %v5910_v14, %v4579_v13 }
0x11f1   :  { %4596 = vperm.xlu1 %5741, %v4582_v47   ;;  %v4588_v10 = vmul.f32 %v4582_v47, %v4534_v35 }
0x11f2   :  { %v5912_v24 = vpop.eup %5911 }
0x11f3   :  { %v4583_v41 = vmul.f32 %v5912_v24, %v4580_v26  ;;  %v4591_v3 = vsub.f32 %v4585_v18, %v4588_v10 }
0x11f5   :  { %4601 = vperm.xlu1 %5741, %v4583_v41   ;;  %4623 = vperm.xlu0 %5742, %v4591_v3   ;;  %v4589_v25 = vmul.f32 %v4583_v41, %v4535_v29 }
0x11f7   :  { %v5914_v1 = vpop.eup %5913  ;;  %v4592_v39 = vsub.f32 %v4586_v48, %v4589_v25 }
0x11f8   :  { %v4584_v33 = vmul.f32 %v5914_v1, %v4581_v23 }
0x11f9   :  { %4628 = vperm.xlu0 %5742, %v4592_v39  }
0x11fa   :  { %4606 = vperm.xlu1 %5741, %v4584_v33   ;;  %v4590_v52 = vmul.f32 %v4584_v33, %v4536_v62 }
0x11fc   :  { %v4593_v46 = vsub.f32 %v4587_v30, %v4590_v52 }
0x11fe   :  { %4633 = vperm.xlu1 %5741, %v4593_v46  }
0x126c   :  { %v4597_v8 = vpop.permute.xlu1 %4596 }
0x126d   :  { %v4610_v35 = vmul.f32 %v4597_v8, %v10866_v42  ;;  %v4611_v53 = vmul.f32 %v4597_v8, %v10876_v12  ;;  %v4609_v49 = vmul.f32 %v4597_v8, %v10864_v21  ;;  %v4612_v29 = vmul.f32 %v4597_v8, %v10885_v17 }
0x1270   :  { %v4624_v61 = vpop.permute.xlu0 %4623  ;;  %v4602_v21 = vpop.permute.xlu1 %4601 }
0x1271   :  { %v4637_v13 = vadd.f32 %v4624_v61, %v4610_v35  ;;  %v4638_v14 = vadd.f32 %v4624_v61, %v4611_v53  ;;  %v4636_v47 = vadd.f32 %v4624_v61, %v4609_v49  ;;  %v4639_v26 = vadd.f32 %v4624_v61, %v4612_v29 }
0x1272   :  { %v4613_v62 = vmul.f32 %v4602_v21, %v10874_v27  ;;  %v4614_v41 = vmul.f32 %v4602_v21, %v10883_v19  ;;  %v4616_v27 = vmul.f32 %v4602_v21, %v10905_v38  ;;  %v4615_v19 = vmul.f32 %v4602_v21, %v10896_v51 }
0x1273   :  { %v10928_v18 = vmax.f32 %v4637_v13, 0.0  ;;  %v10930_v10 = vmax.f32 %v4638_v14, 0.0  ;;  %v10936_v42 = vmax.f32 %v4636_v47, 0.0  ;;  %v10938_v12 = vmax.f32 %v4639_v26, 0.0 }
0x1274   :  { %v4629_v17 = vpop.permute.xlu0 %4628 }
0x1275   :  { %4864 = vrot.lane.b32.xlu1 %v10930_v10, %s6330_s13  ;;  %4858 = vrot.lane.b32.xlu0 %v10928_v18, %s6330_s13  ;;  %v4640_v24 = vadd.f32 %v4629_v17, %v4613_v62  ;;  %v4641_v3 = vadd.f32 %v4629_v17, %v4614_v41  ;;  %v4643_v25 = vadd.f32 %v4629_v17, %v4616_v27  ;;  %v4607_v51 = vpop.permute.xlu1 %4606 }
0x1276   :  { %v4642_v1 = vadd.f32 %v4629_v17, %v4615_v19  ;;  %v4617_v30 = vmul.f32 %v4607_v51, %v10894_v36  ;;  %v4618_v46 = vmul.f32 %v4607_v51, %v10903_v57  ;;  %v4620_v36 = vmul.f32 %v4607_v51, %v10919_v0 }
0x1277   :  { %v10990_v48 = vmax.f32 %v4640_v24, 0.0  ;;  %v10997_v23 = vmax.f32 %v4641_v3, 0.0  ;;  %v11004_v39 = vmax.f32 %v4643_v25, 0.0  ;;  %v4619_v49 = vmul.f32 %v4607_v51, %v10914_v34 }
0x1278   :  { %v11010_v38 = vmax.f32 %v4642_v1, 0.0 }
0x1279   :  { %4870 = vrot.lane.b32.xlu1 %v10938_v12, %s6330_s13  ;;  %4852 = vrot.lane.b32.xlu0 %v10936_v42, %s6330_s13  ;;  %v4634_v33 = vpop.permute.xlu1 %4633 }
0x127a   :  { %v4644_v52 = vadd.f32 %v4634_v33, %v4617_v30  ;;  %v4645_v8 = vadd.f32 %v4634_v33, %v4618_v46  ;;  %v4647_v53 = vadd.f32 %v4634_v33, %v4620_v36  ;;  %v4646_v0 = vadd.f32 %v4634_v33, %v4619_v49 }
0x127b   :  { %v5071_v46 = vpack.c.bf16 %v11004_v39, %v10938_v12 }
0x127c   :  { %v11054_v35 = vmax.f32 %v4644_v52, 0.0  ;;  %v11061_v61 = vmax.f32 %v4645_v8, 0.0  ;;  %v11067_v57 = vmax.f32 %v4647_v53, 0.0  ;;  %v11081_v34 = vmax.f32 %v4646_v0, 0.0 }
0x127d   :  { %4810 = vrot.lane.b32.xlu1 %v10928_v18, %s6326_s30  ;;  %4804 = vrot.lane.b32.xlu0 %v10936_v42, %s6326_s30  ;;  %v5069_v52 = vpack.c.bf16 %v10997_v23, %v10928_v18  ;;  %v5068_v53 = vpack.c.bf16 %v10990_v48, %v10936_v42 }
0x1281   :  { %4822 = vrot.lane.b32.xlu1 %v10938_v12, %s6326_s30  ;;  %4756 = vrot.lane.b32.xlu0 %v10936_v42, %s6331_s16 }
0x1285   :  { %4816 = vrot.lane.b32.xlu1 %v10930_v10, %s6326_s30  ;;  %4762 = vrot.lane.b32.xlu0 %v10928_v18, %s6331_s16 }
0x1289   :  { %4714 = vrot.lane.b32.xlu1 %v10928_v18, %s6324_s9  ;;  %4774 = vrot.lane.b32.xlu0 %v10938_v12, %s6331_s16 }
0x128d   :  { %4726 = vrot.lane.b32.xlu1 %v10938_v12, %s6324_s9  ;;  %4768 = vrot.lane.b32.xlu0 %v10930_v10, %s6331_s16 }
0x1291   :  { %4720 = vrot.lane.b32.xlu1 %v10930_v10, %s6324_s9  ;;  %4708 = vrot.lane.b32.xlu0 %v10936_v42, %s6324_s9 }
0x1295   :  { %5002 = vrot.lane.b32.xlu1 %v10928_v18, %s6327_s17  ;;  %4660 = vrot.lane.b32.xlu0 %v10936_v42, %s6332_s27 }
0x1299   :  { %5008 = vrot.lane.b32.xlu1 %v10930_v10, %s6327_s17  ;;  %4666 = vrot.lane.b32.xlu0 %v10928_v18, %s6332_s27 }
0x129d   :  { %4960 = vrot.lane.b32.xlu1 %v10930_v10, %s6329_s4  ;;  %4678 = vrot.lane.b32.xlu0 %v10938_v12, %s6332_s27 }
0x12a1   :  { %4948 = vrot.lane.b32.xlu1 %v10936_v42, %s6329_s4  ;;  %4672 = vrot.lane.b32.xlu0 %v10930_v10, %s6332_s27 }
0x12a5   :  { %4966 = vrot.lane.b32.xlu1 %v10938_v12, %s6329_s4  ;;  %4996 = vrot.lane.b32.xlu0 %v10936_v42, %s6327_s17 }
0x12a9   :  { %5014 = vrot.lane.b32.xlu0 %v10938_v12, %s6327_s17  ;;  %4758 = vrot.lane.b32.xlu1 %v10990_v48, %s6331_s16 }
0x12ad   :  { %4954 = vrot.lane.b32.xlu0 %v10928_v18, %s6329_s4  ;;  %4764 = vrot.lane.b32.xlu1 %v10997_v23, %s6331_s16 }
0x12b1   :  { %4906 = vrot.lane.b32.xlu0 %v10928_v18, %s6328_s1  ;;  %4776 = vrot.lane.b32.xlu1 %v11004_v39, %s6331_s16  ;;  %v5070_v18 = vpack.c.bf16 %v11010_v38, %v10930_v10 }
0x12b5   :  { %4912 = vrot.lane.b32.xlu0 %v10930_v10, %s6328_s1  ;;  %4770 = vrot.lane.b32.xlu1 %v11010_v38, %s6331_s16 }
0x12b9   :  { %4900 = vrot.lane.b32.xlu0 %v10936_v42, %s6328_s1  ;;  %4662 = vrot.lane.b32.xlu1 %v10990_v48, %s6332_s27 }
0x12bd   :  { %4668 = vrot.lane.b32.xlu1 %v10997_v23, %s6332_s27  ;;  %4806 = vrot.lane.b32.xlu0 %v10990_v48, %s6326_s30 }
0x12c1   :  { %4680 = vrot.lane.b32.xlu1 %v11004_v39, %s6332_s27  ;;  %4812 = vrot.lane.b32.xlu0 %v10997_v23, %s6326_s30 }
0x12c5   :  { %4674 = vrot.lane.b32.xlu1 %v11010_v38, %s6332_s27  ;;  %4824 = vrot.lane.b32.xlu0 %v11004_v39, %s6326_s30 }
0x12c9   :  { %4998 = vrot.lane.b32.xlu1 %v10990_v48, %s6327_s17  ;;  %4818 = vrot.lane.b32.xlu0 %v11010_v38, %s6326_s30 }
0x12cd   :  { %5016 = vrot.lane.b32.xlu1 %v11004_v39, %s6327_s17  ;;  %4710 = vrot.lane.b32.xlu0 %v10990_v48, %s6324_s9 }
0x12d1   :  { %4908 = vrot.lane.b32.xlu1 %v10997_v23, %s6328_s1  ;;  %4716 = vrot.lane.b32.xlu0 %v10997_v23, %s6324_s9 }
0x12d5   :  { %4914 = vrot.lane.b32.xlu1 %v11010_v38, %s6328_s1  ;;  %4728 = vrot.lane.b32.xlu0 %v11004_v39, %s6324_s9 }
0x12d9   :  { %4902 = vrot.lane.b32.xlu1 %v10990_v48, %s6328_s1  ;;  %4722 = vrot.lane.b32.xlu0 %v11010_v38, %s6324_s9 }
0x12dd   :  { %4808 = vrot.lane.b32.xlu1 %v11054_v35, %s6326_s30  ;;  %5004 = vrot.lane.b32.xlu0 %v10997_v23, %s6327_s17 }
0x12e1   :  { %4814 = vrot.lane.b32.xlu1 %v11061_v61, %s6326_s30  ;;  %5010 = vrot.lane.b32.xlu0 %v11010_v38, %s6327_s17 }
0x12e5   :  { %4826 = vrot.lane.b32.xlu1 %v11067_v57, %s6326_s30  ;;  %4956 = vrot.lane.b32.xlu0 %v10997_v23, %s6329_s4 }
0x12e7   :  { %v4865_v29 = vpop.permute.xlu1 %4864  ;;  %v4859_v13 = vpop.permute.xlu0 %4858 }
0x12e8   :  { %v4879_v14 = vsel %vm505_vm4, %v4859_v13, %v4865_v29 }
0x12e9   :  { %v4889_v47 = vmul.f32 %v4879_v14, %v12768_v60  ;;  %4766 = vrot.lane.b32.xlu1 %v11061_v61, %s6331_s16  ;;  %4962 = vrot.lane.b32.xlu0 %v11010_v38, %s6329_s4 }
0x12eb   :  { %v4871_v26 = vpop.permute.xlu1 %4870  ;;  %v4853_v21 = vpop.permute.xlu0 %4852  ;;  %v5073_v17 = vpack.c.bf16 %v4889_v47, %v11061_v61 }
0x12ec   :  { %v4876_v62 = vsel %vm505_vm4, %v4865_v29, %v4871_v26  ;;  %v4882_v24 = vsel %vm505_vm4, %v4853_v21, %v4859_v13  ;;  %v4885_v41 = vsel %vm505_vm4, %v4871_v26, %v4853_v21 }
0x12ed   :  { %v4890_v3 = vmul.f32 %v4876_v62, %v12771_v5  ;;  %v4888_v27 = vmul.f32 %v4882_v24, %v12770_v54  ;;  %v4891_v25 = vmul.f32 %v4885_v41, %v12772_v59  ;;  %4820 = vrot.lane.b32.xlu1 %v11081_v34, %s6326_s30  ;;  %4950 = vrot.lane.b32.xlu0 %v10990_v48, %s6329_s4 }
0x12ee   :  { %5136 = vmatprep.subr.bf16.mxu0 %v5073_v17 }
0x12ef   :  { %v5074_v19 = vpack.c.bf16 %v4890_v3, %v11081_v34  ;;  %v5072_v1 = vpack.c.bf16 %v4888_v27, %v11054_v35  ;;  %v11099_v51 = vpop.permute.xlu1 %4810  ;;  %v11101_v33 = vpop.permute.xlu0 %4804  ;;  %v5075_v30 = vpack.c.bf16 %v4891_v25, %v11067_v57 }
0x12f1   :  { %4712 = vrot.lane.b32.xlu1 %v11054_v35, %s6324_s9  ;;  %4968 = vrot.lane.b32.xlu0 %v11004_v39, %s6329_s4 }
0x12f2   :  { %5137 = vmatpush1.bf16.msra.mxu0 %v5072_v1  ;;  %5187 = vmatprep.subr.bf16.mxu1 %v5075_v30 }
0x12f3   :  { %5138 = vmatprep.subr.bf16.mxu0 %v5069_v52  ;;  %5188 = vmatpush1.bf16.msra.mxu1 %v5074_v19  ;;  %v11112_v8 = vpop.permute.xlu1 %4822  ;;  %v11114_v36 = vpop.permute.xlu0 %4756 }
0x12f4   :  { %5189 = vmatprep.subr.bf16.mxu1 %v5071_v46 }
0x12f5   :  { %4718 = vrot.lane.b32.xlu1 %v11061_v61, %s6324_s9  ;;  %4860 = vrot.lane.b32.xlu0 %v10997_v23, %s6330_s13 }
0x12f6   :  { %5139 = vmatpush1.bf16.msra.mxu0 %v5068_v53 }
0x12f7   :  { %5190 = vmatpush1.bf16.msra.mxu1 %v5070_v18  ;;  %v11124_v49 = vpop.permute.xlu1 %4816  ;;  %v11126_v0 = vpop.permute.xlu0 %4762 }
0x12f9   :  { %4730 = vrot.lane.b32.xlu1 %v11067_v57, %s6324_s9  ;;  %4866 = vrot.lane.b32.xlu0 %v11010_v38, %s6330_s13 }
0x12fb   :  { %v4715_v42 = vpop.permute.xlu1 %4714  ;;  %v11132_v29 = vpop.permute.xlu0 %4774 }
0x12fd   :  { %4670 = vrot.lane.b32.xlu1 %v11061_v61, %s6332_s27  ;;  %4760 = vrot.lane.b32.xlu0 %v11054_v35, %s6331_s16 }
0x12ff   :  { %v4727_v10 = vpop.permute.xlu1 %4726  ;;  %v4769_v23 = vpop.permute.xlu0 %4768 }
0x1301   :  { %4724 = vrot.lane.b32.xlu1 %v11081_v34, %s6324_s9  ;;  %4778 = vrot.lane.b32.xlu0 %v11067_v57, %s6331_s16 }
0x1303   :  { %v4721_v13 = vpop.permute.xlu1 %4720  ;;  %v4709_v14 = vpop.permute.xlu0 %4708 }
0x1304   :  { %v11144_v38 = vsel %vm391_vm8, %v4721_v13, %v4727_v10  ;;  %v11148_v47 = vsel %vm391_vm8, %v4715_v42, %v4721_v13  ;;  %v11152_v26 = vsel %vm391_vm8, %v4709_v14, %v4715_v42  ;;  %v11156_v21 = vsel %vm391_vm8, %v4727_v10, %v4709_v14 }
0x1305   :  { %5006 = vrot.lane.b32.xlu1 %v11061_v61, %s6327_s17  ;;  %4772 = vrot.lane.b32.xlu0 %v11081_v34, %s6331_s16 }
0x1307   :  { %v5003_v17 = vpop.permute.xlu1 %5002  ;;  %v4661_v62 = vpop.permute.xlu0 %4660 }
0x1309   :  { %4920 = vrot.lane.b32.xlu1 %v11004_v39, %s6328_s1  ;;  %4664 = vrot.lane.b32.xlu0 %v11054_v35, %s6332_s27 }
0x130b   :  { %v5009_v24 = vpop.permute.xlu1 %5008  ;;  %v4667_v41 = vpop.permute.xlu0 %4666 }
0x130c   :  { %v11168_v3 = vsel %vm619_vm0, %v5003_v17, %v5009_v24  ;;  %v11172_v27 = vsel %vm353_vm7, %v4661_v62, %v4667_v41 }
0x130d   :  { %12773 = vst [vmem:[#allocation160_spill] sm:$0xff] %v11168_v3  ;;  %5018 = vrot.lane.b32.xlu1 %v11067_v57, %s6327_s17  ;;  %4682 = vrot.lane.b32.xlu0 %v11067_v57, %s6332_s27 }
0x130f   :  { %v4961_v25 = vpop.permute.xlu1 %4960  ;;  %v4679_v19 = vpop.permute.xlu0 %4678 }
0x1310   :  { %v11180_v1 = vsel %vm353_vm7, %v4679_v19, %v4661_v62 }
0x1311   :  { %4958 = vrot.lane.b32.xlu1 %v11061_v61, %s6329_s4  ;;  %4676 = vrot.lane.b32.xlu0 %v11081_v34, %s6332_s27 }
0x1313   :  { %v4949_v30 = vpop.permute.xlu1 %4948  ;;  %v4673_v52 = vpop.permute.xlu0 %4672 }
0x1314   :  { %v11188_v46 = vsel %vm353_vm7, %v4673_v52, %v4679_v19  ;;  %v11192_v53 = vsel %vm353_vm7, %v4667_v41, %v4673_v52 }
0x1315   :  { %4964 = vrot.lane.b32.xlu1 %v11081_v34, %s6329_s4  ;;  %5000 = vrot.lane.b32.xlu0 %v11054_v35, %s6327_s17 }
0x1317   :  { %v4967_v18 = vpop.permute.xlu1 %4966  ;;  %v4997_v42 = vpop.permute.xlu0 %4996 }
0x1318   :  { %v11200_v10 = vsel %vm581_vm3, %v4961_v25, %v4967_v18  ;;  %v11204_v13 = vsel %vm581_vm3, %v4967_v18, %v4949_v30  ;;  %v11208_v14 = vsel %vm619_vm0, %v4997_v42, %v5003_v17 }
0x1319   :  { %12774 = vst [vmem:[#allocation178_spill] sm:$0xff] %v11200_v10  ;;  %12775 = vst [vmem:[#allocation208_spill] sm:$0xff] %v11204_v13  ;;  %4952 = vrot.lane.b32.xlu1 %v11054_v35, %s6329_s4  ;;  %5012 = vrot.lane.b32.xlu0 %v11081_v34, %s6327_s17 }
0x131b   :  { %v4759_v62 = vpop.permute.xlu1 %4758  ;;  %v5015_v41 = vpop.permute.xlu0 %5014 }
0x131c   :  { %v11216_v19 = vsel %vm619_vm0, %v5009_v24, %v5015_v41  ;;  %v11220_v52 = vsel %vm619_vm0, %v5015_v41, %v4997_v42 }
0x131d   :  { %4916 = vrot.lane.b32.xlu1 %v11081_v34, %s6328_s1  ;;  %4918 = vrot.lane.b32.xlu0 %v10938_v12, %s6328_s1 }
0x131f   :  { %v4765_v17 = vpop.permute.xlu1 %4764  ;;  %v4955_v18 = vpop.permute.xlu0 %4954 }
0x1320   :  { %v11228_v59 = vsel %vm429_vm5, %v4759_v62, %v4765_v17  ;;  %v11232_v24 = vsel %vm581_vm3, %v4955_v18, %v4961_v25  ;;  %v11236_v42 = vsel %vm581_vm3, %v4949_v30, %v4955_v18  ;;  %v4780_v25 = vsel %vm429_vm5, %v4769_v23, %v11132_v29 }
0x1321   :  { %12776 = vst [vmem:[#allocation176_spill] sm:$0xff] %v11232_v24  ;;  %12777 = vst [vmem:[#allocation128_spill] sm:$0xff] %v11236_v42  ;;  %4970 = vrot.lane.b32.xlu1 %v11067_v57, %s6329_s4  ;;  %4910 = vrot.lane.b32.xlu0 %v11061_v61, %s6328_s1  ;;  %v4783_v30 = vsel %vm429_vm5, %v11126_v0, %v4769_v23  ;;  %v11268_v58 = vmul.f32 %v4780_v25, %v12475_v56 }
0x1322   :  { %v11265_v60 = vmul.f32 %v4783_v30, %v12573_v4 }
0x1323   :  { %v4777_v12 = vpop.permute.xlu1 %4776  ;;  %v11242_v41 = vpop.permute.xlu0 %4906 }
0x1324   :  { %v11246_v5 = vsel %vm429_vm5, %v4777_v12, %v4759_v62 }
0x1325   :  { %4862 = vrot.lane.b32.xlu1 %v11061_v61, %s6330_s13  ;;  %4904 = vrot.lane.b32.xlu0 %v11054_v35, %s6328_s1 }
0x1327   :  { %v4771_v18 = vpop.permute.xlu1 %4770  ;;  %v11258_v54 = vpop.permute.xlu0 %4912 }
0x1328   :  { %12778 = vst [vmem:[#allocation206_spill] sm:$0xff] %v11258_v54  ;;  %v4781_v62 = vsel %vm429_vm5, %v4771_v18, %v4777_v12  ;;  %v4784_v61 = vsel %vm429_vm5, %v4765_v17, %v4771_v18 }
0x1329   :  { %v11271_v23 = vmul.f32 %v4784_v61, %v12573_v4  ;;  %v11274_v13 = vmul.f32 %v4781_v62, %v12475_v56  ;;  %4868 = vrot.lane.b32.xlu1 %v11081_v34, %s6330_s13  ;;  %4922 = vrot.lane.b32.xlu0 %v11067_v57, %s6328_s1  ;;  %v11298_v61 = vmul.f32 %v11172_v27, %v12737_v55 }
0x132a   :  { %v11315_v27 = vmul.f32 %v11180_v1, %v12738_v31  ;;  %v11332_v1 = vmul.f32 %v11188_v46, %v12617_v15 }
0x132b   :  { %v4663_v12 = vpop.permute.xlu1 %4662  ;;  %v11283_v25 = vpop.permute.xlu0 %4900 }
0x132c   :  { %12779 = vst [vmem:[#allocation188_spill] sm:$0xff] %v11283_v25  ;;  %12781 = vst [vmem:[#allocation191_spill] sm:$0xff] %v11332_v1  ;;  %v4930_v16 = vsel %vm543_vm2, %v11283_v25, %v11242_v41 }
0x132d   :  { %4856 = vrot.lane.b32.xlu1 %v11054_v35, %s6330_s13  ;;  %4854 = vrot.lane.b32.xlu0 %v10990_v48, %s6330_s13 }
0x132f   :  { %v4669_v34 = vpop.permute.xlu1 %4668  ;;  %v11292_v18 = vpop.permute.xlu0 %4806 }
0x1330   :  { %v4691_v62 = vsel %vm353_vm7, %v4663_v12, %v4669_v34 }
0x1331   :  { %v11301_v17 = vmul.f32 %v4691_v62, %v12737_v55  ;;  %4874 = vrot.lane.b32.xlu1 %v11067_v57, %s6330_s13  ;;  %4872 = vrot.lane.b32.xlu0 %v11004_v39, %s6330_s13 }
0x1333   :  { %v4681_v37 = vpop.permute.xlu1 %4680  ;;  %v11307_v48 = vpop.permute.xlu0 %4812 }
0x1334   :  { %v4694_v30 = vsel %vm353_vm7, %v4681_v37, %v4663_v12  ;;  %v11328_v12 = vmul.f32 %v11192_v53, %v12618_v11 }
0x1335   :  { %v11318_v62 = vmul.f32 %v4694_v30, %v12738_v31 }
0x1336   :  { %12780 = vst [vmem:[#allocation95_spill] sm:$0xff] %v11328_v12 }
0x1337   :  { %v4675_v39 = vpop.permute.xlu1 %4674  ;;  %v4825_v10 = vpop.permute.xlu0 %4824 }
0x1338   :  { %v4685_v42 = vsel %vm353_vm7, %v4675_v39, %v4681_v37  ;;  %v4688_v35 = vsel %vm353_vm7, %v4669_v34, %v4675_v39  ;;  %v4927_v34 = vsel %vm543_vm2, %v11242_v41, %v11258_v54 }
0x1339   :  { %v11335_v30 = vmul.f32 %v4688_v35, %v12618_v11  ;;  %v11338_v57 = vmul.f32 %v4685_v42, %v12617_v15  ;;  %v11350_v35 = vmul.f32 %v11220_v52, %v12745_v50 }
0x133b   :  { %12782 = vst [vmem:[#allocation214_spill] sm:$0xff] %v11335_v30  ;;  %v4999_v24 = vpop.permute.xlu1 %4998  ;;  %v4819_v28 = vpop.permute.xlu0 %4818  ;;  %12783 = vst [vmem:[#allocation102_spill] sm:$0xff] %v11350_v35 }
0x133f   :  { %v5017_v53 = vpop.permute.xlu1 %5016  ;;  %v11344_v39 = vpop.permute.xlu0 %4710 }
0x1340   :  { %v5030_v46 = vsel %vm619_vm0, %v5017_v53, %v4999_v24 }
0x1341   :  { %v11353_v42 = vmul.f32 %v5030_v46, %v12745_v50  ;;  %v11371_v46 = vmul.f32 %v4927_v34, %v12761_v22 }
0x1343   :  { %12784 = vst [vmem:[#allocation151_spill] sm:$0xff] %v11353_v42  ;;  %v4909_v2 = vpop.permute.xlu1 %4908  ;;  %v11355_v37 = vpop.permute.xlu0 %4716  ;;  %12786 = vst [vmem:[#allocation193_spill] sm:$0xff] %v11371_v46  ;;  %v11404_v46 = vmul.f32 %v11208_v14, %v12744_v44 }
0x1345   :  { %12791 = vst [vmem:[#allocation173_spill] sm:$0xff] %v11404_v46 }
0x1347   :  { %v11363_v63 = vpop.permute.xlu1 %4914  ;;  %v11365_v12 = vpop.permute.xlu0 %4728 }
0x1348   :  { %12785 = vst [vmem:[#allocation101_spill] sm:$0xff] %v11363_v63  ;;  %v4928_v52 = vsel %vm543_vm2, %v4909_v2, %v11363_v63  ;;  %v11390_v63 = vmul.f32 %v4930_v16, %v12764_v32 }
0x1349   :  { %v11374_v30 = vmul.f32 %v4928_v52, %v12761_v22 }
0x134a   :  { %12789 = vst [vmem:[#allocation136_spill] sm:$0xff] %v11390_v63 }
0x134b   :  { %12787 = vst [vmem:[#allocation64_spill] sm:$0xff] %v11374_v30  ;;  %v11380_v54 = vpop.permute.xlu1 %4902  ;;  %v11382_v35 = vpop.permute.xlu0 %4722 }
0x134c   :  { %12788 = vst [vmem:[#allocation171_spill] sm:$0xff] %v11380_v54  ;;  %v4931_v34 = vsel %vm543_vm2, %v11380_v54, %v4909_v2  ;;  %v4835_v2 = vsel %vm467_vm6, %v11292_v18, %v11307_v48 }
0x134d   :  { %v11393_v52 = vmul.f32 %v4931_v34, %v12764_v32  ;;  %v4838_v32 = vsel %vm467_vm6, %v4825_v10, %v11292_v18  ;;  %v4829_v18 = vsel %vm467_vm6, %v4819_v28, %v4825_v10 }
0x134f   :  { %12790 = vst [vmem:[#allocation163_spill] sm:$0xff] %v11393_v52  ;;  %v4809_v25 = vpop.permute.xlu1 %4808  ;;  %v11397_v22 = vpop.permute.xlu0 %5004  ;;  %v12794_v52 = vld [vmem:[#allocation57_spill] sm:$0xff] }
0x1350   :  { %v5027_v42 = vsel %vm619_vm0, %v4999_v24, %v11397_v22  ;;  %v4845_v30 = vmul.f32 %v4835_v2, %v12794_v52  ;;  %v12797_v2 = vld [vmem:[#allocation58_spill] sm:$0xff] }
0x1351   :  { %v11407_v16 = vmul.f32 %v5027_v42, %v12744_v44  ;;  %v11424_v42 = vmul.f32 %v11216_v19, %v12747_v43  ;;  %v4844_v9 = vmul.f32 %v4838_v32, %v12797_v2 }
0x1353   :  { %12792 = vst [vmem:[#allocation186_spill] sm:$0xff] %v11407_v16  ;;  %v4815_v41 = vpop.permute.xlu1 %4814  ;;  %v11415_v63 = vpop.permute.xlu0 %5010  ;;  %12793 = vst [vmem:[#allocation182_spill] sm:$0xff] %v11424_v42 }
0x1354   :  { %v4836_v24 = vsel %vm467_vm6, %v4809_v25, %v4815_v41  ;;  %v5021_v14 = vsel %vm619_vm0, %v11415_v63, %v5017_v53 }
0x1355   :  { %v4849_v54 = vmul.f32 %v4836_v24, %v12794_v52  ;;  %v11429_v34 = vmul.f32 %v5021_v14, %v12747_v43 }
0x1357   :  { %12795 = vst [vmem:[#allocation207_spill] sm:$0xff] %v11429_v34  ;;  %v4827_v16 = vpop.permute.xlu1 %4826  ;;  %v11436_v53 = vpop.permute.xlu0 %4956  ;;  %v5065_v3 = vpack.c.bf16 %v4849_v54, %v4845_v30  ;;  %v4832_v54 = vsel %vm467_vm6, %v11307_v48, %v4819_v28 }
0x1358   :  { %12796 = vst [vmem:[#allocation88_spill] sm:$0xff] %v11436_v53  ;;  %v4839_v19 = vsel %vm467_vm6, %v4827_v16, %v4809_v25 }
0x1359   :  { %v4848_v24 = vmul.f32 %v4839_v19, %v12797_v2  ;;  %5140 = vmatprep.subr.bf16.mxu0 %v5065_v3  ;;  %v12799_v3 = vld [vmem:[#allocation62_spill] sm:$0xff]  ;;  %v12800_v19 = vld [vmem:[#allocation63_spill] sm:$0xff] }
0x135a   :  { %v4846_v25 = vmul.f32 %v4832_v54, %v12799_v3 }
0x135b   :  { %v5064_v14 = vpack.c.bf16 %v4848_v24, %v4844_v9  ;;  %v4767_v43 = vpop.permute.xlu1 %4766  ;;  %v11442_v1 = vpop.permute.xlu0 %4962  ;;  %v4847_v24 = vmul.f32 %v4829_v18, %v12800_v19  ;;  %v4834_v18 = vsel %vm467_vm6, %v11101_v33, %v11099_v51 }
0x135d   :  { %5141 = vmatpush1.bf16.msra.mxu0 %v5064_v14 }
0x135f   :  { %v4821_v30 = vpop.permute.xlu1 %4820  ;;  %v11449_v46 = vpop.permute.xlu0 %4950 }
0x1360   :  { %12798 = vst [vmem:[#allocation75_spill] sm:$0xff] %v11449_v46  ;;  %v4830_v32 = vsel %vm467_vm6, %v4821_v30, %v4827_v16  ;;  %v4833_v9 = vsel %vm467_vm6, %v4815_v41, %v4821_v30 }
0x1361   :  { %v4850_v14 = vmul.f32 %v4833_v9, %v12799_v3  ;;  %v4851_v10 = vmul.f32 %v4830_v32, %v12800_v19  ;;  %v4841_v9 = vmul.f32 %v4834_v18, %v12794_v52 }
0x1363   :  { %v5066_v42 = vpack.c.bf16 %v4850_v14, %v4846_v25  ;;  %v4713_v34 = vpop.permute.xlu1 %4712  ;;  %v11459_v28 = vpop.permute.xlu0 %4968  ;;  %v5067_v48 = vpack.c.bf16 %v4851_v10, %v4847_v24  ;;  %v4837_v24 = vsel %vm467_vm6, %v11112_v8, %v11101_v33  ;;  %v4786_v14 = vsel %vm429_vm5, %v11114_v36, %v11126_v0  ;;  %v12805_v0 = vld [vmem:[#allocation59_spill] sm:$0xff] }
0x1364   :  { %12801 = vst [vmem:[#allocation125_spill] sm:$0xff] %v11459_v28  ;;  %v4840_v18 = vmul.f32 %v4837_v24, %v12797_v2  ;;  %v4831_v33 = vsel %vm467_vm6, %v11099_v51, %v11124_v49  ;;  %v4789_v2 = vsel %vm429_vm5, %v11132_v29, %v11114_v36  ;;  %v4796_v51 = vmul.f32 %v11246_v5, %v12805_v0 }
0x1365   :  { %5191 = vmatprep.subr.bf16.mxu1 %v5067_v48  ;;  %v4792_v5 = vmul.f32 %v4789_v2, %v12805_v0 }
0x1366   :  { %5192 = vmatpush1.bf16.msra.mxu1 %v5066_v42  ;;  %v12804_v42 = vld [vmem:[#allocation54_spill] sm:$0xff] }
0x1367   :  { %v4719_v46 = vpop.permute.xlu1 %4718  ;;  %v11461_v16 = vpop.permute.xlu0 %4860 }
0x1368   :  { %12802 = vst [vmem:[#allocation197_spill] sm:$0xff] %v11461_v16 }
0x136b   :  { %v4731_v53 = vpop.permute.xlu1 %4730  ;;  %v11463_v41 = vpop.permute.xlu0 %4866 }
0x136c   :  { %12803 = vst [vmem:[#allocation65_spill] sm:$0xff] %v11463_v41  ;;  %v4797_v41 = vmul.f32 %v11228_v59, %v12804_v42  ;;  %v4828_v59 = vsel %vm467_vm6, %v11124_v49, %v11112_v8  ;;  %v4842_v8 = vmul.f32 %v4831_v33, %v12799_v3 }
0x136d   :  { %v4843_v29 = vmul.f32 %v4828_v59, %v12800_v19 }
0x136f   :  { %v11469_v54 = vpop.permute.xlu1 %4670  ;;  %v4761_v30 = vpop.permute.xlu0 %4760 }
0x1370   :  { %v4788_v32 = vsel %vm429_vm5, %v4761_v30, %v4767_v43 }
0x1371   :  { %v4801_v25 = vmul.f32 %v4788_v32, %v12804_v42  ;;  %v4740_v32 = vsel %vm391_vm8, %v4713_v34, %v4719_v46 }
0x1372   :  { %v4753_v49 = vmul.f32 %v4740_v32, %v12735_v45 }
0x1373   :  { %v4725_v10 = vpop.permute.xlu1 %4724  ;;  %v4779_v48 = vpop.permute.xlu0 %4778  ;;  %v5061_v16 = vpack.c.bf16 %v4841_v9, %v4801_v25 }
0x1374   :  { %v4791_v52 = vsel %vm429_vm5, %v4779_v48, %v4761_v30  ;;  %v4793_v30 = vmul.f32 %v4786_v14, %v12804_v42  ;;  %v4743_v42 = vsel %vm391_vm8, %v4731_v53, %v4713_v34  ;;  %v4742_v34 = vsel %vm391_vm8, %v11365_v12, %v11344_v39 }
0x1375   :  { %v4800_v28 = vmul.f32 %v4791_v52, %v12805_v0  ;;  %5142 = vmatprep.subr.bf16.mxu0 %v5061_v16  ;;  %v4739_v16 = vsel %vm391_vm8, %v11344_v39, %v11355_v37  ;;  %v5056_v52 = vpack.c.bf16 %v4796_v51, %v4792_v5  ;;  %v4745_v39 = vmul.f32 %v11152_v26, %v12735_v45 }
0x1376   :  { %v5057_v36 = vpack.c.bf16 %v4797_v41, %v4793_v30  ;;  %v4749_v3 = vmul.f32 %v4739_v16, %v12735_v45  ;;  %v4737_v30 = vsel %vm391_vm8, %v4719_v46, %v4725_v10 }
0x1377   :  { %v5060_v9 = vpack.c.bf16 %v4840_v18, %v4800_v28  ;;  %v11510_v25 = vpop.permute.xlu1 %5006  ;;  %v4773_v24 = vpop.permute.xlu0 %4772  ;;  %v4752_v18 = vmul.f32 %v4743_v42, %v12734_v6 }
0x1378   :  { %v4782_v14 = vsel %vm429_vm5, %v4773_v24, %v4779_v48  ;;  %v4785_v28 = vsel %vm429_vm5, %v4767_v43, %v4773_v24  ;;  %v4734_v48 = vsel %vm391_vm8, %v4725_v10, %v4731_v53  ;;  %v5053_v59 = vpack.c.bf16 %v4753_v49, %v4749_v3 }
0x1379   :  { %5143 = vmatpush1.bf16.msra.mxu0 %v5060_v9  ;;  %v4802_v41 = vmul.f32 %v4785_v28, %v12573_v4  ;;  %v4803_v19 = vmul.f32 %v4782_v14, %v12475_v56  ;;  %v4748_v4 = vmul.f32 %v4742_v34, %v12734_v6  ;;  %v4733_v56 = vsel %vm391_vm8, %v11382_v35, %v11365_v12 }
0x137a   :  { %5144 = vmatprep.subr.bf16.mxu0 %v5057_v36  ;;  %v4755_v2 = vmul.f32 %v4734_v48, %v12732_v40  ;;  %v4736_v12 = vsel %vm391_vm8, %v11355_v37, %v11382_v35  ;;  %v4751_v16 = vmul.f32 %v4733_v56, %v12732_v40  ;;  %v12806_v9 = vpack.c.bf16 %v11274_v13, %v11268_v58  ;;  %v12818_v56 = vld [vmem:[#allocation88_spill] sm:$0xff] }
0x137b   :  { %v11532_v43 = vpop.permute.xlu1 %4920  ;;  %v5062_v33 = vpack.c.bf16 %v4842_v8, %v4802_v41  ;;  %v4665_v32 = vpop.permute.xlu0 %4664  ;;  %v5063_v0 = vpack.c.bf16 %v4843_v29, %v4803_v19  ;;  %v5052_v45 = vpack.c.bf16 %v4752_v18, %v4748_v4  ;;  %v4744_v49 = vmul.f32 %v11156_v21, %v12734_v6 }
0x137c   :  { %v4692_v53 = vsel %vm353_vm7, %v4665_v32, %v11469_v54  ;;  %v5055_v37 = vpack.c.bf16 %v4755_v2, %v4751_v16  ;;  %v4750_v35 = vmul.f32 %v4736_v12, %v12731_v20  ;;  %v12807_v58 = vpack.c.bf16 %v11271_v23, %v11265_v60 }
0x137d   :  { %5145 = vmatpush1.bf16.msra.mxu0 %v5056_v52  ;;  %v4705_v51 = vmul.f32 %v4692_v53, %v12737_v55  ;;  %5193 = vmatprep.subr.bf16.mxu1 %v5063_v0  ;;  %v4754_v55 = vmul.f32 %v4737_v30, %v12731_v20  ;;  %v4747_v21 = vmul.f32 %v11144_v38, %v12732_v40  ;;  %v12812_v52 = vld [vmem:[#allocation40_spill] sm:$0xff]  ;;  %v12815_v0 = vld [vmem:[#allocation214_spill] sm:$0xff]  ;;  %v12819_v53 = vld [vmem:[#allocation125_spill] sm:$0xff] }
0x137e   :  { %5146 = vmatprep.subr.bf16.mxu0 %v5053_v59  ;;  %5194 = vmatpush1.bf16.msra.mxu1 %v5062_v33  ;;  %v12808_v14 = vpack.c.bf16 %v11301_v17, %v11298_v61  ;;  %v12810_v61 = vld [vmem:[#allocation191_spill] sm:$0xff]  ;;  %v12814_v33 = vld [vmem:[#allocation160_spill] sm:$0xff]  ;;  %v4973_v30 = vsel %vm581_vm3, %v11442_v1, %v12819_v53 }
0x137f   :  { %v5019_v26 = vpop.permute.xlu1 %5018  ;;  %5195 = vmatprep.subr.bf16.mxu1 %v12806_v9  ;;  %v4683_v46 = vpop.permute.xlu0 %4682  ;;  %v5049_v10 = vpack.c.bf16 %v4745_v39, %v4705_v51  ;;  %v5054_v29 = vpack.c.bf16 %v4754_v55, %v4750_v35  ;;  %v12811_v41 = vpack.c.bf16 %v11338_v57, %v12810_v61  ;;  %v5033_v57 = vmul.f32 %v12814_v33, %v12812_v52  ;;  %v12816_v59 = vld [vmem:[#allocation95_spill] sm:$0xff] }
0x1380   :  { %v4695_v8 = vsel %vm353_vm7, %v4683_v46, %v4665_v32  ;;  %v12817_v39 = vpack.c.bf16 %v12815_v0, %v12816_v59  ;;  %v12821_v9 = vld [vmem:[#allocation43_spill] sm:$0xff]  ;;  %v12839_v0 = vld [vmem:[#allocation208_spill] sm:$0xff] }
0x1381   :  { %5147 = vmatpush1.bf16.msra.mxu0 %v5052_v45  ;;  %v4704_v42 = vmul.f32 %v4695_v8, %v12738_v31  ;;  %v4746_v31 = vmul.f32 %v11148_v47, %v12731_v20  ;;  %v12809_v47 = vpack.c.bf16 %v11318_v62, %v11315_v27  ;;  %v12813_v62 = vld [vmem:[#allocation45_spill] sm:$0xff] }
0x1382   :  { %5148 = vmatprep.subr.bf16.mxu0 %v5049_v10  ;;  %5196 = vmatpush1.bf16.msra.mxu1 %v12807_v58  ;;  %v12823_v58 = vld [vmem:[#allocation50_spill] sm:$0xff] }
0x1383   :  { %v4959_v13 = vpop.permute.xlu1 %4958  ;;  %v5048_v24 = vpack.c.bf16 %v4744_v49, %v4704_v42  ;;  %5197 = vmatprep.subr.bf16.mxu1 %v5055_v37  ;;  %v4677_v36 = vpop.permute.xlu0 %4676  ;;  %v12822_v42 = vld [vmem:[#allocation49_spill] sm:$0xff]  ;;  %v4987_v59 = vmul.f32 %v12839_v0, %v12823_v58 }
0x1384   :  { %v4686_v5 = vsel %vm353_vm7, %v4677_v36, %v4683_v46  ;;  %v4689_v6 = vsel %vm353_vm7, %v11469_v54, %v4677_v36  ;;  %v4990_v37 = vmul.f32 %v4973_v30, %v12822_v42  ;;  %v12842_v30 = vld [vmem:[#allocation197_spill] sm:$0xff] }
0x1385   :  { %v4706_v60 = vmul.f32 %v4689_v6, %v12618_v11  ;;  %v4707_v23 = vmul.f32 %v4686_v5, %v12617_v15  ;;  %5149 = vmatpush1.bf16.msra.mxu0 %v5048_v24  ;;  %v5024_v15 = vsel %vm619_vm0, %v11397_v22, %v11415_v63  ;;  %v12825_v5 = vld [vmem:[#allocation102_spill] sm:$0xff] }
0x1386   :  { %5150 = vmatprep.subr.bf16.mxu0 %v12808_v14  ;;  %5198 = vmatpush1.bf16.msra.mxu1 %v5054_v29  ;;  %v5037_v18 = vmul.f32 %v5024_v15, %v12812_v52  ;;  %v12824_v29 = vld [vmem:[#allocation151_spill] sm:$0xff]  ;;  %v12829_v15 = vld [vmem:[#allocation186_spill] sm:$0xff] }
0x1387   :  { %v4965_v28 = vpop.permute.xlu1 %4964  ;;  %v5050_v3 = vpack.c.bf16 %v4746_v31, %v4706_v60  ;;  %v5001_v34 = vpop.permute.xlu0 %5000  ;;  %v5051_v54 = vpack.c.bf16 %v4747_v21, %v4707_v23  ;;  %v12826_v6 = vpack.c.bf16 %v12824_v29, %v12825_v5  ;;  %v12827_v21 = vld [vmem:[#allocation46_spill] sm:$0xff] }
0x1388   :  { %v5028_v20 = vsel %vm619_vm0, %v5001_v34, %v11510_v25  ;;  %v5031_v40 = vsel %vm619_vm0, %v5019_v26, %v5001_v34  ;;  %v4977_v32 = vsel %vm581_vm3, %v4959_v13, %v4965_v28  ;;  %v5093_v16 = vpack.c.bf16 %v5037_v18, %v5033_v57  ;;  %v12828_v34 = vld [vmem:[#allocation42_spill] sm:$0xff] }
0x1389   :  { %v5040_v11 = vmul.f32 %v5028_v20, %v12744_v44  ;;  %v5043_v38 = vmul.f32 %v5031_v40, %v12745_v50  ;;  %5151 = vmatpush1.bf16.msra.mxu0 %v12809_v47  ;;  %5199 = vmatprep.subr.bf16.mxu1 %v5051_v54  ;;  %v4993_v46 = vmul.f32 %v4977_v32, %v12821_v9  ;;  %v12832_v47 = vld [vmem:[#allocation207_spill] sm:$0xff]  ;;  %v12838_v57 = vld [vmem:[#allocation178_spill] sm:$0xff] }
0x138a   :  { %5200 = vmatpush1.bf16.msra.mxu1 %v5050_v3  ;;  %v4986_v32 = vmul.f32 %v12838_v57, %v12822_v42 }
0x138b   :  { %v4953_v17 = vpop.permute.xlu1 %4952  ;;  %5201 = vmatprep.subr.bf16.mxu1 %v12811_v41  ;;  %v5013_v19 = vpop.permute.xlu0 %5012  ;;  %v5096_v50 = vpack.c.bf16 %v5040_v11, %v5040_v11  ;;  %v5099_v22 = vpack.c.bf16 %v5043_v38, %v5043_v38  ;;  %v12830_v11 = vld [vmem:[#allocation173_spill] sm:$0xff] }
0x138c   :  { %v5022_v63 = vsel %vm619_vm0, %v5013_v19, %v5019_v26  ;;  %v5025_v44 = vsel %vm619_vm0, %v11510_v25, %v5013_v19  ;;  %v4976_v25 = vsel %vm581_vm3, %v12818_v56, %v11442_v1  ;;  %v12820_v26 = vld [vmem:[#allocation75_spill] sm:$0xff]  ;;  %v4980_v10 = vsel %vm581_vm3, %v4953_v17, %v4959_v13 }
0x138d   :  { %v5041_v27 = vmul.f32 %v5025_v44, %v12812_v52  ;;  %v5042_v48 = vmul.f32 %v5022_v63, %v12813_v62  ;;  %v4982_v12 = vsel %vm581_vm3, %v12819_v53, %v12820_v26  ;;  %v5125_v1 = vsel %vm687_vm1, %v5096_v50, 0  ;;  %v12835_v52 = vld [vmem:[#allocation176_spill] sm:$0xff]  ;;  %v12837_v62 = vld [vmem:[#allocation47_spill] sm:$0xff]  ;;  %v12841_v53 = vld [vmem:[#allocation65_spill] sm:$0xff] }
0x138e   :  { %5202 = vmatpush1.bf16.msra.mxu1 %v12817_v39  ;;  %v4989_v8 = vmul.f32 %v4976_v25, %v12821_v9  ;;  %v4979_v49 = vsel %vm581_vm3, %v12820_v26, %v12818_v56  ;;  %v4991_v13 = vmul.f32 %v4982_v12, %v12823_v58  ;;  %v4992_v60 = vmul.f32 %v4980_v10, %v12827_v21  ;;  %v12840_v39 = vld [vmem:[#allocation188_spill] sm:$0xff] }
0x138f   :  { %v4917_v4 = vpop.permute.xlu1 %4916  ;;  %v5097_v2 = vpack.c.bf16 %v5041_v27, %v5041_v27  ;;  %v5098_v51 = vpack.c.bf16 %v5042_v48, %v5042_v48  ;;  %5641 = vmatprep.subr.msk.bf16.mxu1 %vm687_vm1, %v5099_v22  ;;  %v4919_v45 = vpop.permute.xlu0 %4918  ;;  %v4988_v20 = vmul.f32 %v4979_v49, %v12827_v21  ;;  %v12831_v38 = vpack.c.bf16 %v12829_v15, %v12830_v11  ;;  %v12836_v22 = vld [vmem:[#allocation128_spill] sm:$0xff] }
0x1390   :  { %v5089_v54 = vpack.c.bf16 %v4993_v46, %v4989_v8  ;;  %v4985_v18 = vmul.f32 %v12835_v52, %v12821_v9  ;;  %v4984_v27 = vmul.f32 %v12836_v22, %v12827_v21  ;;  %v4933_v56 = vsel %vm543_vm2, %v4919_v45, %v12840_v39  ;;  %v12844_v46 = vld [vmem:[#allocation101_spill] sm:$0xff]  ;;  %v12846_v49 = vld [vmem:[#allocation52_spill] sm:$0xff] }
0x1391   :  { %5638 = vmatprep.subr.msk.bf16.mxu0 %vm687_vm1, %v5097_v2  ;;  %v5131_v55 = vsel %vm687_vm1, %v5098_v51, 0  ;;  %v5088_v44 = vpack.c.bf16 %v4992_v60, %v4988_v20  ;;  %v4880_v2 = vsel %vm505_vm4, %v12842_v30, %v12841_v53  ;;  %v12843_v51 = vld [vmem:[#allocation206_spill] sm:$0xff]  ;;  %v4925_v10 = vsel %vm543_vm2, %v12844_v46, %v11532_v43  ;;  %v12850_v21 = vld [vmem:[#allocation193_spill] sm:$0xff]  ;;  %v12857_v22 = vld [vmem:[#allocation56_spill] sm:$0xff] }
0x1392   :  { %5157 = vmatpush2.bf16.msra.mxu0 %v5125_v1  ;;  %5208 = vmatpush2.bf16.msra.mxu1 %v5131_v55  ;;  %v4924_v26 = vsel %vm543_vm2, %v12843_v51, %v4919_v45  ;;  %v12845_v1 = vld [vmem:[#allocation171_spill] sm:$0xff] }
0x1393   :  { %v4971_v35 = vpop.permute.xlu1 %4970  ;;  %5158 = vmatprep.subr.bf16.mxu0 %v5093_v16  ;;  %5209 = vmatprep.subr.bf16.mxu1 %v12826_v6  ;;  %v4911_v31 = vpop.permute.xlu0 %4910  ;;  %v4934_v55 = vsel %vm543_vm2, %v11532_v43, %v12845_v1 }
0x1394   :  { %v4974_v24 = vsel %vm581_vm3, %v4965_v28, %v4971_v35  ;;  %v4983_v36 = vsel %vm581_vm3, %v4971_v35, %v4953_v17  ;;  %v4929_v3 = vsel %vm543_vm2, %v4911_v31, %v4917_v4  ;;  %v12833_v17 = vld [vmem:[#allocation182_spill] sm:$0xff]  ;;  %v4943_v5 = vmul.f32 %v4934_v55, %v12846_v49 }
0x1395   :  { %v4994_v23 = vmul.f32 %v4974_v24, %v12822_v42  ;;  %v4995_v14 = vmul.f32 %v4983_v36, %v12823_v58  ;;  %v4945_v28 = vmul.f32 %v4929_v3, %v12828_v34  ;;  %v12834_v61 = vpack.c.bf16 %v12832_v47, %v12833_v17  ;;  %v12848_v58 = vld [vmem:[#allocation51_spill] sm:$0xff]  ;;  %v12852_v34 = vld [vmem:[#allocation53_spill] sm:$0xff]  ;;  %v12854_v47 = vld [vmem:[#allocation136_spill] sm:$0xff] }
0x1396   :  { %5159 = vmatpush2.bf16.msra.mxu0 %v12831_v38  ;;  %v4939_v42 = vmul.f32 %v4933_v56, %v12846_v49  ;;  %v4938_v29 = vmul.f32 %v4924_v26, %v12848_v58  ;;  %v4942_v3 = vmul.f32 %v4925_v10, %v12848_v58  ;;  %v12853_v38 = vld [vmem:[#allocation163_spill] sm:$0xff] }
0x1397   :  { %v5090_v40 = vpack.c.bf16 %v4994_v23, %v4990_v37  ;;  %5210 = vmatpush2.bf16.msra.mxu1 %v12834_v61  ;;  %v4863_v41 = vpop.permute.xlu1 %4862  ;;  %v5091_v19 = vpack.c.bf16 %v4995_v14, %v4991_v13  ;;  %5160 = vmatprep.subr.bf16.mxu0 %v5089_v54  ;;  %v4905_v63 = vpop.permute.xlu0 %4904  ;;  %v5085_v33 = vpack.c.bf16 %v4985_v18, %v4945_v28  ;;  %v12847_v37 = vld [vmem:[#allocation48_spill] sm:$0xff] }
0x1398   :  { %v4932_v50 = vsel %vm543_vm2, %v4905_v63, %v4911_v31  ;;  %v4893_v36 = vmul.f32 %v4880_v2, %v12847_v37  ;;  %v12849_v31 = vld [vmem:[#allocation64_spill] sm:$0xff]  ;;  %v5083_v15 = vpack.c.bf16 %v4943_v5, %v4939_v42  ;;  %v5082_v11 = vpack.c.bf16 %v4942_v3, %v4938_v29 }
0x1399   :  { %5211 = vmatprep.subr.bf16.mxu1 %v5091_v19  ;;  %v4944_v48 = vmul.f32 %v4932_v50, %v12837_v62  ;;  %v12851_v60 = vpack.c.bf16 %v12849_v31, %v12850_v21  ;;  %v12855_v17 = vpack.c.bf16 %v12853_v38, %v12854_v47 }
0x139a   :  { %5161 = vmatpush2.bf16.msra.mxu0 %v5088_v44  ;;  %v12856_v44 = vld [vmem:[#allocation55_spill] sm:$0xff] }
0x139b   :  { %5212 = vmatpush2.bf16.msra.mxu1 %v5090_v40  ;;  %v4869_v25 = vpop.permute.xlu1 %4868  ;;  %v5084_v12 = vpack.c.bf16 %v4984_v27, %v4944_v48  ;;  %5162 = vmatprep.subr.bf16.mxu0 %v5085_v33  ;;  %v4923_v9 = vpop.permute.xlu0 %4922 }
0x139c   :  { %v4881_v16 = vsel %vm505_vm4, %v4863_v41, %v4869_v25  ;;  %v4926_v8 = vsel %vm543_vm2, %v4917_v4, %v4923_v9  ;;  %v4935_v45 = vsel %vm543_vm2, %v4923_v9, %v4905_v63  ;;  %v5102_v63 = vld [vmem:[#allocation21 + $0x10] sm:$0xff] }
0x139d   :  { %v4897_v35 = vmul.f32 %v4881_v16, %v12847_v37  ;;  %v4946_v13 = vmul.f32 %v4926_v8, %v12848_v58  ;;  %v4947_v24 = vmul.f32 %v4935_v45, %v12846_v49  ;;  %v5637_v0 = vcombine.high %v5102_v63, %v5102_v63 }
0x139e   :  { %5163 = vmatpush2.bf16.msra.mxu0 %v5084_v12  ;;  %v5636_v56 = vcombine.low %v5102_v63, %v5102_v63 }
0x139f   :  { %v4857_v43 = vpop.permute.xlu1 %4856  ;;  %v5086_v4 = vpack.c.bf16 %v4986_v32, %v4946_v13  ;;  %5164 = vmatprep.subr.bf16.mxu0 %v12851_v60  ;;  %v4855_v23 = vpop.permute.xlu0 %4854  ;;  %v5087_v14 = vpack.c.bf16 %v4987_v59, %v4947_v24  ;;  %v5077_v40 = vpack.c.bf16 %v4897_v35, %v4893_v36  ;;  %v5880_v32 = vld [vmem:[#allocation21] ss:$8 sps:$4 sm:$0xff]  }
0x13a0   :  { %v4884_v6 = vsel %vm505_vm4, %v4857_v43, %v4863_v41  ;;  %v4883_v54 = vsel %vm505_vm4, %v4855_v23, %v12842_v30 }
0x13a1   :  { %v4896_v28 = vmul.f32 %v4884_v6, %v12852_v34  ;;  %v4892_v20 = vmul.f32 %v4883_v54, %v12852_v34  ;;  %5213 = vmatprep.subr.bf16.mxu1 %v5087_v14 }
0x13a2   :  { %5165 = vmatpush2.bf16.msra.mxu0 %v12855_v17  ;;  %5214 = vmatpush2.bf16.msra.mxu1 %v5086_v4 }
0x13a3   :  { %v4875_v61 = vpop.permute.xlu1 %4874  ;;  %v5076_v41 = vpack.c.bf16 %v4896_v28, %v4892_v20  ;;  %5166 = vmatprep.subr.bf16.mxu0 %v5077_v40  ;;  %5215 = vmatprep.subr.bf16.mxu1 %v5083_v15  ;;  %v4873_v18 = vpop.permute.xlu0 %4872 }
0x13a4   :  { %v4878_v19 = vsel %vm505_vm4, %v4869_v25, %v4875_v61  ;;  %v4887_v52 = vsel %vm505_vm4, %v4875_v61, %v4857_v43  ;;  %v4877_v62 = vsel %vm505_vm4, %v12841_v53, %v4873_v18  ;;  %v4886_v48 = vsel %vm505_vm4, %v4873_v18, %v4855_v23 }
0x13a5   :  { %v4898_v50 = vmul.f32 %v4878_v19, %v12856_v44  ;;  %v4899_v27 = vmul.f32 %v4887_v52, %v12857_v22  ;;  %v4894_v33 = vmul.f32 %v4877_v62, %v12856_v44  ;;  %v4895_v57 = vmul.f32 %v4886_v48, %v12857_v22 }
0x13a6   :  { %5167 = vmatpush2.bf16.msra.mxu0 %v5076_v41  ;;  %5216 = vmatpush2.bf16.msra.mxu1 %v5082_v11 }
0x13a7   :  { %v5078_v59 = vpack.c.bf16 %v4898_v50, %v4894_v33  ;;  %v5079_v39 = vpack.c.bf16 %v4899_v27, %v4895_v57 }
0x13a9   :  { %5169 = vmatmul.mubr.bf16.vlgmr.msra.gmra.mxu0 %v5880_v32  ;;  %5217 = vmatprep.subr.bf16.mxu1 %v5079_v39 }
0x13aa   :  { %5218 = vmatpush2.bf16.msra.mxu1 %v5078_v59  ;;  %5640 = vmatprep.mubr.msk.bf16.mxu0 %vm1401_vm10, %v5637_v0 }
0x13ad   :  { %5220 = vmatmul.mubr.bf16.vlgmr.msra.gmra.mxu1 %v5880_v32 }
0x13ae   :  { %5643 = vmatprep.mubr.msk.bf16.mxu1 %vm1401_vm10, %v5637_v0 }
0x13b1   :  { %5179 = vmatmul.mubr.bf16.gmra.mxu0 %v5636_v56 }
0x13b2   :  { %5442 = vmatprep.mubr.bf16.mxu0 %v12858_v7 }
0x13b5   :  { %5230 = vmatmul.mubr.bf16.gmra.mxu1 %v5636_v56 }
0x1469   :  { %v11730_v25 = vpop.f32.mrf.mxu0 }
0x146a   :  { %v5256_v55 = vmul.f32 %v11730_v25, %v11730_v25 }
0x146b   :  { %v11732_v53 = vpop.f32.mrf.mxu0 }
0x146c   :  { %v5238_v30 = vadd.f32 %v11732_v53, %v11730_v25  ;;  %v5257_v46 = vmul.f32 %v11732_v53, %v11732_v53 }
0x146d   :  { %v11736_v2 = vpop.f32.mrf.mxu0  ;;  %v11738_v51 = vpop.f32.mrf.mxu1 }
0x146e   :  { %v5239_v26 = vadd.f32 %v5238_v30, %v11738_v51  ;;  %v5268_v13 = vadd.f32 %v5257_v46, %v5256_v55  ;;  %v5260_v24 = vmul.f32 %v11736_v2, %v11736_v2  ;;  %v5258_v43 = vmul.f32 %v11738_v51, %v11738_v51  ;;  %v5300_v55 = vld [vmem:[#allocation22 + $0x10] sm:$0xff] }
0x146f   :  { %v11741_v12 = vpop.f32.mrf.mxu0  ;;  %v11743_v16 = vpop.f32.mrf.mxu1 }
0x1470   :  { %v5240_v9 = vadd.f32 %v5239_v26, %v11743_v16  ;;  %v5243_v8 = vadd.f32 %v11741_v12, %v11736_v2  ;;  %v5261_v45 = vmul.f32 %v11741_v12, %v11741_v12  ;;  %v5269_v20 = vadd.f32 %v5268_v13, %v5258_v43 }
0x1471   :  { %v11748_v10 = vpop.f32.mrf.mxu0  ;;  %v11750_v1 = vpop.f32.mrf.mxu1  ;;  %v5259_v40 = vmul.f32 %v11743_v16, %v11743_v16 }
0x1472   :  { %5241 = vadd.xlane.f32.xlu0 %v5240_v9  ;;  %v5264_v37 = vmul.f32 %v11748_v10, %v11748_v10  ;;  %v5273_v31 = vadd.f32 %v5261_v45, %v5260_v24  ;;  %v5244_v21 = vadd.f32 %v5243_v8, %v11750_v1  ;;  %v5262_v14 = vmul.f32 %v11750_v1, %v11750_v1 }
0x1473   :  { %v11758_v49 = vpop.f32.mrf.mxu0  ;;  %v11760_v42 = vpop.f32.mrf.mxu1  ;;  %v5270_v61 = vadd.f32 %v5269_v20, %v5259_v40 }
0x1474   :  { %v5248_v35 = vadd.f32 %v11758_v49, %v11748_v10  ;;  %v5265_v58 = vmul.f32 %v11758_v49, %v11758_v49  ;;  %v5274_v38 = vadd.f32 %v5273_v31, %v5262_v14  ;;  %v5245_v47 = vadd.f32 %v5244_v21, %v11760_v42 }
0x1475   :  { %v5184_v36 = vpop.f32.mrf.mxu0  ;;  %v11770_v29 = vpop.f32.mrf.mxu1  ;;  %v5263_v17 = vmul.f32 %v11760_v42, %v11760_v42 }
0x1476   :  { %v5278_v5 = vadd.f32 %v5265_v58, %v5264_v37  ;;  %v5249_v4 = vadd.f32 %v5248_v35, %v11770_v29  ;;  %v5266_v6 = vmul.f32 %v11770_v29, %v11770_v29  ;;  %v5298_v37 = vld [vmem:[#allocation22] sm:$0xff]  ;;  %v5306_v35 = vld [vmem:[#allocation24 + $0x10] sm:$0xff] }
0x1477   :  { %v5185_v60 = vpop.f32.mrf.mxu0  ;;  %v11778_v23 = vpop.f32.mrf.mxu1  ;;  %v5275_v41 = vadd.f32 %v5274_v38, %v5263_v17 }
0x1478   :  { %v5279_v3 = vadd.f32 %v5278_v5, %v5266_v6  ;;  %v5250_v34 = vadd.f32 %v5249_v4, %v11778_v23  ;;  %v5267_v28 = vmul.f32 %v11778_v23, %v11778_v23  ;;  %v5304_v5 = vld [vmem:[#allocation24] sm:$0xff]  ;;  %v5299_v4 = vld [vmem:[#allocation22 + $0x8] sm:$0xff]  ;;  %v5388_v60 = vld [vmem:[#allocation25] sm:$0x7] }
0x1479   :  { %v5235_v54 = vpop.f32.mrf.mxu1 }
0x147a   :  { %5251 = vadd.xlane.f32.xlu0 %v5250_v34  ;;  %v5280_v15 = vadd.f32 %v5279_v3, %v5267_v28  ;;  %v5305_v3 = vld [vmem:[#allocation24 + $0x8] sm:$0xff] }
0x147b   :  { %v5236_v11 = vpop.f32.mrf.mxu1 }
0x147c   :  { %5281 = vadd.xlane.f32.xlu1 %v5280_v15 }
0x147e   :  { %5246 = vadd.xlane.f32.xlu0 %v5245_v47 }
0x1480   :  { %5271 = vadd.xlane.f32.xlu1 %v5270_v61 }
0x1482   :  { %5276 = vadd.xlane.f32.xlu0 %v5275_v41 }
0x14fb   :  { %v5242_v19 = vpop.xlane.xlu0 %5241 }
0x14fc   :  { %v5253_v44 = vmul.f32 0.001953125, %v5242_v19 }
0x14fe   :  { %v5286_v57 = vmul.f32 %v5253_v44, %v5253_v44 }
0x1503   :  { %v5252_v52 = vpop.xlane.xlu0 %5251 }
0x1504   :  { %v5255_v18 = vmul.f32 0.001953125, %v5252_v52 }
0x1505   :  { %v5282_v63 = vpop.xlane.xlu1 %5281 }
0x1506   :  { %v5288_v50 = vmul.f32 %v5255_v18, %v5255_v18  ;;  %v5285_v22 = vmul.f32 0.001953125, %v5282_v63 }
0x1507   :  { %v5247_v27 = vpop.xlane.xlu0 %5246 }
0x1508   :  { %v5291_v62 = vsub.f32 %v5285_v22, %v5288_v50  ;;  %v5254_v48 = vmul.f32 0.001953125, %v5247_v27 }
0x1509   :  { %v5272_v33 = vpop.xlane.xlu1 %5271 }
0x150a   :  { %v5294_v32 = vadd.f32 0.0001, %v5291_v62  ;;  %v5283_v0 = vmul.f32 0.001953125, %v5272_v33  ;;  %v5287_v39 = vmul.f32 %v5254_v48, %v5254_v48 }
0x150b   :  { %v5277_v59 = vpop.xlane.xlu0 %5276 }
0x150c   :  { %5915 = vrsqrt.f32 %v5294_v32  ;;  %v5289_v56 = vsub.f32 %v5283_v0, %v5286_v57  ;;  %v5284_v30 = vmul.f32 0.001953125, %v5277_v59 }
0x150e   :  { %v5292_v26 = vadd.f32 0.0001, %v5289_v56  ;;  %v5290_v9 = vsub.f32 %v5284_v30, %v5287_v39 }
0x1510   :  { %5917 = vrsqrt.f32 %v5292_v26  ;;  %v5293_v46 = vadd.f32 0.0001, %v5290_v9 }
0x1512   :  { %5919 = vrsqrt.f32 %v5293_v46 }
0x1519   :  { %v5916_v8 = vpop.eup %5915 }
0x151a   :  { %v5303_v45 = vmul.f32 %v5916_v8, %v5300_v55 }
0x151c   :  { %v5309_v58 = vmul.f32 %v5303_v45, %v5255_v18 }
0x151d   :  { %v5918_v13 = vpop.eup %5917 }
0x151e   :  { %v5301_v24 = vmul.f32 %v5918_v13, %v5298_v37  ;;  %v5312_v36 = vsub.f32 %v5306_v35, %v5309_v58  ;;  %v5379_v35 = vld [vmem:[%s11835_s19] sm:$0x3] }
0x151f   :  { %v5920_v43 = vpop.eup %5919 }
0x1520   :  { %5315 = vperm.xlu1 %5741, %v5301_v24   ;;  %5352 = vperm.xlu0 %5742, %v5312_v36   ;;  %v5307_v6 = vmul.f32 %v5301_v24, %v5253_v44  ;;  %v5302_v21 = vmul.f32 %v5920_v43, %v5299_v4 }
0x1522   :  { %v5310_v31 = vsub.f32 %v5304_v5, %v5307_v6  ;;  %v5308_v14 = vmul.f32 %v5302_v21, %v5254_v48 }
0x1524   :  { %5325 = vperm.xlu1 %5741, %v5303_v45   ;;  %5342 = vperm.xlu0 %5742, %v5310_v31   ;;  %v5311_v34 = vsub.f32 %v5305_v3, %v5308_v14 }
0x1528   :  { %5391 = vperm.xlu0 %5742, %v5388_v60   ;;  %5320 = vperm.xlu1 %5741, %v5302_v21  }
0x152c   :  { %5347 = vperm.xlu1 %5741, %v5311_v34  }
0x159b   :  { %v5316_v28 = vpop.permute.xlu1 %5315  ;;  %v5353_v54 = vpop.permute.xlu0 %5352 }
0x159c   :  { %v5328_v47 = vmul.f32 %v5316_v28, %v11730_v25  ;;  %v5329_v19 = vmul.f32 %v5316_v28, %v11732_v53 }
0x159f   :  { %v5326_v20 = vpop.permute.xlu1 %5325  ;;  %v5343_v38 = vpop.permute.xlu0 %5342 }
0x15a0   :  { %v5336_v40 = vmul.f32 %v5326_v20, %v11748_v10  ;;  %v5337_v15 = vmul.f32 %v5326_v20, %v11758_v49  ;;  %v5339_v11 = vmul.f32 %v5326_v20, %v11778_v23  ;;  %v5338_v17 = vmul.f32 %v5326_v20, %v11770_v29 }
0x15a1   :  { %v5355_v18 = vadd.f32 %v5343_v38, %v5328_v47  ;;  %v5356_v44 = vadd.f32 %v5343_v38, %v5329_v19  ;;  %v5331_v29 = vmul.f32 %v5316_v28, %v11743_v16 }
0x15a2   :  { %v5364_v61 = vadd.f32 %v5353_v54, %v5337_v15  ;;  %v5363_v41 = vadd.f32 %v5353_v54, %v5336_v40  ;;  %v5366_v63 = vadd.f32 %v5353_v54, %v5339_v11  ;;  %v5365_v23 = vadd.f32 %v5353_v54, %v5338_v17 }
0x15a3   :  { %v5321_v52 = vpop.permute.xlu1 %5320  ;;  %v5367_v57 = vmax.f32 %v5355_v18, 0.0  ;;  %v5368_v0 = vmax.f32 %v5356_v44, 0.0  ;;  %v5358_v26 = vadd.f32 %v5343_v38, %v5331_v29  ;;  %v5392_v5 = vpop.permute.xlu0 %5391 }
0x15a4   :  { %v5376_v50 = vmax.f32 %v5364_v61, 0.0  ;;  %v5375_v22 = vmax.f32 %v5363_v41, 0.0  ;;  %v5332_v10 = vmul.f32 %v5321_v52, %v11736_v2  ;;  %v5333_v49 = vmul.f32 %v5321_v52, %v11741_v12 }
0x15a5   :  { %v5335_v48 = vmul.f32 %v5321_v52, %v11760_v42  ;;  %v5378_v59 = vmax.f32 %v5366_v63, 0.0  ;;  %v5377_v56 = vmax.f32 %v5365_v23, 0.0  ;;  %v5334_v30 = vmul.f32 %v5321_v52, %v11750_v1 }
0x15a6   :  { %v5385_v62 = vpack.c.bf16 %v5376_v50, %v5376_v50  ;;  %v5384_v25 = vpack.c.bf16 %v5375_v22, %v5375_v22  ;;  %v5330_v42 = vmul.f32 %v5316_v28, %v11738_v51  ;;  %v5370_v1 = vmax.f32 %v5358_v26, 0.0 }
0x15a7   :  { %v5348_v27 = vpop.permute.xlu1 %5347  ;;  %v5387_v8 = vpack.c.bf16 %v5378_v59, %v5378_v59  ;;  %v5386_v45 = vpack.c.bf16 %v5377_v56, %v5377_v56 }
0x15a8   :  { %v5359_v33 = vadd.f32 %v5348_v27, %v5332_v10  ;;  %v5360_v53 = vadd.f32 %v5348_v27, %v5333_v49  ;;  %5644 = vmatprep.subr.msk.bf16.mxu0 %vm687_vm1, %v5385_v62  ;;  %v5399_v32 = vsel %vm687_vm1, %v5384_v25, 0  ;;  %v5362_v2 = vadd.f32 %v5348_v27, %v5335_v48 }
0x15a9   :  { %5423 = vmatpush1.bf16.msra.mxu0 %v5399_v32  ;;  %v5361_v46 = vadd.f32 %v5348_v27, %v5334_v30  ;;  %v5357_v37 = vadd.f32 %v5343_v38, %v5330_v42  ;;  %v5405_v13 = vsel %vm687_vm1, %v5386_v45, 0 }
0x15aa   :  { %v5371_v39 = vmax.f32 %v5359_v33, 0.0  ;;  %v5372_v12 = vmax.f32 %v5360_v53, 0.0  ;;  %v5374_v55 = vmax.f32 %v5362_v2, 0.0 }
0x15ab   :  { %v5373_v58 = vmax.f32 %v5361_v46, 0.0  ;;  %v5369_v24 = vmax.f32 %v5357_v37, 0.0 }
0x15ac   :  { %v5380_v16 = vpack.c.bf16 %v5371_v39, %v5367_v57  ;;  %v5381_v9 = vpack.c.bf16 %v5372_v12, %v5368_v0  ;;  %v5383_v51 = vpack.c.bf16 %v5374_v55, %v5370_v1 }
0x15ad   :  { %v5382_v36 = vpack.c.bf16 %v5373_v58, %v5369_v24 }
0x15ae   :  { %5424 = vmatprep.subr.bf16.mxu0 %v5381_v9 }
0x15af   :  { %5425 = vmatpush1.bf16.msra.mxu0 %v5380_v16 }
0x15b0   :  { %5646 = vmatprep.subr.msk.bf16.mxu0 %vm687_vm1, %v5387_v8 }
0x15b2   :  { %5645 = vmatmul.mubr.msk.bf16.vlgmr.msra.gmra.mxu0 %vm5394_vm12, %v5379_v35 }
0x15b3   :  { %5464 = vmatpush1.bf16.msra.mxu0 %v5405_v13  ;;  %5483 = vmatprep.mubr.bf16.mxu0 %v12858_v7 }
0x15b4   :  { %5465 = vmatprep.subr.bf16.mxu0 %v5383_v51 }
0x15b7   :  { %5466 = vmatpush1.bf16.msra.mxu0 %v5382_v36 }
0x15ba   :  { %5647 = vmatmul.mubr.msk.bf16.vlgmr.msra.gmra.mxu0 %vm5394_vm12, %v5379_v35 }
0x1672   :  { %v5444_v43 = vpop.f32.mrf.mxu0 }
0x1673   :  { %v5445_v6 = vadd.f32 %v5444_v43, %v5392_v5 }
0x1674   :  { %v5446_v4 = vpop.f32.mrf.mxu0 }
0x1675   :  { %v5447_v31 = vadd.f32 %v5446_v4, %v5392_v5 }
0x1676   :  { %v5448_v21 = vpop.f32.mrf.mxu0 }
0x1677   :  { %v5496_v60 = vcombine.low %v5445_v6, %v5447_v31 }
0x1678   :  { %v5449_v14 = vpop.f32.mrf.mxu0 }
0x1679   :  { %5500 = vst [vmem:[%s11841_s25] sm:$0x77] %v5496_v60 }
0x167a   :  { %v5485_v3 = vpop.f32.mrf.mxu0 }
0x167b   :  { %v5486_v28 = vadd.f32 %v5485_v3, %v5392_v5 }
0x167c   :  { %v5487_v34 = vpop.f32.mrf.mxu0 }
0x167d   :  { %v5488_v7 = vadd.f32 %v5487_v34, %v5392_v5 }
0x167e   :  { %v5489_v54 = vpop.f32.mrf.mxu0 }
0x167f   :  { %v5497_v20 = vcombine.low %v5486_v28, %v5488_v7 }
0x1680   :  { %v5490_v40 = vpop.f32.mrf.mxu0 }
0x1681   :  { %5501 = vst [vmem:[%s11841_s25 + $0x8] sm:$0x77] %v5497_v20 }
0x1682   :  { %5506 = vsyncpa [#allocation3], 1 }
0x1683   :  { %5507 = vsyncpa [#allocation5], 1 }
0x1684   :  { %5508 = vsyncpa [#allocation8], 1 }
0x1685   :  { %5509 = vsyncpa [#allocation11], 1 }
0x1686   :  { %5510 = vsyncpa [#allocation14], 1 }
0x1687   :  { %5511 = vsyncpa [#allocation17], 1 }
0x1688   :  { %5512 = vsyncpa [#allocation20], 1 }
0x1689   :  { %5513 = vsyncpa [#allocation23], 1 }
0x168a   :  { %5514 = vsyncpa [#allocation26], 1 }
0x168b   :  { %5515 = vsyncpa [#allocation29], 1 }

</bundles_post_ra>
